<compile_context>
chip_gen: v6e
topology: v6e:2x2x1
jax: 0.10.0
libtpu: 0.0.40
codegen_flags: <defaults>
</compile_context>

<pallas_src>
import jax
import jax.numpy as jnp
from jax.experimental import pallas as pl
from jax.experimental.pallas import tpu as pltpu


# ----------------------------- static geometry (32x32 input) ---------------------------

IMG_TILE = 4                       # images per grid step
IN_HW = 32
H1 = (IN_HW - 5) // 2 + 1          # 14  (conv1 output spatial)
H2 = (H1 - 3) // 2 + 1             # 6   (conv2 output spatial)
H3 = (H2 - 3) // 2 + 1             # 2   (conv3 output spatial)
N1, N2, N3 = H1 * H1, H2 * H2, H3 * H3      # 196, 36, 4
assert H1 % 2 == 0 and H2 % 2 == 0           # parity-plane gather requires even sizes
KSTACK = 9 * 128                   # taps stacked along the contraction dim


# ----------------------------- fused Pallas kernel -------------------------------------


def _parity_planes(x2d, t, h, w):
    """(t*h*w, 128) row-major activations -> planes[ph][pw] of shape (t, h//2, w//2, 128)
    where planes[ph][pw][b, i, j] = x[b, 2*i+ph, 2*j+pw] (even/odd stride-2 decomposition)."""
    x6 = x2d.reshape(t, h // 2, 2, w // 2, 2, 128)
    return [[x6[:, :, ph, :, pw, :] for pw in (0, 1)] for ph in (0, 1)]


def _tap_stack(planes, t, h_out, w_out):
    """Build the K-stacked 3x3/stride-2 patch matrix (t*h_out*w_out, 9*128) from parity
    planes using only contiguous static slices (tap (kh,kw) occupies lanes [128*t,128*(t+1))."""
    taps = []
    for kh in range(3):
        ph, oh = kh % 2, kh // 2
        for kw in range(3):
            pw, ow = kw % 2, kw // 2
            taps.append(planes[ph][pw][:, oh:oh + h_out, ow:ow + w_out, :])
    return jnp.concatenate(taps, axis=-1).reshape(t * h_out * w_out, KSTACK)


def _encoder_kernel(cols1_ref, w1_ref, w2_ref, w3_ref, b_ref, out_ref):
    """One IMG_TILE-image tile per grid step.  Shapes (channel dims padded to 128 lanes):
         cols1_ref: (T*196, 128) bf16   conv1 im2col rows (K padded 75->128), rows = (t,h,w)
         w1_ref:    (128, 128)   bf16   conv1 weights (75x16 valid)
         w2_ref:    (1152, 128)  bf16   conv2 weights, 9 taps stacked along K (16x32 valid/tap)
         w3_ref:    (1152, 128)  bf16   conv3 weights, 9 taps stacked along K (32x64 valid/tap)
         b_ref:     (3, 128)     f32    padded biases (rows: b1, b2, b3)
         out_ref:   (T, 128)     f32    pooled features (lanes [:64] valid), one row per image
    """
    T = IMG_TILE
    bias = b_ref[...]

    # ---- conv1: one (T*196,128)@(128,128) bf16 matmul, f32 accumulate ----
    c1 = jnp.dot(cols1_ref[...], w1_ref[...], preferred_element_type=jnp.float32)
    o1 = jnp.maximum(c1 + bias[0:1, :], 0.0).astype(jnp.bfloat16)          # (T*196, 128)

    # ---- conv2 (3x3, s2): parity-plane gather + single K-stacked matmul, M = T*36 ----
    p2 = _tap_stack(_parity_planes(o1, T, H1, H1), T, H2, H2)              # (T*36, 1152)
    c2 = jnp.dot(p2, w2_ref[...], preferred_element_type=jnp.float32)
    o2 = jnp.maximum(c2 + bias[1:2, :], 0.0).astype(jnp.bfloat16)          # (T*36, 128)

    # ---- conv3 (3x3, s2): same, M = T*4 ----
    p3 = _tap_stack(_parity_planes(o2, T, H2, H2), T, H3, H3)              # (T*4, 1152)
    c3 = jnp.dot(p3, w3_ref[...], preferred_element_type=jnp.float32)
    o3 = jnp.maximum(c3 + bias[2:3, :], 0.0)                               # (T*4, 128) f32

    # ---- AdaptiveAvgPool2d(1): mean over the 4 remaining spatial positions per image ----
    out_ref[...] = jnp.sum(o3.reshape(T, N3, 128), axis=1) * (1.0 / N3)    # (T, 128)


def _fused_forward(cols1, w1, w2, w3, bias, batch_padded):
    T = IMG_TILE
    n_tiles = batch_padded // T

    flops = 2 * batch_padded * (N1 * 128 * 128 + N2 * KSTACK * 128 + N3 * KSTACK * 128)
    bytes_accessed = (cols1.size * 2 + w1.size * 2 + w2.size * 2 + w3.size * 2 +
                      bias.size * 4 + batch_padded * 128 * 4)

    grid_spec = pltpu.PrefetchScalarGridSpec(
        num_scalar_prefetch=0,
        grid=(n_tiles,),
        in_specs=[
            pl.BlockSpec((T * N1, 128), lambda b: (b, 0)),     # per-tile conv1 patch rows
            pl.BlockSpec((128, 128), lambda b: (0, 0)),        # w1 (shared)
            pl.BlockSpec((KSTACK, 128), lambda b: (0, 0)),     # w2 K-stacked (shared)
            pl.BlockSpec((KSTACK, 128), lambda b: (0, 0)),     # w3 K-stacked (shared)
            pl.BlockSpec((3, 128), lambda b: (0, 0)),          # biases
        ],
        out_specs=pl.BlockSpec((None, T, 128), lambda b: (b, 0, 0)),
    )

    out = pl.pallas_call(
        _encoder_kernel,
        out_shape=jax.ShapeDtypeStruct((n_tiles, T, 128), jnp.float32),
        grid_spec=grid_spec,
        compiler_params=pltpu.CompilerParams(dimension_semantics=("parallel",)),
        cost_estimate=pl.CostEstimate(flops=flops, transcendentals=0,
                                      bytes_accessed=bytes_accessed),
    )(cols1, w1, w2, w3, bias)
    return out.reshape(batch_padded, 128)[:, :64]


# --------------------------------- JAX-side glue ---------------------------------------


def prepare_encoder(params):
    """One-time prep (outside the hot path): pack weights into bf16, 128-lane,
    tap-K-stacked layout.  Padded rows/columns are exactly zero."""
    # conv1: patch feature order from conv_general_dilated_patches is (cin, kh, kw).
    w1 = jnp.transpose(params["w1"], (2, 0, 1, 3)).reshape(5 * 5 * 3, 16)
    w1p = jnp.zeros((128, 128), jnp.float32).at[:75, :16].set(w1).astype(jnp.bfloat16)

    # conv2/conv3: 9 taps (kh,kw row-major) stacked along K, each tap 128-row block.
    w2 = params["w2"].reshape(9, 16, 32)
    w2p = jnp.zeros((9, 128, 128), jnp.float32).at[:, :16, :32].set(w2)
    w2stack = w2p.reshape(KSTACK, 128).astype(jnp.bfloat16)

    w3 = params["w3"].reshape(9, 32, 64)
    w3p = jnp.zeros((9, 128, 128), jnp.float32).at[:, :32, :64].set(w3)
    w3stack = w3p.reshape(KSTACK, 128).astype(jnp.bfloat16)

    bias = (jnp.zeros((3, 128), jnp.float32)
            .at[0, :16].set(params["b1"])
            .at[1, :32].set(params["b2"])
            .at[2, :64].set(params["b3"]))
    return {"w1": w1p, "w2": w2stack, "w3": w3stack, "b": bias}


@jax.jit
def image_encoder_forward(prep, x_nchw):
    """Mirrors ImageEncoder.forward.  Input: NCHW float32 (B,3,32,32).  Output: (B, 64)."""
    B = x_nchw.shape[0]
    assert x_nchw.shape[1:] == (3, IN_HW, IN_HW), x_nchw.shape
    T = IMG_TILE
    Bp = ((B + T - 1) // T) * T
    x = x_nchw if Bp == B else jnp.pad(x_nchw, ((0, Bp - B), (0, 0), (0, 0), (0, 0)))

    # conv1 patch extraction: one fused XLA op (feature order (cin,kh,kw)), cast to bf16.
    patches = jax.lax.conv_general_dilated_patches(
        x, filter_shape=(5, 5), window_strides=(2, 2), padding="VALID")   # (Bp, 75, 14, 14)
    cols = jnp.transpose(patches, (0, 2, 3, 1)).reshape(Bp * N1, 75)      # rows = (b, h, w)
    cols = jnp.pad(cols, ((0, 0), (0, 128 - 75))).astype(jnp.bfloat16)    # K: 75 -> 128

    out = _fused_forward(cols, prep["w1"], prep["w2"], prep["w3"], prep["b"], Bp)
    return out[:B]


# ----------------------------------- parameters -----------------------------------------


def init_params(key):
    """Deterministic synthetic parameters matching the PyTorch module shapes (HWIO)."""
    ks = jax.random.split(key, 6)

    def w_init(k, shape, fan_in):
        return jax.random.normal(k, shape, jnp.float32) * (1.0 / jnp.sqrt(fan_in))

    return {
        "w1": w_init(ks[0], (5, 5, 3, 16), 5 * 5 * 3),
        "b1": w_init(ks[1], (16,), 5 * 5 * 3),
        "w2": w_init(ks[2], (3, 3, 16, 32), 3 * 3 * 16),
        "b2": w_init(ks[3], (32,), 3 * 3 * 16),
        "w3": w_init(ks[4], (3, 3, 32, 64), 3 * 3 * 32),
        "b3": w_init(ks[5], (64,), 3 * 3 * 32),
    }


# ------------------------------------ reference -----------------------------------------


def _reference_forward(params, x_nchw):
    """Pure-JAX f32 reference (lax conv) for a correctness sanity check."""
    x = x_nchw
    for wname, bname, stride in (("w1", "b1", 2), ("w2", "b2", 2), ("w3", "b3", 2)):
        w = jnp.transpose(params[wname], (3, 2, 0, 1))      # (kH,kW,Cin,Cout) -> OIHW
        x = jax.lax.conv_general_dilated(
            x, w, window_strides=(stride, stride), padding="VALID",
            dimension_numbers=("NCHW", "OIHW", "NCHW"))
        x = jnp.maximum(x + params[bname][None, :, None, None], 0.0)
    return jnp.mean(x, axis=(2, 3))


# -------------------------------------- main ---------------------------------------------

if __name__ == "__main__":
    key = jax.random.PRNGKey(0)
    pkey, xkey = jax.random.split(key)

    params = init_params(pkey)
    # B=8 -> 2 parallel grid steps of 4 images each (keeps both v7x TensorCores busy).
    x = jax.random.normal(xkey, (8, 3, 32, 32), jnp.float32)

    prep = prepare_encoder(params)                      # one-time, outside the hot path

    out = jax.block_until_ready(image_encoder_forward(prep, x))
    assert out.shape == (8, 64), out.shape

    ref = jax.block_until_ready(_reference_forward(params, x))
    # bf16 MXU feed: tolerance re-validated for the 75/144/288-deep reductions.
    assert jnp.allclose(out, ref, atol=5e-2, rtol=5e-2), float(jnp.max(jnp.abs(out - ref)))

    print("KERNEL_OK")
</pallas_src>

<mosaic_0001>
module attributes {stable_mosaic.version = 11 : i64} {
  func.func @_encoder_kernel(%arg0: i32, %arg1: memref<784x128xbf16, #tpu.memory_space<vmem>>, %arg2: memref<128x128xbf16, #tpu.memory_space<vmem>>, %arg3: memref<1152x128xbf16, #tpu.memory_space<vmem>>, %arg4: memref<1152x128xbf16, #tpu.memory_space<vmem>>, %arg5: memref<3x128xf32, #tpu.memory_space<vmem>>, %arg6: memref<1x4x128xf32, #tpu.memory_space<vmem>>) attributes {dimension_semantics = [#tpu.dimension_semantics<parallel>], iteration_bounds = array<i64: 2>, scalar_prefetch = 0 : i64, scratch_operands = 0 : i64, tpu.core_type = #tpu.core_type<tc>, window_params = [{transform_indices = @transform_0, window_bounds = array<i64: 784, 128>}, {pipeline_mode = #tpu.pipeline_mode<synchronous>, transform_indices = @transform_1, window_bounds = array<i64: 128, 128>}, {pipeline_mode = #tpu.pipeline_mode<synchronous>, transform_indices = @transform_2, window_bounds = array<i64: 1152, 128>}, {pipeline_mode = #tpu.pipeline_mode<synchronous>, transform_indices = @transform_3, window_bounds = array<i64: 1152, 128>}, {pipeline_mode = #tpu.pipeline_mode<synchronous>, transform_indices = @transform_4, window_bounds = array<i64: 3, 128>}, {transform_indices = @transform_5, window_bounds = array<i64: 1, 4, 128>}]} {
    %c0 = arith.constant 0 : index
    %c0_0 = arith.constant 0 : index
    %0 = vector.load %arg5[%c0, %c0_0] : memref<3x128xf32, #tpu.memory_space<vmem>>, vector<3x128xf32>
    %c0_1 = arith.constant 0 : index
    %c0_2 = arith.constant 0 : index
    %1 = vector.load %arg1[%c0_1, %c0_2] : memref<784x128xbf16, #tpu.memory_space<vmem>>, vector<784x128xbf16>
    %c0_3 = arith.constant 0 : index
    %c0_4 = arith.constant 0 : index
    %2 = vector.load %arg2[%c0_3, %c0_4] : memref<128x128xbf16, #tpu.memory_space<vmem>>, vector<128x128xbf16>
    %cst = arith.constant dense<0.000000e+00> : vector<784x128xf32>
    %3 = tpu.matmul %1, %2, %cst {dimension_numbers = #tpu.dot_dimension_numbers<[1], [0], [0], [1], [0, 0, 1, 1], [], []>} : vector<784x128xbf16>, vector<128x128xbf16>, vector<784x128xf32> -> vector<784x128xf32>
    %4 = vector.extract_strided_slice %0 {offsets = [0, 0], sizes = [1, 128], strides = [1, 1]} : vector<3x128xf32> to vector<1x128xf32>
    %5 = vector.broadcast %4 : vector<1x128xf32> to vector<784x128xf32>
    %6 = arith.addf %3, %5 : vector<784x128xf32>
    %cst_5 = arith.constant 0.000000e+00 : f32
    %7 = vector.broadcast %cst_5 : f32 to vector<784x128xf32>
    %8 = arith.maximumf %6, %7 : vector<784x128xf32>
    %9 = arith.truncf %8 : vector<784x128xf32> to vector<784x128xbf16>
    %10 = vector.shape_cast %9 : vector<784x128xbf16> to vector<4x7x2x7x2x128xbf16>
    %11 = vector.extract_strided_slice %10 {offsets = [0, 0, 0, 0, 0, 0], sizes = [4, 7, 1, 7, 1, 128], strides = [1, 1, 1, 1, 1, 1]} : vector<4x7x2x7x2x128xbf16> to vector<4x7x1x7x1x128xbf16>
    %12 = vector.shape_cast %11 : vector<4x7x1x7x1x128xbf16> to vector<4x7x7x128xbf16>
    %13 = vector.extract_strided_slice %10 {offsets = [0, 0, 0, 0, 1, 0], sizes = [4, 7, 1, 7, 1, 128], strides = [1, 1, 1, 1, 1, 1]} : vector<4x7x2x7x2x128xbf16> to vector<4x7x1x7x1x128xbf16>
    %14 = vector.shape_cast %13 : vector<4x7x1x7x1x128xbf16> to vector<4x7x7x128xbf16>
    %15 = vector.extract_strided_slice %10 {offsets = [0, 0, 1, 0, 0, 0], sizes = [4, 7, 1, 7, 1, 128], strides = [1, 1, 1, 1, 1, 1]} : vector<4x7x2x7x2x128xbf16> to vector<4x7x1x7x1x128xbf16>
    %16 = vector.shape_cast %15 : vector<4x7x1x7x1x128xbf16> to vector<4x7x7x128xbf16>
    %17 = vector.extract_strided_slice %10 {offsets = [0, 0, 1, 0, 1, 0], sizes = [4, 7, 1, 7, 1, 128], strides = [1, 1, 1, 1, 1, 1]} : vector<4x7x2x7x2x128xbf16> to vector<4x7x1x7x1x128xbf16>
    %18 = vector.shape_cast %17 : vector<4x7x1x7x1x128xbf16> to vector<4x7x7x128xbf16>
    %19 = vector.extract_strided_slice %12 {offsets = [0, 0, 0, 0], sizes = [4, 6, 6, 128], strides = [1, 1, 1, 1]} : vector<4x7x7x128xbf16> to vector<4x6x6x128xbf16>
    %20 = vector.extract_strided_slice %14 {offsets = [0, 0, 0, 0], sizes = [4, 6, 6, 128], strides = [1, 1, 1, 1]} : vector<4x7x7x128xbf16> to vector<4x6x6x128xbf16>
    %21 = vector.extract_strided_slice %12 {offsets = [0, 0, 1, 0], sizes = [4, 6, 6, 128], strides = [1, 1, 1, 1]} : vector<4x7x7x128xbf16> to vector<4x6x6x128xbf16>
    %22 = vector.extract_strided_slice %16 {offsets = [0, 0, 0, 0], sizes = [4, 6, 6, 128], strides = [1, 1, 1, 1]} : vector<4x7x7x128xbf16> to vector<4x6x6x128xbf16>
    %23 = vector.extract_strided_slice %18 {offsets = [0, 0, 0, 0], sizes = [4, 6, 6, 128], strides = [1, 1, 1, 1]} : vector<4x7x7x128xbf16> to vector<4x6x6x128xbf16>
    %24 = vector.extract_strided_slice %16 {offsets = [0, 0, 1, 0], sizes = [4, 6, 6, 128], strides = [1, 1, 1, 1]} : vector<4x7x7x128xbf16> to vector<4x6x6x128xbf16>
    %25 = vector.extract_strided_slice %12 {offsets = [0, 1, 0, 0], sizes = [4, 6, 6, 128], strides = [1, 1, 1, 1]} : vector<4x7x7x128xbf16> to vector<4x6x6x128xbf16>
    %26 = vector.extract_strided_slice %14 {offsets = [0, 1, 0, 0], sizes = [4, 6, 6, 128], strides = [1, 1, 1, 1]} : vector<4x7x7x128xbf16> to vector<4x6x6x128xbf16>
    %27 = vector.extract_strided_slice %12 {offsets = [0, 1, 1, 0], sizes = [4, 6, 6, 128], strides = [1, 1, 1, 1]} : vector<4x7x7x128xbf16> to vector<4x6x6x128xbf16>
    %28 = tpu.concatenate %19, %20, %21, %22, %23, %24, %25, %26, %27 in 3 : vector<4x6x6x128xbf16>, vector<4x6x6x128xbf16>, vector<4x6x6x128xbf16>, vector<4x6x6x128xbf16>, vector<4x6x6x128xbf16>, vector<4x6x6x128xbf16>, vector<4x6x6x128xbf16>, vector<4x6x6x128xbf16>, vector<4x6x6x128xbf16> -> vector<4x6x6x1152xbf16>
    %29 = vector.shape_cast %28 : vector<4x6x6x1152xbf16> to vector<144x1152xbf16>
    %c0_6 = arith.constant 0 : index
    %c0_7 = arith.constant 0 : index
    %30 = vector.load %arg3[%c0_6, %c0_7] : memref<1152x128xbf16, #tpu.memory_space<vmem>>, vector<1152x128xbf16>
    %cst_8 = arith.constant dense<0.000000e+00> : vector<144x128xf32>
    %31 = tpu.matmul %29, %30, %cst_8 {dimension_numbers = #tpu.dot_dimension_numbers<[1], [0], [0], [1], [0, 0, 1, 1], [], []>} : vector<144x1152xbf16>, vector<1152x128xbf16>, vector<144x128xf32> -> vector<144x128xf32>
    %32 = vector.extract_strided_slice %0 {offsets = [1, 0], sizes = [1, 128], strides = [1, 1]} : vector<3x128xf32> to vector<1x128xf32>
    %33 = vector.broadcast %32 : vector<1x128xf32> to vector<144x128xf32>
    %34 = arith.addf %31, %33 : vector<144x128xf32>
    %cst_9 = arith.constant 0.000000e+00 : f32
    %35 = vector.broadcast %cst_9 : f32 to vector<144x128xf32>
    %36 = arith.maximumf %34, %35 : vector<144x128xf32>
    %37 = arith.truncf %36 : vector<144x128xf32> to vector<144x128xbf16>
    %38 = vector.shape_cast %37 : vector<144x128xbf16> to vector<4x3x2x3x2x128xbf16>
    %39 = vector.extract_strided_slice %38 {offsets = [0, 0, 0, 0, 0, 0], sizes = [4, 3, 1, 3, 1, 128], strides = [1, 1, 1, 1, 1, 1]} : vector<4x3x2x3x2x128xbf16> to vector<4x3x1x3x1x128xbf16>
    %40 = vector.shape_cast %39 : vector<4x3x1x3x1x128xbf16> to vector<4x3x3x128xbf16>
    %41 = vector.extract_strided_slice %38 {offsets = [0, 0, 0, 0, 1, 0], sizes = [4, 3, 1, 3, 1, 128], strides = [1, 1, 1, 1, 1, 1]} : vector<4x3x2x3x2x128xbf16> to vector<4x3x1x3x1x128xbf16>
    %42 = vector.shape_cast %41 : vector<4x3x1x3x1x128xbf16> to vector<4x3x3x128xbf16>
    %43 = vector.extract_strided_slice %38 {offsets = [0, 0, 1, 0, 0, 0], sizes = [4, 3, 1, 3, 1, 128], strides = [1, 1, 1, 1, 1, 1]} : vector<4x3x2x3x2x128xbf16> to vector<4x3x1x3x1x128xbf16>
    %44 = vector.shape_cast %43 : vector<4x3x1x3x1x128xbf16> to vector<4x3x3x128xbf16>
    %45 = vector.extract_strided_slice %38 {offsets = [0, 0, 1, 0, 1, 0], sizes = [4, 3, 1, 3, 1, 128], strides = [1, 1, 1, 1, 1, 1]} : vector<4x3x2x3x2x128xbf16> to vector<4x3x1x3x1x128xbf16>
    %46 = vector.shape_cast %45 : vector<4x3x1x3x1x128xbf16> to vector<4x3x3x128xbf16>
    %47 = vector.extract_strided_slice %40 {offsets = [0, 0, 0, 0], sizes = [4, 2, 2, 128], strides = [1, 1, 1, 1]} : vector<4x3x3x128xbf16> to vector<4x2x2x128xbf16>
    %48 = vector.extract_strided_slice %42 {offsets = [0, 0, 0, 0], sizes = [4, 2, 2, 128], strides = [1, 1, 1, 1]} : vector<4x3x3x128xbf16> to vector<4x2x2x128xbf16>
    %49 = vector.extract_strided_slice %40 {offsets = [0, 0, 1, 0], sizes = [4, 2, 2, 128], strides = [1, 1, 1, 1]} : vector<4x3x3x128xbf16> to vector<4x2x2x128xbf16>
    %50 = vector.extract_strided_slice %44 {offsets = [0, 0, 0, 0], sizes = [4, 2, 2, 128], strides = [1, 1, 1, 1]} : vector<4x3x3x128xbf16> to vector<4x2x2x128xbf16>
    %51 = vector.extract_strided_slice %46 {offsets = [0, 0, 0, 0], sizes = [4, 2, 2, 128], strides = [1, 1, 1, 1]} : vector<4x3x3x128xbf16> to vector<4x2x2x128xbf16>
    %52 = vector.extract_strided_slice %44 {offsets = [0, 0, 1, 0], sizes = [4, 2, 2, 128], strides = [1, 1, 1, 1]} : vector<4x3x3x128xbf16> to vector<4x2x2x128xbf16>
    %53 = vector.extract_strided_slice %40 {offsets = [0, 1, 0, 0], sizes = [4, 2, 2, 128], strides = [1, 1, 1, 1]} : vector<4x3x3x128xbf16> to vector<4x2x2x128xbf16>
    %54 = vector.extract_strided_slice %42 {offsets = [0, 1, 0, 0], sizes = [4, 2, 2, 128], strides = [1, 1, 1, 1]} : vector<4x3x3x128xbf16> to vector<4x2x2x128xbf16>
    %55 = vector.extract_strided_slice %40 {offsets = [0, 1, 1, 0], sizes = [4, 2, 2, 128], strides = [1, 1, 1, 1]} : vector<4x3x3x128xbf16> to vector<4x2x2x128xbf16>
    %56 = tpu.concatenate %47, %48, %49, %50, %51, %52, %53, %54, %55 in 3 : vector<4x2x2x128xbf16>, vector<4x2x2x128xbf16>, vector<4x2x2x128xbf16>, vector<4x2x2x128xbf16>, vector<4x2x2x128xbf16>, vector<4x2x2x128xbf16>, vector<4x2x2x128xbf16>, vector<4x2x2x128xbf16>, vector<4x2x2x128xbf16> -> vector<4x2x2x1152xbf16>
    %57 = vector.shape_cast %56 : vector<4x2x2x1152xbf16> to vector<16x1152xbf16>
    %c0_10 = arith.constant 0 : index
    %c0_11 = arith.constant 0 : index
    %58 = vector.load %arg4[%c0_10, %c0_11] : memref<1152x128xbf16, #tpu.memory_space<vmem>>, vector<1152x128xbf16>
    %cst_12 = arith.constant dense<0.000000e+00> : vector<16x128xf32>
    %59 = tpu.matmul %57, %58, %cst_12 {dimension_numbers = #tpu.dot_dimension_numbers<[1], [0], [0], [1], [0, 0, 1, 1], [], []>} : vector<16x1152xbf16>, vector<1152x128xbf16>, vector<16x128xf32> -> vector<16x128xf32>
    %60 = vector.extract_strided_slice %0 {offsets = [2, 0], sizes = [1, 128], strides = [1, 1]} : vector<3x128xf32> to vector<1x128xf32>
    %61 = vector.broadcast %60 : vector<1x128xf32> to vector<16x128xf32>
    %62 = arith.addf %59, %61 : vector<16x128xf32>
    %cst_13 = arith.constant 0.000000e+00 : f32
    %63 = vector.broadcast %cst_13 : f32 to vector<16x128xf32>
    %64 = arith.maximumf %62, %63 : vector<16x128xf32>
    %65 = vector.shape_cast %64 : vector<16x128xf32> to vector<4x4x128xf32>
    %cst_14 = arith.constant dense<0.000000e+00> : vector<4x128xf32>
    %66 = vector.multi_reduction <add>, %65, %cst_14 [1] : vector<4x4x128xf32> to vector<4x128xf32>
    %cst_15 = arith.constant 2.500000e-01 : f32
    %67 = vector.broadcast %cst_15 : f32 to vector<4x128xf32>
    %68 = arith.mulf %66, %67 : vector<4x128xf32>
    %c0_16 = arith.constant 0 : index
    %c0_17 = arith.constant 0 : index
    %c0_18 = arith.constant 0 : index
    %69 = vector.load %arg6[%c0_16, %c0_17, %c0_18] : memref<1x4x128xf32, #tpu.memory_space<vmem>>, vector<1x4x128xf32>
    %70 = vector.shape_cast %69 : vector<1x4x128xf32> to vector<4x128xf32>
    %71 = vector.shape_cast %68 : vector<4x128xf32> to vector<1x4x128xf32>
    tpu.vector_store %arg6[%c0_16, %c0_17, %c0_18], %71 {strides = array<i32>} : memref<1x4x128xf32, #tpu.memory_space<vmem>>, vector<1x4x128xf32>,
    return
  }
  func.func @transform_0(%arg0: i32) -> (i32, i32) {
    %c0_i32 = arith.constant 0 : i32
    %c0_i32_0 = arith.constant 0 : i32
    return %arg0, %c0_i32 : i32, i32
  }
  func.func @transform_1(%arg0: i32) -> (i32, i32) {
    %c0_i32 = arith.constant 0 : i32
    %c0_i32_0 = arith.constant 0 : i32
    %c0_i32_1 = arith.constant 0 : i32
    return %c0_i32, %c0_i32_0 : i32, i32
  }
  func.func @transform_2(%arg0: i32) -> (i32, i32) {
    %c0_i32 = arith.constant 0 : i32
    %c0_i32_0 = arith.constant 0 : i32
    %c0_i32_1 = arith.constant 0 : i32
    return %c0_i32, %c0_i32_0 : i32, i32
  }
  func.func @transform_3(%arg0: i32) -> (i32, i32) {
    %c0_i32 = arith.constant 0 : i32
    %c0_i32_0 = arith.constant 0 : i32
    %c0_i32_1 = arith.constant 0 : i32
    return %c0_i32, %c0_i32_0 : i32, i32
  }
  func.func @transform_4(%arg0: i32) -> (i32, i32) {
    %c0_i32 = arith.constant 0 : i32
    %c0_i32_0 = arith.constant 0 : i32
    %c0_i32_1 = arith.constant 0 : i32
    return %c0_i32, %c0_i32_0 : i32, i32
  }
  func.func @transform_5(%arg0: i32) -> (i32, i32, i32) {
    %c0_i32 = arith.constant 0 : i32
    %c0_i32_0 = arith.constant 0 : i32
    %c0_i32_1 = arith.constant 0 : i32
    return %arg0, %c0_i32, %c0_i32_0 : i32, i32, i32
  }
}

</mosaic_0001>

<bundles_post_ra>
// kernel: image_encoder_forward.1
= control target key start
LH: loop header
LB: loop body
LE: loop exit
PB: predicated region body
PF: predicated region fallthrough
CT: control target
= control target key end

     0   :  { %10 = vsyncpa [#allocation3], 0  ;;  %s26963_s0 = inlined_call_operand.vmem [shape: bf16[1568,128], index: 0, kind: input, shape index: {}]   ;;  %s26964_s1 = inlined_call_operand.vmem [shape: bf16[128,128], index: 1, kind: input, shape index: {}]   ;;  %s26965_s2 = inlined_call_operand.vmem [shape: bf16[1152,128], index: 2, kind: input, shape index: {}]   ;;  %s26966_s3 = inlined_call_operand.vmem [shape: bf16[1152,128], index: 3, kind: input, shape index: {}]   ;;  %s26967_s4 = inlined_call_operand.vmem [shape: f32[3,128], index: 4, kind: input, shape index: {}]   ;;  %s26968_s5 = inlined_call_operand.hbm [shape: f32[2,4,128], index: 5, kind: output, shape index: {}]  }
   0x1   :  { %12 = vsyncpa [#allocation3 + $0x1], 0  ;;  %s20049_s18 = smov 0   ;;  %s20051_s19 = smov 0  }
   0x2   :  { %s20053_s20 = smov 0   ;;  %s20055_s21 = smov 0  }
   0x3 LB: > { %s20070_s22 = sadd.s32 4294967295, %s20013_s21   ;;  %s18522_s23 = sadd.s32 4294967294, %s20013_s21   ;;  %s20013_s21 = sphi %s20055_s21, %s27901_s21   ;;  %s20009_s20 = sphi %s20053_s20, %s27900_s20   ;;  %s20005_s19 = sphi %s20051_s19, %s27899_s19   ;;  %s20001_s18 = sphi %s20049_s18, %s27898_s18  }
   0x4   : > { %s20074_s24 = sadd.s32 1, %s20013_s21   ;;  %s135_s25 = sadd.s32 1, %s20009_s20 }
   0x5   : > { %s132_s26 = ssub.s32 %s20013_s21, %s20074_s24  ;;  %p145_p0 = scmp.ne.s32.totalorder %s20009_s20, %s20005_s19 }
   0x6   : > { %p133_p1 = scmp.eq.s32.totalorder %s132_s26, 0  ;;  %p146_p2 = scmp.eq.s32.totalorder %s20070_s22, 1 }
   0x7   : > { %p151_p3 = scmp.ne.s32.totalorder %s20005_s19, %s20001_s18  ;;  %p152_p4 = scmp.eq.s32.totalorder %s18522_s23, 1 }
   0x8   : > { %s20085_s27 = scalar_select %p133_p1, %s20009_s20, %s135_s25  }
   0x9   : > { %p20087_p5 = por %p146_p2, %p145_p0  ;;  %p20091_p6 = por %p152_p4, %p151_p3 }
   0xa   : > { %p18525_p7 = scmp.ge.s32.totalorder %s20013_s21, 1  ;;  %p191_p8 = scmp.lt.s32.totalorder %s20013_s21, 3 }
   0xc   : > { %p192_p9 = pnand %p18525_p7, %p191_p8 }
   0xe   : > { %195 = sbr.rel (%p192_p9) target bundleno = 2093 (0x82d), region = 40 }
  0x13   : > { %v19750_v0 = vld [vmem:[%s26964_s1 + $0x38] sm:$0xff]   ;;  %v26971_v1 = vmov 0.0   ;;  %v19751_v2 = vld [vmem:[%s26964_s1 + $0x30] sm:$0xff]   ;;  %vm20016_vm0 = vmmov 0   ;;  %s219_s9 = smul.u32 98, %s20070_s22  ;;  %v19752_v3 = vld [vmem:[%s26964_s1 + $0x28] sm:$0xff]   ;;  %v341_v33 = vlaneseq }
  0x14   : > { %19424 = vmatprep.subr.bf16.mxu0 %v26971_v1  ;;  %19440 = vmatprep.mubr.msk.bf16.mxu0 %vm20016_vm0, %v26971_v1  ;;  %v19753_v4 = vld [vmem:[%s26964_s1 + $0x20] sm:$0xff]   ;;  %v19754_v5 = vld [vmem:[%s26964_s1 + $0x18] sm:$0xff]   ;;  %v19755_v6 = vld [vmem:[%s26964_s1 + $0x10] sm:$0xff]   ;;  %v20017_v44 = vmov 1966171168   ;;  %vm5750_vm1 = vcmask 1041409  }
  0x15   : > { %19425 = vmatpush3.bf16.msra.mxu0 %v19750_v0  ;;  %p220_p10 = scmp.lt.s32.totalorder %s219_s9, 195  ;;  %v19756_v7 = vld [vmem:[%s26964_s1 + $0x8] sm:$0xff]   ;;  %v19757_v8 = vld [vmem:[%s26964_s1] sm:$0xff]   ;;  %v19789_v32 = vld [vmem:[%s26965_s2 + $0x78] sm:$0xff]   ;;  %v20213_v36 = vshrl.u32 %v341_v33, 7  ;;  %v1310_v45 = vunpack.c.l.s4 %v20017_v44  ;;  %vm5753_vm2 = vcmask 1042434  }
  0x16   : > { %19426 = vmatprep.subr.bf16.mxu0 %v26971_v1  ;;  %19030 = vmatprep.subr.bf16.mxu1 %v19789_v32  ;;  %v19790_v35 = vld [vmem:[%s26965_s2 + $0x38] sm:$0xff]   ;;  %v19791_v37 = vld [vmem:[%s26965_s2 + $0x70] sm:$0xff]   ;;  %v19794_v40 = vld [vmem:[%s26965_s2 + $0x68] sm:$0xff]   ;;  %vm5756_vm3 = vcmask 1043459   ;;  %vm5759_vm4 = vcmask 1044484   ;;  %vm5762_vm5 = vcmask 1045509  }
  0x17   : > { %s27903_s9 = smov (!%p220_p10, %s219_s9), 195  ;;  %19031 = vmatpush3.bf16.msra.mxu1 %v19790_v35  ;;  %27228 = vst [vmem:[#allocation5_spill] sm:$0xff] %v20213_v36  ;;  %v19793_v38 = vld [vmem:[%s26965_s2 + $0x30] sm:$0xff]   ;;  %v343_v39 = vsub.s32 0, %v20213_v36  ;;  %v226_v41 = vld [vmem:[%s26967_s4] sm:$0x7]  ;;  %v1311_v49 = vunpack.c.0.s8 %v1310_v45 }
  0x18   : > { %s18527_s12 = sshll.u32 %s27903_s9, 2  ;;  %19032 = vmatprep.subr.bf16.mxu1 %v19791_v37  ;;  %v19795_v54 = vld [vmem:[%s26965_s2 + $0x28] sm:$0xff]   ;;  %v19796_v61 = vld [vmem:[%s26965_s2 + $0x60] sm:$0xff]   ;;  %vm18407_vm6 = vcmask 1043456   ;;  %s216_s23 = sand.u32 1, %s20005_s19  }
  0x19   : > { %19427 = vmatpush3.bf16.msra.mxu0 %v19751_v2  ;;  %s20115_s15 = scalar_lea.vmem %s26963_s0, %s18527_s12  ;;  %v20231_v43 = vrot.slane %v226_v41, %v343_v39  ;;  %v20242_v57 = vsub.s32 %v1311_v49, %v20213_v36  ;;  %v19798_v63 = vld [vmem:[%s26965_s2 + $0x20] sm:$0xff]   ;;  %s18526_s25 = sshll.u32 %s216_s23, 2 }
  0x1a   : > { %19428 = vmatprep.subr.bf16.mxu0 %v26971_v1  ;;  %v19758_v9 = vld [vmem:[%s20115_s15] sm:$0xff]   ;;  %v19759_v10 = vld [vmem:[%s20115_s15 + $0x8] sm:$0xff]   ;;  %v19760_v11 = vld [vmem:[%s20115_s15 + $0x10] sm:$0xff]   ;;  %s18970_s26 = sshll.u32 %s20070_s22, 6  ;;  %s218_s30 = scalar_lea.vmem [#allocation2], %s18526_s25 }
  0x1b   : > { %v19761_v12 = vld [vmem:[%s20115_s15 + $0x18] sm:$0xff]   ;;  %v19762_v13 = vld [vmem:[%s20115_s15 + $0x20] sm:$0xff]   ;;  %v19763_v14 = vld [vmem:[%s20115_s15 + $0x28] sm:$0xff]   ;;  %19033 = vmatpush3.bf16.msra.mxu1 %v19793_v38  ;;  %27229 = vst [vmem:[#allocation6_spill] sm:$0xff] %v20231_v43  ;;  %s18463_s6 = sshll.u32 %s218_s30, 4  ;;  %s26927_s9 = scalar_lea.hbm %s26968_s5, %s18970_s26  ;;  %s18464_s6 = int_to_ptr.vmem [resolvable:$true] %s18463_s6 }
  0x1c   : > { %v19764_v15 = vld [vmem:[%s20115_s15 + $0x30] sm:$0xff]   ;;  %v19765_v16 = vld [vmem:[%s20115_s15 + $0x38] sm:$0xff]   ;;  %v19766_v17 = vld [vmem:[%s20115_s15 + $0x40] sm:$0xff]   ;;  %19034 = vmatprep.subr.bf16.mxu1 %v19794_v40  ;;  %s18450_s10 = scalar_lea.sflag [#allocation3], %s216_s23  ;;  %s19953_s11 = scalar_lea.vmem %s18464_s6, 64 }
  0x1d   : > { %19429 = vmatpush3.bf16.msra.mxu0 %v19752_v3  ;;  %v19767_v18 = vld [vmem:[%s20115_s15 + $0x48] sm:$0xff]   ;;  %v19768_v19 = vld [vmem:[%s20115_s15 + $0x50] sm:$0xff]   ;;  %v19769_v20 = vld [vmem:[%s20115_s15 + $0x58] sm:$0xff]   ;;  %p19954_p11 = scmp.ne.s32.totalorder %s18464_s6, %s19953_s11  ;;  %s20018_s22 = smov [#allocation2]  }
  0x1e   : > { %19430 = vmatprep.subr.bf16.mxu0 %v26971_v1  ;;  %v19770_v21 = vld [vmem:[%s20115_s15 + $0x60] sm:$0xff]   ;;  %v19771_v22 = vld [vmem:[%s20115_s15 + $0x68] sm:$0xff]   ;;  %v19772_v23 = vld [vmem:[%s20115_s15 + $0x70] sm:$0xff]   ;;  %s19957_s12 = sshll.u32 %s20018_s22, 4  ;;  %s19958_s12 = int_to_ptr.vmem [resolvable:$false] %s19957_s12 }
  0x1f   : > { %v19773_v24 = vld [vmem:[%s20115_s15 + $0x78] sm:$0xff]   ;;  %v19774_v25 = vld [vmem:[%s20115_s15 + $0x80] sm:$0xff]   ;;  %v19775_v26 = vld [vmem:[%s20115_s15 + $0x88] sm:$0xff]   ;;  %19035 = vmatpush3.bf16.msra.mxu1 %v19795_v54  ;;  %p19955_p12 = pnand %p19954_p11, %p20087_p5  ;;  %s19959_s13 = scalar_lea.vmem %s19958_s12, 128 }
  0x20   : > { %v19776_v27 = vld [vmem:[%s20115_s15 + $0x90] sm:$0xff]   ;;  %v19777_v28 = vld [vmem:[%s20115_s15 + $0x98] sm:$0xff]   ;;  %v19778_v29 = vld [vmem:[%s20115_s15 + $0xa0] sm:$0xff]   ;;  %19036 = vmatprep.subr.bf16.mxu1 %v19796_v61  ;;  %p19960_p0 = scmp.lt.s32.totalorder %s18464_s6, %s19958_s12  ;;  %p19961_p1 = scmp.lt.s32.totalorder %s19959_s13, %s19953_s11 }
  0x21   : > { %19431 = vmatpush3.bf16.msra.mxu0 %v19753_v4  ;;  %v19779_v30 = vld [vmem:[%s20115_s15 + $0xa8] sm:$0xff]   ;;  %v19780_v31 = vld [vmem:[%s20115_s15 + $0xb0] sm:$0xff]   ;;  %v19781_v34 = vld [vmem:[%s20115_s15 + $0xb8] sm:$0xff]   ;;  %p19956_p13 = pneg %p19955_p12 }
  0x22   : > { %19432 = vmatprep.subr.bf16.mxu0 %v26971_v1  ;;  %v19782_v42 = vld [vmem:[%s20115_s15 + $0xc0] sm:$0xff]   ;;  %v19783_v51 = vld [vmem:[%s20115_s15 + $0xc8] sm:$0xff]   ;;  %v19784_v4 = vld [vmem:[%s20115_s15 + $0xd0] sm:$0xff]   ;;  %p19962_p2 = por %p19961_p1, %p19960_p0 }
  0x23   : > { %19037 = vmatpush3.bf16.msra.mxu1 %v19798_v63  ;;  %v19785_v35 = vld [vmem:[%s20115_s15 + $0xd8] sm:$0xff]  }
  0x24   : > { %p19963_p3 = pnand %p19962_p2, %p19956_p13 }
  0x25   : > { %19433 = vmatpush3.bf16.msra.mxu0 %v19754_v5 }
  0x26   : > { %19434 = vmatprep.subr.bf16.mxu0 %v26971_v1 }
  0x29   : > { %19435 = vmatpush3.bf16.msra.mxu0 %v19755_v6 }
  0x2a   : > { %19436 = vmatprep.subr.bf16.mxu0 %v26971_v1 }
  0x2d   : > { %19437 = vmatpush3.bf16.msra.mxu0 %v19756_v7 }
  0x2e   : > { %19438 = vmatprep.subr.bf16.mxu0 %v26971_v1 }
  0x31   : > { %19439 = vmatpush3.bf16.msra.mxu0 %v19757_v8 }
  0x34   : > { %19441 = vmatmul.mubr.bf16.vlgmr.msra.gmra.mxu0 %v19758_v9  ;;  %v19799_v9 = vld [vmem:[%s26965_s2 + $0x58] sm:$0xff]  }
  0x35   : > { %19444 = vmatprep.mubr.msk.bf16.mxu0 %vm20016_vm0, %v26971_v1  ;;  %19038 = vmatprep.subr.bf16.mxu1 %v19799_v9 }
  0x3c   : > { %19445 = vmatmul.mubr.bf16.gmra.mxu0 %v19759_v10 }
  0x3d   : > { %19448 = vmatprep.mubr.msk.bf16.mxu0 %vm20016_vm0, %v26971_v1 }
  0x44   : > { %19449 = vmatmul.mubr.bf16.gmra.mxu0 %v19760_v11 }
  0x45   : > { %19452 = vmatprep.mubr.msk.bf16.mxu0 %vm20016_vm0, %v26971_v1 }
  0x4c   : > { %19453 = vmatmul.mubr.bf16.gmra.mxu0 %v19761_v12 }
  0x4d   : > { %19456 = vmatprep.mubr.msk.bf16.mxu0 %vm20016_vm0, %v26971_v1 }
  0x54   : > { %19457 = vmatmul.mubr.bf16.gmra.mxu0 %v19762_v13 }
  0x55   : > { %19460 = vmatprep.mubr.msk.bf16.mxu0 %vm20016_vm0, %v26971_v1 }
  0x5c   : > { %19461 = vmatmul.mubr.bf16.gmra.mxu0 %v19763_v14 }
  0x5d   : > { %19464 = vmatprep.mubr.msk.bf16.mxu0 %vm20016_vm0, %v26971_v1 }
  0x64   : > { %19465 = vmatmul.mubr.bf16.gmra.mxu0 %v19764_v15 }
  0x65   : > { %19468 = vmatprep.mubr.msk.bf16.mxu0 %vm20016_vm0, %v26971_v1 }
  0x6c   : > { %19469 = vmatmul.mubr.bf16.gmra.mxu0 %v19765_v16 }
  0x6d   : > { %19472 = vmatprep.mubr.msk.bf16.mxu0 %vm20016_vm0, %v26971_v1 }
  0x74   : > { %19473 = vmatmul.mubr.bf16.gmra.mxu0 %v19766_v17 }
  0x75   : > { %19476 = vmatprep.mubr.msk.bf16.mxu0 %vm20016_vm0, %v26971_v1 }
  0x7c   : > { %19477 = vmatmul.mubr.bf16.gmra.mxu0 %v19767_v18 }
  0x7d   : > { %19480 = vmatprep.mubr.msk.bf16.mxu0 %vm20016_vm0, %v26971_v1 }
  0x84   : > { %19481 = vmatmul.mubr.bf16.gmra.mxu0 %v19768_v19 }
  0x85   : > { %19484 = vmatprep.mubr.msk.bf16.mxu0 %vm20016_vm0, %v26971_v1 }
  0x8c   : > { %19485 = vmatmul.mubr.bf16.gmra.mxu0 %v19769_v20 }
  0x8d   : > { %19488 = vmatprep.mubr.msk.bf16.mxu0 %vm20016_vm0, %v26971_v1 }
  0x94   : > { %19489 = vmatmul.mubr.bf16.gmra.mxu0 %v19770_v21 }
  0x95   : > { %19492 = vmatprep.mubr.msk.bf16.mxu0 %vm20016_vm0, %v26971_v1 }
  0x9c   : > { %19493 = vmatmul.mubr.bf16.gmra.mxu0 %v19771_v22 }
  0x9d   : > { %19496 = vmatprep.mubr.msk.bf16.mxu0 %vm20016_vm0, %v26971_v1 }
  0xa4   : > { %19497 = vmatmul.mubr.bf16.gmra.mxu0 %v19772_v23 }
  0xa5   : > { %19500 = vmatprep.mubr.msk.bf16.mxu0 %vm20016_vm0, %v26971_v1 }
  0xac   : > { %19501 = vmatmul.mubr.bf16.gmra.mxu0 %v19773_v24 }
  0xad   : > { %19504 = vmatprep.mubr.msk.bf16.mxu0 %vm20016_vm0, %v26971_v1 }
  0xb4   : > { %19505 = vmatmul.mubr.bf16.gmra.mxu0 %v19774_v25 }
  0xb5   : > { %19508 = vmatprep.mubr.msk.bf16.mxu0 %vm20016_vm0, %v26971_v1 }
  0xbc   : > { %19509 = vmatmul.mubr.bf16.gmra.mxu0 %v19775_v26 }
  0xbd   : > { %19512 = vmatprep.mubr.msk.bf16.mxu0 %vm20016_vm0, %v26971_v1 }
  0xc4   : > { %19513 = vmatmul.mubr.bf16.gmra.mxu0 %v19776_v27 }
  0xc5   : > { %19516 = vmatprep.mubr.msk.bf16.mxu0 %vm20016_vm0, %v26971_v1 }
  0xcc   : > { %19517 = vmatmul.mubr.bf16.gmra.mxu0 %v19777_v28 }
  0xcd   : > { %19520 = vmatprep.mubr.msk.bf16.mxu0 %vm20016_vm0, %v26971_v1 }
  0xd4   : > { %19521 = vmatmul.mubr.bf16.gmra.mxu0 %v19778_v29 }
  0xd5   : > { %19524 = vmatprep.mubr.msk.bf16.mxu0 %vm20016_vm0, %v26971_v1 }
  0xdc   : > { %19525 = vmatmul.mubr.bf16.gmra.mxu0 %v19779_v30 }
  0xdd   : > { %19528 = vmatprep.mubr.msk.bf16.mxu0 %vm20016_vm0, %v26971_v1 }
  0xe4   : > { %19529 = vmatmul.mubr.bf16.gmra.mxu0 %v19780_v31 }
  0xe5   : > { %19532 = vmatprep.mubr.msk.bf16.mxu0 %vm20016_vm0, %v26971_v1 }
  0xec   : > { %19533 = vmatmul.mubr.bf16.gmra.mxu0 %v19781_v34 }
  0xed   : > { %19536 = vmatprep.mubr.msk.bf16.mxu0 %vm20016_vm0, %v26971_v1 }
  0xf4   : > { %v721_v46 = vpop.f32.mrf.mxu0  ;;  %19537 = vmatmul.mubr.bf16.gmra.mxu0 %v19782_v42 }
  0xf5   : > { %19540 = vmatprep.mubr.msk.bf16.mxu0 %vm20016_vm0, %v26971_v1  ;;  %v722_v48 = vadd.f32 %v721_v46, %v20231_v43 }
  0xf6   : > { %v19442_v47 = vpop.f32.mrf.mxu0 }
  0xf7   : > { %v1112_v55 = vmax.f32 %v722_v48, 0.0 }
  0xf8   : > { %v724_v50 = vpop.f32.mrf.mxu0 }
  0xf9   : > { %v725_v52 = vadd.f32 %v724_v50, %v20231_v43 }
  0xfa   : > { %v19443_v53 = vpop.f32.mrf.mxu0 }
  0xfb   : > { %v1113_v56 = vmax.f32 %v725_v52, 0.0 }
  0xfc   : > { %v729_v58 = vpop.f32.mrf.mxu0  ;;  %19541 = vmatmul.mubr.bf16.gmra.mxu0 %v19783_v51 }
  0xfd   : > { %v1210_v59 = vpack.c.bf16 %v1113_v56, %v1112_v55  ;;  %v18585_v60 = vpack.c.bf16 %v1113_v56, %v1113_v56  ;;  %19544 = vmatprep.mubr.msk.bf16.mxu0 %vm20016_vm0, %v26971_v1  ;;  %v730_v16 = vadd.f32 %v729_v58, %v20231_v43 }
  0xfe   : > { %v19446_v62 = vpop.f32.mrf.mxu0 }
  0xff   : > { %v1315_v0 = vrot.slane %v1210_v59, %v20242_v57  ;;  %v1322_v2 = vrot.slane %v18585_v60, %v20242_v57  ;;  %v1114_v42 = vmax.f32 %v730_v16, 0.0 }
 0x100   : > { %v732_v3 = vpop.f32.mrf.mxu0 }
 0x101   : > { %v1323_v5 = vcombine.high %v1315_v0, %v1315_v0  ;;  %v1324_v6 = vcombine.high %v1322_v2, %v1322_v2  ;;  %v1331_v7 = vrot.slane %v1315_v0, %v20242_v57  ;;  %v20257_v8 = vrot.slane %v1322_v2, %v20242_v57 }
 0x102   : > { %v19447_v10 = vpop.f32.mrf.mxu0  ;;  %v733_v25 = vadd.f32 %v732_v3, %v20231_v43 }
 0x103   : > { %v1345_v11 = vrot.slane %v1323_v5, %v20242_v57  ;;  %v1352_v12 = vrot.slane %v1324_v6, %v20242_v57  ;;  %v1353_v13 = vcombine.high %v1331_v7, %v1331_v7  ;;  %v3595_v14 = vrot.slane %v1331_v7, %v20242_v57 }
 0x104   : > { %v3651_v15 = vrot.slane %v20257_v8, %v20242_v57  ;;  %v20268_v17 = vpop.f32.mrf.mxu0  ;;  %19545 = vmatmul.mubr.bf16.gmra.mxu0 %v19784_v4  ;;  %v1115_v44 = vmax.f32 %v733_v25, 0.0 }
 0x105   : > { %v1355_v18 = vcombine.high %v1345_v11, %v1345_v11  ;;  %v1356_v19 = vcombine.high %v1352_v12, %v1352_v12  ;;  %v3609_v20 = vrot.slane %v1345_v11, %v20242_v57  ;;  %v3623_v21 = vrot.slane %v1353_v13, %v20242_v57  ;;  %19548 = vmatprep.mubr.msk.bf16.mxu0 %vm20016_vm0, %v26971_v1 }
 0x106   : > { %v3602_v22 = vrot.slane %v3595_v14, %v20242_v57  ;;  %v3658_v23 = vrot.slane %v3651_v15, %v20242_v57  ;;  %v3665_v24 = vrot.slane %v1352_v12, %v20242_v57  ;;  %v19450_v26 = vpop.f32.mrf.mxu0  ;;  %v1211_v5 = vpack.c.bf16 %v1115_v44, %v1114_v42  ;;  %v19786_v12 = vld [vmem:[%s20115_s15 + $0xe0] sm:$0xff]  }
 0x107   : > { %v3616_v27 = vrot.slane %v3609_v20, %v20242_v57  ;;  %v3630_v28 = vrot.slane %v3623_v21, %v20242_v57  ;;  %v3637_v29 = vrot.slane %v1355_v18, %v20242_v57  ;;  %v6816_v33 = vrot.slane %v1356_v19, %v20242_v57  ;;  %v19800_v21 = vld [vmem:[%s26965_s2 + $0x18] sm:$0xff]  }
 0x108   : > { %v3672_v30 = vrot.slane %v3665_v24, %v20242_v57  ;;  %v5605_v31 = vunpack.c.l.b16 %v3602_v22  ;;  %v5609_v32 = vunpack.c.l.b16 %v3658_v23  ;;  %v740_v34 = vpop.f32.mrf.mxu0  ;;  %v18586_v13 = vpack.c.bf16 %v1115_v44, %v1115_v44  ;;  %19039 = vmatpush3.bf16.msra.mxu1 %v19800_v21  ;;  %v19803_v44 = vld [vmem:[%s26965_s2 + $0x10] sm:$0xff]  }
 0x109   : > { %v3644_v37 = vrot.slane %v3637_v29, %v20242_v57  ;;  %v5606_v38 = vunpack.c.l.b16 %v3616_v27  ;;  %v5607_v39 = vunpack.c.l.b16 %v3630_v28  ;;  %v6823_v53 = vrot.slane %v6816_v33, %v20242_v57 }
 0x10a   : > { %v5610_v40 = vunpack.c.l.b16 %v3672_v30  ;;  %v6018_v41 = vrot.slane %v5605_v31, 1  ;;  %v19451_v45 = vpop.f32.mrf.mxu0  ;;  %v5758_v50 = vrot.slane %v5609_v32, 4  ;;  %v6024_v52 = vrot.slane %v5609_v32, 5 }
 0x10b   : > { %v5608_v46 = vunpack.c.l.b16 %v3644_v37  ;;  %v5749_v47 = vrot.slane %v5606_v38, 7  ;;  %v5752_v48 = vrot.slane %v5607_v39, 6  ;;  %v6020_v49 = vrot.slane %v5607_v39, 7  ;;  %v19801_v37 = vld [vmem:[%s26965_s2 + $0x50] sm:$0xff]  }
 0x10c   : > { %v6019_v51 = vsel %vm5750_vm1, %v5606_v38, %v6018_v41  ;;  %v745_v54 = vpop.f32.mrf.mxu0  ;;  %19549 = vmatmul.mubr.bf16.gmra.mxu0 %v19785_v35  ;;  %v5761_v61 = vrot.slane %v5610_v40, 3  ;;  %v6026_v62 = vrot.slane %v5610_v40, 4  ;;  %v20299_v10 = vunpack.c.l.b16 %v6823_v53  ;;  %19040 = vmatprep.subr.bf16.mxu1 %v19801_v37 }
 0x10d   : > { %v5751_v55 = vsel %vm5750_vm1, %v5749_v47, %v5605_v31  ;;  %v5755_v56 = vrot.slane %v5608_v46, 5  ;;  %v6021_v58 = vsel %vm5753_vm2, %v6020_v49, %v6019_v51  ;;  %v6022_v59 = vrot.slane %v5608_v46, 6  ;;  %19552 = vmatprep.mubr.msk.bf16.mxu0 %vm20016_vm0, %v26971_v1  ;;  %19041 = vmatpush3.bf16.msra.mxu1 %v19803_v44 }
 0x10e   : > { %v5754_v60 = vsel %vm5753_vm2, %v5752_v48, %v5751_v55  ;;  %v6642_v63 = vsel %vm5750_vm1, %v6020_v49, %v5606_v38  ;;  %v19454_v0 = vpop.f32.mrf.mxu0  ;;  %v1364_v14 = vrot.slane %v1211_v5, %v20242_v57  ;;  %v738_v15 = vadd.f32 %v20268_v17, %v20231_v43 }
 0x10f   : > { %v5757_v2 = vsel %vm5756_vm3, %v5755_v56, %v5754_v60  ;;  %v6023_v3 = vsel %vm5756_vm3, %v6022_v59, %v6021_v58  ;;  %v6643_v4 = vsel %vm5753_vm2, %v6022_v59, %v6642_v63  ;;  %v741_v16 = vadd.f32 %v740_v34, %v20231_v43  ;;  %v19804_v60 = vld [vmem:[%s26965_s2 + $0x48] sm:$0xff]  }
 0x110   : > { %v5760_v6 = vsel %vm5759_vm4, %v5758_v50, %v5757_v2  ;;  %v6025_v7 = vsel %vm5759_vm4, %v6024_v52, %v6023_v3  ;;  %v6644_v9 = vsel %vm5756_vm3, %v6024_v52, %v6643_v4  ;;  %v748_v11 = vpop.f32.mrf.mxu0  ;;  %v746_v18 = vadd.f32 %v745_v54, %v20231_v43  ;;  %v19787_v54 = vld [vmem:[%s20115_s15 + $0xe8] sm:$0xff]   ;;  %19042 = vmatprep.subr.bf16.mxu1 %v19804_v60 }
 0x111   : > { %v749_v19 = vadd.f32 %v748_v11, %v20231_v43  ;;  %v20312_v22 = vsel %vm5762_vm5, %v5761_v61, %v5760_v6  ;;  %v20315_v23 = vsel %vm5762_vm5, %v6026_v62, %v6025_v7  ;;  %v1371_v24 = vrot.slane %v18586_v13, %v20242_v57 }
 0x112   : > { %v19455_v20 = vpop.f32.mrf.mxu0  ;;  %v1372_v17 = vcombine.high %v1364_v14, %v1364_v14  ;;  %v1380_v25 = vrot.slane %v1364_v14, %v20242_v57  ;;  %v1116_v26 = vmax.f32 %v738_v15, 0.0  ;;  %v20319_v27 = vmax.f32 %v741_v16, 0.0 }
 0x113   : > { %v1118_v28 = vmax.f32 %v746_v18, 0.0  ;;  %v20321_v29 = vmax.f32 %v749_v19, 0.0  ;;  %v20326_v31 = vsel %vm5759_vm4, %v6026_v62, %v6644_v9  ;;  %v1373_v32 = vcombine.high %v1371_v24, %v1371_v24 }
 0x114   : > { %v20323_v30 = vpop.f32.mrf.mxu0  ;;  %19553 = vmatmul.mubr.bf16.gmra.mxu0 %v19786_v12  ;;  %v1387_v33 = vrot.slane %v1371_v24, %v20242_v57  ;;  %v1394_v34 = vrot.slane %v1372_v17, %v20242_v57  ;;  %v1402_v35 = vcombine.high %v1380_v25, %v1380_v25  ;;  %v9234_v38 = vrot.slane %v20299_v10, 1 }
 0x115   : > { %19556 = vmatprep.mubr.msk.bf16.mxu0 %vm20016_vm0, %v26971_v1  ;;  %v6830_v39 = vrot.slane %v1380_v25, %v20242_v57  ;;  %v1212_v40 = vpack.c.bf16 %v20319_v27, %v1116_v26  ;;  %v20339_v41 = vpack.c.bf16 %v20321_v29, %v1118_v28  ;;  %v1401_v45 = vrot.slane %v1373_v32, %v20242_v57 }
 0x116   : > { %v19458_v42 = vpop.f32.mrf.mxu0  ;;  %v1403_v46 = vcombine.high %v1387_v33, %v1387_v33  ;;  %v1404_v47 = vcombine.high %v1394_v34, %v1394_v34  ;;  %v6844_v48 = vrot.slane %v1394_v34, %v20242_v57  ;;  %v6858_v50 = vrot.slane %v1402_v35, %v20242_v57 }
 0x117   : > { %v6837_v49 = vrot.slane %v6830_v39, %v20242_v57  ;;  %v6886_v51 = vrot.slane %v1387_v33, %v20242_v57  ;;  %v18587_v52 = vpack.c.bf16 %v20319_v27, %v20319_v27  ;;  %v1405_v55 = vcombine.high %v1401_v45, %v1401_v45  ;;  %v19805_v39 = vld [vmem:[%s26965_s2 + $0x8] sm:$0xff]  }
 0x118   : > { %v20351_v53 = vpop.f32.mrf.mxu0  ;;  %v3679_v56 = vrot.slane %v1403_v46, %v20242_v57  ;;  %v6851_v58 = vrot.slane %v6844_v48, %v20242_v57  ;;  %v6872_v59 = vrot.slane %v1404_v47, %v20242_v57  ;;  %v6865_v61 = vrot.slane %v6858_v50, %v20242_v57  ;;  %19043 = vmatpush3.bf16.msra.mxu1 %v19805_v39 }
 0x119   : > { %v20362_v62 = vrot.slane %v6886_v51, %v20242_v57  ;;  %v8827_v63 = vunpack.c.l.b16 %v6837_v49  ;;  %v9504_v0 = vrot.slane %v1401_v45, %v20242_v57  ;;  %v3693_v4 = vrot.slane %v1405_v55, %v20242_v57 }
 0x11a   : > { %v19459_v2 = vpop.f32.mrf.mxu0  ;;  %v3686_v3 = vrot.slane %v3679_v56, %v20242_v57  ;;  %v6879_v5 = vrot.slane %v6872_v59, %v20242_v57  ;;  %v8828_v6 = vunpack.c.l.b16 %v6851_v58  ;;  %v8829_v7 = vunpack.c.l.b16 %v6865_v61 }
 0x11b   : > { %v26970_v9 = vunpack.c.l.b16 %v20362_v62  ;;  %v8970_v11 = vrot.slane %v8827_v63, 7  ;;  %v9235_v12 = vsel %vm5750_vm1, %v8827_v63, %v9234_v38  ;;  %v3700_v14 = vrot.slane %v3693_v4, %v20242_v57 }
 0x11c   : > { %v20370_v13 = vpop.f32.mrf.mxu0  ;;  %19557 = vmatmul.mubr.bf16.gmra.mxu0 %v19787_v54  ;;  %v5611_v15 = vunpack.c.l.b16 %v3686_v3  ;;  %v20373_v16 = vunpack.c.l.b16 %v6879_v5  ;;  %v8972_v18 = vrot.slane %v8828_v6, 6  ;;  %v8974_v20 = vrot.slane %v8829_v7, 5 }
 0x11d   : > { %19560 = vmatprep.mubr.msk.bf16.mxu0 %vm20016_vm0, %v26971_v1  ;;  %v8971_v19 = vsel %vm5750_vm1, %v8970_v11, %v20299_v10  ;;  %v9236_v21 = vrot.slane %v8828_v6, 7  ;;  %v1413_v24 = vrot.slane %v1212_v40, %v20242_v57  ;;  %v20380_v25 = vunpack.c.l.b16 %v3700_v14  ;;  %v19788_v10 = vld [vmem:[%s20115_s15 + $0xf0] sm:$0xff]  }
 0x11e   : > { %v19462_v17 = vpop.f32.mrf.mxu0  ;;  %v8973_v26 = vsel %vm5753_vm2, %v8972_v18, %v8971_v19  ;;  %v9238_v32 = vrot.slane %v8829_v7, 6  ;;  %v9240_v33 = vrot.slane %v20373_v16, 5  ;;  %v6028_v35 = vrot.slane %v5611_v15, 1 }
 0x11f   : > { %v20384_v27 = vsel %vm5756_vm3, %v8974_v20, %v8973_v26  ;;  %v9237_v28 = vsel %vm5753_vm2, %v9236_v21, %v9235_v12  ;;  %v9242_v37 = vrot.slane %v26970_v9, 4  ;;  %v9511_v38 = vrot.slane %v9504_v0, %v20242_v57  ;;  %v19808_v0 = vld [vmem:[%s26965_s2] sm:$0xff]   ;;  %v19792_v17 = vld [vmem:[%s20115_s15 + $0xf8] sm:$0xff]  }
 0x120   : > { %v20388_v34 = vpop.f32.mrf.mxu0  ;;  %v9239_v40 = vsel %vm5756_vm3, %v9238_v32, %v9237_v28  ;;  %v9858_v42 = vsel %vm5750_vm1, %v9236_v21, %v8827_v63  ;;  %v1420_v44 = vrot.slane %v18587_v52, %v20242_v57  ;;  %v1421_v45 = vcombine.high %v1413_v24, %v1413_v24  ;;  %v19806_v52 = vld [vmem:[%s26965_s2 + $0x40] sm:$0xff]  }
 0x121   : > { %v5764_v47 = vrot.slane %v20380_v25, 7  ;;  %v9241_v48 = vsel %vm5759_vm4, %v9240_v33, %v9239_v40  ;;  %v9834_v49 = vunpack.c.l.b16 %v9511_v38  ;;  %v9859_v50 = vsel %vm5753_vm2, %v9238_v32, %v9858_v42  ;;  %19044 = vmatprep.subr.bf16.mxu1 %v19806_v52 }
 0x122   : > { %v19463_v46 = vpop.f32.mrf.mxu0  ;;  %v20404_v51 = vsel %vm5762_vm5, %v9242_v37, %v9241_v48  ;;  %v9860_v54 = vsel %vm5756_vm3, %v9240_v33, %v9859_v50  ;;  %v1422_v55 = vcombine.high %v1420_v44, %v1420_v44  ;;  %v1429_v56 = vrot.slane %v1413_v24, %v20242_v57  ;;  %19045 = vmatpush3.bf16.msra.mxu1 %v19808_v0 }
 0x123   : > { %v9861_v59 = vsel %vm5759_vm4, %v9242_v37, %v9860_v54  ;;  %v9862_v60 = vrot.slane %v9834_v49, 3  ;;  %v1436_v61 = vrot.slane %v1420_v44, %v20242_v57  ;;  %v1443_v63 = vrot.slane %v1421_v45, %v20242_v57 }
 0x124   : > { %v20408_v58 = vpop.f32.mrf.mxu0  ;;  %19561 = vmatmul.mubr.bf16.gmra.mxu0 %v19788_v10  ;;  %v6029_v2 = vsel %vm5750_vm1, %v20380_v25, %v6028_v35  ;;  %v20424_v3 = vrot.slane %v1422_v55, %v20242_v57  ;;  %v1451_v4 = vcombine.high %v1429_v56, %v1429_v56  ;;  %v3707_v5 = vrot.slane %v1429_v56, %v20242_v57 }
 0x125   : > { %19564 = vmatprep.mubr.msk.bf16.mxu0 %vm20016_vm0, %v26971_v1  ;;  %v20428_v7 = vsel %vm5762_vm5, %v9862_v60, %v9861_v59  ;;  %v1452_v11 = vcombine.high %v1436_v61, %v1436_v61  ;;  %v1453_v12 = vcombine.high %v1443_v63, %v1443_v63  ;;  %v3721_v14 = vrot.slane %v1443_v63, %v20242_v57 }
 0x126   : > { %v19466_v6 = vpop.f32.mrf.mxu0  ;;  %v1454_v19 = vcombine.high %v20424_v3, %v20424_v3  ;;  %v3714_v20 = vrot.slane %v3707_v5, %v20242_v57  ;;  %v3735_v21 = vrot.slane %v1451_v4, %v20242_v57  ;;  %v5765_v26 = vsel %vm5750_vm1, %v5764_v47, %v5611_v15 }
 0x127   : > { %v3728_v28 = vrot.slane %v3721_v14, %v20242_v57  ;;  %v3749_v32 = vrot.slane %v1453_v12, %v20242_v57  ;;  %v6302_v33 = vrot.slane %v1436_v61, %v20242_v57  ;;  %v6900_v37 = vrot.slane %v20424_v3, %v20242_v57  ;;  %v19797_v14 = vld [vmem:[%s20115_s15 + $0x100] sm:$0xff]  }
 0x128   : > { %v20437_v24 = vpop.f32.mrf.mxu0  ;;  %v3742_v10 = vrot.slane %v3735_v21, %v20242_v57  ;;  %v5613_v35 = vunpack.c.l.b16 %v3714_v20  ;;  %v18588_v38 = vpack.c.bf16 %v20321_v29, %v20321_v29  ;;  %v6914_v44 = vrot.slane %v1452_v11, %v20242_v57 }
 0x129   : > { %v3756_v40 = vrot.slane %v3749_v32, %v20242_v57  ;;  %v5614_v42 = vunpack.c.l.b16 %v3728_v28  ;;  %v6309_v15 = vrot.slane %v6302_v33, %v20242_v57  ;;  %v6928_v48 = vrot.slane %v1454_v19, %v20242_v57 }
 0x12a   : > { %v19467_v39 = vpop.f32.mrf.mxu0  ;;  %v5615_v45 = vunpack.c.l.b16 %v3742_v10  ;;  %v5766_v46 = vrot.slane %v5613_v35, 6  ;;  %v6030_v47 = vrot.slane %v5613_v35, 7  ;;  %v6921_v21 = vrot.slane %v6914_v44, %v20242_v57 }
 0x12b   : > { %v5616_v50 = vunpack.c.l.b16 %v3756_v40  ;;  %v5768_v54 = vrot.slane %v5614_v42, 5  ;;  %v6032_v55 = vrot.slane %v5614_v42, 6  ;;  %v6619_v29 = vunpack.c.l.b16 %v6309_v15 }
 0x12c   : > { %v20453_v49 = vpop.f32.mrf.mxu0  ;;  %19565 = vmatmul.mubr.bf16.gmra.mxu0 %v19792_v17  ;;  %v5767_v56 = vsel %vm5753_vm2, %v5766_v46, %v5765_v26  ;;  %v5770_v52 = vrot.slane %v5615_v45, 4  ;;  %v6031_v59 = vsel %vm5753_vm2, %v6030_v47, %v6029_v2  ;;  %v6034_v60 = vrot.slane %v5615_v45, 5 }
 0x12d   : > { %19568 = vmatprep.mubr.msk.bf16.mxu0 %vm20016_vm0, %v26971_v1  ;;  %v5769_v63 = vsel %vm5756_vm3, %v5768_v54, %v5767_v56  ;;  %v5772_v0 = vrot.slane %v5616_v50, 3  ;;  %v6033_v3 = vsel %vm5756_vm3, %v6032_v55, %v6031_v59  ;;  %v6036_v4 = vrot.slane %v5616_v50, 4 }
 0x12e   : > { %v19470_v61 = vpop.f32.mrf.mxu0  ;;  %v5771_v5 = vsel %vm5759_vm4, %v5770_v52, %v5769_v63  ;;  %v6035_v6 = vsel %vm5759_vm4, %v6034_v60, %v6033_v3  ;;  %v6648_v11 = vsel %vm5750_vm1, %v6030_v47, %v20380_v25  ;;  %v6652_v26 = vrot.slane %v6619_v29, 3  ;;  %v19802_v52 = vld [vmem:[%s20115_s15 + $0x108] sm:$0xff]  }
 0x12f   : > { %v20469_v2 = vsel %vm5762_vm5, %v5772_v0, %v5771_v5  ;;  %v20472_v19 = vsel %vm5762_vm5, %v6036_v4, %v6035_v6  ;;  %v6649_v20 = vsel %vm5753_vm2, %v6032_v55, %v6648_v11  ;;  %v1462_v28 = vrot.slane %v20339_v41, %v20242_v57 }
 0x130   : > { %v20465_v12 = vpop.f32.mrf.mxu0  ;;  %v6650_v17 = vsel %vm5756_vm3, %v6034_v60, %v6649_v20  ;;  %v6907_v33 = vrot.slane %v6900_v37, %v20242_v57  ;;  %v6935_v10 = vrot.slane %v6928_v48, %v20242_v57  ;;  %v1469_v35 = vrot.slane %v18588_v38, %v20242_v57 }
 0x131   : > { %v6651_v32 = vsel %vm5759_vm4, %v6036_v4, %v6650_v17  ;;  %v1470_v40 = vcombine.high %v1462_v28, %v1462_v28  ;;  %v8833_v15 = vunpack.c.l.b16 %v6921_v21  ;;  %v1478_v41 = vrot.slane %v1462_v28, %v20242_v57 }
 0x132   : > { %v19471_v25 = vpop.f32.mrf.mxu0  ;;  %v20484_v39 = vsel %vm5762_vm5, %v6652_v26, %v6651_v32  ;;  %v1471_v44 = vcombine.high %v1469_v35, %v1469_v35  ;;  %v1485_v37 = vrot.slane %v1469_v35, %v20242_v57  ;;  %v8832_v46 = vunpack.c.l.b16 %v6907_v33 }
 0x133   : > { %v8834_v38 = vunpack.c.l.b16 %v6935_v10  ;;  %v1492_v47 = vrot.slane %v1470_v40, %v20242_v57  ;;  %v1500_v50 = vcombine.high %v1478_v41, %v1478_v41  ;;  %v6942_v29 = vrot.slane %v1478_v41, %v20242_v57 }
 0x134   : > { %v20486_v42 = vpop.f32.mrf.mxu0  ;;  %19569 = vmatmul.mubr.bf16.gmra.mxu0 %v19797_v14  ;;  %v1499_v48 = vrot.slane %v1471_v44, %v20242_v57  ;;  %v1501_v54 = vcombine.high %v1485_v37, %v1485_v37  ;;  %v3763_v55 = vrot.slane %v1485_v37, %v20242_v57  ;;  %v8980_v59 = vrot.slane %v8833_v15, 7 }
 0x135   : > { %19572 = vmatprep.mubr.msk.bf16.mxu0 %vm20016_vm0, %v26971_v1  ;;  %v6949_v3 = vrot.slane %v6942_v29, %v20242_v57  ;;  %v8982_v5 = vrot.slane %v8834_v38, 6  ;;  %v9244_v6 = vrot.slane %v8832_v46, 1  ;;  %v6956_v14 = vrot.slane %v1492_v47, %v20242_v57 }
 0x136   : > { %v19474_v45 = vpop.f32.mrf.mxu0  ;;  %v1503_v60 = vcombine.high %v1499_v48, %v1499_v48  ;;  %v3770_v61 = vrot.slane %v3763_v55, %v20242_v57  ;;  %v3777_v63 = vrot.slane %v1499_v48, %v20242_v57  ;;  %v3791_v0 = vrot.slane %v1501_v54, %v20242_v57 }
 0x137   : > { %v6970_v26 = vrot.slane %v1500_v50, %v20242_v57  ;;  %v8981_v25 = vsel %vm5750_vm1, %v8980_v59, %v8832_v46  ;;  %v20513_v33 = vrot.slane %v6956_v14, %v20242_v57  ;;  %v8835_v10 = vunpack.c.l.b16 %v6949_v3 }
 0x138   : > { %v20496_v56 = vpop.f32.mrf.mxu0  ;;  %v3805_v11 = vrot.slane %v1503_v60, %v20242_v57  ;;  %v3784_v20 = vrot.slane %v3777_v63, %v20242_v57  ;;  %v3798_v21 = vrot.slane %v3791_v0, %v20242_v57  ;;  %v5617_v17 = vunpack.c.l.b16 %v3770_v61 }
 0x139   : > { %v9246_v35 = vrot.slane %v8834_v38, 7  ;;  %v6977_v41 = vrot.slane %v6970_v26, %v20242_v57  ;;  %v8984_v46 = vrot.slane %v8835_v10, 5  ;;  %v1502_v50 = vcombine.high %v1492_v47, %v1492_v47 }
 0x13a   : > { %v19475_v4 = vpop.f32.mrf.mxu0  ;;  %v3812_v32 = vrot.slane %v3805_v11, %v20242_v57  ;;  %v5618_v40 = vunpack.c.l.b16 %v3784_v20  ;;  %v5619_v44 = vunpack.c.l.b16 %v3798_v21  ;;  %v6038_v48 = vrot.slane %v5617_v17, 1 }
 0x13b   : > { %v26969_v54 = vunpack.c.l.b16 %v20513_v33  ;;  %v8983_v55 = vsel %vm5753_vm2, %v8982_v5, %v8981_v25  ;;  %v9245_v59 = vsel %vm5750_vm1, %v8833_v15, %v9244_v6  ;;  %v20526_v38 = vunpack.c.l.b16 %v6977_v41 }
 0x13c   : > { %v20508_v28 = vpop.f32.mrf.mxu0  ;;  %19573 = vmatmul.mubr.bf16.gmra.mxu0 %v19802_v52  ;;  %v20518_v45 = vunpack.c.l.b16 %v3812_v32  ;;  %v19807_v52 = vld [vmem:[%s20115_s15 + $0x110] sm:$0xff]   ;;  %v20529_v60 = vsel %vm5756_vm3, %v8984_v46, %v8983_v55  ;;  %v9864_v61 = vsel %vm5750_vm1, %v9246_v35, %v8833_v15  ;;  %v5774_v63 = vrot.slane %v5618_v40, 7 }
 0x13d   : > { %19576 = vmatprep.mubr.msk.bf16.mxu0 %vm20016_vm0, %v26971_v1  ;;  %v5776_v0 = vrot.slane %v5619_v44, 6  ;;  %v754_v47 = vadd.f32 %v20323_v30, %v20231_v43  ;;  %v6039_v5 = vsel %vm5750_vm1, %v5618_v40, %v6038_v48  ;;  %v6040_v11 = vrot.slane %v5619_v44, 7 }
 0x13e   : > { %v19478_v37 = vpop.f32.mrf.mxu0  ;;  %v5778_v4 = vrot.slane %v20518_v45, 5  ;;  %v9248_v14 = vrot.slane %v8835_v10, 6  ;;  %v9247_v6 = vsel %vm5753_vm2, %v9246_v35, %v9245_v59  ;;  %v9250_v20 = vrot.slane %v26969_v54, 5 }
 0x13f   : > { %v9252_v21 = vrot.slane %v20526_v38, 4  ;;  %v9518_v15 = vrot.slane %v1502_v50, %v20242_v57  ;;  %v6042_v30 = vrot.slane %v20518_v45, 6  ;;  %v757_v10 = vadd.f32 %v20351_v53, %v20231_v43 }
 0x140   : > { %v20522_v29 = vpop.f32.mrf.mxu0  ;;  %v9249_v25 = vsel %vm5756_vm3, %v9248_v14, %v9247_v6  ;;  %v9865_v32 = vsel %vm5753_vm2, %v9248_v14, %v9864_v61  ;;  %v5775_v35 = vsel %vm5750_vm1, %v5774_v63, %v5617_v17  ;;  %v1120_v50 = vmax.f32 %v754_v47, 0.0 }
 0x141   : > { %v9251_v44 = vsel %vm5759_vm4, %v9250_v20, %v9249_v25  ;;  %v9525_v41 = vrot.slane %v9518_v15, %v20242_v57  ;;  %v9866_v37 = vsel %vm5756_vm3, %v9250_v20, %v9865_v32  ;;  %v1121_v55 = vmax.f32 %v757_v10, 0.0 }
 0x142   : > { %v19479_v3 = vpop.f32.mrf.mxu0  ;;  %v20555_v45 = vsel %vm5762_vm5, %v9252_v21, %v9251_v44  ;;  %v9867_v46 = vsel %vm5759_vm4, %v9252_v21, %v9866_v37  ;;  %v765_v17 = vadd.f32 %v20388_v34, %v20231_v43  ;;  %v770_v59 = vadd.f32 %v20408_v58, %v20231_v43 }
 0x143   : > { %v9835_v53 = vunpack.c.l.b16 %v9525_v41  ;;  %v6041_v61 = vsel %vm5753_vm2, %v6040_v11, %v6039_v5  ;;  %v1214_v63 = vpack.c.bf16 %v1121_v55, %v1120_v50  ;;  %v18589_v3 = vpack.c.bf16 %v1121_v55, %v1121_v55 }
 0x144   : > { %v20541_v26 = vpop.f32.mrf.mxu0  ;;  %19577 = vmatmul.mubr.bf16.gmra.mxu0 %v19807_v52  ;;  %v762_v52 = vadd.f32 %v20370_v13, %v20231_v43  ;;  %v773_v14 = vadd.f32 %v20437_v24, %v20231_v43  ;;  %v6654_v47 = vsel %vm5750_vm1, %v6040_v11, %v5618_v40  ;;  %v1123_v21 = vmax.f32 %v765_v17, 0.0 }
 0x145   : > { %19580 = vmatprep.mubr.msk.bf16.mxu0 %vm20016_vm0, %v26971_v1  ;;  %v9868_v6 = vrot.slane %v9835_v53, 3  ;;  %v5777_v13 = vsel %vm5753_vm2, %v5776_v0, %v5775_v35  ;;  %v1511_v15 = vrot.slane %v1214_v63, %v20242_v57  ;;  %v1518_v34 = vrot.slane %v18589_v3, %v20242_v57 }
 0x146   : > { %v19482_v48 = vpop.f32.mrf.mxu0  ;;  %v1122_v20 = vmax.f32 %v762_v52, 0.0  ;;  %v20571_v25 = vmax.f32 %v773_v14, 0.0  ;;  %v1124_v32 = vmax.f32 %v770_v59, 0.0  ;;  %v20578_v24 = vadd.f32 %v20453_v49, %v20231_v43 }
 0x147   : > { %v20574_v58 = vsel %vm5762_vm5, %v9868_v6, %v9867_v46  ;;  %v1519_v40 = vcombine.high %v1511_v15, %v1511_v15  ;;  %v1520_v11 = vcombine.high %v1518_v34, %v1518_v34  ;;  %v20581_v10 = vrot.slane %v1511_v15, %v20242_v57 }
 0x148   : > { %v1215_v5 = vpack.c.bf16 %v1123_v21, %v1122_v20  ;;  %v1534_v0 = vrot.slane %v1518_v34, %v20242_v57  ;;  %v5779_v35 = vsel %vm5756_vm3, %v5778_v4, %v5777_v13  ;;  %v6043_v44 = vsel %vm5756_vm3, %v6042_v30, %v6041_v61  ;;  %v20609_v13 = vpop.f32.mrf.mxu0 }
 0x149   : > { %v20587_v41 = vpack.c.bf16 %v20571_v25, %v1124_v32  ;;  %v1541_v37 = vrot.slane %v1519_v40, %v20242_v57  ;;  %v1548_v48 = vrot.slane %v1520_v11, %v20242_v57  ;;  %v6655_v46 = vsel %vm5753_vm2, %v6042_v30, %v6654_v47 }
 0x14a   : > { %v1550_v49 = vcombine.high %v1534_v0, %v1534_v0  ;;  %v3819_v50 = vrot.slane %v20581_v10, %v20242_v57  ;;  %v6998_v55 = vrot.slane %v1534_v0, %v20242_v57  ;;  %v18590_v53 = vpack.c.bf16 %v1123_v21, %v1123_v21 }
 0x14b   : > { %v1551_v52 = vcombine.high %v1541_v37, %v1541_v37  ;;  %v1552_v17 = vcombine.high %v1548_v48, %v1548_v48  ;;  %v3833_v59 = vrot.slane %v1541_v37, %v20242_v57  ;;  %v20599_v61 = vadd.f32 %v20465_v12, %v20231_v43 }
 0x14c   : > { %v3826_v63 = vrot.slane %v3819_v50, %v20242_v57  ;;  %v7005_v30 = vrot.slane %v6998_v55, %v20242_v57  ;;  %v7012_v3 = vrot.slane %v1548_v48, %v20242_v57  ;;  %v7026_v14 = vrot.slane %v1550_v49, %v20242_v57  ;;  %v19483_v48 = vpop.f32.mrf.mxu0 }
 0x14d   : > { %v3840_v47 = vrot.slane %v3833_v59, %v20242_v57  ;;  %v6984_v6 = vrot.slane %v1551_v52, %v20242_v57  ;;  %v7040_v20 = vrot.slane %v1552_v17, %v20242_v57  ;;  %v1560_v21 = vrot.slane %v1215_v5, %v20242_v57 }
 0x14e   : > { %v5621_v12 = vunpack.c.l.b16 %v3826_v63  ;;  %v7019_v15 = vrot.slane %v7012_v3, %v20242_v57  ;;  %v7033_v34 = vrot.slane %v7026_v14, %v20242_v57  ;;  %v1567_v32 = vrot.slane %v18590_v53, %v20242_v57 }
 0x14f   : > { %v5622_v40 = vunpack.c.l.b16 %v3840_v47  ;;  %v6991_v11 = vrot.slane %v6984_v6, %v20242_v57  ;;  %v7047_v0 = vrot.slane %v7040_v20, %v20242_v57  ;;  %v8839_v37 = vunpack.c.l.b16 %v7005_v30 }
 0x150   : > { %v5780_v49 = vrot.slane %v5621_v12, 4  ;;  %v6044_v50 = vrot.slane %v5621_v12, 5  ;;  %v8840_v55 = vunpack.c.l.b16 %v7019_v15  ;;  %v8841_v5 = vunpack.c.l.b16 %v7033_v34 }
 0x151   : > { %v5782_v52 = vrot.slane %v5622_v40, 3  ;;  %v20616_v17 = vrot.slane %v5622_v40, 4  ;;  %v8838_v59 = vunpack.c.l.b16 %v6991_v11  ;;  %v1568_v63 = vcombine.high %v1560_v21, %v1560_v21 }
 0x152   : > { %v5781_v3 = vsel %vm5759_vm4, %v5780_v49, %v5779_v35  ;;  %v6045_v53 = vsel %vm5759_vm4, %v6044_v50, %v6043_v44  ;;  %v20621_v14 = vsel %vm5756_vm3, %v6044_v50, %v6655_v46  ;;  %v20623_v47 = vunpack.c.l.b16 %v7047_v0 }
 0x153   : > { %v20626_v30 = vsel %vm5762_vm5, %v5782_v52, %v5781_v3  ;;  %v20630_v6 = vsel %vm5762_vm5, %v20616_v17, %v6045_v53  ;;  %v8990_v20 = vrot.slane %v8839_v37, 7  ;;  %v8992_v12 = vrot.slane %v8840_v55, 6 }
 0x154   : > { %v8994_v15 = vrot.slane %v8841_v5, 5  ;;  %v9254_v34 = vrot.slane %v8838_v59, 1  ;;  %v9256_v40 = vrot.slane %v8840_v55, 7  ;;  %v1569_v35 = vcombine.high %v1567_v32, %v1567_v32 }
 0x155   : > { %v8991_v44 = vsel %vm5750_vm1, %v8990_v20, %v8838_v59  ;;  %v9258_v11 = vrot.slane %v8841_v5, 6  ;;  %v26973_v46 = vrot.slane %v20623_v47, 5  ;;  %v1576_v52 = vrot.slane %v1560_v21, %v20242_v57 }
 0x156   : > { %v8993_v48 = vsel %vm5753_vm2, %v8992_v12, %v8991_v44  ;;  %v9255_v49 = vsel %vm5750_vm1, %v8839_v37, %v9254_v34  ;;  %v9870_v50 = vsel %vm5750_vm1, %v9256_v40, %v8839_v37  ;;  %v1583_v3 = vrot.slane %v1567_v32, %v20242_v57  ;;  %v20649_v44 = vpop.f32.mrf.mxu0  ;;  %v19809_v37 = vld [vmem:[%s20115_s15 + $0x118] sm:$0xff]  }
 0x157   : > { %v20641_v55 = vsel %vm5756_vm3, %v8994_v15, %v8993_v48  ;;  %v9257_v59 = vsel %vm5753_vm2, %v9256_v40, %v9255_v49  ;;  %v9871_v5 = vsel %vm5753_vm2, %v9258_v11, %v9870_v50  ;;  %v1590_v20 = vrot.slane %v1568_v63, %v20242_v57  ;;  %27230 = vst [vmem:[#allocation7_spill] sm:$0xff] %v20649_v44 }
 0x158   : > { %v9259_v53 = vsel %vm5756_vm3, %v9258_v11, %v9257_v59  ;;  %v1597_v12 = vrot.slane %v1569_v35, %v20242_v57  ;;  %v1598_v34 = vcombine.high %v1576_v52, %v1576_v52  ;;  %v1599_v21 = vcombine.high %v1583_v3, %v1583_v3  ;;  %19581 = vmatmul.mubr.bf16.gmra.mxu0 %v19809_v37  ;;  %v19486_v35 = vpop.f32.mrf.mxu0 }
 0x159   : > { %v3875_v15 = vrot.slane %v1583_v3, %v20242_v57  ;;  %v7054_v48 = vrot.slane %v1576_v52, %v20242_v57  ;;  %v9261_v40 = vsel %vm5759_vm4, %v26973_v46, %v9259_v53  ;;  %v1600_v32 = vcombine.high %v1590_v20, %v1590_v20  ;;  %19584 = vmatprep.mubr.msk.bf16.mxu0 %vm20016_vm0, %v26971_v1 }
 0x15a   : > { %v1601_v49 = vcombine.high %v1597_v12, %v1597_v12  ;;  %v3847_v11 = vrot.slane %v1598_v34, %v20242_v57  ;;  %v3889_v63 = vrot.slane %v1597_v12, %v20242_v57  ;;  %v3903_v59 = vrot.slane %v1599_v21, %v20242_v57  ;;  %v20671_v35 = vpop.f32.mrf.mxu0 }
 0x15b   : > { %v3882_v50 = vrot.slane %v3875_v15, %v20242_v57  ;;  %v20662_v3 = vrot.slane %v7054_v48, %v20242_v57  ;;  %v9532_v52 = vrot.slane %v1590_v20, %v20242_v57  ;;  %v3861_v34 = vrot.slane %v1600_v32, %v20242_v57  ;;  %27231 = vst [vmem:[#allocation8_spill] sm:$0xff] %v20671_v35 }
 0x15c   : > { %v3854_v53 = vrot.slane %v3847_v11, %v20242_v57  ;;  %v3896_v12 = vrot.slane %v3889_v63, %v20242_v57  ;;  %v3917_v37 = vrot.slane %v1601_v49, %v20242_v57  ;;  %v3910_v21 = vrot.slane %v3903_v59, %v20242_v57  ;;  %v19487_v54 = vpop.f32.mrf.mxu0 }
 0x15d   : > { %v5625_v15 = vunpack.c.l.b16 %v3882_v50  ;;  %v18591_v20 = vpack.c.bf16 %v20571_v25, %v20571_v25  ;;  %v3868_v0 = vrot.slane %v3861_v34, %v20242_v57  ;;  %v9539_v4 = vrot.slane %v9532_v52, %v20242_v57 }
 0x15e   : > { %v3924_v11 = vrot.slane %v3917_v37, %v20242_v57  ;;  %v5623_v18 = vunpack.c.l.b16 %v3854_v53  ;;  %v5626_v32 = vunpack.c.l.b16 %v3896_v12  ;;  %v5627_v63 = vunpack.c.l.b16 %v3910_v21 }
 0x15f   : > { %v5786_v9 = vrot.slane %v5625_v15, 6  ;;  %v6050_v49 = vrot.slane %v5625_v15, 7  ;;  %v5624_v1 = vunpack.c.l.b16 %v3868_v0  ;;  %v27232_v25 = vunpack.c.l.b16 %v20662_v3 }
 0x160   : > { %v5628_v59 = vunpack.c.l.b16 %v3924_v11  ;;  %v5788_v50 = vrot.slane %v5626_v32, 5  ;;  %v6048_v46 = vrot.slane %v5623_v18, 1  ;;  %v5790_v48 = vrot.slane %v5627_v63, 4 }
 0x161   : > { %v6052_v36 = vrot.slane %v5626_v32, 6  ;;  %v6054_v44 = vrot.slane %v5627_v63, 5  ;;  %v9262_v34 = vrot.slane %v27232_v25, 4  ;;  %v5784_v35 = vrot.slane %v5624_v1, 7 }
 0x162   : > { %v5792_v37 = vrot.slane %v5628_v59, 3  ;;  %v6049_v53 = vsel %vm5750_vm1, %v5624_v1, %v6048_v46  ;;  %v6056_v54 = vrot.slane %v5628_v59, 4  ;;  %v6660_v21 = vsel %vm5750_vm1, %v6050_v49, %v5624_v1 }
 0x163   : > { %v6051_v12 = vsel %vm5753_vm2, %v6050_v49, %v6049_v53  ;;  %v20686_v0 = vsel %vm5762_vm5, %v9262_v34, %v9261_v40  ;;  %v9836_v52 = vunpack.c.l.b16 %v9539_v4  ;;  %v5785_v15 = vsel %vm5750_vm1, %v5784_v35, %v5623_v18  ;;  %v20704_v49 = vpop.f32.mrf.mxu0 }
 0x164   : > { %27233 = vst [vmem:[#allocation9_spill] sm:$0xff] %v20686_v0  ;;  %v6053_v11 = vsel %vm5756_vm3, %v6052_v36, %v6051_v12  ;;  %v6661_v32 = vsel %vm5753_vm2, %v6052_v36, %v6660_v21  ;;  %v27234_v63 = vrot.slane %v20623_v47, 5  ;;  %v5787_v59 = vsel %vm5753_vm2, %v5786_v9, %v5785_v15 }
 0x165   : > { %v6055_v25 = vsel %vm5759_vm4, %v6054_v44, %v6053_v11  ;;  %v6662_v1 = vsel %vm5756_vm3, %v6054_v44, %v6661_v32  ;;  %v5789_v4 = vsel %vm5756_vm3, %v5788_v50, %v5787_v59  ;;  %v9874_v35 = vrot.slane %v9836_v52, 3  ;;  %v19490_v52 = vpop.f32.mrf.mxu0 }
 0x166   : > { %v9872_v46 = vsel %vm5756_vm3, %v27234_v63, %v9871_v5  ;;  %v20700_v18 = vsel %vm5762_vm5, %v6056_v54, %v6055_v25  ;;  %v1609_v36 = vrot.slane %v20587_v41, %v20242_v57  ;;  %v19810_v5 = vld [vmem:[%s20115_s15 + $0x120] sm:$0xff]   ;;  %v5791_v9 = vsel %vm5759_vm4, %v5790_v48, %v5789_v4 }
 0x167   : > { %v9873_v40 = vsel %vm5759_vm4, %v9262_v34, %v9872_v46  ;;  %v1616_v53 = vrot.slane %v18591_v20, %v20242_v57  ;;  %v6663_v44 = vsel %vm5759_vm4, %v6056_v54, %v6662_v1  ;;  %v20711_v34 = vmax.f32 %v20599_v61, 0.0  ;;  %19585 = vmatmul.mubr.bf16.gmra.mxu0 %v19810_v5  ;;  %v20732_v59 = vpop.f32.mrf.mxu0 }
 0x168   : > { %v20714_v50 = vsel %vm5762_vm5, %v5792_v37, %v5791_v9  ;;  %v20717_v12 = vsel %vm5762_vm5, %v9874_v35, %v9873_v40  ;;  %v1617_v21 = vcombine.high %v1609_v36, %v1609_v36  ;;  %v1625_v41 = vrot.slane %v1609_v36, %v20242_v57  ;;  %27238 = vst [vmem:[#allocation11_spill] sm:$0xff] %v20732_v59 }
 0x169   : > { %27235 = vst [vmem:[#allocation10_spill] sm:$0xff] %v20717_v12  ;;  %v1618_v54 = vcombine.high %v1616_v53, %v1616_v53  ;;  %v1632_v61 = vrot.slane %v1616_v53, %v20242_v57  ;;  %v27236_v15 = vmov 0.0   ;;  %v27237_v63 = vmax.f32 %v20578_v24, 0.0  ;;  %v19491_v9 = vpop.f32.mrf.mxu0 }
 0x16a   : > { %19588 = vmatprep.mubr.msk.bf16.mxu0 %vm20016_vm0, %v27236_v15  ;;  %v1639_v37 = vrot.slane %v1617_v21, %v20242_v57  ;;  %v1647_v11 = vcombine.high %v1625_v41, %v1625_v41  ;;  %v6330_v32 = vrot.slane %v1625_v41, %v20242_v57 }
 0x16b   : > { %v1217_v46 = vpack.c.bf16 %v20711_v34, %v27237_v63  ;;  %v1646_v25 = vrot.slane %v1618_v54, %v20242_v57  ;;  %v1648_v1 = vcombine.high %v1632_v61, %v1632_v61  ;;  %v7110_v40 = vrot.slane %v1632_v61, %v20242_v57 }
 0x16c   : > { %v1649_v4 = vcombine.high %v1639_v37, %v1639_v37  ;;  %v6337_v35 = vrot.slane %v6330_v32, %v20242_v57  ;;  %v7068_v36 = vrot.slane %v1639_v37, %v20242_v57  ;;  %v7082_v5 = vrot.slane %v1647_v11, %v20242_v57 }
 0x16d   : > { %v1650_v53 = vcombine.high %v1646_v25, %v1646_v25  ;;  %v7117_v24 = vrot.slane %v7110_v40, %v20242_v57  ;;  %v7124_v21 = vrot.slane %v1646_v25, %v20242_v57  ;;  %v7138_v41 = vrot.slane %v1648_v1, %v20242_v57  ;;  %v20748_v25 = vpop.f32.mrf.mxu0  ;;  %v19811_v1 = vld [vmem:[%s20115_s15 + $0x128] sm:$0xff]  }
 0x16e   : > { %v6621_v52 = vunpack.c.l.b16 %v6337_v35  ;;  %v7075_v54 = vrot.slane %v7068_v36, %v20242_v57  ;;  %v7089_v61 = vrot.slane %v7082_v5, %v20242_v57  ;;  %v7096_v32 = vrot.slane %v1649_v4, %v20242_v57  ;;  %27239 = vst [vmem:[#allocation12_spill] sm:$0xff] %v20748_v25 }
 0x16f   : > { %v7131_v37 = vrot.slane %v7124_v21, %v20242_v57  ;;  %v7145_v11 = vrot.slane %v7138_v41, %v20242_v57  ;;  %v8847_v63 = vunpack.c.l.b16 %v7117_v24  ;;  %v1354_v35 = vcombine.high %v20257_v8, %v20257_v8  ;;  %19589 = vmatmul.mubr.bf16.gmra.mxu0 %v19811_v1 }
 0x170   : > { %v6664_v9 = vrot.slane %v6621_v52, 3  ;;  %v7103_v48 = vrot.slane %v7096_v32, %v20242_v57  ;;  %v8844_v40 = vunpack.c.l.b16 %v7075_v54  ;;  %v8845_v20 = vunpack.c.l.b16 %v7089_v61  ;;  %v19494_v32 = vpop.f32.mrf.mxu0  ;;  %19592 = vmatprep.mubr.msk.bf16.mxu0 %vm20016_vm0, %v27236_v15 }
 0x171   : > { %v8848_v36 = vunpack.c.l.b16 %v7131_v37  ;;  %v8849_v5 = vunpack.c.l.b16 %v7145_v11  ;;  %v9546_v4 = vrot.slane %v1650_v53, %v20242_v57  ;;  %v9004_v54 = vrot.slane %v8847_v63, 5 }
 0x172   : > { %v20755_v21 = vsel %vm5762_vm5, %v6664_v9, %v6663_v44  ;;  %v8846_v41 = vunpack.c.l.b16 %v7103_v48  ;;  %v9000_v24 = vrot.slane %v8845_v20, 7  ;;  %v9264_v52 = vrot.slane %v8844_v40, 1  ;;  %v20761_v44 = vpop.f32.mrf.mxu0 }
 0x173   : > { %v9006_v61 = vrot.slane %v8848_v36, 4  ;;  %v9008_v0 = vrot.slane %v8849_v5, 3  ;;  %v9268_v12 = vrot.slane %v8847_v63, 6  ;;  %27240 = vst [vmem:[#allocation13_spill] sm:$0xff] %v20761_v44  ;;  %v9270_v48 = vrot.slane %v8848_v36, 5 }
 0x174   : > { %v9001_v8 = vsel %vm5750_vm1, %v9000_v24, %v8844_v40  ;;  %v9002_v37 = vrot.slane %v8846_v41, 6  ;;  %v9265_v53 = vsel %vm5750_vm1, %v8845_v20, %v9264_v52  ;;  %v9266_v11 = vrot.slane %v8846_v41, 7  ;;  %v19495_v24 = vpop.f32.mrf.mxu0 }
 0x175   : > { %v9272_v9 = vrot.slane %v8849_v5, 4  ;;  %v9553_v1 = vrot.slane %v9546_v4, %v20242_v57  ;;  %v18592_v32 = vpack.c.bf16 %v20711_v34, %v20711_v34  ;;  %v1658_v40 = vrot.slane %v1217_v46, %v20242_v57 }
 0x176   : > { %v9003_v63 = vsel %vm5753_vm2, %v9002_v37, %v9001_v8  ;;  %v9267_v25 = vsel %vm5753_vm2, %v9266_v11, %v9265_v53  ;;  %v9876_v59 = vsel %vm5750_vm1, %v9266_v11, %v8845_v20  ;;  %v6288_v4 = vrot.slane %v1354_v35, %v20242_v57 }
 0x177   : > { %v9005_v41 = vsel %vm5756_vm3, %v9004_v54, %v9003_v63  ;;  %v9269_v52 = vsel %vm5756_vm3, %v9268_v12, %v9267_v25  ;;  %v9837_v36 = vunpack.c.l.b16 %v9553_v1  ;;  %v9877_v5 = vsel %vm5753_vm2, %v9268_v12, %v9876_v59 }
 0x178   : > { %v9007_v34 = vsel %vm5759_vm4, %v9006_v61, %v9005_v41  ;;  %v9271_v8 = vsel %vm5759_vm4, %v9270_v48, %v9269_v52  ;;  %v9878_v37 = vsel %vm5756_vm3, %v9270_v48, %v9877_v5  ;;  %v1665_v59 = vrot.slane %v18592_v32, %v20242_v57 }
 0x179   : > { %v20778_v20 = vsel %vm5762_vm5, %v9008_v0, %v9007_v34  ;;  %v20781_v46 = vsel %vm5762_vm5, %v9272_v9, %v9271_v8  ;;  %v9879_v54 = vsel %vm5759_vm4, %v9272_v9, %v9878_v37  ;;  %v9880_v25 = vrot.slane %v9837_v36, 3 }
 0x17a   : > { %27241 = vst [vmem:[#allocation14_spill] sm:$0xff] %v20778_v20  ;;  %27242 = vst [vmem:[#allocation15_spill] sm:$0xff] %v20781_v46  ;;  %v1666_v61 = vcombine.high %v1658_v40, %v1658_v40  ;;  %v1674_v53 = vrot.slane %v1658_v40, %v20242_v57  ;;  %v6295_v0 = vrot.slane %v6288_v4, %v20242_v57 }
 0x17b   : > { %v20788_v35 = vsel %vm5762_vm5, %v9880_v25, %v9879_v54  ;;  %v1667_v48 = vcombine.high %v1665_v59, %v1665_v59  ;;  %v1681_v9 = vrot.slane %v1665_v59, %v20242_v57  ;;  %v786_v52 = vadd.f32 %v20486_v42, %v20231_v43 }
 0x17c   : > { %27243 = vst [vmem:[#allocation16_spill] sm:$0xff] %v20788_v35  ;;  %v1688_v1 = vrot.slane %v1666_v61, %v20242_v57  ;;  %v1696_v63 = vcombine.high %v1674_v53, %v1674_v53  ;;  %v3931_v24 = vrot.slane %v1674_v53, %v20242_v57  ;;  %v20806_v8 = vunpack.c.l.b16 %v6295_v0 }
 0x17d   : > { %v20798_v32 = vrot.slane %v1667_v48, %v20242_v57  ;;  %v1697_v41 = vcombine.high %v1681_v9, %v1681_v9  ;;  %v3987_v40 = vrot.slane %v1681_v9, %v20242_v57  ;;  %v20815_v48 = vpop.f32.mrf.mxu0  ;;  %v19812_v9 = vld [vmem:[%s20115_s15 + $0x130] sm:$0xff]   ;;  %v789_v46 = vadd.f32 %v20496_v56, %v20231_v43 }
 0x17e   : > { %v1698_v36 = vcombine.high %v1688_v1, %v1688_v1  ;;  %v3938_v5 = vrot.slane %v3931_v24, %v20242_v57  ;;  %v3945_v4 = vrot.slane %v1688_v1, %v20242_v57  ;;  %v3959_v34 = vrot.slane %v1696_v63, %v20242_v57  ;;  %27244 = vst [vmem:[#allocation17_spill] sm:$0xff] %v20815_v48 }
 0x17f   : > { %v3994_v37 = vrot.slane %v3987_v40, %v20242_v57  ;;  %v4001_v54 = vrot.slane %v20798_v32, %v20242_v57  ;;  %v6344_v25 = vrot.slane %v1697_v41, %v20242_v57  ;;  %v1128_v24 = vmax.f32 %v786_v52, 0.0  ;;  %19593 = vmatmul.mubr.bf16.gmra.mxu0 %v19812_v9 }
 0x180   : > { %v3952_v59 = vrot.slane %v3945_v4, %v20242_v57  ;;  %v3966_v42 = vrot.slane %v3959_v34, %v20242_v57  ;;  %v3973_v61 = vrot.slane %v1698_v36, %v20242_v57  ;;  %v5629_v53 = vunpack.c.l.b16 %v3938_v5  ;;  %v19498_v4 = vpop.f32.mrf.mxu0  ;;  %19596 = vmatprep.mubr.msk.bf16.mxu0 %vm20016_vm0, %v27236_v15 }
 0x181   : > { %v4008_v0 = vrot.slane %v4001_v54, %v20242_v57  ;;  %v5633_v1 = vunpack.c.l.b16 %v3994_v37  ;;  %v6351_v63 = vrot.slane %v6344_v25, %v20242_v57  ;;  %v1699_v36 = vcombine.high %v20798_v32, %v20798_v32 }
 0x182   : > { %v3980_v40 = vrot.slane %v3973_v61, %v20242_v57  ;;  %v5630_v11 = vunpack.c.l.b16 %v3952_v59  ;;  %v5631_v41 = vunpack.c.l.b16 %v3966_v42  ;;  %v6058_v12 = vrot.slane %v5629_v53, 1  ;;  %v20828_v59 = vpop.f32.mrf.mxu0 }
 0x183   : > { %v5634_v5 = vunpack.c.l.b16 %v4008_v0  ;;  %v6622_v34 = vunpack.c.l.b16 %v6351_v63  ;;  %27245 = vst [vmem:[#allocation18_spill] sm:$0xff] %v20828_v59  ;;  %v5800_v42 = vrot.slane %v5633_v1, 4  ;;  %v6064_v4 = vrot.slane %v5633_v1, 5 }
 0x184   : > { %v5632_v37 = vunpack.c.l.b16 %v3980_v40  ;;  %v5794_v52 = vrot.slane %v5630_v11, 7  ;;  %v5796_v54 = vrot.slane %v5631_v41, 6  ;;  %v6059_v25 = vsel %vm5750_vm1, %v5630_v11, %v6058_v12  ;;  %v19499_v56 = vpop.f32.mrf.mxu0 }
 0x185   : > { %v5802_v61 = vrot.slane %v5634_v5, 3  ;;  %v6060_v9 = vrot.slane %v5631_v41, 7  ;;  %v6066_v35 = vrot.slane %v5634_v5, 4  ;;  %v1129_v12 = vmax.f32 %v789_v46, 0.0 }
 0x186   : > { %v5795_v32 = vsel %vm5750_vm1, %v5794_v52, %v5629_v53  ;;  %v5798_v0 = vrot.slane %v5632_v37, 5  ;;  %v6062_v63 = vrot.slane %v5632_v37, 6  ;;  %v6670_v41 = vrot.slane %v6622_v34, 3 }
 0x187   : > { %v5797_v20 = vsel %vm5753_vm2, %v5796_v54, %v5795_v32  ;;  %v6061_v40 = vsel %vm5753_vm2, %v6060_v9, %v6059_v25  ;;  %v6666_v48 = vsel %vm5750_vm1, %v6060_v9, %v5630_v11  ;;  %v1218_v52 = vpack.c.bf16 %v1129_v12, %v1128_v24 }
 0x188   : > { %v5799_v59 = vsel %vm5756_vm3, %v5798_v0, %v5797_v20  ;;  %v6063_v44 = vsel %vm5756_vm3, %v6062_v63, %v6061_v40  ;;  %v6667_v1 = vsel %vm5753_vm2, %v6062_v63, %v6666_v48  ;;  %v1549_v54 = vcombine.high %v20581_v10, %v20581_v10  ;;  %v19813_v48 = vld [vmem:[%s20115_s15 + $0x138] sm:$0xff]  }
 0x189   : > { %v5801_v53 = vsel %vm5759_vm4, %v5800_v42, %v5799_v59  ;;  %v6065_v5 = vsel %vm5759_vm4, %v6064_v4, %v6063_v44  ;;  %v6668_v37 = vsel %vm5756_vm3, %v6064_v4, %v6667_v1  ;;  %v18593_v25 = vpack.c.bf16 %v1129_v12, %v1129_v12  ;;  %v20857_v59 = vpop.f32.mrf.mxu0  ;;  %19597 = vmatmul.mubr.bf16.gmra.mxu0 %v19813_v48 }
 0x18a   : > { %v20843_v11 = vsel %vm5762_vm5, %v5802_v61, %v5801_v53  ;;  %v20846_v20 = vsel %vm5762_vm5, %v6066_v35, %v6065_v5  ;;  %v6669_v46 = vsel %vm5759_vm4, %v6066_v35, %v6668_v37  ;;  %v1707_v24 = vrot.slane %v1218_v52, %v20242_v57  ;;  %19600 = vmatprep.mubr.msk.bf16.mxu0 %vm20016_vm0, %v27236_v15 }
 0x18b   : > { %v20851_v34 = vsel %vm5762_vm5, %v6670_v41, %v6669_v46  ;;  %v6646_v10 = vrot.slane %v20806_v8, 3  ;;  %v7152_v42 = vrot.slane %v1699_v36, %v20242_v57  ;;  %v1714_v61 = vrot.slane %v18593_v25, %v20242_v57  ;;  %v19502_v32 = vpop.f32.mrf.mxu0 }
 0x18c   : > { %27246 = vst [vmem:[#allocation19_spill] sm:$0xff] %v20851_v34  ;;  %v1715_v35 = vcombine.high %v1707_v24, %v1707_v24  ;;  %v1723_v9 = vrot.slane %v1707_v24, %v20242_v57  ;;  %v6316_v8 = vrot.slane %v1549_v54, %v20242_v57  ;;  %v6657_v40 = vsel %vm5759_vm4, %v20616_v17, %v20621_v14 }
 0x18d   : > { %v20866_v4 = vsel %vm5762_vm5, %v6646_v10, %v20326_v31  ;;  %v1730_v0 = vrot.slane %v1714_v61, %v20242_v57  ;;  %v20875_v12 = vpop.f32.mrf.mxu0  ;;  %v7159_v1 = vrot.slane %v7152_v42, %v20242_v57  ;;  %v797_v52 = vadd.f32 %v20522_v29, %v20231_v43 }
 0x18e   : > { %v1737_v63 = vrot.slane %v1715_v35, %v20242_v57  ;;  %v1745_v36 = vcombine.high %v1723_v9, %v1723_v9  ;;  %v7166_v56 = vrot.slane %v1723_v9, %v20242_v57  ;;  %v6323_v46 = vrot.slane %v6316_v8, %v20242_v57 }
 0x18f   : > { %v7222_v37 = vrot.slane %v1730_v0, %v20242_v57  ;;  %v19503_v54 = vpop.f32.mrf.mxu0  ;;  %v8850_v10 = vunpack.c.l.b16 %v7159_v1  ;;  %v1716_v42 = vcombine.high %v1714_v61, %v1714_v61 }
 0x190   : > { %v1747_v31 = vcombine.high %v1737_v63, %v1737_v63  ;;  %v7180_v41 = vrot.slane %v1737_v63, %v20242_v57  ;;  %v7173_v53 = vrot.slane %v7166_v56, %v20242_v57  ;;  %v7194_v5 = vrot.slane %v1745_v36, %v20242_v57 }
 0x191   : > { %v20889_v25 = vrot.slane %v7222_v37, %v20242_v57  ;;  %v1131_v63 = vmax.f32 %v797_v52, 0.0  ;;  %v6620_v36 = vunpack.c.l.b16 %v6323_v46  ;;  %v20903_v61 = vrot.slane %v1716_v42, %v20242_v57 }
 0x192   : > { %v7187_v17 = vrot.slane %v7180_v41, %v20242_v57  ;;  %v7208_v14 = vrot.slane %v1747_v31, %v20242_v57  ;;  %v7201_v48 = vrot.slane %v7194_v5, %v20242_v57  ;;  %v20891_v24 = vunpack.c.l.b16 %v7173_v53 }
 0x193   : > { %v26981_v32 = vunpack.c.l.b16 %v20889_v25  ;;  %v18594_v54 = vpack.c.bf16 %v1131_v63, %v1131_v63  ;;  %v6658_v46 = vrot.slane %v6620_v36, 3  ;;  %v8976_v42 = vrot.slane %v20373_v16, 4 }
 0x194   : > { %v7215_v35 = vrot.slane %v7208_v14, %v20242_v57  ;;  %v8852_v9 = vunpack.c.l.b16 %v7187_v17  ;;  %v20894_v29 = vunpack.c.l.b16 %v7201_v48  ;;  %v9010_v8 = vrot.slane %v20891_v24, 7 }
 0x195   : > { %v9018_v52 = vrot.slane %v26981_v32, 3  ;;  %v1746_v17 = vcombine.high %v1730_v0, %v1730_v0  ;;  %v20924_v36 = vsel %vm5762_vm5, %v6658_v46, %v6657_v40  ;;  %v6789_v46 = vpack.c.b16 %v20755_v21, %v20755_v21 }
 0x196   : > { %v20898_v56 = vunpack.c.l.b16 %v7215_v35  ;;  %v9012_v31 = vrot.slane %v8852_v9, 6  ;;  %v9011_v41 = vsel %vm5750_vm1, %v9010_v8, %v8850_v10  ;;  %v9014_v53 = vrot.slane %v20894_v29, 5  ;;  %27247 = vst [vmem:[#allocation20_spill] sm:$0xff] %v20924_v36 }
 0x197   : > { %v1748_v35 = vcombine.high %v20903_v61, %v20903_v61  ;;  %v4015_v0 = vrot.slane %v1746_v17, %v20242_v57  ;;  %v8988_v32 = vrot.slane %v20526_v38, 3  ;;  %v9274_v34 = vrot.slane %v8850_v10, 1 }
 0x198   : > { %v9013_v1 = vsel %vm5753_vm2, %v9012_v31, %v9011_v41  ;;  %v9016_v5 = vrot.slane %v20898_v56, 4  ;;  %v6787_v31 = vpack.c.b16 %v20484_v39, %v20484_v39  ;;  %v1763_v41 = vrot.slane %v18594_v54, %v20242_v57 }
 0x199   : > { %v9015_v37 = vsel %vm5756_vm3, %v9014_v53, %v9013_v1  ;;  %v4029_v16 = vrot.slane %v1748_v35, %v20242_v57  ;;  %v4022_v40 = vrot.slane %v4015_v0, %v20242_v57  ;;  %v27250_v0 = vunpack.c.l.b16 %v20513_v33 }
 0x19a   : > { %v9017_v14 = vsel %vm5759_vm4, %v9016_v5, %v9015_v37  ;;  %v1765_v53 = vcombine.high %v1763_v41, %v1763_v41  ;;  %v20927_v1 = vrot.slane %v1763_v41, %v20242_v57  ;;  %v8977_v5 = vsel %vm5759_vm4, %v8976_v42, %v20384_v27 }
 0x19b   : > { %v20912_v48 = vsel %vm5762_vm5, %v9018_v52, %v9017_v14  ;;  %v20933_v37 = vrot.slane %v6787_v31, %v20242_v57  ;;  %v4036_v35 = vrot.slane %v4029_v16, %v20242_v57  ;;  %v794_v27 = vadd.f32 %v20508_v28, %v20231_v43 }
 0x19c   : > { %v1793_v52 = vrot.slane %v1765_v53, %v20242_v57  ;;  %v1795_v54 = vcombine.high %v20927_v1, %v20927_v1  ;;  %v27249_v42 = vunpack.c.l.b16 %v20362_v62  ;;  %v8986_v8 = vrot.slane %v27250_v0, 4 }
 0x19d   : > { %27248 = vst [vmem:[#allocation21_spill] sm:$0xff] %v20933_v37  ;;  %v5635_v44 = vunpack.c.l.b16 %v4022_v40  ;;  %v20954_v16 = vrot.slane %v6789_v46, %v20242_v57  ;;  %v20961_v41 = vunpack.c.l.b16 %v4036_v35  ;;  %v20965_v33 = vadd.f32 %v20541_v26, %v20231_v43 }
 0x19e   : > { %v1797_v17 = vcombine.high %v1793_v52, %v1793_v52  ;;  %v7236_v14 = vrot.slane %v1793_v52, %v20242_v57  ;;  %v8978_v31 = vrot.slane %v27249_v42, 3  ;;  %v7250_v53 = vrot.slane %v1795_v54, %v20242_v57 }
 0x19f   : > { %v9276_v52 = vrot.slane %v8852_v9, 7  ;;  %27251 = vst [vmem:[#allocation22_spill] sm:$0xff] %v20954_v16  ;;  %v8996_v42 = vrot.slane %v20623_v47, 4  ;;  %v1130_v54 = vmax.f32 %v794_v27, 0.0  ;;  %v27252_v38 = vunpack.c.l.b16 %v20662_v3 }
 0x1a0   : > { %v20957_v28 = vrot.slane %v7236_v14, %v20242_v57  ;;  %v7264_v62 = vrot.slane %v1797_v17, %v20242_v57  ;;  %v9275_v10 = vsel %vm5750_vm1, %v20891_v24, %v9274_v34  ;;  %v9278_v40 = vrot.slane %v20894_v29, 6 }
 0x1a1   : > { %v8998_v9 = vrot.slane %v27252_v38, 3  ;;  %v7257_v46 = vrot.slane %v7250_v53, %v20242_v57  ;;  %v6068_v17 = vrot.slane %v5635_v44, 1  ;;  %v9277_v47 = vsel %vm5753_vm2, %v9276_v52, %v9275_v10 }
 0x1a2   : > { %v1219_v14 = vpack.c.bf16 %v1131_v63, %v1130_v54  ;;  %v7271_v35 = vrot.slane %v7264_v62, %v20242_v57  ;;  %v27253_v26 = vpack.c.b16 %v20700_v18, %v20714_v50  ;;  %v9560_v34 = vrot.slane %v20903_v61, %v20242_v57 }
 0x1a3   : > { %v26984_v29 = vunpack.c.l.b16 %v20957_v28  ;;  %v27255_v63 = vpack.c.b16 %v20846_v20, %v20843_v11  ;;  %v5804_v0 = vrot.slane %v20961_v41, 7  ;;  %v9280_v18 = vrot.slane %v20898_v56, 5 }
 0x1a4   : > { %v20979_v27 = vrot.slane %v27253_v26, %v20242_v57  ;;  %v1132_v50 = vmax.f32 %v20965_v33, 0.0  ;;  %v9279_v62 = vsel %vm5756_vm3, %v9278_v40, %v9277_v47  ;;  %v20996_v54 = vunpack.c.l.b16 %v7257_v46 }
 0x1a5   : > { %v20990_v53 = vrot.slane %v27255_v63, %v20242_v57  ;;  %v20998_v38 = vunpack.c.l.b16 %v7271_v35  ;;  %v9284_v61 = vrot.slane %v26984_v29, 1  ;;  %v21004_v11 = vsel %vm5750_vm1, %v20961_v41, %v6068_v17 }
 0x1a6   : > { %27254 = vst [vmem:[#allocation23_spill] sm:$0xff] %v20979_v27  ;;  %v27257_v20 = vunpack.c.l.b16 %v20889_v25  ;;  %v1756_v56 = vrot.slane %v1219_v14, %v20242_v57  ;;  %v8979_v26 = vsel %vm5762_vm5, %v8978_v31, %v8977_v5  ;;  %v9567_v47 = vrot.slane %v9560_v34, %v20242_v57 }
 0x1a7   : > { %27256 = vst [vmem:[#allocation24_spill] sm:$0xff] %v20990_v53  ;;  %v9882_v46 = vsel %vm5750_vm1, %v9276_v52, %v20891_v24  ;;  %v21015_v35 = vsel %vm5750_vm1, %v20996_v54, %v9284_v61  ;;  %v9286_v63 = vrot.slane %v20998_v38, 7  ;;  %v21019_v17 = vsel %vm5750_vm1, %v5804_v0, %v5635_v44  ;;  %v21065_v0 = vpop.f32.mrf.mxu0 }
 0x1a8   : > { %v9282_v10 = vrot.slane %v27257_v20, 4  ;;  %v9281_v25 = vsel %vm5759_vm4, %v9280_v18, %v9279_v62  ;;  %v8987_v14 = vsel %vm5759_vm4, %v8986_v8, %v20529_v60  ;;  %v8997_v5 = vsel %vm5759_vm4, %v8996_v42, %v20641_v55 }
 0x1a9   : > { %v21030_v24 = vsel %vm5750_vm1, %v9286_v63, %v20996_v54  ;;  %v8989_v31 = vsel %vm5762_vm5, %v8988_v32, %v8987_v14  ;;  %v8999_v52 = vsel %vm5762_vm5, %v8998_v9, %v8997_v5  ;;  %v18632_v44 = vpack.c.b16 %v20315_v23, %v20312_v22 }
 0x1aa   : > { %v9883_v34 = vsel %vm5753_vm2, %v9278_v40, %v9882_v46  ;;  %v18633_v60 = vpack.c.b16 %v8979_v26, %v20866_v4  ;;  %v18635_v55 = vpack.c.b16 %v20472_v19, %v20469_v2  ;;  %v18636_v8 = vpack.c.b16 %v8989_v31, %v20484_v39 }
 0x1ab   : > { %v10572_v42 = vrot.slane %v18632_v44, %v20242_v57  ;;  %v27258_v32 = vpack.c.b16 %v20428_v7, %v20404_v51  ;;  %v18637_v22 = vpack.c.b16 %v20574_v58, %v20555_v45  ;;  %v27260_v23 = vpack.c.b16 %v20630_v6, %v20626_v30  ;;  %v19814_v30 = vld [vmem:[%s20115_s15 + $0x140] sm:$0xff]  }
 0x1ac   : > { %v10579_v2 = vrot.slane %v18633_v60, %v20242_v57  ;;  %v21056_v19 = vrot.slane %v18635_v55, %v20242_v57  ;;  %v10661_v39 = vrot.slane %v18636_v8, %v20242_v57  ;;  %v18639_v40 = vpack.c.b16 %v8999_v52, %v20924_v36  ;;  %19601 = vmatmul.mubr.bf16.gmra.mxu0 %v19814_v30 }
 0x1ad   : > { %v21046_v9 = vrot.slane %v27258_v32, %v20242_v57  ;;  %v10675_v4 = vrot.slane %v27260_v23, %v20242_v57  ;;  %v21061_v51 = vsel %vm5762_vm5, %v9282_v10, %v9281_v25  ;;  %v9838_v7 = vunpack.c.l.b16 %v9567_v47  ;;  %v19506_v47 = vpop.f32.mrf.mxu0  ;;  %19604 = vmatprep.mubr.msk.bf16.mxu0 %vm20016_vm0, %v27236_v15 }
 0x1ae   : > { %27261 = vst [vmem:[#allocation26_spill] sm:$0xff] %v21056_v19  ;;  %v9884_v45 = vsel %vm5756_vm3, %v9280_v18, %v9883_v34  ;;  %v10668_v58 = vrot.slane %v18637_v22, %v20242_v57  ;;  %v10594_v6 = vcombine.low %v10572_v42, %v10579_v2  ;;  %v10595_v62 = vcombine.high %v10572_v42, %v10579_v2 }
 0x1af   : > { %27259 = vst [vmem:[#allocation25_spill] sm:$0xff] %v21046_v9  ;;  %v10596_v61 = vcombine.low %v21046_v9, %v21056_v19  ;;  %v10676_v20 = vcombine.low %v21056_v19, %v10661_v39  ;;  %v1764_v26 = vcombine.high %v1756_v56, %v1756_v56  ;;  %v10677_v46 = vcombine.high %v21056_v19, %v10661_v39  ;;  %v21092_v8 = vpop.f32.mrf.mxu0 }
 0x1b0   : > { %v10678_v25 = vcombine.low %v10668_v58, %v10675_v4  ;;  %v10679_v14 = vcombine.high %v10668_v58, %v10675_v4  ;;  %v10604_v18 = vrot.slane %v10594_v6, %v20242_v57  ;;  %v10611_v5 = vrot.slane %v10595_v62, %v20242_v57 }
 0x1b1   : > { %v21075_v31 = vrot.slane %v10596_v61, %v20242_v57  ;;  %v21078_v52 = vrot.slane %v10676_v20, %v20242_v57  ;;  %v1772_v44 = vrot.slane %v1756_v56, %v20242_v57  ;;  %v21084_v34 = vrot.slane %v10677_v46, %v20242_v57  ;;  %v19507_v30 = vpop.f32.mrf.mxu0 }
 0x1b2   : > { %v21087_v60 = vrot.slane %v10678_v25, %v20242_v57  ;;  %v21090_v55 = vrot.slane %v10679_v14, %v20242_v57  ;;  %v9885_v42 = vsel %vm5759_vm4, %v9282_v10, %v9884_v45  ;;  %v10743_v22 = vrot.slane %v18639_v40, %v20242_v57 }
 0x1b3   : > { %27262 = vst [vmem:[#allocation27_spill] sm:$0xff] %v21075_v31  ;;  %27263 = vst [vmem:[#allocation28_spill] sm:$0xff] %v21078_v52  ;;  %v10627_v32 = vcombine.high %v10604_v18, %v21075_v31  ;;  %v18708_v23 = vcombine.low %v10604_v18, %v10611_v5  ;;  %v9886_v2 = vrot.slane %v9838_v7, 3  ;;  %v805_v58 = vadd.f32 %v20609_v13, %v20231_v43  ;;  %v21135_v33 = vpop.f32.mrf.mxu0 }
 0x1b4   : > { %27264 = vst [vmem:[#allocation29_spill] sm:$0xff] %v21084_v34  ;;  %27265 = vst [vmem:[#allocation30_spill] sm:$0xff] %v21087_v60  ;;  %v10709_v56 = vcombine.high %v21078_v52, %v21087_v60  ;;  %v21104_v6 = vrot.slane %v1764_v26, %v20242_v57  ;;  %v10758_v10 = vcombine.low %v10675_v4, %v10743_v22 }
 0x1b5   : > { %27266 = vst [vmem:[#allocation31_spill] sm:$0xff] %v21090_v55  ;;  %v10759_v45 = vcombine.high %v10675_v4, %v10743_v22  ;;  %v18710_v62 = vcombine.low %v10627_v32, %v21078_v52  ;;  %v4043_v40 = vrot.slane %v1772_v44, %v20242_v57  ;;  %v12724_v61 = vrot.slane %v18708_v23, %v20242_v57 }
 0x1b6   : > { %v18712_v7 = vcombine.low %v21084_v34, %v10709_v56  ;;  %v1133_v20 = vmax.f32 %v805_v58, 0.0  ;;  %v21111_v46 = vrot.slane %v10758_v10, %v20242_v57  ;;  %v21119_v4 = vsel %vm5753_vm2, %v9286_v63, %v21015_v35 }
 0x1b7   : > { %v10775_v13 = vrot.slane %v10759_v45, %v20242_v57  ;;  %v12738_v26 = vrot.slane %v18710_v62, %v20242_v57  ;;  %v1794_v25 = vcombine.high %v1772_v44, %v1772_v44  ;;  %v21126_v5 = vsel %vm5762_vm5, %v9886_v2, %v9885_v42 }
 0x1b8   : > { %v1220_v47 = vpack.c.bf16 %v1133_v20, %v1132_v50  ;;  %v18595_v18 = vpack.c.bf16 %v1133_v20, %v1133_v20  ;;  %v1796_v56 = vcombine.high %v21104_v6, %v21104_v6  ;;  %v6358_v35 = vrot.slane %v20927_v1, %v20242_v57  ;;  %v19815_v50 = vld [vmem:[%s20115_s15 + $0x148] sm:$0xff]  }
 0x1b9   : > { %v18714_v32 = vcombine.low %v21111_v46, %v10775_v13  ;;  %v12775_v22 = vcombine.high %v12724_v61, %v12738_v26  ;;  %v12774_v23 = vcombine.low %v12724_v61, %v12738_v26  ;;  %v21139_v42 = vrot.slane %v4043_v40, %v20242_v57  ;;  %19605 = vmatmul.mubr.bf16.gmra.mxu0 %v19815_v50  ;;  %v19510_v61 = vpop.f32.mrf.mxu0 }
 0x1ba   : > { %v1805_v63 = vrot.slane %v1220_v47, %v20242_v57  ;;  %v1812_v44 = vrot.slane %v18595_v18, %v20242_v57  ;;  %v4057_v2 = vrot.slane %v21104_v6, %v20242_v57  ;;  %v12752_v58 = vrot.slane %v18712_v7, %v20242_v57  ;;  %19608 = vmatprep.mubr.msk.bf16.mxu0 %vm20016_vm0, %v27236_v15 }
 0x1bb   : > { %v12766_v30 = vrot.slane %v18714_v32, %v20242_v57  ;;  %v21150_v20 = vrot.slane %v1794_v25, %v20242_v57  ;;  %v21153_v13 = vrot.slane %v12775_v22, %v20242_v57  ;;  %v21158_v7 = vrot.slane %v12774_v23, %v20242_v57  ;;  %v21162_v32 = vpop.f32.mrf.mxu0 }
 0x1bc   : > { %v1813_v10 = vcombine.high %v1805_v63, %v1805_v63  ;;  %v1814_v45 = vcombine.high %v1812_v44, %v1812_v44  ;;  %v1821_v1 = vrot.slane %v1805_v63, %v20242_v57  ;;  %v21147_v62 = vrot.slane %v1812_v44, %v20242_v57 }
 0x1bd   : > { %v12779_v40 = vcombine.high %v12752_v58, %v12766_v30  ;;  %27267 = vst [vmem:[#allocation32_spill] sm:$0xff] %v21153_v13  ;;  %v12778_v6 = vcombine.low %v12752_v58, %v12766_v30  ;;  %27268 = vst [vmem:[#allocation33_spill] sm:$0xff] %v21158_v7 }
 0x1be   : > { %v1835_v26 = vrot.slane %v1813_v10, %v20242_v57  ;;  %v1842_v47 = vrot.slane %v1814_v45, %v20242_v57  ;;  %v1843_v18 = vcombine.high %v1821_v1, %v1821_v1  ;;  %v1844_v63 = vcombine.high %v21147_v62, %v21147_v62  ;;  %v19511_v10 = vpop.f32.mrf.mxu0 }
 0x1bf   : > { %v21165_v25 = vrot.slane %v12779_v40, %v20242_v57  ;;  %v21168_v22 = vrot.slane %v12778_v6, %v20242_v57  ;;  %v7278_v44 = vrot.slane %v1821_v1, %v20242_v57  ;;  %v21185_v1 = vrot.slane %v6358_v35, %v20242_v57 }
 0x1c0   : > { %v1845_v23 = vcombine.high %v1835_v26, %v1835_v26  ;;  %v1846_v50 = vcombine.high %v1842_v47, %v1842_v47  ;;  %v7292_v58 = vrot.slane %v1835_v26, %v20242_v57  ;;  %v7306_v30 = vrot.slane %v1843_v18, %v20242_v57 }
 0x1c1   : > { %27269 = vst [vmem:[#allocation34_spill] sm:$0xff] %v21165_v25  ;;  %27270 = vst [vmem:[#allocation35_spill] sm:$0xff] %v21168_v22  ;;  %v12842_v45 = vcombine.low %v21153_v13, %v21165_v25  ;;  %v12838_v61 = vcombine.low %v21158_v7, %v21168_v22  ;;  %v21182_v6 = vrot.slane %v7278_v44, %v20242_v57  ;;  %v27271_v44 = vld [vmem:[#allocation8_spill] sm:$0xff] }
 0x1c2   : > { %v21188_v26 = vrot.slane %v7292_v58, %v20242_v57  ;;  %v7313_v18 = vrot.slane %v7306_v30, %v20242_v57  ;;  %v9574_v10 = vrot.slane %v1845_v23, %v20242_v57  ;;  %v10046_v3 = vrot.slane %v1842_v47, %v20242_v57 }
 0x1c3   : > { %14920 = vmatprep.mubr.bf16.mxu1 %v12842_v45  ;;  %v26986_v39 = vunpack.c.l.b16 %v21182_v6  ;;  %v10060_v40 = vrot.slane %v1844_v63, %v20242_v57  ;;  %v813_v14 = vadd.f32 %v27271_v44, %v20231_v43  ;;  %v10074_v30 = vrot.slane %v1846_v50, %v20242_v57  ;;  %v27272_v63 = vld [vmem:[#allocation7_spill] sm:$0xff] }
 0x1c4   : > { %14921 = vmatmul.mubr.bf16.vlgmr.msra.gmra.mxu1 %v12838_v61  ;;  %v26988_v35 = vunpack.c.l.b16 %v21188_v26  ;;  %v21198_v29 = vunpack.c.l.b16 %v7313_v18  ;;  %v9581_v58 = vrot.slane %v9574_v10, %v20242_v57  ;;  %v4064_v23 = vrot.slane %v4057_v2, %v20242_v57 }
 0x1c5   : > { %v4085_v45 = vrot.slane %v1796_v56, %v20242_v57  ;;  %v9288_v47 = vrot.slane %v26986_v39, 6  ;;  %v810_v22 = vadd.f32 %v27272_v63, %v20231_v43  ;;  %v5637_v61 = vunpack.c.l.b16 %v21139_v42 }
 0x1c6   : > { %v9290_v18 = vrot.slane %v26988_v35, 5  ;;  %v9292_v44 = vrot.slane %v21198_v29, 4  ;;  %v10067_v10 = vrot.slane %v10060_v40, %v20242_v57  ;;  %v9839_v50 = vunpack.c.l.b16 %v9581_v58 }
 0x1c7   : > { %v9289_v2 = vsel %vm5756_vm3, %v9288_v47, %v21119_v4  ;;  %v9889_v56 = vsel %vm5753_vm2, %v9288_v47, %v21030_v24  ;;  %v1135_v39 = vmax.f32 %v813_v14, 0.0  ;;  %v10053_v42 = vrot.slane %v10046_v3, %v20242_v57 }
 0x1c8   : > { %v9291_v7 = vsel %vm5759_vm4, %v9290_v18, %v9289_v2  ;;  %v9890_v63 = vsel %vm5756_vm3, %v9290_v18, %v9889_v56  ;;  %v10081_v35 = vrot.slane %v10074_v30, %v20242_v57  ;;  %v9892_v34 = vrot.slane %v9839_v50, 3  ;;  %v27275_v18 = vld [vmem:[#allocation11_spill] sm:$0xff]  ;;  %v21247_v50 = vpop.f32.mrf.mxu0 }
 0x1c9   : > { %v21222_v55 = vsel %vm5762_vm5, %v9292_v44, %v9291_v7  ;;  %v9891_v40 = vsel %vm5759_vm4, %v9292_v44, %v9890_v63  ;;  %v1134_v4 = vmax.f32 %v810_v22, 0.0  ;;  %v4078_v58 = vrot.slane %v21150_v20, %v20242_v57 }
 0x1ca   : > { %27273 = vst [vmem:[#allocation8_spill] sm:$0xff] %v21222_v55  ;;  %v6623_v24 = vunpack.c.l.b16 %v21185_v1  ;;  %v21228_v14 = vunpack.c.l.b16 %v10067_v10  ;;  %v21230_v47 = vunpack.c.l.b16 %v10081_v35  ;;  %v21233_v3 = vsel %vm5762_vm5, %v9892_v34, %v9891_v40 }
 0x1cb   : > { %27274 = vst [vmem:[#allocation7_spill] sm:$0xff] %v21233_v3  ;;  %v1221_v30 = vpack.c.bf16 %v1135_v39, %v1134_v4  ;;  %v818_v7 = vadd.f32 %v20704_v49, %v20231_v43  ;;  %v821_v22 = vadd.f32 %v27275_v18, %v20231_v43  ;;  %v4092_v44 = vrot.slane %v4085_v45, %v20242_v57  ;;  %v19816_v49 = vld [vmem:[%s20115_s15 + $0x150] sm:$0xff]   ;;  %v19514_v18 = vpop.f32.mrf.mxu0 }
 0x1cc   : > { %v5638_v20 = vunpack.c.l.b16 %v4064_v23  ;;  %v5806_v2 = vrot.slane %v5637_v61, 6  ;;  %v21240_v1 = vunpack.c.l.b16 %v10053_v42  ;;  %v26991_v10 = vrot.slane %v21228_v14, 7  ;;  %19609 = vmatmul.mubr.bf16.gmra.mxu0 %v19816_v49 }
 0x1cd   : > { %v1853_v39 = vrot.slane %v1221_v30, %v20242_v57  ;;  %v21252_v45 = vunpack.c.l.b16 %v4078_v58  ;;  %v6070_v23 = vrot.slane %v5637_v61, 7  ;;  %v1137_v63 = vmax.f32 %v821_v22, 0.0  ;;  %19612 = vmatprep.mubr.msk.bf16.mxu0 %vm20016_vm0, %v27236_v15 }
 0x1ce   : > { %v10032_v42 = vrot.slane %v21147_v62, %v20242_v57  ;;  %v10534_v40 = vsel %vm5750_vm1, %v26991_v10, %v21240_v1  ;;  %v1136_v30 = vmax.f32 %v818_v7, 0.0  ;;  %v21260_v34 = vunpack.c.l.b16 %v4092_v44  ;;  %v21273_v44 = vpop.f32.mrf.mxu0 }
 0x1cf   : > { %v1854_v4 = vcombine.high %v1853_v39, %v1853_v39  ;;  %v21262_v35 = vrot.slane %v6623_v24, 3  ;;  %v1861_v58 = vrot.slane %v1853_v39, %v20242_v57  ;;  %v27276_v61 = vrot.slane %v21230_v47, 6 }
 0x1d0   : > { %v5807_v62 = vsel %vm5753_vm2, %v5806_v2, %v21019_v17  ;;  %v5808_v56 = vrot.slane %v5638_v20, 5  ;;  %v1222_v49 = vpack.c.bf16 %v1137_v63, %v1136_v30  ;;  %v6071_v24 = vsel %vm5753_vm2, %v6070_v23, %v21004_v11  ;;  %v19515_v2 = vpop.f32.mrf.mxu0 }
 0x1d1   : > { %v10535_v22 = vsel %vm5753_vm2, %v27276_v61, %v10534_v40  ;;  %v1868_v7 = vrot.slane %v1854_v4, %v20242_v57  ;;  %v6072_v39 = vrot.slane %v5638_v20, 6  ;;  %v1869_v18 = vcombine.high %v1861_v58, %v1861_v58 }
 0x1d2   : > { %v10088_v10 = vrot.slane %v1861_v58, %v20242_v57  ;;  %v10039_v40 = vrot.slane %v10032_v42, %v20242_v57  ;;  %v18596_v31 = vpack.c.bf16 %v1137_v63, %v1137_v63  ;;  %v1877_v17 = vrot.slane %v1222_v49, %v20242_v57  ;;  %v21330_v19 = vpop.f32.mrf.mxu0 }
 0x1d3   : > { %v10102_v61 = vrot.slane %v1868_v7, %v20242_v57  ;;  %v5810_v4 = vrot.slane %v21252_v45, 4  ;;  %v6074_v30 = vrot.slane %v21252_v45, 5  ;;  %v10480_v11 = vrot.slane %v1869_v18, %v20242_v57 }
 0x1d4   : > { %v21284_v13 = vrot.slane %v10088_v10, %v20242_v57  ;;  %v5809_v20 = vsel %vm5756_vm3, %v5808_v56, %v5807_v62  ;;  %v6672_v42 = vsel %vm5750_vm1, %v6070_v23, %v20961_v41  ;;  %v1885_v63 = vcombine.high %v1877_v17, %v1877_v17 }
 0x1d5   : > { %v21291_v58 = vrot.slane %v10102_v61, %v20242_v57  ;;  %v5812_v7 = vrot.slane %v21260_v34, 3  ;;  %v6076_v49 = vrot.slane %v21260_v34, 4  ;;  %v10487_v10 = vrot.slane %v10480_v11, %v20242_v57 }
 0x1d6   : > { %v10366_v45 = vunpack.c.l.b16 %v21284_v13  ;;  %v6073_v2 = vsel %vm5756_vm3, %v6072_v39, %v6071_v24  ;;  %v10362_v18 = vunpack.c.l.b16 %v10039_v40  ;;  %v1884_v62 = vrot.slane %v18596_v31, %v20242_v57  ;;  %v27277_v40 = vld [vmem:[#allocation13_spill] sm:$0xff] }
 0x1d7   : > { %v26996_v56 = vunpack.c.l.b16 %v21291_v58  ;;  %v5811_v41 = vsel %vm5759_vm4, %v5810_v4, %v5809_v20  ;;  %v10530_v61 = vunpack.c.l.b16 %v10487_v10  ;;  %v1893_v25 = vrot.slane %v1877_v17, %v20242_v57 }
 0x1d8   : > { %v21301_v23 = vrot.slane %v10366_v45, 5  ;;  %v6673_v34 = vsel %vm5753_vm2, %v6072_v39, %v6672_v42  ;;  %v1907_v24 = vrot.slane %v1885_v63, %v20242_v57  ;;  %v829_v11 = vadd.f32 %v27277_v40, %v20231_v43  ;;  %v19817_v63 = vld [vmem:[%s20115_s15 + $0x158] sm:$0xff]  }
 0x1d9   : > { %v21307_v13 = vrot.slane %v26996_v56, 4  ;;  %v6075_v31 = vsel %vm5759_vm4, %v6074_v30, %v6073_v2  ;;  %v9020_v4 = vrot.slane %v20996_v54, 7  ;;  %v10538_v10 = vrot.slane %v10530_v61, 3  ;;  %v27278_v56 = vld [vmem:[#allocation12_spill] sm:$0xff]  ;;  %19613 = vmatmul.mubr.bf16.gmra.mxu0 %v19817_v63 }
 0x1da   : > { %v10536_v20 = vsel %vm5756_vm3, %v21301_v23, %v10535_v22  ;;  %v10430_v17 = vrot.slane %v10362_v18, 1  ;;  %v1886_v42 = vcombine.high %v1884_v62, %v1884_v62  ;;  %v826_v52 = vadd.f32 %v27278_v56, %v20231_v43  ;;  %19616 = vmatprep.mubr.msk.bf16.mxu0 %vm20016_vm0, %v27236_v15 }
 0x1db   : > { %v10537_v39 = vsel %vm5759_vm4, %v21307_v13, %v10536_v20  ;;  %v10386_v60 = vrot.slane %v21240_v1, 7  ;;  %v1900_v54 = vrot.slane %v1884_v62, %v20242_v57  ;;  %v1915_v2 = vcombine.high %v1893_v25, %v1893_v25 }
 0x1dc   : > { %v21323_v40 = vsel %vm5762_vm5, %v10538_v10, %v10537_v39  ;;  %v21327_v22 = vsel %vm5762_vm5, %v5812_v7, %v5811_v41  ;;  %v9022_v61 = vrot.slane %v20998_v38, 6  ;;  %v1917_v9 = vcombine.high %v1907_v24, %v1907_v24  ;;  %v27282_v38 = vld [vmem:[#allocation10_spill] sm:$0xff]  ;;  %v27283_v7 = vld [vmem:[#allocation9_spill] sm:$0xff] }
 0x1dd   : > { %27279 = vst [vmem:[#allocation11_spill] sm:$0xff] %v21323_v40  ;;  %v1139_v20 = vmax.f32 %v829_v11, 0.0  ;;  %v6077_v56 = vsel %vm5762_vm5, %v6076_v49, %v6075_v31  ;;  %v6674_v16 = vsel %vm5756_vm3, %v6074_v30, %v6673_v34  ;;  %v27280_v10 = vunpack.c.l.b16 %v20957_v28  ;;  %v19518_v28 = vpop.f32.mrf.mxu0 }
 0x1de   : > { %v27281_v25 = vunpack.c.l.b16 %v21182_v6  ;;  %v27284_v41 = vpack.c.b16 %v27282_v38, %v27283_v7  ;;  %v10388_v11 = vrot.slane %v21228_v14, 6  ;;  %v1914_v30 = vrot.slane %v1886_v42, %v20242_v57 }
 0x1df   : > { %v9021_v39 = vsel %vm5750_vm1, %v9020_v4, %v27280_v10  ;;  %v1138_v34 = vmax.f32 %v826_v52, 0.0  ;;  %v10387_v31 = vsel %vm5750_vm1, %v10386_v60, %v10362_v18  ;;  %v10431_v6 = vsel %vm5750_vm1, %v21240_v1, %v10430_v17 }
 0x1e0   : > { %v9024_v62 = vrot.slane %v27281_v25, 5  ;;  %v21345_v24 = vrot.slane %v27284_v41, %v20242_v57  ;;  %v1916_v4 = vcombine.high %v1900_v54, %v1900_v54  ;;  %v4099_v63 = vrot.slane %v1915_v2, %v20242_v57  ;;  %v21356_v41 = vpop.f32.mrf.mxu0 }
 0x1e1   : > { %v6675_v10 = vsel %vm5759_vm4, %v6076_v49, %v6674_v16  ;;  %v9023_v25 = vsel %vm5753_vm2, %v9022_v61, %v9021_v39  ;;  %v4113_v38 = vrot.slane %v1917_v9, %v20242_v57  ;;  %v1223_v7 = vpack.c.bf16 %v1139_v20, %v1138_v34  ;;  %v19818_v39 = vld [vmem:[%s20115_s15 + $0x160] sm:$0xff]  }
 0x1e2   : > { %27285 = vst [vmem:[#allocation13_spill] sm:$0xff] %v21345_v24  ;;  %v10760_v52 = vcombine.low %v21345_v24, %v20979_v27  ;;  %v9025_v60 = vsel %vm5756_vm3, %v9024_v62, %v9023_v25  ;;  %v27286_v1 = vunpack.c.l.b16 %v21188_v26  ;;  %v10390_v17 = vrot.slane %v21230_v47, 5  ;;  %v19519_v61 = vpop.f32.mrf.mxu0  ;;  %19617 = vmatmul.mubr.bf16.gmra.mxu0 %v19818_v39 }
 0x1e3   : > { %v10389_v42 = vsel %vm5753_vm2, %v10388_v11, %v10387_v31  ;;  %v27287_v16 = vrot.slane %v21228_v14, 7  ;;  %v1918_v9 = vcombine.high %v1914_v30, %v1914_v30  ;;  %v4127_v2 = vrot.slane %v1900_v54, %v20242_v57  ;;  %19620 = vmatprep.mubr.msk.bf16.mxu0 %vm20016_vm0, %v27236_v15 }
 0x1e4   : > { %v9026_v18 = vrot.slane %v27286_v1, 4  ;;  %v10392_v34 = vrot.slane %v10366_v45, 4  ;;  %v4106_v28 = vrot.slane %v4099_v63, %v20242_v57  ;;  %v4141_v62 = vrot.slane %v1914_v30, %v20242_v57 }
 0x1e5   : > { %v10433_v49 = vsel %vm5753_vm2, %v27287_v16, %v10431_v6  ;;  %v4155_v26 = vrot.slane %v1916_v4, %v20242_v57  ;;  %v18647_v25 = vpack.c.b16 %v6077_v56, %v21327_v22  ;;  %v4120_v11 = vrot.slane %v4113_v38, %v20242_v57  ;;  %v21376_v6 = vpop.f32.mrf.mxu0 }
 0x1e6   : > { %v18597_v31 = vpack.c.bf16 %v1139_v20, %v1139_v20  ;;  %v1926_v14 = vrot.slane %v1223_v7, %v20242_v57  ;;  %v21379_v54 = vrot.slane %v10760_v52, %v20242_v57  ;;  %v9027_v45 = vsel %vm5759_vm4, %v9026_v18, %v9025_v60 }
 0x1e7   : > { %v9028_v63 = vrot.slane %v21198_v29, 3  ;;  %v10391_v30 = vsel %vm5756_vm3, %v10390_v17, %v10389_v42  ;;  %v27289_v22 = vunpack.c.l.b16 %v21291_v58  ;;  %v27290_v56 = vrot.slane %v21230_v47, 6  ;;  %v19522_v52 = vpop.f32.mrf.mxu0 }
 0x1e8   : > { %27288 = vst [vmem:[#allocation12_spill] sm:$0xff] %v21379_v54  ;;  %v4134_v38 = vrot.slane %v4127_v2, %v20242_v57  ;;  %v4169_v7 = vrot.slane %v1918_v9, %v20242_v57  ;;  %v10393_v60 = vsel %vm5759_vm4, %v10392_v34, %v10391_v30  ;;  %v4148_v29 = vrot.slane %v4141_v62, %v20242_v57  ;;  %v27297_v30 = vld [vmem:[#allocation17_spill] sm:$0xff] }
 0x1e9   : > { %v10394_v20 = vrot.slane %v27289_v22, 3  ;;  %v10435_v4 = vsel %vm5756_vm3, %v27290_v56, %v10433_v49  ;;  %v4162_v1 = vrot.slane %v4155_v26, %v20242_v57  ;;  %v5641_v18 = vunpack.c.l.b16 %v4106_v28  ;;  %v21399_v16 = vpop.f32.mrf.mxu0  ;;  %v19819_v56 = vld [vmem:[%s20115_s15 + $0x168] sm:$0xff]  }
 0x1ea   : > { %v10437_v58 = vsel %vm5759_vm4, %v21301_v23, %v10435_v4  ;;  %v5642_v17 = vunpack.c.l.b16 %v4120_v11  ;;  %v1933_v47 = vrot.slane %v18597_v31, %v20242_v57  ;;  %v1934_v42 = vcombine.high %v1926_v14, %v1926_v14  ;;  %19621 = vmatmul.mubr.bf16.gmra.mxu0 %v19819_v56 }
 0x1eb   : > { %v27291_v49 = vpack.c.b16 %v21126_v5, %v21061_v51  ;;  %v21409_v2 = vsel %vm5762_vm5, %v21262_v35, %v6675_v10  ;;  %v21412_v61 = vrot.slane %v18647_v25, %v20242_v57  ;;  %v1942_v23 = vrot.slane %v1926_v14, %v20242_v57  ;;  %v19523_v28 = vpop.f32.mrf.mxu0  ;;  %19624 = vmatprep.mubr.msk.bf16.mxu0 %vm20016_vm0, %v27236_v15 }
 0x1ec   : > { %27293 = vst [vmem:[#allocation9_spill] sm:$0xff] %v21409_v2  ;;  %v21416_v39 = vsel %vm5762_vm5, %v9028_v63, %v9027_v45  ;;  %v21419_v34 = vsel %vm5762_vm5, %v10394_v20, %v10393_v60  ;;  %v4176_v51 = vrot.slane %v4169_v7, %v20242_v57  ;;  %v5643_v5 = vunpack.c.l.b16 %v4134_v38 }
 0x1ed   : > { %v21405_v9 = vrot.slane %v27291_v49, %v20242_v57  ;;  %27294 = vst [vmem:[#allocation36_spill] sm:$0xff] %v21412_v61  ;;  %27295 = vst [vmem:[#allocation37_spill] sm:$0xff] %v21419_v34  ;;  %v21424_v35 = vsel %vm5762_vm5, %v21307_v13, %v10437_v58  ;;  %v5644_v10 = vunpack.c.l.b16 %v4148_v29  ;;  %v21426_v62 = vunpack.c.l.b16 %v4162_v1  ;;  %v27298_v13 = vld [vmem:[#allocation18_spill] sm:$0xff] }
 0x1ee   : > { %27296 = vst [vmem:[#allocation38_spill] sm:$0xff] %v21424_v35  ;;  %v6078_v26 = vrot.slane %v5641_v18, 1  ;;  %v5814_v11 = vrot.slane %v5642_v17, 7  ;;  %v1935_v31 = vcombine.high %v1933_v47, %v1933_v47  ;;  %v1956_v14 = vrot.slane %v1934_v42, %v20242_v57  ;;  %v21445_v42 = vpop.f32.mrf.mxu0 }
 0x1ef   : > { %27292 = vst [vmem:[#allocation10_spill] sm:$0xff] %v21405_v9  ;;  %v1964_v63 = vcombine.high %v1942_v23, %v1942_v23  ;;  %v834_v22 = vadd.f32 %v27297_v30, %v20231_v43  ;;  %v837_v20 = vadd.f32 %v27298_v13, %v20231_v43  ;;  %v21440_v38 = vunpack.c.l.b16 %v4176_v51 }
 0x1f0   : > { %v5816_v7 = vrot.slane %v5643_v5, 6  ;;  %v6080_v52 = vrot.slane %v5643_v5, 7  ;;  %v5818_v60 = vrot.slane %v5644_v10, 5  ;;  %v6079_v1 = vsel %vm5750_vm1, %v5642_v17, %v6078_v26  ;;  %v19526_v4 = vpop.f32.mrf.mxu0 }
 0x1f1   : > { %27299 = vst [vmem:[#allocation17_spill] sm:$0xff] %v21440_v38  ;;  %v1949_v58 = vrot.slane %v1933_v47, %v20242_v57  ;;  %v5815_v49 = vsel %vm5750_vm1, %v5814_v11, %v5641_v18  ;;  %v6082_v28 = vrot.slane %v5644_v10, 6  ;;  %v1963_v30 = vrot.slane %v1935_v31, %v20242_v57 }
 0x1f2   : > { %v1966_v13 = vcombine.high %v1956_v14, %v1956_v14  ;;  %v6678_v51 = vsel %vm5750_vm1, %v6080_v52, %v5642_v17  ;;  %v6372_v5 = vrot.slane %v1942_v23, %v20242_v57  ;;  %v7320_v26 = vrot.slane %v1956_v14, %v20242_v57  ;;  %v21460_v29 = vpop.f32.mrf.mxu0 }
 0x1f3   : > { %v7334_v47 = vrot.slane %v1964_v63, %v20242_v57  ;;  %v6081_v18 = vsel %vm5753_vm2, %v6080_v52, %v6079_v1  ;;  %v1140_v10 = vmax.f32 %v834_v22, 0.0  ;;  %v1141_v11 = vmax.f32 %v837_v20, 0.0 }
 0x1f4   : > { %v5817_v31 = vsel %vm5753_vm2, %v5816_v7, %v5815_v49  ;;  %v6084_v25 = vrot.slane %v21426_v62, 5  ;;  %v1965_v45 = vcombine.high %v1949_v58, %v1949_v58  ;;  %v7362_v17 = vrot.slane %v1949_v58, %v20242_v57  ;;  %v19527_v52 = vpop.f32.mrf.mxu0 }
 0x1f5   : > { %v6679_v23 = vsel %vm5753_vm2, %v6082_v28, %v6678_v51  ;;  %v1967_v14 = vcombine.high %v1963_v30, %v1963_v30  ;;  %v7348_v63 = vrot.slane %v1966_v13, %v20242_v57  ;;  %v1224_v4 = vpack.c.bf16 %v1141_v11, %v1140_v10 }
 0x1f6   : > { %v6379_v56 = vrot.slane %v6372_v5, %v20242_v57  ;;  %v7327_v22 = vrot.slane %v7320_v26, %v20242_v57  ;;  %v7341_v20 = vrot.slane %v7334_v47, %v20242_v57  ;;  %v7376_v7 = vrot.slane %v1963_v30, %v20242_v57 }
 0x1f7   : > { %v6083_v1 = vsel %vm5756_vm3, %v6082_v28, %v6081_v18  ;;  %v27008_v58 = vrot.slane %v21440_v38, 4  ;;  %v18598_v49 = vpack.c.bf16 %v1141_v11, %v1141_v11  ;;  %v1975_v51 = vrot.slane %v1224_v4, %v20242_v57 }
 0x1f8   : > { %v21472_v40 = vsel %vm5756_vm3, %v5818_v60, %v5817_v31  ;;  %v6680_v13 = vsel %vm5756_vm3, %v6084_v25, %v6679_v23  ;;  %v7369_v5 = vrot.slane %v7362_v17, %v20242_v57  ;;  %v7390_v26 = vrot.slane %v1965_v45, %v20242_v57 }
 0x1f9   : > { %v7355_v47 = vrot.slane %v7348_v63, %v20242_v57  ;;  %v9588_v30 = vrot.slane %v1967_v14, %v20242_v57  ;;  %v1983_v10 = vcombine.high %v1975_v51, %v1975_v51  ;;  %v1991_v28 = vrot.slane %v1975_v51, %v20242_v57 }
 0x1fa   : > { %v6624_v18 = vunpack.c.l.b16 %v6379_v56  ;;  %v7383_v11 = vrot.slane %v7376_v7, %v20242_v57  ;;  %v8862_v4 = vunpack.c.l.b16 %v7327_v22  ;;  %v8863_v52 = vunpack.c.l.b16 %v7341_v20 }
 0x1fb   : > { %v1982_v60 = vrot.slane %v18598_v49, %v20242_v57  ;;  %v2005_v31 = vrot.slane %v1983_v10, %v20242_v57  ;;  %v2013_v23 = vcombine.high %v1991_v28, %v1991_v28  ;;  %v4183_v17 = vrot.slane %v1991_v28, %v20242_v57 }
 0x1fc   : > { %v21485_v45 = vsel %vm5759_vm4, %v6084_v25, %v6083_v1  ;;  %v6681_v14 = vsel %vm5759_vm4, %v27008_v58, %v6680_v13  ;;  %v7397_v56 = vrot.slane %v7390_v26, %v20242_v57  ;;  %v8865_v63 = vunpack.c.l.b16 %v7369_v5 }
 0x1fd   : > { %27300 = vst [vmem:[#allocation18_spill] sm:$0xff] %v21485_v45  ;;  %v8864_v7 = vunpack.c.l.b16 %v7355_v47  ;;  %v2015_v22 = vcombine.high %v2005_v31, %v2005_v31  ;;  %v4197_v20 = vrot.slane %v2005_v31, %v20242_v57  ;;  %v4211_v49 = vrot.slane %v2013_v23, %v20242_v57 }
 0x1fe   : > { %v6682_v51 = vrot.slane %v6624_v18, 3  ;;  %v9030_v10 = vrot.slane %v8863_v52, 7  ;;  %v9595_v28 = vrot.slane %v9588_v30, %v20242_v57  ;;  %v4190_v25 = vrot.slane %v4183_v17, %v20242_v57 }
 0x1ff   : > { %v8866_v1 = vunpack.c.l.b16 %v7383_v11  ;;  %v9294_v24 = vrot.slane %v8862_v4, 1  ;;  %v1984_v37 = vcombine.high %v1982_v60, %v1982_v60  ;;  %v4204_v13 = vrot.slane %v4197_v20, %v20242_v57  ;;  %v19820_v20 = vld [vmem:[%s20115_s15 + $0x170] sm:$0xff]  }
 0x200   : > { %v21496_v26 = vunpack.c.l.b16 %v7397_v56  ;;  %v9034_v5 = vrot.slane %v8865_v63, 5  ;;  %v1998_v47 = vrot.slane %v1982_v60, %v20242_v57  ;;  %v4225_v31 = vrot.slane %v2015_v22, %v20242_v57  ;;  %19625 = vmatmul.mubr.bf16.gmra.mxu0 %v19820_v20 }
 0x201   : > { %v9032_v23 = vrot.slane %v8864_v7, 6  ;;  %v9296_v18 = vrot.slane %v8864_v7, 7  ;;  %v9298_v58 = vrot.slane %v8865_v63, 6  ;;  %v4218_v30 = vrot.slane %v4211_v49, %v20242_v57  ;;  %19628 = vmatprep.mubr.msk.bf16.mxu0 %vm20016_vm0, %v27236_v15 }
 0x202   : > { %v9031_v17 = vsel %vm5750_vm1, %v9030_v10, %v8862_v4  ;;  %v5647_v11 = vunpack.c.l.b16 %v4190_v25  ;;  %v5648_v36 = vunpack.c.l.b16 %v4204_v13  ;;  %v845_v55 = vadd.f32 %v20875_v12, %v20231_v43  ;;  %v21515_v10 = vpop.f32.mrf.mxu0 }
 0x203   : > { %v21506_v56 = vsel %vm5762_vm5, %v6682_v51, %v6681_v14  ;;  %v9036_v3 = vrot.slane %v8866_v1, 4  ;;  %v9295_v60 = vsel %vm5750_vm1, %v8863_v52, %v9294_v24  ;;  %v2012_v22 = vrot.slane %v1984_v37, %v20242_v57  ;;  %27301 = vst [vmem:[#allocation39_spill] sm:$0xff] %v21515_v10 }
 0x204   : > { %v9038_v63 = vrot.slane %v21496_v26, 3  ;;  %v4232_v7 = vrot.slane %v4225_v31, %v20242_v57  ;;  %v4239_v4 = vrot.slane %v1998_v47, %v20242_v57  ;;  %v842_v49 = vadd.f32 %v20857_v59, %v20231_v43  ;;  %v19530_v45 = vpop.f32.mrf.mxu0 }
 0x205   : > { %v9033_v12 = vsel %vm5753_vm2, %v9032_v23, %v9031_v17  ;;  %v9300_v14 = vrot.slane %v8866_v1, 5  ;;  %v9302_v51 = vrot.slane %v21496_v26, 4  ;;  %v5649_v24 = vunpack.c.l.b16 %v4218_v30 }
 0x206   : > { %v9297_v37 = vsel %vm5753_vm2, %v9296_v18, %v9295_v60  ;;  %v5824_v25 = vrot.slane %v5648_v36, 7  ;;  %v6088_v13 = vrot.slane %v5647_v11, 1  ;;  %v1143_v31 = vmax.f32 %v845_v55, 0.0 }
 0x207   : > { %v9840_v34 = vunpack.c.l.b16 %v9595_v28  ;;  %v9894_v59 = vsel %vm5750_vm1, %v9296_v18, %v8863_v52  ;;  %v2014_v35 = vcombine.high %v1998_v47, %v1998_v47  ;;  %v4253_v20 = vrot.slane %v2012_v22, %v20242_v57 }
 0x208   : > { %v9035_v1 = vsel %vm5756_vm3, %v9034_v5, %v9033_v12  ;;  %v4246_v26 = vrot.slane %v4239_v4, %v20242_v57  ;;  %v5650_v23 = vunpack.c.l.b16 %v4232_v7  ;;  %v1142_v30 = vmax.f32 %v842_v49, 0.0 }
 0x209   : > { %v9299_v17 = vsel %vm5756_vm3, %v9298_v58, %v9297_v37  ;;  %v2016_v38 = vcombine.high %v2012_v22, %v2012_v22  ;;  %v5826_v60 = vrot.slane %v5649_v24, 6  ;;  %v6090_v10 = vrot.slane %v5649_v24, 7 }
 0x20a   : > { %v9895_v55 = vsel %vm5753_vm2, %v9298_v58, %v9894_v59  ;;  %v5825_v45 = vsel %vm5750_vm1, %v5824_v25, %v5647_v11  ;;  %v6089_v52 = vsel %vm5750_vm1, %v5648_v36, %v6088_v13  ;;  %v1225_v28 = vpack.c.bf16 %v1143_v31, %v1142_v30 }
 0x20b   : > { %v9037_v47 = vsel %vm5759_vm4, %v9036_v3, %v9035_v1  ;;  %v9898_v18 = vrot.slane %v9840_v34, 3  ;;  %v4260_v5 = vrot.slane %v4253_v20, %v20242_v57  ;;  %v6386_v7 = vrot.slane %v2014_v35, %v20242_v57  ;;  %v27302_v35 = vld [vmem:[#allocation14_spill] sm:$0xff] }
 0x20c   : > { %v5651_v4 = vunpack.c.l.b16 %v4246_v26  ;;  %v5828_v49 = vrot.slane %v5650_v23, 5  ;;  %v6092_v12 = vrot.slane %v5650_v23, 6  ;;  %v18599_v22 = vpack.c.bf16 %v1143_v31, %v1143_v31  ;;  %v27304_v26 = vld [vmem:[#allocation16_spill] sm:$0xff] }
 0x20d   : > { %v9301_v24 = vsel %vm5759_vm4, %v9300_v14, %v9299_v17  ;;  %v5827_v58 = vsel %vm5753_vm2, %v5826_v60, %v5825_v45  ;;  %v6091_v11 = vsel %vm5753_vm2, %v6090_v10, %v6089_v52  ;;  %v7404_v37 = vrot.slane %v2016_v38, %v20242_v57  ;;  %v27305_v38 = vld [vmem:[#allocation15_spill] sm:$0xff] }
 0x20e   : > { %v9896_v25 = vsel %vm5756_vm3, %v9300_v14, %v9895_v55  ;;  %v6684_v3 = vsel %vm5750_vm1, %v6090_v10, %v5648_v36  ;;  %v2024_v34 = vrot.slane %v1225_v28, %v20242_v57  ;;  %v27303_v13 = vpack.c.b16 %v27302_v35, %v20755_v21 }
 0x20f   : > { %v21545_v31 = vsel %vm5762_vm5, %v9038_v63, %v9037_v47  ;;  %v5652_v20 = vunpack.c.l.b16 %v4260_v5  ;;  %v6393_v1 = vrot.slane %v6386_v7, %v20242_v57  ;;  %v27306_v23 = vpack.c.b16 %v27304_v26, %v27305_v38 }
 0x210   : > { %v10825_v59 = vrot.slane %v27303_v13, %v20242_v57  ;;  %v5829_v36 = vsel %vm5756_vm3, %v5828_v49, %v5827_v58  ;;  %v5830_v10 = vrot.slane %v5651_v4, 4  ;;  %v6093_v30 = vsel %vm5756_vm3, %v6092_v12, %v6091_v11 }
 0x211   : > { %v21552_v14 = vrot.slane %v27306_v23, %v20242_v57  ;;  %v2031_v21 = vrot.slane %v18599_v22, %v20242_v57  ;;  %v6094_v17 = vrot.slane %v5651_v4, 5  ;;  %v6685_v63 = vsel %vm5753_vm2, %v6092_v12, %v6684_v3 }
 0x212   : > { %v7411_v60 = vrot.slane %v7404_v37, %v20242_v57  ;;  %v21562_v45 = vsel %vm5762_vm5, %v9302_v51, %v9301_v24  ;;  %v9897_v52 = vsel %vm5759_vm4, %v9302_v51, %v9896_v25  ;;  %v2032_v28 = vcombine.high %v2024_v34, %v2024_v34 }
 0x213   : > { %27307 = vst [vmem:[#allocation14_spill] sm:$0xff] %v21552_v14  ;;  %v10842_v55 = vcombine.low %v21552_v14, %v20990_v53  ;;  %v10840_v47 = vcombine.low %v20979_v27, %v10825_v59  ;;  %v5831_v5 = vsel %vm5759_vm4, %v5830_v10, %v5829_v36  ;;  %v6095_v7 = vsel %vm5759_vm4, %v6094_v17, %v6093_v30 }
 0x214   : > { %v6625_v4 = vunpack.c.l.b16 %v6393_v1  ;;  %v2040_v49 = vrot.slane %v2024_v34, %v20242_v57  ;;  %v5832_v12 = vrot.slane %v5652_v20, 3  ;;  %v6096_v22 = vrot.slane %v5652_v20, 4 }
 0x215   : > { %v6686_v58 = vsel %vm5756_vm3, %v6094_v17, %v6685_v63  ;;  %v2033_v11 = vcombine.high %v2031_v21, %v2031_v21  ;;  %v21571_v24 = vsel %vm5762_vm5, %v9898_v18, %v9897_v52  ;;  %v21573_v37 = vunpack.c.l.b16 %v7411_v60 }
 0x216   : > { %v2047_v51 = vrot.slane %v2031_v21, %v20242_v57  ;;  %v21577_v25 = vrot.slane %v10842_v55, %v20242_v57  ;;  %v21580_v3 = vsel %vm5762_vm5, %v5832_v12, %v5831_v5  ;;  %v21583_v34 = vsel %vm5762_vm5, %v6096_v22, %v6095_v7  ;;  %v27313_v5 = vld [vmem:[#allocation19_spill] sm:$0xff] }
 0x217   : > { %v2054_v35 = vrot.slane %v2032_v28, %v20242_v57  ;;  %v10841_v13 = vcombine.high %v20979_v27, %v10825_v59  ;;  %v6687_v18 = vsel %vm5759_vm4, %v6096_v22, %v6686_v58  ;;  %v2062_v20 = vcombine.high %v2040_v49, %v2040_v49 }
 0x218   : > { %27308 = vst [vmem:[#allocation16_spill] sm:$0xff] %v21577_v25  ;;  %v7418_v1 = vrot.slane %v2040_v49, %v20242_v57  ;;  %v21590_v26 = vrot.slane %v10840_v47, %v20242_v57  ;;  %v27310_v38 = vrot.slane %v21426_v62, 4  ;;  %v6688_v10 = vrot.slane %v6625_v4, 3 }
 0x219   : > { %v21601_v59 = vrot.slane %v2033_v11, %v20242_v57  ;;  %v9304_v21 = vrot.slane %v21573_v37, 1  ;;  %v2063_v17 = vcombine.high %v2047_v51, %v2047_v51  ;;  %v7432_v60 = vrot.slane %v2054_v35, %v20242_v57 }
 0x21a   : > { %27309 = vst [vmem:[#allocation15_spill] sm:$0xff] %v21590_v26  ;;  %v21596_v23 = vsel %vm5759_vm4, %v27310_v38, %v21472_v40  ;;  %v10873_v63 = vcombine.high %v21590_v26, %v21577_v25  ;;  %v21609_v62 = vsel %vm5762_vm5, %v6688_v10, %v6687_v18  ;;  %v21615_v55 = vrot.slane %v10841_v13, %v20242_v57 }
 0x21b   : > { %27311 = vst [vmem:[#allocation40_spill] sm:$0xff] %v21609_v62  ;;  %v2064_v52 = vcombine.high %v2054_v35, %v2054_v35  ;;  %v7425_v28 = vrot.slane %v7418_v1, %v20242_v57  ;;  %v7446_v47 = vrot.slane %v2062_v20, %v20242_v57  ;;  %v27314_v7 = vpack.c.b16 %v20912_v48, %v27313_v5 }
 0x21c   : > { %27312 = vst [vmem:[#allocation41_spill] sm:$0xff] %v21615_v55  ;;  %v2065_v49 = vcombine.high %v21601_v59, %v21601_v59  ;;  %v7474_v12 = vrot.slane %v2047_v51, %v20242_v57  ;;  %v10924_v22 = vcombine.low %v21405_v9, %v21412_v61  ;;  %v27315_v58 = vpack.c.b16 %v21416_v39, %v21409_v2 }
 0x21d   : > { %v10907_v4 = vrot.slane %v27314_v7, %v20242_v57  ;;  %v4267_v35 = vrot.slane %v2063_v17, %v20242_v57  ;;  %v18718_v18 = vcombine.low %v21615_v55, %v10873_v63  ;;  %v21639_v20 = vrot.slane %v7432_v60, %v20242_v57 }
 0x21e   : > { %v21632_v11 = vrot.slane %v27315_v58, %v20242_v57  ;;  %v21642_v51 = vrot.slane %v10924_v22, %v20242_v57  ;;  %v850_v39 = vadd.f32 %v21065_v0, %v20231_v43  ;;  %v7460_v38 = vrot.slane %v2064_v52, %v20242_v57 }
 0x21f   : > { %v10922_v13 = vcombine.low %v20990_v53, %v10907_v4  ;;  %v10923_v48 = vcombine.high %v20990_v53, %v10907_v4  ;;  %v27317_v63 = vcombine.high %v21111_v46, %v21379_v54  ;;  %v7453_v7 = vrot.slane %v7446_v47, %v20242_v57  ;;  %v21718_v47 = vpop.f32.mrf.mxu0 }
 0x220   : > { %27316 = vst [vmem:[#allocation42_spill] sm:$0xff] %v21642_v51  ;;  %v11004_v1 = vcombine.low %v21412_v61, %v21632_v11  ;;  %v21657_v4 = vrot.slane %v7474_v12, %v20242_v57  ;;  %v853_v0 = vadd.f32 %v21092_v8, %v20231_v43  ;;  %v21664_v52 = vunpack.c.l.b16 %v7425_v28 }
 0x221   : > { %v10932_v10 = vrot.slane %v10922_v13, %v20242_v57  ;;  %v10939_v17 = vrot.slane %v10923_v48, %v20242_v57  ;;  %v18716_v60 = vcombine.low %v27317_v63, %v21590_v26  ;;  %v12923_v48 = vrot.slane %v18718_v18, %v20242_v57  ;;  %v19531_v9 = vpop.f32.mrf.mxu0 }
 0x222   : > { %v21660_v22 = vrot.slane %v11004_v1, %v20242_v57  ;;  %v4274_v46 = vrot.slane %v4267_v35, %v20242_v57  ;;  %v1144_v12 = vmax.f32 %v850_v39, 0.0  ;;  %v1145_v63 = vmax.f32 %v853_v0, 0.0 }
 0x223   : > { %v10955_v58 = vcombine.high %v10932_v10, %v21642_v51  ;;  %v18720_v13 = vcombine.low %v10932_v10, %v10939_v17  ;;  %v4281_v1 = vrot.slane %v2065_v49, %v20242_v57  ;;  %v7467_v30 = vrot.slane %v7460_v38, %v20242_v57 }
 0x224   : > { %27318 = vst [vmem:[#allocation43_spill] sm:$0xff] %v21660_v22  ;;  %v12909_v28 = vrot.slane %v18716_v60, %v20242_v57  ;;  %v8870_v36 = vunpack.c.l.b16 %v21639_v20  ;;  %v21676_v10 = vunpack.c.l.b16 %v7453_v7  ;;  %v1226_v18 = vpack.c.bf16 %v1145_v63, %v1144_v12 }
 0x225   : > { %v18722_v8 = vcombine.low %v10955_v58, %v21660_v22  ;;  %v18600_v17 = vpack.c.bf16 %v1145_v63, %v1145_v63  ;;  %v12937_v35 = vrot.slane %v18720_v13, %v20242_v57  ;;  %v9040_v38 = vrot.slane %v21664_v52, 7 }
 0x226   : > { %v12960_v39 = vcombine.high %v12909_v28, %v12923_v48  ;;  %v12959_v0 = vcombine.low %v12909_v28, %v12923_v48  ;;  %v2073_v58 = vrot.slane %v1226_v18, %v20242_v57  ;;  %v4288_v20 = vrot.slane %v4281_v1, %v20242_v57 }
 0x227   : > { %v12951_v40 = vrot.slane %v18722_v8, %v20242_v57  ;;  %v21684_v60 = vrot.slane %v18600_v17, %v20242_v57  ;;  %v9305_v7 = vsel %vm5750_vm1, %v21664_v52, %v9304_v21  ;;  %v21689_v63 = vunpack.c.l.b16 %v4274_v46 }
 0x228   : > { %v2081_v8 = vcombine.high %v2073_v58, %v2073_v58  ;;  %v2089_v48 = vrot.slane %v2073_v58, %v20242_v57  ;;  %v21697_v18 = vrot.slane %v12960_v39, %v20242_v57  ;;  %v21703_v1 = vrot.slane %v12959_v0, %v20242_v57 }
 0x229   : > { %v12964_v12 = vcombine.high %v12937_v35, %v12951_v40  ;;  %v12963_v13 = vcombine.low %v12937_v35, %v12951_v40  ;;  %v21694_v28 = vrot.slane %v21684_v60, %v20242_v57  ;;  %v21708_v40 = vunpack.c.l.b16 %v7467_v30 }
 0x22a   : > { %27319 = vst [vmem:[#allocation44_spill] sm:$0xff] %v21697_v18  ;;  %27321 = vst [vmem:[#allocation46_spill] sm:$0xff] %v21703_v1  ;;  %v9042_v46 = vrot.slane %v8870_v36, 6  ;;  %v2103_v35 = vrot.slane %v2081_v8, %v20242_v57  ;;  %v2111_v58 = vcombine.high %v2089_v48, %v2089_v48  ;;  %v861_v8 = vadd.f32 %v21162_v32, %v20231_v43 }
 0x22b   : > { %v21700_v17 = vrot.slane %v12964_v12, %v20242_v57  ;;  %v21706_v21 = vrot.slane %v12963_v13, %v20242_v57  ;;  %v4295_v12 = vrot.slane %v2089_v48, %v20242_v57  ;;  %v6400_v0 = vrot.slane %v21694_v28, %v20242_v57 }
 0x22c   : > { %v2113_v13 = vcombine.high %v2103_v35, %v2103_v35  ;;  %v4309_v30 = vrot.slane %v2103_v35, %v20242_v57  ;;  %v4323_v51 = vrot.slane %v2111_v58, %v20242_v57  ;;  %v9041_v55 = vsel %vm5750_vm1, %v9040_v38, %v21573_v37 }
 0x22d   : > { %27320 = vst [vmem:[#allocation45_spill] sm:$0xff] %v21700_v17  ;;  %27322 = vst [vmem:[#allocation47_spill] sm:$0xff] %v21706_v21  ;;  %v13027_v49 = vcombine.low %v21697_v18, %v21700_v17  ;;  %v13023_v39 = vcombine.low %v21703_v1, %v21706_v21  ;;  %v9044_v26 = vrot.slane %v21676_v10, 5  ;;  %v9306_v25 = vrot.slane %v8870_v36, 7 }
 0x22e   : > { %v4302_v48 = vrot.slane %v4295_v12, %v20242_v57  ;;  %v4316_v1 = vrot.slane %v4309_v30, %v20242_v57  ;;  %v4330_v35 = vrot.slane %v4323_v51, %v20242_v57  ;;  %v4337_v58 = vrot.slane %v2113_v13, %v20242_v57 }
 0x22f   : > { %14928 = vmatprep.mubr.bf16.mxu1 %v13027_v49  ;;  %v6407_v21 = vrot.slane %v6400_v0, %v20242_v57  ;;  %v5654_v32 = vunpack.c.l.b16 %v4288_v20  ;;  %v6098_v18 = vrot.slane %v21689_v63, 1  ;;  %v858_v36 = vadd.f32 %v21135_v33, %v20231_v43 }
 0x230   : > { %14929 = vmatmul.mubr.bf16.gmra.mxu1 %v13023_v39  ;;  %v5655_v37 = vunpack.c.l.b16 %v4302_v48  ;;  %v4344_v49 = vrot.slane %v4337_v58, %v20242_v57  ;;  %v5656_v38 = vunpack.c.l.b16 %v4316_v1  ;;  %v21736_v9 = vunpack.c.l.b16 %v4330_v35 }
 0x231   : > { %v1147_v39 = vmax.f32 %v861_v8, 0.0  ;;  %v9043_v12 = vsel %vm5753_vm2, %v9042_v46, %v9041_v55  ;;  %v9308_v51 = vrot.slane %v21676_v10, 6  ;;  %v27323_v20 = vrot.slane %v21601_v59, %v20242_v57 }
 0x232   : > { %v6100_v13 = vrot.slane %v5655_v37, 7  ;;  %v9900_v30 = vsel %vm5750_vm1, %v9306_v25, %v21664_v52  ;;  %v21746_v33 = vunpack.c.l.b16 %v4344_v49  ;;  %v21748_v48 = vrot.slane %v5656_v38, 6 }
 0x233   : > { %v9609_v0 = vrot.slane %v27323_v20, %v20242_v57  ;;  %v6626_v1 = vunpack.c.l.b16 %v6407_v21  ;;  %v2082_v8 = vcombine.high %v21684_v60, %v21684_v60  ;;  %v1146_v46 = vmax.f32 %v858_v36, 0.0 }
 0x234   : > { %v6690_v10 = vsel %vm5750_vm1, %v6100_v13, %v5654_v32  ;;  %v9307_v59 = vsel %vm5753_vm2, %v9306_v25, %v9305_v7  ;;  %v9310_v35 = vrot.slane %v21708_v40, 5  ;;  %v18601_v52 = vpack.c.bf16 %v1147_v39, %v1147_v39 }
 0x235   : > { %v9046_v49 = vrot.slane %v21708_v40, 4  ;;  %v9901_v20 = vsel %vm5753_vm2, %v9308_v51, %v9900_v30  ;;  %v6691_v21 = vsel %vm5753_vm2, %v21748_v48, %v6690_v10  ;;  %v1227_v60 = vpack.c.bf16 %v1147_v39, %v1146_v46 }
 0x236   : > { %v5834_v17 = vrot.slane %v5654_v32, 7  ;;  %v9045_v55 = vsel %vm5756_vm3, %v9044_v26, %v9043_v12  ;;  %v27324_v36 = vrot.slane %v21736_v9, 5  ;;  %v6694_v7 = vrot.slane %v6626_v1, 3 }
 0x237   : > { %v9309_v58 = vsel %vm5756_vm3, %v9308_v51, %v9307_v59  ;;  %v9841_v54 = vunpack.c.l.b16 %v9609_v0  ;;  %v2110_v40 = vrot.slane %v2082_v8, %v20242_v57  ;;  %v27325_v30 = vrot.slane %v21746_v33, 4 }
 0x238   : > { %v6692_v25 = vsel %vm5756_vm3, %v27324_v36, %v6691_v21  ;;  %v9902_v39 = vsel %vm5756_vm3, %v9310_v35, %v9901_v20  ;;  %v2112_v26 = vcombine.high %v21694_v28, %v21694_v28  ;;  %v2129_v10 = vrot.slane %v18601_v52, %v20242_v57  ;;  %v21786_v20 = vpop.f32.mrf.mxu0  ;;  %v19821_v28 = vld [vmem:[%s20115_s15 + $0x178] sm:$0xff]  }
 0x239   : > { %v6693_v14 = vsel %vm5759_vm4, %v27325_v30, %v6692_v25  ;;  %v27327_v51 = vpack.c.b16 %v21583_v34, %v21580_v3  ;;  %v27329_v1 = vunpack.c.l.b16 %v21657_v4  ;;  %v5836_v46 = vrot.slane %v5655_v37, 6  ;;  %19629 = vmatmul.mubr.bf16.gmra.mxu0 %v19821_v28 }
 0x23a   : > { %v21774_v12 = vsel %vm5762_vm5, %v6694_v7, %v6693_v14  ;;  %v2122_v59 = vrot.slane %v1227_v60, %v20242_v57  ;;  %v5835_v14 = vsel %vm5750_vm1, %v5834_v17, %v21689_v63  ;;  %v6099_v52 = vsel %vm5750_vm1, %v5654_v32, %v6098_v18  ;;  %v19534_v60 = vpop.f32.mrf.mxu0  ;;  %19632 = vmatprep.mubr.msk.bf16.mxu0 %vm20016_vm0, %v27236_v15 }
 0x23b   : > { %27326 = vst [vmem:[#allocation48_spill] sm:$0xff] %v21774_v12  ;;  %v21781_v0 = vrot.slane %v27327_v51, %v20242_v57  ;;  %v9312_v8 = vrot.slane %v27329_v1, 4  ;;  %v9047_v21 = vsel %vm5759_vm4, %v9046_v49, %v9045_v55  ;;  %v27330_v3 = vmov %v27329_v1 }
 0x23c   : > { %v9048_v34 = vrot.slane %v27330_v3, 3  ;;  %v9311_v36 = vsel %vm5759_vm4, %v9310_v35, %v9309_v58  ;;  %v9904_v37 = vrot.slane %v9841_v54, 3  ;;  %v2114_v7 = vcombine.high %v2110_v40, %v2110_v40  ;;  %v21805_v32 = vpop.f32.mrf.mxu0 }
 0x23d   : > { %27328 = vst [vmem:[#allocation49_spill] sm:$0xff] %v21781_v0  ;;  %v9903_v25 = vsel %vm5759_vm4, %v9312_v8, %v9902_v39  ;;  %v5838_v30 = vrot.slane %v5656_v38, 5  ;;  %v7502_v51 = vrot.slane %v2112_v26, %v20242_v57  ;;  %v2131_v1 = vcombine.high %v2129_v10, %v2129_v10 }
 0x23e   : > { %v869_v63 = vadd.f32 %v21273_v44, %v20231_v43  ;;  %v5837_v4 = vsel %vm5753_vm2, %v5836_v46, %v5835_v14  ;;  %v6101_v18 = vsel %vm5753_vm2, %v6100_v13, %v6099_v52  ;;  %v7488_v17 = vrot.slane %v2110_v40, %v20242_v57  ;;  %v19535_v39 = vpop.f32.mrf.mxu0 }
 0x23f   : > { %v2130_v54 = vcombine.high %v2122_v59, %v2122_v59  ;;  %v9313_v38 = vsel %vm5762_vm5, %v9312_v8, %v9311_v36  ;;  %v9905_v55 = vsel %vm5762_vm5, %v9904_v37, %v9903_v25  ;;  %v2145_v35 = vrot.slane %v2129_v10, %v20242_v57 }
 0x240   : > { %v866_v44 = vadd.f32 %v21247_v50, %v20231_v43  ;;  %v21813_v58 = vsel %vm5762_vm5, %v9048_v34, %v9047_v21  ;;  %v5840_v49 = vrot.slane %v21736_v9, 4  ;;  %v7516_v13 = vrot.slane %v2114_v7, %v20242_v57  ;;  %v913_v21 = vpop.f32.mrf.mxu0 }
 0x241   : > { %v2138_v40 = vrot.slane %v2122_v59, %v20242_v57  ;;  %v5839_v26 = vsel %vm5756_vm3, %v5838_v30, %v5837_v4  ;;  %v6103_v8 = vsel %vm5756_vm3, %v21748_v48, %v6101_v18  ;;  %v7509_v10 = vrot.slane %v7502_v51, %v20242_v57 }
 0x242   : > { %v2159_v46 = vrot.slane %v2131_v1, %v20242_v57  ;;  %v18656_v50 = vpack.c.b16 %v9905_v55, %v9313_v38  ;;  %v7495_v28 = vrot.slane %v7488_v17, %v20242_v57  ;;  %v2152_v14 = vrot.slane %v2130_v54, %v20242_v57  ;;  %v19538_v30 = vpop.f32.mrf.mxu0 }
 0x243   : > { %v1149_v52 = vmax.f32 %v869_v63, 0.0  ;;  %v5842_v3 = vrot.slane %v21746_v33, 3  ;;  %v2161_v59 = vcombine.high %v2145_v35, %v2145_v35  ;;  %v4351_v34 = vrot.slane %v2145_v35, %v20242_v57 }
 0x244   : > { %v1148_v36 = vmax.f32 %v866_v44, 0.0  ;;  %v5841_v25 = vsel %vm5759_vm4, %v5840_v49, %v5839_v26  ;;  %v27331_v48 = vrot.slane %v21736_v9, 5  ;;  %v7523_v7 = vrot.slane %v7516_v13, %v20242_v57 }
 0x245   : > { %v7530_v60 = vrot.slane %v2138_v40, %v20242_v57  ;;  %v8875_v51 = vunpack.c.l.b16 %v7509_v10  ;;  %v2160_v1 = vcombine.high %v2138_v40, %v2138_v40  ;;  %v2163_v63 = vcombine.high %v2159_v46, %v2159_v46  ;;  %v21850_v10 = vpop.f32.mrf.mxu0 }
 0x246   : > { %v6105_v37 = vsel %vm5759_vm4, %v27331_v48, %v6103_v8  ;;  %v4365_v4 = vrot.slane %v2159_v46, %v20242_v57  ;;  %v8874_v17 = vunpack.c.l.b16 %v7495_v28  ;;  %v7544_v54 = vrot.slane %v2152_v14, %v20242_v57  ;;  %v19822_v8 = vld [vmem:[%s20115_s15 + $0x180] sm:$0xff]  }
 0x247   : > { %v1228_v9 = vpack.c.bf16 %v1149_v52, %v1148_v36  ;;  %v21838_v38 = vrot.slane %v18656_v50, %v20242_v57  ;;  %v5843_v55 = vsel %vm5762_vm5, %v5842_v3, %v5841_v25  ;;  %v21842_v35 = vrot.slane %v4351_v34, %v20242_v57  ;;  %19633 = vmatmul.mubr.bf16.gmra.mxu0 %v19822_v8  ;;  %v19539_v36 = vpop.f32.mrf.mxu0 }
 0x248   : > { %v4379_v44 = vrot.slane %v2161_v59, %v20242_v57  ;;  %v27333_v49 = vrot.slane %v21746_v33, 4  ;;  %v8876_v40 = vunpack.c.l.b16 %v7523_v7  ;;  %v7537_v39 = vrot.slane %v7530_v60, %v20242_v57 }
 0x249   : > { %27332 = vst [vmem:[#allocation50_spill] sm:$0xff] %v21838_v38  ;;  %v18602_v26 = vpack.c.bf16 %v1149_v52, %v1149_v52  ;;  %v9050_v46 = vrot.slane %v8875_v51, 7  ;;  %v4372_v50 = vrot.slane %v4365_v4, %v20242_v57  ;;  %v4393_v28 = vrot.slane %v2163_v63, %v20242_v57 }
 0x24a   : > { %v6107_v13 = vsel %vm5762_vm5, %v27333_v49, %v6105_v37  ;;  %v7558_v21 = vrot.slane %v2160_v1, %v20242_v57  ;;  %v9314_v3 = vrot.slane %v8874_v17, 1  ;;  %v2162_v59 = vcombine.high %v2152_v14, %v2152_v14  ;;  %v21864_v1 = vpop.f32.mrf.mxu0 }
 0x24b   : > { %v7551_v33 = vrot.slane %v7544_v54, %v20242_v57  ;;  %v2171_v34 = vrot.slane %v1228_v9, %v20242_v57  ;;  %v18657_v25 = vpack.c.b16 %v6107_v13, %v5843_v55  ;;  %v4386_v52 = vrot.slane %v4379_v44, %v20242_v57 }
 0x24c   : > { %v5659_v48 = vunpack.c.l.b16 %v21842_v35  ;;  %v21861_v37 = vadd.f32 %v21330_v19, %v20231_v43  ;;  %v9316_v7 = vrot.slane %v8876_v40, 7  ;;  %v8877_v60 = vunpack.c.l.b16 %v7537_v39  ;;  %v19542_v49 = vpop.f32.mrf.mxu0 }
 0x24d   : > { %v2178_v30 = vrot.slane %v18602_v26, %v20242_v57  ;;  %v2179_v14 = vcombine.high %v2171_v34, %v2171_v34  ;;  %v9052_v63 = vrot.slane %v8876_v40, 6  ;;  %v4400_v4 = vrot.slane %v4393_v28, %v20242_v57 }
 0x24e   : > { %v21867_v54 = vunpack.c.l.b16 %v4372_v50  ;;  %v7565_v9 = vrot.slane %v7558_v21, %v20242_v57  ;;  %v9051_v55 = vsel %vm5750_vm1, %v9050_v46, %v8874_v17  ;;  %v9315_v35 = vsel %vm5750_vm1, %v8875_v51, %v9314_v3  ;;  %v21879_v17 = vpop.f32.mrf.mxu0 }
 0x24f   : > { %v8878_v19 = vunpack.c.l.b16 %v7551_v33  ;;  %v9616_v44 = vrot.slane %v2162_v59, %v20242_v57  ;;  %v21874_v13 = vrot.slane %v18657_v25, %v20242_v57  ;;  %v5661_v39 = vunpack.c.l.b16 %v4386_v52 }
 0x250   : > { %v6108_v26 = vrot.slane %v5659_v48, 1  ;;  %v2187_v40 = vrot.slane %v2171_v34, %v20242_v57  ;;  %v9906_v8 = vsel %vm5750_vm1, %v9316_v7, %v8875_v51  ;;  %v9054_v50 = vrot.slane %v8877_v60, 5  ;;  %v19543_v52 = vpop.f32.mrf.mxu0 }
 0x251   : > { %27334 = vst [vmem:[#allocation51_spill] sm:$0xff] %v21874_v13  ;;  %v2180_v28 = vcombine.high %v2178_v30, %v2178_v30  ;;  %v2201_v21 = vrot.slane %v2179_v14, %v20242_v57  ;;  %v21881_v46 = vunpack.c.l.b16 %v4400_v4  ;;  %v5844_v3 = vrot.slane %v21867_v54, 7 }
 0x252   : > { %v21884_v59 = vunpack.c.l.b16 %v7565_v9  ;;  %v9318_v33 = vrot.slane %v8877_v60, 6  ;;  %v9053_v36 = vsel %vm5753_vm2, %v9052_v63, %v9051_v55  ;;  %v9056_v25 = vrot.slane %v8878_v19, 4 }
 0x253   : > { %v9317_v34 = vsel %vm5753_vm2, %v9316_v7, %v9315_v35  ;;  %v9623_v51 = vrot.slane %v9616_v44, %v20242_v57  ;;  %v5846_v49 = vrot.slane %v5661_v39, 6  ;;  %v6109_v14 = vsel %vm5750_vm1, %v21867_v54, %v6108_v26 }
 0x254   : > { %v2194_v4 = vrot.slane %v2178_v30, %v20242_v57  ;;  %v4407_v18 = vrot.slane %v2187_v40, %v20242_v57  ;;  %v6110_v15 = vrot.slane %v5661_v39, 7  ;;  %v9055_v9 = vsel %vm5756_vm3, %v9054_v50, %v9053_v36 }
 0x255   : > { %v2208_v60 = vrot.slane %v2180_v28, %v20242_v57  ;;  %v2211_v63 = vcombine.high %v2201_v21, %v2201_v21  ;;  %v5845_v55 = vsel %vm5750_vm1, %v5844_v3, %v5659_v48  ;;  %v5848_v7 = vrot.slane %v21881_v46, 5 }
 0x256   : > { %v9319_v44 = vsel %vm5756_vm3, %v9318_v33, %v9317_v34  ;;  %v6112_v26 = vrot.slane %v21881_v46, 6  ;;  %v9320_v52 = vrot.slane %v8878_v19, 5  ;;  %v2209_v30 = vcombine.high %v2187_v40, %v2187_v40 }
 0x257   : > { %v4421_v53 = vrot.slane %v2201_v21, %v20242_v57  ;;  %v9907_v39 = vsel %vm5753_vm2, %v9318_v33, %v9906_v8  ;;  %v2210_v50 = vcombine.high %v2194_v4, %v2194_v4  ;;  %v4414_v28 = vrot.slane %v4407_v18, %v20242_v57 }
 0x258   : > { %v7586_v36 = vrot.slane %v2194_v4, %v20242_v57  ;;  %v2212_v48 = vcombine.high %v2208_v60, %v2208_v60  ;;  %v7572_v3 = vrot.slane %v2211_v63, %v20242_v57  ;;  %v7600_v35 = vrot.slane %v2208_v60, %v20242_v57 }
 0x259   : > { %v877_v34 = vadd.f32 %v21356_v41, %v20231_v43  ;;  %v5847_v19 = vsel %vm5753_vm2, %v5846_v49, %v5845_v55  ;;  %v6111_v40 = vsel %vm5753_vm2, %v6110_v15, %v6109_v14  ;;  %v9057_v21 = vsel %vm5759_vm4, %v9056_v25, %v9055_v9 }
 0x25a   : > { %v9842_v8 = vunpack.c.l.b16 %v9623_v51  ;;  %v9322_v46 = vrot.slane %v21884_v59, 4  ;;  %v9908_v18 = vsel %vm5756_vm3, %v9320_v52, %v9907_v39  ;;  %v4428_v33 = vrot.slane %v4421_v53, %v20242_v57 }
 0x25b   : > { %v6414_v4 = vrot.slane %v2209_v30, %v20242_v57  ;;  %v5663_v63 = vunpack.c.l.b16 %v4414_v28  ;;  %v7593_v60 = vrot.slane %v7586_v36, %v20242_v57  ;;  %v7614_v41 = vrot.slane %v2210_v50, %v20242_v57 }
 0x25c   : > { %v1150_v49 = vmax.f32 %v21861_v37, 0.0  ;;  %v7579_v14 = vrot.slane %v7572_v3, %v20242_v57  ;;  %v7607_v25 = vrot.slane %v7600_v35, %v20242_v57  ;;  %v7628_v51 = vrot.slane %v2212_v48, %v20242_v57 }
 0x25d   : > { %v1151_v9 = vmax.f32 %v877_v34, 0.0  ;;  %v6696_v55 = vsel %vm5750_vm1, %v6110_v15, %v21867_v54  ;;  %v9321_v53 = vsel %vm5759_vm4, %v9320_v52, %v9319_v44  ;;  %v9910_v30 = vrot.slane %v9842_v8, 3  ;;  %v21928_v34 = vpop.f32.mrf.mxu0 }
 0x25e   : > { %v5849_v39 = vsel %vm5756_vm3, %v5848_v7, %v5847_v19  ;;  %v9909_v28 = vsel %vm5759_vm4, %v9322_v46, %v9908_v18  ;;  %v5664_v50 = vunpack.c.l.b16 %v4428_v33  ;;  %v6421_v37 = vrot.slane %v6414_v4, %v20242_v57  ;;  %27335 = vst [vmem:[#allocation52_spill] sm:$0xff] %v21928_v34 }
 0x25f   : > { %v1229_v36 = vpack.c.bf16 %v1151_v9, %v1150_v49  ;;  %v5850_v3 = vrot.slane %v5663_v63, 4  ;;  %v6113_v35 = vsel %vm5756_vm3, %v6112_v26, %v6111_v40  ;;  %v6114_v27 = vrot.slane %v5663_v63, 5  ;;  %v19546_v40 = vpop.f32.mrf.mxu0 }
 0x260   : > { %v8881_v48 = vunpack.c.l.b16 %v7593_v60  ;;  %v7621_v15 = vrot.slane %v7614_v41, %v20242_v57  ;;  %v7635_v54 = vrot.slane %v7628_v51, %v20242_v57  ;;  %v8880_v44 = vunpack.c.l.b16 %v7579_v14 }
 0x261   : > { %v8882_v52 = vunpack.c.l.b16 %v7607_v25  ;;  %v21933_v7 = vsel %vm5762_vm5, %v9322_v46, %v9321_v53  ;;  %v21936_v19 = vsel %vm5762_vm5, %v9910_v30, %v9909_v28  ;;  %v6697_v8 = vsel %vm5753_vm2, %v6112_v26, %v6696_v55 }
 0x262   : > { %27336 = vst [vmem:[#allocation53_spill] sm:$0xff] %v21933_v7  ;;  %27337 = vst [vmem:[#allocation54_spill] sm:$0xff] %v21936_v19  ;;  %v18603_v18 = vpack.c.bf16 %v1151_v9, %v1151_v9  ;;  %v5852_v33 = vrot.slane %v5664_v50, 3  ;;  %v6116_v4 = vrot.slane %v5664_v50, 4  ;;  %v6627_v63 = vunpack.c.l.b16 %v6421_v37 }
 0x263   : > { %v2220_v60 = vrot.slane %v1229_v36, %v20242_v57  ;;  %v5851_v41 = vsel %vm5759_vm4, %v5850_v3, %v5849_v39  ;;  %v6115_v49 = vsel %vm5759_vm4, %v6114_v27, %v6113_v35  ;;  %v9060_v14 = vrot.slane %v8881_v48, 7 }
 0x264   : > { %v885_v46 = vadd.f32 %v21399_v16, %v20231_v43  ;;  %v8883_v25 = vunpack.c.l.b16 %v7621_v15  ;;  %v8884_v51 = vunpack.c.l.b16 %v7635_v54  ;;  %v9062_v53 = vrot.slane %v8882_v52, 6 }
 0x265   : > { %v9324_v30 = vrot.slane %v8880_v44, 1  ;;  %v6698_v26 = vsel %vm5756_vm3, %v6114_v27, %v6697_v8  ;;  %v9061_v9 = vsel %vm5750_vm1, %v9060_v14, %v8880_v44  ;;  %v2227_v55 = vrot.slane %v18603_v18, %v20242_v57 }
 0x266   : > { %v882_v28 = vadd.f32 %v21376_v6, %v20231_v43  ;;  %v5853_v39 = vsel %vm5762_vm5, %v5852_v33, %v5851_v41  ;;  %v6117_v50 = vsel %vm5762_vm5, %v6116_v4, %v6115_v49  ;;  %v9326_v37 = vrot.slane %v8882_v52, 7 }
 0x267   : > { %v2228_v36 = vcombine.high %v2220_v60, %v2220_v60  ;;  %v27338_v16 = vrot.slane %v21884_v59, 3  ;;  %v6700_v35 = vrot.slane %v6627_v63, 3  ;;  %v1153_v15 = vmax.f32 %v885_v46, 0.0 }
 0x268   : > { %v6699_v54 = vsel %vm5759_vm4, %v6116_v4, %v6698_v26  ;;  %v9063_v6 = vsel %vm5753_vm2, %v9062_v53, %v9061_v9  ;;  %v9325_v44 = vsel %vm5750_vm1, %v8881_v48, %v9324_v30  ;;  %v2236_v8 = vrot.slane %v2220_v60, %v20242_v57 }
 0x269   : > { %v21954_v3 = vsel %vm5762_vm5, %v27338_v16, %v9057_v21  ;;  %v9328_v52 = vrot.slane %v8883_v25, 6  ;;  %v18660_v18 = vpack.c.b16 %v6117_v50, %v5853_v39  ;;  %v2229_v40 = vcombine.high %v2227_v55, %v2227_v55  ;;  %v27342_v50 = vld [vmem:[#allocation39_spill] sm:$0xff] }
 0x26a   : > { %27339 = vst [vmem:[#allocation55_spill] sm:$0xff] %v21954_v3  ;;  %v1152_v59 = vmax.f32 %v882_v28, 0.0  ;;  %v9064_v33 = vrot.slane %v8883_v25, 5  ;;  %v9066_v21 = vrot.slane %v8884_v51, 4  ;;  %v9912_v41 = vsel %vm5750_vm1, %v9326_v37, %v8881_v48 }
 0x26b   : > { %v21964_v49 = vrot.slane %v2228_v36, %v20242_v57  ;;  %v9327_v63 = vsel %vm5753_vm2, %v9326_v37, %v9325_v44  ;;  %v2243_v4 = vrot.slane %v2227_v55, %v20242_v57  ;;  %v18604_v46 = vpack.c.bf16 %v1153_v15, %v1153_v15  ;;  %v22001_v44 = vpop.f32.mrf.mxu0 }
 0x26c   : > { %v1230_v14 = vpack.c.bf16 %v1153_v15, %v1152_v59  ;;  %v21969_v53 = vsel %vm5762_vm5, %v6700_v35, %v6699_v54  ;;  %v9065_v60 = vsel %vm5756_vm3, %v9064_v33, %v9063_v6  ;;  %v9330_v30 = vrot.slane %v8884_v51, 5  ;;  %27343 = vst [vmem:[#allocation39_spill] sm:$0xff] %v22001_v44  ;;  %v27344_v59 = vld [vmem:[#allocation17_spill] sm:$0xff] }
 0x26d   : > { %27340 = vst [vmem:[#allocation56_spill] sm:$0xff] %v21969_v53  ;;  %v2258_v26 = vcombine.high %v2236_v8, %v2236_v8  ;;  %v9913_v25 = vsel %vm5753_vm2, %v9328_v52, %v9912_v41  ;;  %v21974_v48 = vrot.slane %v18660_v18, %v20242_v57  ;;  %v2257_v9 = vrot.slane %v2229_v40, %v20242_v57 }
 0x26e   : > { %v21979_v28 = vadd.f32 %v21445_v42, %v20231_v43  ;;  %v9329_v55 = vsel %vm5756_vm3, %v9328_v52, %v9327_v63  ;;  %v2260_v39 = vcombine.high %v21964_v49, %v21964_v49  ;;  %v893_v51 = vadd.f32 %v21460_v29, %v20231_v43 }
 0x26f   : > { %27341 = vst [vmem:[#allocation57_spill] sm:$0xff] %v21974_v48  ;;  %v21988_v37 = vadd.f32 %v27342_v50, %v20231_v43  ;;  %v4463_v36 = vrot.slane %v2243_v4, %v20242_v57  ;;  %v21992_v16 = vsel %vm5759_vm4, %v9066_v21, %v9065_v60  ;;  %v2269_v42 = vrot.slane %v1230_v14, %v20242_v57  ;;  %v19547_v14 = vpop.f32.mrf.mxu0 }
 0x270   : > { %v2276_v35 = vrot.slane %v18604_v46, %v20242_v57  ;;  %v2259_v15 = vcombine.high %v2243_v4, %v2243_v4  ;;  %v4435_v54 = vrot.slane %v2258_v26, %v20242_v57  ;;  %v7642_v6 = vrot.slane %v2236_v8, %v20242_v57 }
 0x271   : > { %v21999_v29 = vsel %vm5756_vm3, %v9330_v30, %v9913_v25  ;;  %v4477_v52 = vrot.slane %v2257_v9, %v20242_v57  ;;  %v22005_v18 = vsel %vm5759_vm4, %v9330_v30, %v9329_v55  ;;  %v27345_v33 = vrot.slane %v27344_v59, 3 }
 0x272   : > { %v2261_v41 = vcombine.high %v2257_v9, %v2257_v9  ;;  %v4449_v8 = vrot.slane %v2260_v39, %v20242_v57  ;;  %v22015_v63 = vmax.f32 %v893_v51, 0.0  ;;  %v4470_v46 = vrot.slane %v4463_v36, %v20242_v57 }
 0x273   : > { %v22012_v21 = vsel %vm5762_vm5, %v27345_v33, %v21596_v23  ;;  %v2277_v60 = vcombine.high %v2269_v42, %v2269_v42  ;;  %v2278_v30 = vcombine.high %v2276_v35, %v2276_v35  ;;  %v22020_v26 = vrot.slane %v2269_v42, %v20242_v57 }
 0x274   : > { %v4442_v25 = vrot.slane %v4435_v54, %v20242_v57  ;;  %v4491_v23 = vrot.slane %v2259_v15, %v20242_v57  ;;  %v7649_v9 = vrot.slane %v7642_v6, %v20242_v57  ;;  %v2292_v55 = vrot.slane %v2276_v35, %v20242_v57 }
 0x275   : > { %v22027_v39 = vrot.slane %v4477_v52, %v20242_v57  ;;  %v9630_v51 = vrot.slane %v21964_v49, %v20242_v57  ;;  %v2299_v50 = vrot.slane %v2277_v60, %v20242_v57  ;;  %v2306_v36 = vrot.slane %v2278_v30, %v20242_v57 }
 0x276   : > { %v4456_v42 = vrot.slane %v4449_v8, %v20242_v57  ;;  %v2307_v54 = vcombine.high %v22020_v26, %v22020_v26  ;;  %v2308_v15 = vcombine.high %v2292_v55, %v2292_v55  ;;  %v7698_v6 = vrot.slane %v2292_v55, %v20242_v57 }
 0x277   : > { %v22038_v35 = vrot.slane %v2261_v41, %v20242_v57  ;;  %v2309_v52 = vcombine.high %v2299_v50, %v2299_v50  ;;  %v2310_v33 = vcombine.high %v2306_v36, %v2306_v36  ;;  %v7656_v14 = vrot.slane %v2299_v50, %v20242_v57 }
 0x278   : > { %v5665_v49 = vunpack.c.l.b16 %v4442_v25  ;;  %v7670_v60 = vrot.slane %v2307_v54, %v20242_v57  ;;  %v22043_v30 = vrot.slane %v7698_v6, %v20242_v57  ;;  %v7712_v8 = vrot.slane %v2306_v36, %v20242_v57 }
 0x279   : > { %v22047_v27 = vrot.slane %v7656_v14, %v20242_v57  ;;  %v7684_v55 = vrot.slane %v2309_v52, %v20242_v57  ;;  %v7726_v41 = vrot.slane %v2308_v15, %v20242_v57  ;;  %v9644_v4 = vrot.slane %v2310_v33, %v20242_v57 }
 0x27a   : > { %v4498_v40 = vrot.slane %v4491_v23, %v20242_v57  ;;  %v5666_v50 = vunpack.c.l.b16 %v4456_v42  ;;  %v7677_v25 = vrot.slane %v7670_v60, %v20242_v57  ;;  %v22055_v54 = vrot.slane %v7712_v8, %v20242_v57  ;;  %v22079_v60 = vpop.f32.mrf.mxu0 }
 0x27b   : > { %v5667_v6 = vunpack.c.l.b16 %v4470_v46  ;;  %v7691_v36 = vrot.slane %v7684_v55, %v20242_v57  ;;  %v7733_v14 = vrot.slane %v7726_v41, %v20242_v57  ;;  %v27038_v2 = vunpack.c.l.b16 %v22047_v27  ;;  %27346 = vst [vmem:[#allocation17_spill] sm:$0xff] %v22079_v60 }
 0x27c   : > { %v6118_v52 = vrot.slane %v5665_v49, 1  ;;  %v8885_v5 = vunpack.c.l.b16 %v7649_v9  ;;  %v9637_v15 = vrot.slane %v9630_v51, %v20242_v57  ;;  %v9651_v33 = vrot.slane %v9644_v4, %v20242_v57  ;;  %v19550_v34 = vpop.f32.mrf.mxu0 }
 0x27d   : > { %v22062_v23 = vunpack.c.l.b16 %v7677_v25  ;;  %v22064_v42 = vunpack.c.l.b16 %v7691_v36  ;;  %v9334_v46 = vrot.slane %v27038_v2, 1  ;;  %v4512_v8 = vrot.slane %v22038_v35, %v20242_v57 }
 0x27e   : > { %v5668_v55 = vunpack.c.l.b16 %v22027_v39  ;;  %v5854_v41 = vrot.slane %v5666_v50, 7  ;;  %v22073_v51 = vunpack.c.l.b16 %v4498_v40  ;;  %v5856_v4 = vrot.slane %v5667_v6, 6  ;;  %v22097_v12 = vpop.f32.mrf.mxu0 }
 0x27f   : > { %v22075_v25 = vunpack.c.l.b16 %v7733_v14  ;;  %v9335_v36 = vsel %vm5750_vm1, %v22062_v23, %v9334_v46  ;;  %v6120_v44 = vrot.slane %v5667_v6, 7  ;;  %v9068_v2 = vrot.slane %v8885_v5, 3 }
 0x280   : > { %v9336_v48 = vrot.slane %v22064_v42, 7  ;;  %v9844_v35 = vunpack.c.l.b16 %v9651_v33  ;;  %v6119_v39 = vsel %vm5750_vm1, %v5666_v50, %v6118_v52  ;;  %v9332_v7 = vrot.slane %v8885_v5, 4 }
 0x281   : > { %v27347_v9 = vunpack.c.l.b16 %v22043_v30  ;;  %v27348_v19 = vmax.f32 %v21979_v28, 0.0  ;;  %v5855_v46 = vsel %vm5750_vm1, %v5854_v41, %v5665_v49  ;;  %v27349_v6 = vunpack.c.l.b16 %v22055_v54 }
 0x282   : > { %v9337_v60 = vsel %vm5753_vm2, %v9336_v48, %v9335_v36  ;;  %v9918_v33 = vsel %vm5750_vm1, %v9336_v48, %v22062_v23  ;;  %v9843_v52 = vunpack.c.l.b16 %v9637_v15  ;;  %v9922_v49 = vrot.slane %v9844_v35, 3 }
 0x283   : > { %v9338_v40 = vrot.slane %v27347_v9, 6  ;;  %v1231_v14 = vpack.c.bf16 %v22015_v63, %v27348_v19  ;;  %v9340_v3 = vrot.slane %v27349_v6, 5  ;;  %v9342_v9 = vrot.slane %v22075_v25, 4 }
 0x284   : > { %v5857_v36 = vsel %vm5753_vm2, %v5856_v4, %v5855_v46  ;;  %v5858_v6 = vrot.slane %v5668_v55, 5  ;;  %v6702_v35 = vsel %vm5750_vm1, %v6120_v44, %v5666_v50  ;;  %v6428_v4 = vrot.slane %v22020_v26, %v20242_v57 }
 0x285   : > { %v9339_v5 = vsel %vm5756_vm3, %v9338_v40, %v9337_v60  ;;  %v9919_v28 = vsel %vm5753_vm2, %v9338_v40, %v9918_v33  ;;  %v2318_v41 = vrot.slane %v1231_v14, %v20242_v57  ;;  %v18605_v60 = vpack.c.bf16 %v22015_v63, %v22015_v63  ;;  %v19551_v40 = vpop.f32.mrf.mxu0 }
 0x286   : > { %v9341_v34 = vsel %vm5759_vm4, %v9340_v3, %v9339_v5  ;;  %v9920_v19 = vsel %vm5756_vm3, %v9340_v3, %v9919_v28  ;;  %v6121_v33 = vsel %vm5753_vm2, %v6120_v44, %v6119_v39  ;;  %v6122_v5 = vrot.slane %v5668_v55, 6 }
 0x287   : > { %v22104_v48 = vsel %vm5762_vm5, %v9342_v9, %v9341_v34  ;;  %v9921_v15 = vsel %vm5759_vm4, %v9342_v9, %v9920_v19  ;;  %v9070_v14 = vrot.slane %v22062_v23, 7  ;;  %v5670_v9 = vunpack.c.l.b16 %v4512_v8 }
 0x288   : > { %27350 = vst [vmem:[#allocation58_spill] sm:$0xff] %v22104_v48  ;;  %v22111_v3 = vsel %vm5762_vm5, %v9922_v49, %v9921_v15  ;;  %v5859_v63 = vsel %vm5756_vm3, %v5858_v6, %v5857_v36  ;;  %v9916_v28 = vrot.slane %v9843_v52, 3  ;;  %v2326_v34 = vcombine.high %v2318_v41, %v2318_v41 }
 0x289   : > { %v5860_v55 = vrot.slane %v22073_v51, 4  ;;  %v6124_v39 = vrot.slane %v22073_v51, 5  ;;  %v9915_v44 = vsel %vm5759_vm4, %v9332_v7, %v21999_v29  ;;  %v2325_v50 = vrot.slane %v18605_v60, %v20242_v57 }
 0x28a   : > { %v6123_v26 = vsel %vm5756_vm3, %v6122_v5, %v6121_v33  ;;  %v6703_v23 = vsel %vm5753_vm2, %v6122_v5, %v6702_v35  ;;  %v9072_v19 = vrot.slane %v22064_v42, 6  ;;  %v2334_v8 = vrot.slane %v2318_v41, %v20242_v57 }
 0x28b   : > { %v5861_v52 = vsel %vm5759_vm4, %v5860_v55, %v5859_v63  ;;  %v22132_v49 = vsel %vm5762_vm5, %v9068_v2, %v21992_v16  ;;  %v6435_v51 = vrot.slane %v6428_v4, %v20242_v57  ;;  %v27351_v29 = vunpack.c.l.b16 %v22047_v27 }
 0x28c   : > { %v5862_v15 = vrot.slane %v5670_v9, 3  ;;  %v6126_v60 = vrot.slane %v5670_v9, 4  ;;  %v9917_v40 = vsel %vm5762_vm5, %v9916_v28, %v9915_v44  ;;  %v2348_v42 = vrot.slane %v2326_v34, %v20242_v57  ;;  %v22152_v34 = vpop.f32.mrf.mxu0 }
 0x28d   : > { %v9071_v36 = vsel %vm5750_vm1, %v9070_v14, %v27351_v29  ;;  %v6125_v41 = vsel %vm5759_vm4, %v6124_v39, %v6123_v26  ;;  %v6704_v6 = vsel %vm5756_vm3, %v6124_v39, %v6703_v23  ;;  %v9333_v2 = vsel %vm5762_vm5, %v9332_v7, %v22005_v18  ;;  %v27354_v29 = vld [vmem:[#allocation38_spill] sm:$0xff] }
 0x28e   : > { %v2327_v16 = vcombine.high %v2325_v50, %v2325_v50  ;;  %v22145_v33 = vsel %vm5762_vm5, %v5862_v15, %v5861_v52  ;;  %v9073_v27 = vsel %vm5753_vm2, %v9072_v19, %v9071_v36  ;;  %v2341_v5 = vrot.slane %v2325_v50, %v20242_v57  ;;  %v19554_v19 = vpop.f32.mrf.mxu0  ;;  %v27355_v36 = vld [vmem:[#allocation37_spill] sm:$0xff] }
 0x28f   : > { %v2356_v35 = vcombine.high %v2334_v8, %v2334_v8  ;;  %v18662_v4 = vpack.c.b16 %v9917_v40, %v9333_v2  ;;  %v6628_v14 = vunpack.c.l.b16 %v6435_v51  ;;  %v27352_v9 = vunpack.c.l.b16 %v22043_v30 }
 0x290   : > { %v4519_v28 = vrot.slane %v2334_v8, %v20242_v57  ;;  %v22155_v7 = vsel %vm5762_vm5, %v6126_v60, %v6125_v41  ;;  %v22160_v55 = vsel %vm5759_vm4, %v6126_v60, %v6704_v6  ;;  %v4533_v39 = vrot.slane %v2348_v42, %v20242_v57 }
 0x291   : > { %v9074_v63 = vrot.slane %v27352_v9, 5  ;;  %v27353_v50 = vunpack.c.l.b16 %v22055_v54  ;;  %v2355_v23 = vrot.slane %v2327_v16, %v20242_v57  ;;  %v2358_v8 = vcombine.high %v2348_v42, %v2348_v42  ;;  %v22186_v42 = vpop.f32.mrf.mxu0  ;;  %v27362_v9 = vld [vmem:[#allocation8_spill] sm:$0xff] }
 0x292   : > { %v4547_v52 = vrot.slane %v2356_v35, %v20242_v57  ;;  %v4575_v51 = vrot.slane %v2341_v5, %v20242_v57  ;;  %v27356_v15 = vpack.c.b16 %v27354_v29, %v27355_v36  ;;  %v22178_v40 = vrot.slane %v18662_v4, %v20242_v57 }
 0x293   : > { %v9075_v30 = vsel %vm5756_vm3, %v9074_v63, %v9073_v27  ;;  %v9076_v26 = vrot.slane %v27353_v50, 4  ;;  %v22180_v41 = vrot.slane %v6628_v14, 3  ;;  %v22184_v6 = vrot.slane %v4519_v28, %v20242_v57  ;;  %v27359_v27 = vld [vmem:[#allocation18_spill] sm:$0xff]  ;;  %v27361_v14 = vld [vmem:[#allocation7_spill] sm:$0xff] }
 0x294   : > { %v22175_v60 = vrot.slane %v27356_v15, %v20242_v57  ;;  %27358 = vst [vmem:[#allocation37_spill] sm:$0xff] %v22178_v40  ;;  %v4540_v16 = vrot.slane %v4533_v39, %v20242_v57  ;;  %v27360_v35 = vrot.slane %v27344_v59, 4  ;;  %v27363_v63 = vpack.c.b16 %v27361_v14, %v27362_v9 }
 0x295   : > { %v22189_v2 = vsel %vm5759_vm4, %v9076_v26, %v9075_v30  ;;  %v2357_v28 = vcombine.high %v2341_v5, %v2341_v5  ;;  %v2359_v19 = vcombine.high %v2355_v23, %v2355_v23  ;;  %v4589_v29 = vrot.slane %v2355_v23, %v20242_v57  ;;  %v19555_v26 = vpop.f32.mrf.mxu0 }
 0x296   : > { %27357 = vst [vmem:[#allocation38_spill] sm:$0xff] %v22175_v60  ;;  %v6087_v4 = vsel %vm5762_vm5, %v27360_v35, %v27359_v27  ;;  %v22200_v50 = vrot.slane %v27363_v63, %v20242_v57  ;;  %v11005_v30 = vcombine.high %v21412_v61, %v21632_v11  ;;  %v4554_v39 = vrot.slane %v4547_v52, %v20242_v57 }
 0x297   : > { %v4561_v59 = vrot.slane %v2358_v8, %v20242_v57  ;;  %v22208_v36 = vrot.slane %v4575_v51, %v20242_v57  ;;  %v5671_v27 = vunpack.c.l.b16 %v22184_v6  ;;  %v18651_v5 = vpack.c.b16 %v6087_v4, %v22012_v21 }
 0x298   : > { %27364 = vst [vmem:[#allocation18_spill] sm:$0xff] %v22200_v50  ;;  %v11006_v15 = vcombine.low %v22200_v50, %v22175_v60  ;;  %v27365_v23 = vpack.c.b16 %v21545_v31, %v21506_v56  ;;  %v27366_v52 = vpack.c.b16 %v21571_v24, %v21562_v45  ;;  %v22224_v51 = vunpack.c.l.b16 %v4540_v16 }
 0x299   : > { %v27369_v21 = vpack.c.b16 %v21813_v58, %v21609_v62  ;;  %v11178_v56 = vcombine.low %v21838_v38, %v21874_v13  ;;  %v22236_v31 = vrot.slane %v11005_v30, %v20242_v57  ;;  %v11072_v45 = vrot.slane %v18651_v5, %v20242_v57 }
 0x29a   : > { %v11079_v11 = vrot.slane %v27365_v23, %v20242_v57  ;;  %v22222_v8 = vrot.slane %v27366_v52, %v20242_v57  ;;  %v22227_v35 = vrot.slane %v11006_v15, %v20242_v57  ;;  %v901_v16 = vadd.f32 %v21718_v47, %v20231_v43 }
 0x29b   : > { %v11161_v6 = vrot.slane %v27369_v21, %v20242_v57  ;;  %27370 = vst [vmem:[#allocation59_spill] sm:$0xff] %v22236_v31  ;;  %v22248_v9 = vrot.slane %v11178_v56, %v20242_v57  ;;  %v4568_v5 = vrot.slane %v4561_v59, %v20242_v57  ;;  %v5673_v23 = vunpack.c.l.b16 %v4554_v39 }
 0x29c   : > { %27367 = vst [vmem:[#allocation7_spill] sm:$0xff] %v22222_v8  ;;  %27368 = vst [vmem:[#allocation8_spill] sm:$0xff] %v22227_v35  ;;  %v11096_v24 = vcombine.low %v22222_v8, %v21781_v0  ;;  %v11037_v4 = vcombine.high %v21660_v22, %v22227_v35  ;;  %v11094_v63 = vcombine.low %v11072_v45, %v11079_v11  ;;  %v1157_v15 = vmax.f32 %v901_v16, 0.0 }
 0x29d   : > { %v11176_v58 = vcombine.low %v21781_v0, %v11161_v6  ;;  %v11177_v14 = vcombine.high %v21781_v0, %v11161_v6  ;;  %27371 = vst [vmem:[#allocation60_spill] sm:$0xff] %v22248_v9  ;;  %v11095_v30 = vcombine.high %v11072_v45, %v11079_v11  ;;  %v22255_v47 = vrot.slane %v2357_v28, %v20242_v57  ;;  %v22266_v45 = vpop.f32.mrf.mxu0 }
 0x29e   : > { %v22251_v26 = vrot.slane %v11096_v24, %v20242_v57  ;;  %v22261_v21 = vrot.slane %v4589_v29, %v20242_v57  ;;  %v11104_v6 = vrot.slane %v11094_v63, %v20242_v57  ;;  %v18724_v56 = vcombine.low %v22236_v31, %v11037_v4 }
 0x29f   : > { %v22258_v52 = vrot.slane %v11176_v58, %v20242_v57  ;;  %v11111_v11 = vrot.slane %v11095_v30, %v20242_v57  ;;  %v5864_v59 = vrot.slane %v22224_v51, 7  ;;  %v22270_v39 = vrot.slane %v11177_v14, %v20242_v57  ;;  %v19558_v30 = vpop.f32.mrf.mxu0 }
 0x2a0   : > { %27372 = vst [vmem:[#allocation61_spill] sm:$0xff] %v22251_v26  ;;  %v27375_v24 = vmax.f32 %v21988_v37, 0.0  ;;  %v6128_v16 = vrot.slane %v5671_v27, 1  ;;  %v22277_v58 = vrot.slane %v2359_v19, %v20242_v57  ;;  %v11127_v63 = vcombine.high %v11104_v6, %v22251_v26 }
 0x2a1   : > { %27373 = vst [vmem:[#allocation62_spill] sm:$0xff] %v22258_v52  ;;  %27374 = vst [vmem:[#allocation63_spill] sm:$0xff] %v22270_v39  ;;  %v11209_v28 = vcombine.high %v22258_v52, %v22248_v9  ;;  %v18726_v4 = vcombine.low %v11104_v6, %v11111_v11  ;;  %v5674_v46 = vunpack.c.l.b16 %v4568_v5  ;;  %v5675_v44 = vunpack.c.l.b16 %v22208_v36  ;;  %v22285_v31 = vpop.f32.mrf.mxu0 }
 0x2a2   : > { %v1232_v29 = vpack.c.bf16 %v1157_v15, %v27375_v24  ;;  %v5866_v18 = vrot.slane %v5673_v23, 6  ;;  %v6130_v54 = vrot.slane %v5673_v23, 7  ;;  %v18728_v9 = vcombine.low %v11127_v63, %v22258_v52 }
 0x2a3   : > { %v18730_v14 = vcombine.low %v22270_v39, %v11209_v28  ;;  %v13094_v37 = vrot.slane %v18724_v56, %v20242_v57  ;;  %v13108_v24 = vrot.slane %v18726_v4, %v20242_v57  ;;  %v5865_v19 = vsel %vm5750_vm1, %v5864_v59, %v5671_v27  ;;  %v19559_v30 = vpop.f32.mrf.mxu0 }
 0x2a4   : > { %v18606_v11 = vpack.c.bf16 %v1157_v15, %v1157_v15  ;;  %v2367_v5 = vrot.slane %v1232_v29, %v20242_v57  ;;  %v6129_v36 = vsel %vm5750_vm1, %v22224_v51, %v6128_v16  ;;  %v13122_v23 = vrot.slane %v18728_v9, %v20242_v57 }
 0x2a5   : > { %v13136_v6 = vrot.slane %v18730_v14, %v20242_v57  ;;  %v13145_v28 = vcombine.high %v13094_v37, %v13108_v24  ;;  %v13144_v63 = vcombine.low %v13094_v37, %v13108_v24  ;;  %v5676_v56 = vunpack.c.l.b16 %v22261_v21  ;;  %v22299_v16 = vpop.f32.mrf.mxu0 }
 0x2a6   : > { %v5868_v4 = vrot.slane %v5674_v46, 5  ;;  %v6449_v26 = vrot.slane %v22255_v47, %v20242_v57  ;;  %v7747_v27 = vrot.slane %v22277_v58, %v20242_v57  ;;  %v5867_v15 = vsel %vm5753_vm2, %v5866_v18, %v5865_v19 }
 0x2a7   : > { %v6132_v59 = vrot.slane %v5674_v46, 6  ;;  %v13149_v29 = vcombine.high %v13122_v23, %v13136_v6  ;;  %v13148_v14 = vcombine.low %v13122_v23, %v13136_v6  ;;  %v6131_v9 = vsel %vm5753_vm2, %v6130_v54, %v6129_v36  ;;  %v19562_v19 = vpop.f32.mrf.mxu0 }
 0x2a8   : > { %v2374_v37 = vrot.slane %v18606_v11, %v20242_v57  ;;  %v2375_v24 = vcombine.high %v2367_v5, %v2367_v5  ;;  %v909_v21 = vadd.f32 %v21805_v32, %v20231_v43  ;;  %v22306_v47 = vrot.slane %v13145_v28, %v20242_v57 }
 0x2a9   : > { %v22309_v58 = vrot.slane %v13149_v29, %v20242_v57  ;;  %v22312_v46 = vrot.slane %v13144_v63, %v20242_v57  ;;  %v22315_v18 = vrot.slane %v13148_v14, %v20242_v57  ;;  %v5870_v6 = vrot.slane %v5675_v44, 4  ;;  %v22327_v29 = vpop.f32.mrf.mxu0 }
 0x2aa   : > { %27376 = vst [vmem:[#allocation64_spill] sm:$0xff] %v22306_v47  ;;  %v6134_v36 = vrot.slane %v5675_v44, 5  ;;  %v6708_v11 = vsel %vm5750_vm1, %v6130_v54, %v22224_v51  ;;  %v2383_v32 = vrot.slane %v2367_v5, %v20242_v57  ;;  %v5869_v23 = vsel %vm5756_vm3, %v5868_v4, %v5867_v15 }
 0x2ab   : > { %27377 = vst [vmem:[#allocation65_spill] sm:$0xff] %v22309_v58  ;;  %27378 = vst [vmem:[#allocation66_spill] sm:$0xff] %v22312_v46  ;;  %v13212_v28 = vcombine.low %v22306_v47, %v22309_v58  ;;  %v13208_v63 = vcombine.low %v22312_v46, %v22315_v18  ;;  %v906_v30 = vadd.f32 %v21786_v20, %v20231_v43  ;;  %v5872_v14 = vrot.slane %v5676_v56, 3  ;;  %v19563_v39 = vpop.f32.mrf.mxu0 }
 0x2ac   : > { %27379 = vst [vmem:[#allocation67_spill] sm:$0xff] %v22315_v18  ;;  %v6133_v44 = vsel %vm5756_vm3, %v6132_v59, %v6131_v9  ;;  %v2376_v19 = vcombine.high %v2374_v37, %v2374_v37  ;;  %v2397_v54 = vrot.slane %v2375_v24, %v20242_v57  ;;  %v6136_v51 = vrot.slane %v5676_v56, 4 }
 0x2ad   : > { %v22331_v5 = vunpack.c.l.b16 %v6449_v26  ;;  %v6709_v4 = vsel %vm5753_vm2, %v6132_v59, %v6708_v11  ;;  %14936 = vmatprep.mubr.bf16.mxu1 %v13212_v28  ;;  %v1159_v15 = vmax.f32 %v909_v21, 0.0  ;;  %v5871_v52 = vsel %vm5759_vm4, %v5870_v6, %v5869_v23 }
 0x2ae   : > { %14937 = vmatmul.mubr.bf16.gmra.mxu1 %v13208_v63  ;;  %v2405_v20 = vcombine.high %v2383_v32, %v2383_v32  ;;  %v7754_v38 = vrot.slane %v2383_v32, %v20242_v57  ;;  %v917_v9 = vadd.f32 %v21850_v10, %v20231_v43  ;;  %v6135_v8 = vsel %vm5759_vm4, %v6134_v36, %v6133_v44 }
 0x2af   : > { %v22339_v24 = vunpack.c.l.b16 %v7747_v27  ;;  %v2390_v26 = vrot.slane %v2374_v37, %v20242_v57  ;;  %v1158_v56 = vmax.f32 %v906_v30, 0.0  ;;  %v6710_v59 = vsel %vm5756_vm3, %v6134_v36, %v6709_v4 }
 0x2b0   : > { %v2404_v39 = vrot.slane %v2376_v19, %v20242_v57  ;;  %v2407_v21 = vcombine.high %v2397_v54, %v2397_v54  ;;  %v7768_v6 = vrot.slane %v2397_v54, %v20242_v57  ;;  %v22348_v11 = vsel %vm5762_vm5, %v22180_v41, %v22160_v55 }
 0x2b1   : > { %27380 = vst [vmem:[#allocation68_spill] sm:$0xff] %v22348_v11  ;;  %v27381_v10 = vrot.slane %v22075_v25, 3  ;;  %v22357_v37 = vsel %vm5762_vm5, %v5872_v14, %v5871_v52  ;;  %v1233_v36 = vpack.c.bf16 %v1159_v15, %v1158_v56  ;;  %v22360_v32 = vsel %vm5762_vm5, %v6136_v51, %v6135_v8 }
 0x2b2   : > { %v7761_v23 = vrot.slane %v7754_v38, %v20242_v57  ;;  %v7782_v28 = vrot.slane %v2405_v20, %v20242_v57  ;;  %v1161_v63 = vmax.f32 %v917_v9, 0.0  ;;  %v22365_v55 = vsel %vm5759_vm4, %v6136_v51, %v6710_v59 }
 0x2b3   : > { %v22354_v27 = vsel %vm5762_vm5, %v27381_v10, %v22189_v2  ;;  %v9344_v41 = vrot.slane %v22339_v24, 1  ;;  %v7810_v2 = vrot.slane %v2390_v26, %v20242_v57  ;;  %v2406_v52 = vcombine.high %v2390_v26, %v2390_v26 }
 0x2b4   : > { %v2408_v30 = vcombine.high %v2404_v39, %v2404_v39  ;;  %v22371_v14 = vrot.slane %v7768_v6, %v20242_v57  ;;  %v7796_v8 = vrot.slane %v2407_v21, %v20242_v57  ;;  %v18607_v44 = vpack.c.bf16 %v1159_v15, %v1159_v15  ;;  %v22388_v21 = vpop.f32.mrf.mxu0 }
 0x2b5   : > { %v2416_v19 = vrot.slane %v1233_v36, %v20242_v57  ;;  %v22379_v54 = vadd.f32 %v21864_v1, %v20231_v43  ;;  %v7789_v51 = vrot.slane %v7782_v28, %v20242_v57  ;;  %v8893_v4 = vunpack.c.l.b16 %v7761_v23 }
 0x2b6   : > { %v9658_v20 = vrot.slane %v2404_v39, %v20242_v57  ;;  %v18608_v9 = vpack.c.bf16 %v1161_v63, %v1161_v63  ;;  %v22384_v26 = vrot.slane %v7810_v2, %v20242_v57  ;;  %v2423_v56 = vrot.slane %v18607_v44, %v20242_v57  ;;  %v19566_v2 = vpop.f32.mrf.mxu0 }
 0x2b7   : > { %v2424_v59 = vcombine.high %v2416_v19, %v2416_v19  ;;  %v2431_v15 = vrot.slane %v2416_v19, %v20242_v57  ;;  %v7803_v6 = vrot.slane %v7796_v8, %v20242_v57  ;;  %v8894_v1 = vunpack.c.l.b16 %v22371_v14 }
 0x2b8   : > { %v10116_v10 = vrot.slane %v2406_v52, %v20242_v57  ;;  %v10130_v36 = vrot.slane %v2408_v30, %v20242_v57  ;;  %v2438_v39 = vrot.slane %v2423_v56, %v20242_v57  ;;  %v22397_v44 = vunpack.c.l.b16 %v7789_v51  ;;  %v22404_v25 = vpop.f32.mrf.mxu0 }
 0x2b9   : > { %v2445_v23 = vrot.slane %v2424_v59, %v20242_v57  ;;  %v2446_v28 = vcombine.high %v2431_v15, %v2431_v15  ;;  %v10144_v63 = vrot.slane %v2431_v15, %v20242_v57  ;;  %v9080_v19 = vrot.slane %v8893_v4, 7 }
 0x2ba   : > { %v9345_v38 = vsel %vm5750_vm1, %v8893_v4, %v9344_v41  ;;  %v2455_v8 = vrot.slane %v18608_v9, %v20242_v57  ;;  %v9346_v59 = vrot.slane %v8894_v1, 7  ;;  %v10123_v15 = vrot.slane %v10116_v10, %v20242_v57  ;;  %v19567_v22 = vpop.f32.mrf.mxu0 }
 0x2bb   : > { %v2447_v14 = vcombine.high %v2445_v23, %v2445_v23  ;;  %v10151_v52 = vrot.slane %v10144_v63, %v20242_v57  ;;  %v10158_v30 = vrot.slane %v2445_v23, %v20242_v57  ;;  %v10172_v56 = vrot.slane %v2446_v28, %v20242_v57 }
 0x2bc   : > { %v10137_v51 = vrot.slane %v10130_v36, %v20242_v57  ;;  %v10494_v2 = vrot.slane %v2438_v39, %v20242_v57  ;;  %v22414_v28 = vrot.slane %v9658_v20, %v20242_v57  ;;  %v2456_v10 = vcombine.high %v2455_v8, %v2455_v8  ;;  %v22455_v48 = vpop.f32.mrf.mxu0 }
 0x2bd   : > { %v10165_v41 = vrot.slane %v10158_v30, %v20242_v57  ;;  %v10179_v9 = vrot.slane %v10172_v56, %v20242_v57  ;;  %v10186_v0 = vrot.slane %v2447_v14, %v20242_v57  ;;  %v10370_v63 = vunpack.c.l.b16 %v10151_v52 }
 0x2be   : > { %v10501_v35 = vrot.slane %v10494_v2, %v20242_v57  ;;  %v22417_v46 = vunpack.c.l.b16 %v7803_v6  ;;  %v9348_v56 = vrot.slane %v22397_v44, 6  ;;  %v9924_v14 = vsel %vm5750_vm1, %v9346_v59, %v8893_v4 }
 0x2bf   : > { %v10193_v36 = vrot.slane %v10186_v0, %v20242_v57  ;;  %v10371_v39 = vunpack.c.l.b16 %v10165_v41  ;;  %v22420_v30 = vunpack.c.l.b16 %v10179_v9  ;;  %v10369_v22 = vunpack.c.l.b16 %v10137_v51 }
 0x2c0   : > { %v10442_v52 = vrot.slane %v10370_v63, 7  ;;  %v10368_v23 = vunpack.c.l.b16 %v10123_v15  ;;  %v10531_v20 = vunpack.c.l.b16 %v10501_v35  ;;  %v2463_v2 = vrot.slane %v2455_v8, %v20242_v57 }
 0x2c1   : > { %v22424_v18 = vunpack.c.l.b16 %v10193_v36  ;;  %v10444_v50 = vrot.slane %v10371_v39, 6  ;;  %v2470_v41 = vrot.slane %v2456_v10, %v20242_v57  ;;  %v9081_v9 = vsel %vm5750_vm1, %v9080_v19, %v22339_v24 }
 0x2c2   : > { %v10540_v0 = vsel %vm5750_vm1, %v10442_v52, %v10369_v22  ;;  %v9082_v60 = vrot.slane %v8894_v1, 6  ;;  %v9084_v4 = vrot.slane %v22397_v44, 5  ;;  %v9347_v51 = vsel %vm5753_vm2, %v9346_v59, %v9345_v38 }
 0x2c3   : > { %v27070_v15 = vrot.slane %v22424_v18, 4  ;;  %v9350_v35 = vrot.slane %v22417_v46, 5  ;;  %v10541_v8 = vsel %vm5753_vm2, %v10444_v50, %v10540_v0  ;;  %v925_v36 = vadd.f32 %v21879_v17, %v20231_v43 }
 0x2c4   : > { %v9925_v6 = vsel %vm5753_vm2, %v9348_v56, %v9924_v14  ;;  %v27382_v10 = vrot.slane %v22420_v30, 5  ;;  %v10544_v1 = vrot.slane %v10531_v20, 3  ;;  %v2471_v19 = vcombine.high %v2463_v2, %v2463_v2 }
 0x2c5   : > { %v10396_v44 = vrot.slane %v10369_v22, 7  ;;  %v10440_v61 = vrot.slane %v10368_v23, 1  ;;  %v4617_v59 = vrot.slane %v2470_v41, %v20242_v57  ;;  %v27383_v0 = vunpack.c.l.b16 %v22384_v26 }
 0x2c6   : > { %v10542_v24 = vsel %vm5756_vm3, %v27382_v10, %v10541_v8  ;;  %v10398_v17 = vrot.slane %v10370_v63, 6  ;;  %v4603_v58 = vrot.slane %v2463_v2, %v20242_v57  ;;  %v9083_v20 = vsel %vm5753_vm2, %v9082_v60, %v9081_v9 }
 0x2c7   : > { %v10543_v38 = vsel %vm5759_vm4, %v27070_v15, %v10542_v24  ;;  %v9352_v47 = vrot.slane %v27383_v0, 4  ;;  %v9349_v8 = vsel %vm5756_vm3, %v9348_v56, %v9347_v51  ;;  %v2472_v10 = vcombine.high %v2470_v41, %v2470_v41  ;;  %v19570_v56 = vpop.f32.mrf.mxu0 }
 0x2c8   : > { %v22450_v14 = vsel %vm5762_vm5, %v10544_v1, %v10543_v38  ;;  %v1163_v62 = vmax.f32 %v925_v36, 0.0  ;;  %v9845_v24 = vunpack.c.l.b16 %v22414_v28  ;;  %v9926_v15 = vsel %vm5756_vm3, %v9350_v35, %v9925_v6 }
 0x2c9   : > { %27384 = vst [vmem:[#allocation69_spill] sm:$0xff] %v22450_v14  ;;  %v4631_v0 = vrot.slane %v2471_v19, %v20242_v57  ;;  %v1162_v63 = vmax.f32 %v22379_v54, 0.0  ;;  %v10397_v1 = vsel %vm5750_vm1, %v10396_v44, %v10368_v23  ;;  %v10441_v2 = vsel %vm5750_vm1, %v10369_v22, %v10440_v61  ;;  %v22471_v61 = vpop.f32.mrf.mxu0 }
 0x2ca   : > { %v10400_v38 = vrot.slane %v10371_v39, 5  ;;  %v4624_v60 = vrot.slane %v4617_v59, %v20242_v57  ;;  %v9086_v41 = vrot.slane %v22417_v46, 4  ;;  %v10399_v9 = vsel %vm5753_vm2, %v10398_v17, %v10397_v1 }
 0x2cb   : > { %v10443_v28 = vsel %vm5753_vm2, %v10442_v52, %v10441_v2  ;;  %v4610_v6 = vrot.slane %v4603_v58, %v20242_v57  ;;  %v9351_v51 = vsel %vm5759_vm4, %v9350_v35, %v9349_v8  ;;  %v9927_v54 = vsel %vm5759_vm4, %v9352_v47, %v9926_v15  ;;  %v19571_v59 = vpop.f32.mrf.mxu0 }
 0x2cc   : > { %v4645_v23 = vrot.slane %v2472_v10, %v20242_v57  ;;  %v1235_v36 = vpack.c.bf16 %v1163_v62, %v1162_v63  ;;  %v9085_v39 = vsel %vm5756_vm3, %v9084_v4, %v9083_v20  ;;  %v9928_v22 = vrot.slane %v9845_v24, 3 }
 0x2cd   : > { %v10402_v46 = vrot.slane %v22420_v30, 4  ;;  %v4638_v19 = vrot.slane %v4631_v0, %v20242_v57  ;;  %v27385_v52 = vunpack.c.l.b16 %v22384_v26  ;;  %v10401_v58 = vsel %vm5756_vm3, %v10400_v38, %v10399_v9  ;;  %v27388_v38 = vld [vmem:[#allocation55_spill] sm:$0xff] }
 0x2ce   : > { %v10445_v35 = vsel %vm5756_vm3, %v10444_v50, %v10443_v28  ;;  %v5678_v15 = vunpack.c.l.b16 %v4624_v60  ;;  %v9353_v17 = vsel %vm5762_vm5, %v9352_v47, %v9351_v51  ;;  %v9929_v8 = vsel %vm5762_vm5, %v9928_v22, %v9927_v54  ;;  %v27387_v47 = vld [vmem:[#allocation48_spill] sm:$0xff] }
 0x2cf   : > { %v9088_v44 = vrot.slane %v27385_v52, 3  ;;  %v5677_v10 = vunpack.c.l.b16 %v4610_v6  ;;  %v18609_v4 = vpack.c.bf16 %v1163_v62, %v1163_v62  ;;  %v9087_v20 = vsel %vm5759_vm4, %v9086_v41, %v9085_v39 }
 0x2d0   : > { %v10404_v24 = vrot.slane %v22424_v18, 3  ;;  %v4652_v0 = vrot.slane %v4645_v23, %v20242_v57  ;;  %v2480_v26 = vrot.slane %v1235_v36, %v20242_v57  ;;  %v10403_v63 = vsel %vm5759_vm4, %v10402_v46, %v10401_v58 }
 0x2d1   : > { %v27386_v50 = vrot.slane %v22420_v30, 5  ;;  %v5679_v2 = vunpack.c.l.b16 %v4638_v19  ;;  %v18658_v60 = vpack.c.b16 %v27388_v38, %v27387_v47  ;;  %v18664_v62 = vpack.c.b16 %v22354_v27, %v22348_v11 }
 0x2d2   : > { %v27389_v56 = vrot.slane %v22331_v5, 3  ;;  %v18668_v9 = vpack.c.b16 %v9929_v8, %v9353_v17  ;;  %v5874_v28 = vrot.slane %v5678_v15, 7  ;;  %v27391_v30 = vpack.c.b16 %v22360_v32, %v22357_v37  ;;  %v27394_v32 = vld [vmem:[#allocation52_spill] sm:$0xff] }
 0x2d3   : > { %v10447_v1 = vsel %vm5759_vm4, %v27386_v50, %v10445_v35  ;;  %v22507_v51 = vsel %vm5762_vm5, %v9088_v44, %v9087_v20  ;;  %v6138_v54 = vrot.slane %v5677_v10, 1  ;;  %v2487_v27 = vrot.slane %v18609_v4, %v20242_v57 }
 0x2d4   : > { %v22498_v41 = vsel %vm5762_vm5, %v27389_v56, %v22365_v55  ;;  %v22504_v6 = vrot.slane %v27391_v30, %v20242_v57  ;;  %v22511_v23 = vsel %vm5762_vm5, %v10404_v24, %v10403_v63  ;;  %v27393_v5 = vrot.slane %v22424_v18, 4  ;;  %v27397_v63 = vld [vmem:[#allocation53_spill] sm:$0xff] }
 0x2d5   : > { %27390 = vst [vmem:[#allocation55_spill] sm:$0xff] %v22498_v41  ;;  %v5680_v36 = vunpack.c.l.b16 %v4652_v0  ;;  %v2488_v39 = vcombine.high %v2480_v26, %v2480_v26  ;;  %v5876_v22 = vrot.slane %v5679_v2, 6  ;;  %v6140_v37 = vrot.slane %v5679_v2, 7  ;;  %v27396_v0 = vld [vmem:[#allocation54_spill] sm:$0xff]  ;;  %v27400_v30 = vld [vmem:[#allocation57_spill] sm:$0xff] }
 0x2d6   : > { %27392 = vst [vmem:[#allocation70_spill] sm:$0xff] %v22504_v6  ;;  %v22516_v55 = vsel %vm5762_vm5, %v27393_v5, %v10447_v1  ;;  %v22520_v46 = vadd.f32 %v27394_v32, %v20231_v43  ;;  %v11243_v19 = vrot.slane %v18658_v60, %v20242_v57  ;;  %v22526_v44 = vrot.slane %v18668_v9, %v20242_v57  ;;  %v22545_v60 = vpop.f32.mrf.mxu0 }
 0x2d7   : > { %v5875_v18 = vsel %vm5750_vm1, %v5874_v28, %v5677_v10  ;;  %v2496_v58 = vrot.slane %v2480_v26, %v20242_v57  ;;  %v6139_v59 = vsel %vm5750_vm1, %v5678_v15, %v6138_v54  ;;  %v2489_v17 = vcombine.high %v2487_v27, %v2487_v27 }
 0x2d8   : > { %27395 = vst [vmem:[#allocation52_spill] sm:$0xff] %v22526_v44  ;;  %v2503_v8 = vrot.slane %v2487_v27, %v20242_v57  ;;  %v5878_v4 = vrot.slane %v5680_v36, 5  ;;  %v6142_v20 = vrot.slane %v5680_v36, 6  ;;  %v2510_v24 = vrot.slane %v2488_v39, %v20242_v57 }
 0x2d9   : > { %v27398_v50 = vpack.c.b16 %v27396_v0, %v27397_v63  ;;  %v5877_v10 = vsel %vm5753_vm2, %v5876_v22, %v5875_v18  ;;  %v6714_v26 = vsel %vm5750_vm1, %v6140_v37, %v5678_v15  ;;  %v1164_v2 = vmax.f32 %v22520_v46, 0.0  ;;  %v19574_v22 = vpop.f32.mrf.mxu0 }
 0x2da   : > { %v11258_v38 = vcombine.low %v21874_v13, %v11243_v19  ;;  %v6141_v56 = vsel %vm5753_vm2, %v6140_v37, %v6139_v59  ;;  %v2518_v9 = vcombine.high %v2496_v58, %v2496_v58  ;;  %v4659_v28 = vrot.slane %v2496_v58, %v20242_v57 }
 0x2db   : > { %v22539_v1 = vrot.slane %v27398_v50, %v20242_v57  ;;  %v2517_v27 = vrot.slane %v2489_v17, %v20242_v57  ;;  %v7838_v5 = vrot.slane %v2503_v8, %v20242_v57  ;;  %v11259_v15 = vcombine.high %v21874_v13, %v11243_v19 }
 0x2dc   : > { %v27401_v36 = vpack.c.b16 %v22132_v49, %v21969_v53  ;;  %v22559_v37 = vsel %vm5756_vm3, %v5878_v4, %v5877_v10  ;;  %v22562_v32 = vsel %vm5753_vm2, %v6142_v20, %v6714_v26  ;;  %v2519_v46 = vcombine.high %v2503_v8, %v2503_v8 }
 0x2dd   : > { %27399 = vst [vmem:[#allocation54_spill] sm:$0xff] %v22539_v1  ;;  %v11260_v54 = vcombine.low %v22539_v1, %v27400_v30  ;;  %v2520_v18 = vcombine.high %v2510_v24, %v2510_v24  ;;  %v22565_v58 = vsel %vm5756_vm3, %v6142_v20, %v6141_v56  ;;  %v11268_v59 = vrot.slane %v11258_v38, %v20242_v57 }
 0x2de   : > { %v11325_v39 = vrot.slane %v27401_v36, %v20242_v57  ;;  %v27402_v19 = vpack.c.b16 %v22155_v7, %v22145_v33  ;;  %v11407_v17 = vrot.slane %v18664_v62, %v20242_v57  ;;  %v4666_v4 = vrot.slane %v4659_v28, %v20242_v57 }
 0x2df   : > { %v4673_v0 = vrot.slane %v2510_v24, %v20242_v57  ;;  %v6456_v8 = vrot.slane %v2518_v9, %v20242_v57  ;;  %v22579_v63 = vrot.slane %v11260_v54, %v20242_v57  ;;  %v2521_v20 = vcombine.high %v2517_v27, %v2517_v27 }
 0x2e0   : > { %v22572_v49 = vrot.slane %v27402_v19, %v20242_v57  ;;  %v7845_v50 = vrot.slane %v7838_v5, %v20242_v57  ;;  %v11275_v10 = vrot.slane %v11259_v15, %v20242_v57  ;;  %v11340_v33 = vcombine.low %v27400_v30, %v11325_v39 }
 0x2e1   : > { %27404 = vst [vmem:[#allocation71_spill] sm:$0xff] %v22579_v63  ;;  %v7824_v7 = vrot.slane %v2520_v18, %v20242_v57  ;;  %v7852_v62 = vrot.slane %v2517_v27, %v20242_v57  ;;  %v7866_v26 = vrot.slane %v2519_v46, %v20242_v57  ;;  %v11291_v24 = vcombine.high %v11268_v59, %v22579_v63  ;;  %v27406_v27 = vld [vmem:[#allocation39_spill] sm:$0xff] }
 0x2e2   : > { %27403 = vst [vmem:[#allocation53_spill] sm:$0xff] %v22572_v49  ;;  %v11341_v38 = vcombine.high %v27400_v30, %v11325_v39  ;;  %v11342_v56 = vcombine.low %v22178_v40, %v22572_v49  ;;  %v22592_v9 = vrot.slane %v11340_v33, %v20242_v57  ;;  %v11422_v28 = vcombine.low %v22572_v49, %v11407_v17 }
 0x2e3   : > { %v4680_v54 = vrot.slane %v4673_v0, %v20242_v57  ;;  %v5681_v5 = vunpack.c.l.b16 %v4666_v4  ;;  %v11423_v15 = vcombine.high %v22572_v49, %v11407_v17  ;;  %v933_v36 = vadd.f32 %v27406_v27, %v20231_v43 }
 0x2e4   : > { %27405 = vst [vmem:[#allocation72_spill] sm:$0xff] %v22592_v9  ;;  %v22600_v22 = vrot.slane %v11342_v56, %v20242_v57  ;;  %v22603_v39 = vrot.slane %v11422_v28, %v20242_v57  ;;  %v18732_v46 = vcombine.low %v11268_v59, %v11275_v10  ;;  %v18734_v18 = vcombine.low %v11291_v24, %v22592_v9 }
 0x2e5   : > { %v6463_v19 = vrot.slane %v6456_v8, %v20242_v57  ;;  %v7831_v33 = vrot.slane %v7824_v7, %v20242_v57  ;;  %v11439_v4 = vrot.slane %v11423_v15, %v20242_v57  ;;  %v1165_v0 = vmax.f32 %v933_v36, 0.0 }
 0x2e6   : > { %27407 = vst [vmem:[#allocation39_spill] sm:$0xff] %v22600_v22  ;;  %v7859_v17 = vrot.slane %v7852_v62, %v20242_v57  ;;  %v22611_v27 = vrot.slane %v11341_v38, %v20242_v57  ;;  %v11373_v56 = vcombine.high %v22592_v9, %v22600_v22  ;;  %v13293_v28 = vrot.slane %v18734_v18, %v20242_v57  ;;  %v27413_v9 = vld [vmem:[#allocation17_spill] sm:$0xff] }
 0x2e7   : > { %v7873_v59 = vrot.slane %v7866_v26, %v20242_v57  ;;  %v18738_v10 = vcombine.low %v22603_v39, %v11439_v4  ;;  %v1236_v8 = vpack.c.bf16 %v1165_v0, %v1164_v2  ;;  %v18610_v24 = vpack.c.bf16 %v1165_v0, %v1165_v0 }
 0x2e8   : > { %27408 = vst [vmem:[#allocation73_spill] sm:$0xff] %v22611_v27  ;;  %v7880_v7 = vrot.slane %v2521_v20, %v20242_v57  ;;  %v22619_v15 = vunpack.c.l.b16 %v7845_v50  ;;  %v18736_v62 = vcombine.low %v22611_v27, %v11373_v56  ;;  %v13279_v38 = vrot.slane %v18732_v46, %v20242_v57 }
 0x2e9   : > { %v5880_v36 = vrot.slane %v5681_v5, 4  ;;  %v8898_v35 = vunpack.c.l.b16 %v7831_v33  ;;  %v13321_v52 = vrot.slane %v18738_v10, %v20242_v57  ;;  %v2529_v18 = vrot.slane %v1236_v8, %v20242_v57 }
 0x2ea   : > { %v5682_v14 = vunpack.c.l.b16 %v4680_v54  ;;  %v13307_v26 = vrot.slane %v18736_v62, %v20242_v57  ;;  %v13330_v4 = vcombine.high %v13279_v38, %v13293_v28  ;;  %v13329_v2 = vcombine.low %v13279_v38, %v13293_v28 }
 0x2eb   : > { %v6144_v0 = vrot.slane %v5681_v5, 5  ;;  %v22626_v63 = vunpack.c.l.b16 %v6463_v19  ;;  %v8900_v20 = vunpack.c.l.b16 %v7859_v17  ;;  %v2536_v50 = vrot.slane %v18610_v24, %v20242_v57 }
 0x2ec   : > { %v7887_v56 = vrot.slane %v7880_v7, %v20242_v57  ;;  %v8901_v46 = vunpack.c.l.b16 %v7873_v59  ;;  %v13334_v27 = vcombine.high %v13307_v26, %v13321_v52  ;;  %v13333_v33 = vcombine.low %v13307_v26, %v13321_v52 }
 0x2ed   : > { %v5881_v10 = vsel %vm5759_vm4, %v5880_v36, %v22559_v37  ;;  %v9090_v54 = vrot.slane %v22619_v15, 7  ;;  %v9354_v8 = vrot.slane %v8898_v35, 1  ;;  %v2537_v62 = vcombine.high %v2529_v18, %v2529_v18 }
 0x2ee   : > { %v22634_v28 = vrot.slane %v13330_v4, %v20242_v57  ;;  %v22637_v5 = vrot.slane %v13334_v27, %v20242_v57  ;;  %v22640_v19 = vrot.slane %v13329_v2, %v20242_v57  ;;  %v22643_v17 = vrot.slane %v13333_v33, %v20242_v57 }
 0x2ef   : > { %v9091_v52 = vsel %vm5750_vm1, %v9090_v54, %v8898_v35  ;;  %v9092_v59 = vrot.slane %v8900_v20, 6  ;;  %v2538_v37 = vcombine.high %v2536_v50, %v2536_v50  ;;  %v2545_v24 = vrot.slane %v2529_v18, %v20242_v57 }
 0x2f0   : > { %27409 = vst [vmem:[#allocation74_spill] sm:$0xff] %v22634_v28  ;;  %27410 = vst [vmem:[#allocation75_spill] sm:$0xff] %v22637_v5  ;;  %v13397_v7 = vcombine.low %v22634_v28, %v22637_v5  ;;  %v13393_v38 = vcombine.low %v22640_v19, %v22643_v17  ;;  %v2552_v27 = vrot.slane %v2536_v50, %v20242_v57  ;;  %v5882_v26 = vrot.slane %v5682_v14, 3 }
 0x2f1   : > { %27411 = vst [vmem:[#allocation76_spill] sm:$0xff] %v22640_v19  ;;  %27412 = vst [vmem:[#allocation77_spill] sm:$0xff] %v22643_v17  ;;  %v941_v36 = vadd.f32 %v22097_v12, %v20231_v43  ;;  %v6145_v4 = vsel %vm5759_vm4, %v6144_v0, %v22565_v58  ;;  %v9355_v35 = vsel %vm5750_vm1, %v22619_v15, %v9354_v8  ;;  %v6146_v2 = vrot.slane %v5682_v14, 4 }
 0x2f2   : > { %v22659_v18 = vrot.slane %v2537_v62, %v20242_v57  ;;  %v8902_v33 = vunpack.c.l.b16 %v7887_v56  ;;  %v9356_v54 = vrot.slane %v8900_v20, 7  ;;  %14944 = vmatprep.mubr.bf16.mxu1 %v13397_v7  ;;  %v938_v50 = vadd.f32 %v27413_v9, %v20231_v43 }
 0x2f3   : > { %v6716_v12 = vsel %vm5756_vm3, %v6144_v0, %v22562_v32  ;;  %v9093_v22 = vsel %vm5753_vm2, %v9092_v59, %v9091_v52  ;;  %14945 = vmatmul.mubr.bf16.gmra.mxu1 %v13393_v38  ;;  %v2566_v58 = vrot.slane %v2538_v37, %v20242_v57  ;;  %v2567_v40 = vcombine.high %v2545_v24, %v2545_v24 }
 0x2f4   : > { %v9094_v8 = vrot.slane %v8901_v46, 5  ;;  %v9357_v62 = vsel %vm5753_vm2, %v9356_v54, %v9355_v35  ;;  %v2568_v49 = vcombine.high %v2552_v27, %v2552_v27  ;;  %v1167_v14 = vmax.f32 %v941_v36, 0.0 }
 0x2f5   : > { %v6718_v20 = vrot.slane %v22626_v63, 3  ;;  %v9358_v56 = vrot.slane %v8901_v46, 6  ;;  %v2569_v9 = vcombine.high %v22659_v18, %v22659_v18  ;;  %v4715_v7 = vrot.slane %v2552_v27, %v20242_v57 }
 0x2f6   : > { %v6717_v32 = vsel %vm5759_vm4, %v6146_v2, %v6716_v12  ;;  %v9095_v0 = vsel %vm5756_vm3, %v9094_v8, %v9093_v22  ;;  %v9096_v52 = vrot.slane %v8902_v33, 4  ;;  %v1166_v59 = vmax.f32 %v938_v50, 0.0 }
 0x2f7   : > { %v9359_v37 = vsel %vm5756_vm3, %v9358_v56, %v9357_v62  ;;  %v9930_v38 = vsel %vm5750_vm1, %v9356_v54, %v22619_v15  ;;  %v2570_v36 = vcombine.high %v2566_v58, %v2566_v58  ;;  %v4687_v63 = vrot.slane %v2567_v40, %v20242_v57 }
 0x2f8   : > { %v4729_v46 = vrot.slane %v2566_v58, %v20242_v57  ;;  %v4743_v35 = vrot.slane %v2568_v49, %v20242_v57  ;;  %v1237_v1 = vpack.c.bf16 %v1167_v14, %v1166_v59  ;;  %v18611_v27 = vpack.c.bf16 %v1167_v14, %v1167_v14 }
 0x2f9   : > { %v22681_v12 = vsel %vm5762_vm5, %v5882_v26, %v5881_v10  ;;  %v9360_v22 = vrot.slane %v8902_v33, 5  ;;  %v4701_v50 = vrot.slane %v2569_v9, %v20242_v57  ;;  %v4722_v8 = vrot.slane %v4715_v7, %v20242_v57 }
 0x2fa   : > { %v22686_v62 = vsel %vm5762_vm5, %v6146_v2, %v6145_v4  ;;  %v22689_v15 = vsel %vm5762_vm5, %v6718_v20, %v6717_v32  ;;  %v9931_v40 = vsel %vm5753_vm2, %v9358_v56, %v9930_v38  ;;  %v7894_v49 = vrot.slane %v2545_v24, %v20242_v57 }
 0x2fb   : > { %v4694_v54 = vrot.slane %v4687_v63, %v20242_v57  ;;  %v4757_v10 = vrot.slane %v2570_v36, %v20242_v57  ;;  %v22696_v26 = vsel %vm5759_vm4, %v9096_v52, %v9095_v0  ;;  %v22699_v33 = vsel %vm5759_vm4, %v9360_v22, %v9359_v37 }
 0x2fc   : > { %v4736_v4 = vrot.slane %v4729_v46, %v20242_v57  ;;  %v4750_v2 = vrot.slane %v4743_v35, %v20242_v57  ;;  %v2578_v58 = vrot.slane %v1237_v1, %v20242_v57  ;;  %v2585_v14 = vrot.slane %v18611_v27, %v20242_v57 }
 0x2fd   : > { %v4708_v24 = vrot.slane %v4701_v50, %v20242_v57  ;;  %v5685_v20 = vunpack.c.l.b16 %v4722_v8  ;;  %v22707_v56 = vsel %vm5756_vm3, %v9360_v22, %v9931_v40  ;;  %v22711_v9 = vadd.f32 %v22152_v34, %v20231_v43  ;;  %v22732_v8 = vpop.f32.mrf.mxu0 }
 0x2fe   : > { %v22714_v7 = vrot.slane %v7894_v49, %v20242_v57  ;;  %v2586_v32 = vcombine.high %v2578_v58, %v2578_v58  ;;  %v2587_v0 = vcombine.high %v2585_v14, %v2585_v14  ;;  %v22717_v52 = vrot.slane %v2578_v58, %v20242_v57 }
 0x2ff   : > { %v4764_v1 = vrot.slane %v4757_v10, %v20242_v57  ;;  %v5683_v59 = vunpack.c.l.b16 %v4694_v54  ;;  %v9672_v37 = vrot.slane %v22659_v18, %v20242_v57  ;;  %v2601_v38 = vrot.slane %v2585_v14, %v20242_v57  ;;  %v19575_v14 = vpop.f32.mrf.mxu0 }
 0x300   : > { %v5686_v36 = vunpack.c.l.b16 %v4736_v4  ;;  %v22723_v63 = vunpack.c.l.b16 %v4750_v2  ;;  %v2608_v34 = vrot.slane %v2586_v32, %v20242_v57  ;;  %v2615_v46 = vrot.slane %v2587_v0, %v20242_v57 }
 0x301   : > { %v22727_v35 = vunpack.c.l.b16 %v4708_v24  ;;  %v2616_v27 = vcombine.high %v22717_v52, %v22717_v52  ;;  %v2617_v22 = vcombine.high %v2601_v38, %v2601_v38  ;;  %v7950_v50 = vrot.slane %v2601_v38, %v20242_v57 }
 0x302   : > { %v5886_v18 = vrot.slane %v5685_v20, 6  ;;  %v2618_v40 = vcombine.high %v2608_v34, %v2608_v34  ;;  %v2619_v49 = vcombine.high %v2615_v46, %v2615_v46  ;;  %v7908_v54 = vrot.slane %v2608_v34, %v20242_v57 }
 0x303   : > { %v22735_v10 = vrot.slane %v5685_v20, 7  ;;  %v7922_v4 = vrot.slane %v2616_v27, %v20242_v57  ;;  %v22739_v2 = vrot.slane %v7950_v50, %v20242_v57  ;;  %v7964_v58 = vrot.slane %v2615_v46, %v20242_v57 }
 0x304   : > { %v22743_v24 = vrot.slane %v7908_v54, %v20242_v57  ;;  %v7936_v32 = vrot.slane %v2618_v40, %v20242_v57  ;;  %v7978_v0 = vrot.slane %v2617_v22, %v20242_v57  ;;  %v9686_v38 = vrot.slane %v2619_v49, %v20242_v57 }
 0x305   : > { %v5884_v20 = vrot.slane %v22727_v35, 7  ;;  %v8903_v34 = vunpack.c.l.b16 %v22714_v7  ;;  %v7929_v27 = vrot.slane %v7922_v4, %v20242_v57  ;;  %v22752_v50 = vrot.slane %v7964_v58, %v20242_v57 }
 0x306   : > { %v6148_v46 = vrot.slane %v5683_v59, 1  ;;  %v7943_v14 = vrot.slane %v7936_v32, %v20242_v57  ;;  %v7985_v54 = vrot.slane %v7978_v0, %v20242_v57  ;;  %v8904_v40 = vunpack.c.l.b16 %v22743_v24 }
 0x307   : > { %v22757_v30 = vunpack.c.l.b16 %v4764_v1  ;;  %v5888_v22 = vrot.slane %v5686_v36, 5  ;;  %v9693_v49 = vrot.slane %v9686_v38, %v20242_v57  ;;  %v949_v7 = vadd.f32 %v22186_v42, %v20231_v43 }
 0x308   : > { %v8905_v13 = vunpack.c.l.b16 %v7929_v27  ;;  %v22762_v4 = vunpack.c.l.b16 %v7943_v14  ;;  %v9364_v19 = vrot.slane %v8904_v40, 1  ;;  %v5885_v32 = vsel %vm5750_vm1, %v5884_v20, %v5683_v59 }
 0x309   : > { %v5890_v0 = vrot.slane %v22723_v63, 4  ;;  %v22767_v17 = vrot.slane %v5686_v36, 6  ;;  %v6149_v24 = vsel %vm5750_vm1, %v22727_v35, %v6148_v46  ;;  %v22773_v42 = vunpack.c.l.b16 %v7985_v54 }
 0x30a   : > { %v9365_v27 = vsel %vm5750_vm1, %v8905_v13, %v9364_v19  ;;  %v9098_v14 = vrot.slane %v8903_v34, 3  ;;  %v9679_v58 = vrot.slane %v9672_v37, %v20242_v57  ;;  %v9366_v59 = vrot.slane %v22762_v4, 7 }
 0x30b   : > { %v9847_v20 = vunpack.c.l.b16 %v9693_v49  ;;  %v5887_v36 = vsel %vm5753_vm2, %v5886_v18, %v5885_v32  ;;  %v27414_v28 = vunpack.c.l.b16 %v22739_v2  ;;  %v1168_v5 = vmax.f32 %v22711_v9, 0.0 }
 0x30c   : > { %v1169_v46 = vmax.f32 %v949_v7, 0.0  ;;  %v6151_v54 = vsel %vm5753_vm2, %v22735_v10, %v6149_v24  ;;  %v9367_v38 = vsel %vm5753_vm2, %v9366_v59, %v9365_v27  ;;  %v27415_v19 = vunpack.c.l.b16 %v22752_v50  ;;  %v22794_v27 = vpop.f32.mrf.mxu0 }
 0x30d   : > { %v9368_v1 = vrot.slane %v27414_v28, 6  ;;  %v9936_v37 = vsel %vm5750_vm1, %v9366_v59, %v8905_v13  ;;  %v9372_v18 = vrot.slane %v22773_v42, 4  ;;  %v5889_v9 = vsel %vm5756_vm3, %v5888_v22, %v5887_v36 }
 0x30e   : > { %v9370_v11 = vrot.slane %v27415_v19, 5  ;;  %v1238_v28 = vpack.c.bf16 %v1169_v46, %v1168_v5  ;;  %v9940_v53 = vrot.slane %v9847_v20, 3  ;;  %v9846_v47 = vunpack.c.l.b16 %v9679_v58  ;;  %v19578_v20 = vpop.f32.mrf.mxu0 }
 0x30f   : > { %v9369_v49 = vsel %vm5756_vm3, %v9368_v1, %v9367_v38  ;;  %v9937_v32 = vsel %vm5753_vm2, %v9368_v1, %v9936_v37  ;;  %v6470_v5 = vrot.slane %v22717_v52, %v20242_v57  ;;  %v9100_v1 = vrot.slane %v8905_v13, 7 }
 0x310   : > { %v9371_v7 = vsel %vm5759_vm4, %v9370_v11, %v9369_v49  ;;  %v9938_v24 = vsel %vm5756_vm3, %v9370_v11, %v9937_v32  ;;  %v2627_v59 = vrot.slane %v1238_v28, %v20242_v57  ;;  %v957_v11 = vadd.f32 %v22285_v31, %v20231_v43 }
 0x311   : > { %v22797_v19 = vsel %vm5762_vm5, %v9372_v18, %v9371_v7  ;;  %v9939_v38 = vsel %vm5759_vm4, %v9372_v18, %v9938_v24  ;;  %v18612_v36 = vpack.c.bf16 %v1169_v46, %v1169_v46  ;;  %v5892_v18 = vrot.slane %v22757_v30, 3 }
 0x312   : > { %27416 = vst [vmem:[#allocation17_spill] sm:$0xff] %v22797_v19  ;;  %v22804_v22 = vsel %vm5762_vm5, %v9940_v53, %v9939_v38  ;;  %v2635_v37 = vcombine.high %v2627_v59, %v2627_v59  ;;  %v2643_v49 = vrot.slane %v2627_v59, %v20242_v57  ;;  %v6156_v32 = vrot.slane %v22757_v30, 4  ;;  %v22815_v53 = vpop.f32.mrf.mxu0 }
 0x313   : > { %v9362_v52 = vrot.slane %v8903_v34, 4  ;;  %v954_v13 = vadd.f32 %v22266_v45, %v20231_v43  ;;  %v6153_v31 = vsel %vm5756_vm3, %v22767_v17, %v6151_v54  ;;  %v6720_v46 = vsel %vm5750_vm1, %v22735_v10, %v22727_v35 }
 0x314   : > { %v9102_v28 = vrot.slane %v22762_v4, 6  ;;  %v2657_v7 = vrot.slane %v2635_v37, %v20242_v57  ;;  %v5891_v24 = vsel %vm5759_vm4, %v5890_v0, %v5889_v9  ;;  %v9101_v30 = vsel %vm5750_vm1, %v9100_v1, %v8904_v40  ;;  %v19579_v45 = vpop.f32.mrf.mxu0 }
 0x315   : > { %v2665_v34 = vcombine.high %v2643_v49, %v2643_v49  ;;  %v1171_v38 = vmax.f32 %v957_v11, 0.0  ;;  %v9934_v59 = vrot.slane %v9846_v47, 3  ;;  %v6477_v20 = vrot.slane %v6470_v5, %v20242_v57 }
 0x316   : > { %v2634_v54 = vrot.slane %v18612_v36, %v20242_v57  ;;  %v4785_v58 = vrot.slane %v2657_v7, %v20242_v57  ;;  %v22831_v35 = vsel %vm5762_vm5, %v9098_v14, %v22696_v26  ;;  %v9933_v10 = vsel %vm5759_vm4, %v9362_v52, %v22707_v56 }
 0x317   : > { %v4771_v4 = vrot.slane %v2643_v49, %v20242_v57  ;;  %v1170_v40 = vmax.f32 %v954_v13, 0.0  ;;  %v27417_v0 = vrot.slane %v22723_v63, 5  ;;  %v6721_v9 = vsel %vm5753_vm2, %v22767_v17, %v6720_v46 }
 0x318   : > { %v9103_v5 = vsel %vm5753_vm2, %v9102_v28, %v9101_v30  ;;  %v2667_v1 = vcombine.high %v2657_v7, %v2657_v7  ;;  %v5893_v11 = vsel %vm5762_vm5, %v5892_v18, %v5891_v24  ;;  %v27418_v26 = vunpack.c.l.b16 %v22739_v2 }
 0x319   : > { %v6155_v47 = vsel %vm5759_vm4, %v27417_v0, %v6153_v31  ;;  %v4799_v56 = vrot.slane %v2665_v34, %v20242_v57  ;;  %v1239_v36 = vpack.c.bf16 %v1171_v38, %v1170_v40  ;;  %v9935_v37 = vsel %vm5762_vm5, %v9934_v59, %v9933_v10 }
 0x31a   : > { %v9104_v14 = vrot.slane %v27418_v26, 5  ;;  %v6631_v49 = vunpack.c.l.b16 %v6477_v20  ;;  %v2636_v13 = vcombine.high %v2634_v54, %v2634_v54  ;;  %v4792_v31 = vrot.slane %v4785_v58, %v20242_v57 }
 0x31b   : > { %v6157_v45 = vsel %vm5762_vm5, %v6156_v32, %v6155_v47  ;;  %v9363_v17 = vsel %vm5762_vm5, %v9362_v52, %v22699_v33  ;;  %v4778_v18 = vrot.slane %v4771_v4, %v20242_v57  ;;  %v27419_v28 = vunpack.c.l.b16 %v22752_v50 }
 0x31c   : > { %v9105_v46 = vsel %vm5756_vm3, %v9104_v14, %v9103_v5  ;;  %v18673_v2 = vpack.c.b16 %v6157_v45, %v5893_v11  ;;  %v2650_v24 = vrot.slane %v2634_v54, %v20242_v57  ;;  %v4813_v30 = vrot.slane %v2667_v1, %v20242_v57  ;;  %v22873_v11 = vpop.f32.mrf.mxu0 }
 0x31d   : > { %v9106_v7 = vrot.slane %v27419_v28, 4  ;;  %v27420_v34 = vmov %v27417_v0  ;;  %v18672_v59 = vpack.c.b16 %v9935_v37, %v9363_v17  ;;  %v4806_v20 = vrot.slane %v4799_v56, %v20242_v57 }
 0x31e   : > { %v6722_v58 = vsel %vm5756_vm3, %v27420_v34, %v6721_v9  ;;  %v2676_v33 = vrot.slane %v1239_v36, %v20242_v57  ;;  %v6724_v52 = vrot.slane %v6631_v49, 3  ;;  %v2664_v4 = vrot.slane %v2636_v13, %v20242_v57  ;;  %v19582_v49 = vpop.f32.mrf.mxu0 }
 0x31f   : > { %v9107_v10 = vsel %vm5759_vm4, %v9106_v7, %v9105_v46  ;;  %v5690_v50 = vunpack.c.l.b16 %v4792_v31  ;;  %v9108_v40 = vrot.slane %v22773_v42, 3  ;;  %v5689_v0 = vunpack.c.l.b16 %v4778_v18 }
 0x320   : > { %v18613_v63 = vpack.c.bf16 %v1171_v38, %v1171_v38  ;;  %v22868_v47 = vrot.slane %v18673_v2, %v20242_v57  ;;  %v6723_v9 = vsel %vm5759_vm4, %v6156_v32, %v6722_v58  ;;  %v4820_v5 = vrot.slane %v4813_v30, %v20242_v57  ;;  %v22888_v7 = vpop.f32.mrf.mxu0 }
 0x321   : > { %v4827_v1 = vrot.slane %v2650_v24, %v20242_v57  ;;  %v9109_v26 = vsel %vm5762_vm5, %v9108_v40, %v9107_v10  ;;  %v2666_v14 = vcombine.high %v2650_v24, %v2650_v24  ;;  %v5691_v56 = vunpack.c.l.b16 %v4806_v20 }
 0x322   : > { %27421 = vst [vmem:[#allocation78_spill] sm:$0xff] %v22868_v47  ;;  %v2684_v36 = vcombine.high %v2676_v33, %v2676_v33  ;;  %v22877_v42 = vrot.slane %v18672_v59, %v20242_v57  ;;  %v22880_v38 = vsel %vm5762_vm5, %v6724_v52, %v6723_v9  ;;  %v4841_v37 = vrot.slane %v2664_v4, %v20242_v57  ;;  %v19583_v10 = vpop.f32.mrf.mxu0 }
 0x323   : > { %27423 = vst [vmem:[#allocation80_spill] sm:$0xff] %v22880_v38  ;;  %v5894_v32 = vrot.slane %v5690_v50, 7  ;;  %v2668_v13 = vcombine.high %v2664_v4, %v2664_v4  ;;  %v6158_v31 = vrot.slane %v5689_v0, 1  ;;  %v2683_v45 = vrot.slane %v18613_v63, %v20242_v57 }
 0x324   : > { %27422 = vst [vmem:[#allocation79_spill] sm:$0xff] %v22877_v42  ;;  %v2692_v17 = vrot.slane %v2676_v33, %v20242_v57  ;;  %v18674_v46 = vpack.c.b16 %v9109_v26, %v22880_v38  ;;  %v4834_v18 = vrot.slane %v4827_v1, %v20242_v57  ;;  %v5692_v2 = vunpack.c.l.b16 %v4820_v5 }
 0x325   : > { %v2706_v28 = vrot.slane %v2684_v36, %v20242_v57  ;;  %v5896_v24 = vrot.slane %v5691_v56, 6  ;;  %v6484_v30 = vrot.slane %v2666_v14, %v20242_v57  ;;  %v22894_v58 = vadd.f32 %v22299_v16, %v20231_v43  ;;  %v1009_v14 = vpop.f32.mrf.mxu0 }
 0x326   : > { %v8006_v34 = vrot.slane %v2692_v17, %v20242_v57  ;;  %v4848_v59 = vrot.slane %v4841_v37, %v20242_v57  ;;  %v5895_v20 = vsel %vm5750_vm1, %v5894_v32, %v5689_v0  ;;  %v6160_v33 = vrot.slane %v5691_v56, 7 }
 0x327   : > { %v2714_v52 = vcombine.high %v2692_v17, %v2692_v17  ;;  %v6159_v4 = vsel %vm5750_vm1, %v5690_v50, %v6158_v31  ;;  %v7992_v40 = vrot.slane %v2668_v13, %v20242_v57  ;;  %v2685_v63 = vcombine.high %v2683_v45, %v2683_v45  ;;  %v19586_v17 = vpop.f32.mrf.mxu0 }
 0x328   : > { %v8020_v9 = vrot.slane %v2706_v28, %v20242_v57  ;;  %v5693_v5 = vunpack.c.l.b16 %v4834_v18  ;;  %v5898_v1 = vrot.slane %v5692_v2, 5  ;;  %v2699_v26 = vrot.slane %v2683_v45, %v20242_v57 }
 0x329   : > { %v8013_v16 = vrot.slane %v8006_v34, %v20242_v57  ;;  %v5897_v36 = vsel %vm5753_vm2, %v5896_v24, %v5895_v20  ;;  %v6162_v0 = vrot.slane %v5692_v2, 6  ;;  %v6491_v56 = vrot.slane %v6484_v30, %v20242_v57 }
 0x32a   : > { %v2716_v37 = vcombine.high %v2706_v28, %v2706_v28  ;;  %v5694_v32 = vunpack.c.l.b16 %v4848_v59  ;;  %v6161_v49 = vsel %vm5753_vm2, %v6160_v33, %v6159_v4  ;;  %v6726_v13 = vsel %vm5750_vm1, %v6160_v33, %v5690_v50 }
 0x32b   : > { %v8034_v31 = vrot.slane %v2714_v52, %v20242_v57  ;;  %v22909_v18 = vrot.slane %v18674_v46, %v20242_v57  ;;  %v7999_v45 = vrot.slane %v7992_v40, %v20242_v57  ;;  %v22913_v34 = vrot.slane %v2685_v63, %v20242_v57 }
 0x32c   : > { %v8027_v2 = vrot.slane %v8020_v9, %v20242_v57  ;;  %v5899_v28 = vsel %vm5756_vm3, %v5898_v1, %v5897_v36  ;;  %v5900_v24 = vrot.slane %v5693_v5, 4  ;;  %v2715_v30 = vcombine.high %v2699_v26, %v2699_v26 }
 0x32d   : > { %v8911_v59 = vunpack.c.l.b16 %v8013_v16  ;;  %v6163_v50 = vsel %vm5756_vm3, %v6162_v0, %v6161_v49  ;;  %v6164_v20 = vrot.slane %v5693_v5, 5  ;;  %v6727_v33 = vsel %vm5753_vm2, %v6162_v0, %v6726_v13 }
 0x32e   : > { %v8048_v46 = vrot.slane %v2716_v37, %v20242_v57  ;;  %v5902_v52 = vrot.slane %v5694_v32, 3  ;;  %v6632_v10 = vunpack.c.l.b16 %v6491_v56  ;;  %v8041_v4 = vrot.slane %v8034_v31, %v20242_v57 }
 0x32f   : > { %v965_v40 = vadd.f32 %v22327_v29, %v20231_v43  ;;  %v5901_v63 = vsel %vm5759_vm4, %v5900_v24, %v5899_v28  ;;  %v8910_v9 = vunpack.c.l.b16 %v7999_v45  ;;  %v2717_v1 = vcombine.high %v22913_v34, %v22913_v34 }
 0x330   : > { %v8912_v16 = vunpack.c.l.b16 %v8027_v2  ;;  %v6165_v5 = vsel %vm5759_vm4, %v6164_v20, %v6163_v50  ;;  %v6728_v14 = vsel %vm5756_vm3, %v6164_v20, %v6727_v33  ;;  %v4855_v36 = vrot.slane %v2715_v30, %v20242_v57 }
 0x331   : > { %v9110_v0 = vrot.slane %v8911_v59, 7  ;;  %v6166_v56 = vrot.slane %v5694_v32, 4  ;;  %v8055_v37 = vrot.slane %v8048_v46, %v20242_v57  ;;  %v8062_v49 = vrot.slane %v2699_v26, %v20242_v57 }
 0x332   : > { %v1172_v29 = vmax.f32 %v22894_v58, 0.0  ;;  %v5903_v13 = vsel %vm5762_vm5, %v5902_v52, %v5901_v63  ;;  %v6730_v31 = vrot.slane %v6632_v10, 3  ;;  %v8913_v17 = vunpack.c.l.b16 %v8041_v4 }
 0x333   : > { %v1173_v45 = vmax.f32 %v965_v40, 0.0  ;;  %v6167_v2 = vsel %vm5762_vm5, %v6166_v56, %v6165_v5  ;;  %v6729_v28 = vsel %vm5759_vm4, %v6166_v56, %v6728_v14  ;;  %v4869_v24 = vrot.slane %v2717_v1, %v20242_v57  ;;  %v22945_v1 = vpop.f32.mrf.mxu0 }
 0x334   : > { %v9112_v30 = vrot.slane %v8912_v16, 6  ;;  %v9374_v50 = vrot.slane %v8910_v9, 1  ;;  %v4862_v32 = vrot.slane %v4855_v36, %v20242_v57  ;;  %v9111_v20 = vsel %vm5750_vm1, %v9110_v0, %v8910_v9 }
 0x335   : > { %v1240_v26 = vpack.c.bf16 %v1173_v45, %v1172_v29  ;;  %v8069_v58 = vrot.slane %v8062_v49, %v20242_v57  ;;  %v8914_v33 = vunpack.c.l.b16 %v8055_v37  ;;  %v9376_v46 = vrot.slane %v8912_v16, 7  ;;  %v19587_v49 = vpop.f32.mrf.mxu0 }
 0x336   : > { %v18614_v52 = vpack.c.bf16 %v1173_v45, %v1173_v45  ;;  %v22940_v10 = vsel %vm5762_vm5, %v6730_v31, %v6729_v28  ;;  %v9114_v4 = vrot.slane %v8913_v17, 5  ;;  %v973_v63 = vadd.f32 %v22404_v25, %v20231_v43 }
 0x337   : > { %27424 = vst [vmem:[#allocation81_spill] sm:$0xff] %v22940_v10  ;;  %v2725_v40 = vrot.slane %v1240_v26, %v20242_v57  ;;  %v18676_v5 = vpack.c.b16 %v6167_v2, %v5903_v13  ;;  %v4876_v9 = vrot.slane %v4869_v24, %v20242_v57  ;;  %v9113_v14 = vsel %vm5753_vm2, %v9112_v30, %v9111_v20 }
 0x338   : > { %v9700_v16 = vrot.slane %v22913_v34, %v20242_v57  ;;  %v5695_v36 = vunpack.c.l.b16 %v4862_v32  ;;  %v9378_v0 = vrot.slane %v8913_v17, 6  ;;  %v8915_v29 = vunpack.c.l.b16 %v8069_v58  ;;  %v22957_v34 = vpop.f32.mrf.mxu0 }
 0x339   : > { %v2733_v56 = vcombine.high %v2725_v40, %v2725_v40  ;;  %v2741_v37 = vrot.slane %v2725_v40, %v20242_v57  ;;  %v9116_v31 = vrot.slane %v8914_v33, 4  ;;  %v9942_v25 = vsel %vm5750_vm1, %v9376_v46, %v8911_v59 }
 0x33a   : > { %v2732_v45 = vrot.slane %v18614_v52, %v20242_v57  ;;  %v9115_v13 = vsel %vm5756_vm3, %v9114_v4, %v9113_v14  ;;  %v9375_v2 = vsel %vm5750_vm1, %v8911_v59, %v9374_v50  ;;  %v1175_v24 = vmax.f32 %v973_v63, 0.0  ;;  %v19590_v50 = vpop.f32.mrf.mxu0 }
 0x33b   : > { %v2755_v28 = vrot.slane %v2733_v56, %v20242_v57  ;;  %v9377_v17 = vsel %vm5753_vm2, %v9376_v46, %v9375_v2  ;;  %v9380_v30 = vrot.slane %v8914_v33, 5  ;;  %v9707_v32 = vrot.slane %v9700_v16, %v20242_v57 }
 0x33c   : > { %v4883_v20 = vrot.slane %v2741_v37, %v20242_v57  ;;  %v22963_v26 = vrot.slane %v18676_v5, %v20242_v57  ;;  %v22965_v58 = vunpack.c.l.b16 %v4876_v9  ;;  %v6168_v52 = vrot.slane %v5695_v36, 1  ;;  %v22973_v56 = vpop.f32.mrf.mxu0 }
 0x33d   : > { %v9943_v59 = vsel %vm5753_vm2, %v9378_v0, %v9942_v25  ;;  %v9117_v4 = vsel %vm5759_vm4, %v9116_v31, %v9115_v13  ;;  %v9118_v40 = vrot.slane %v8915_v29, 3  ;;  %v2734_v63 = vcombine.high %v2732_v45, %v2732_v45 }
 0x33e   : > { %27425 = vst [vmem:[#allocation82_spill] sm:$0xff] %v22963_v26  ;;  %v2763_v14 = vcombine.high %v2741_v37, %v2741_v37  ;;  %v9379_v33 = vsel %vm5756_vm3, %v9378_v0, %v9377_v17  ;;  %v4897_v46 = vrot.slane %v2755_v28, %v20242_v57  ;;  %v970_v16 = vadd.f32 %v22388_v21, %v20231_v43  ;;  %v19591_v17 = vpop.f32.mrf.mxu0 }
 0x33f   : > { %v18615_v5 = vpack.c.bf16 %v1175_v24, %v1175_v24  ;;  %v9848_v9 = vunpack.c.l.b16 %v9707_v32  ;;  %v9944_v49 = vsel %vm5756_vm3, %v9380_v30, %v9943_v59  ;;  %v2748_v25 = vrot.slane %v2732_v45, %v20242_v57 }
 0x340   : > { %v4890_v31 = vrot.slane %v4883_v20, %v20242_v57  ;;  %v5904_v13 = vrot.slane %v22965_v58, 7  ;;  %v6169_v0 = vsel %vm5750_vm1, %v22965_v58, %v6168_v52  ;;  %v9382_v37 = vrot.slane %v8915_v29, 4 }
 0x341   : > { %v2765_v2 = vcombine.high %v2755_v28, %v2755_v28  ;;  %v22982_v21 = vsel %vm5762_vm5, %v9118_v40, %v9117_v4  ;;  %v9381_v50 = vsel %vm5759_vm4, %v9380_v30, %v9379_v33  ;;  %v2762_v32 = vrot.slane %v2734_v63, %v20242_v57 }
 0x342   : > { %27426 = vst [vmem:[#allocation83_spill] sm:$0xff] %v22982_v21  ;;  %v4911_v59 = vrot.slane %v2763_v14, %v20242_v57  ;;  %v9945_v45 = vsel %vm5759_vm4, %v9382_v37, %v9944_v49  ;;  %v4904_v20 = vrot.slane %v4897_v46, %v20242_v57  ;;  %v1174_v54 = vmax.f32 %v970_v16, 0.0 }
 0x343   : > { %v2781_v38 = vrot.slane %v18615_v5, %v20242_v57  ;;  %v9946_v52 = vrot.slane %v9848_v9, 3  ;;  %v2764_v29 = vcombine.high %v2748_v25, %v2748_v25  ;;  %v5697_v28 = vunpack.c.l.b16 %v4890_v31 }
 0x344   : > { %v22992_v4 = vadd.f32 %v22455_v48, %v20231_v43  ;;  %v5905_v30 = vsel %vm5750_vm1, %v5904_v13, %v5695_v36  ;;  %v4925_v40 = vrot.slane %v2765_v2, %v20242_v57  ;;  %v1241_v63 = vpack.c.bf16 %v1175_v24, %v1174_v54  ;;  %v23114_v48 = vpop.f32.mrf.mxu0 }
 0x345   : > { %v981_v14 = vadd.f32 %v22471_v61, %v20231_v43  ;;  %v22999_v33 = vsel %vm5762_vm5, %v9382_v37, %v9381_v50  ;;  %v23002_v46 = vsel %vm5762_vm5, %v9946_v52, %v9945_v45  ;;  %v2766_v16 = vcombine.high %v2762_v32, %v2762_v32  ;;  %27431 = vst [vmem:[#allocation88_spill] sm:$0xff] %v23114_v48 }
 0x346   : > { %v4918_v5 = vrot.slane %v4911_v59, %v20242_v57  ;;  %v5698_v9 = vunpack.c.l.b16 %v4904_v20  ;;  %v8076_v36 = vrot.slane %v2762_v32, %v20242_v57  ;;  %v2783_v49 = vcombine.high %v2781_v38, %v2781_v38 }
 0x347   : > { %v5906_v54 = vrot.slane %v5697_v28, 6  ;;  %v6170_v24 = vrot.slane %v5697_v28, 7  ;;  %v8090_v61 = vrot.slane %v2764_v29, %v20242_v57  ;;  %v1176_v31 = vmax.f32 %v22992_v4, 0.0 }
 0x348   : > { %v18678_v13 = vpack.c.b16 %v23002_v46, %v22999_v33  ;;  %v4932_v37 = vrot.slane %v4925_v40, %v20242_v57  ;;  %v2774_v2 = vrot.slane %v1241_v63, %v20242_v57  ;;  %v23014_v17 = vmax.f32 %v981_v14, 0.0 }
 0x349   : > { %v5699_v50 = vunpack.c.l.b16 %v4918_v5  ;;  %v6498_v59 = vrot.slane %v2748_v25, %v20242_v57  ;;  %v8104_v32 = vrot.slane %v2766_v16, %v20242_v57  ;;  %v23019_v45 = vrot.slane %v2781_v38, %v20242_v57 }
 0x34a   : > { %v5908_v20 = vrot.slane %v5698_v9, 5  ;;  %v6172_v52 = vrot.slane %v5698_v9, 6  ;;  %v8083_v29 = vrot.slane %v8076_v36, %v20242_v57  ;;  %v2811_v28 = vrot.slane %v2783_v49, %v20242_v57 }
 0x34b   : > { %v5907_v4 = vsel %vm5753_vm2, %v5906_v54, %v5905_v30  ;;  %v6171_v40 = vsel %vm5753_vm2, %v6170_v24, %v6169_v0  ;;  %v8097_v63 = vrot.slane %v8090_v61, %v20242_v57  ;;  %v2813_v25 = vcombine.high %v23019_v45, %v23019_v45 }
 0x34c   : > { %v5700_v14 = vunpack.c.l.b16 %v4932_v37  ;;  %v6732_v38 = vsel %vm5750_vm1, %v6170_v24, %v22965_v58  ;;  %v2815_v33 = vcombine.high %v2811_v28, %v2811_v28  ;;  %v4953_v46 = vrot.slane %v2811_v28, %v20242_v57 }
 0x34d   : > { %v5910_v16 = vrot.slane %v5699_v50, 4  ;;  %v6174_v5 = vrot.slane %v5699_v50, 5  ;;  %v8111_v9 = vrot.slane %v8104_v32, %v20242_v57  ;;  %v4967_v30 = vrot.slane %v2813_v25, %v20242_v57 }
 0x34e   : > { %v5909_v0 = vsel %vm5756_vm3, %v5908_v20, %v5907_v4  ;;  %v6173_v36 = vsel %vm5756_vm3, %v6172_v52, %v6171_v40  ;;  %v6505_v49 = vrot.slane %v6498_v59, %v20242_v57  ;;  %v4981_v54 = vrot.slane %v2815_v33, %v20242_v57 }
 0x34f   : > { %v6733_v61 = vsel %vm5753_vm2, %v6172_v52, %v6732_v38  ;;  %v8917_v58 = vunpack.c.l.b16 %v8097_v63  ;;  %v4960_v24 = vrot.slane %v4953_v46, %v20242_v57  ;;  %v4974_v37 = vrot.slane %v4967_v30, %v20242_v57 }
 0x350   : > { %v5912_v50 = vrot.slane %v5700_v14, 3  ;;  %v6176_v28 = vrot.slane %v5700_v14, 4  ;;  %v8916_v32 = vunpack.c.l.b16 %v8083_v29  ;;  %v4988_v25 = vrot.slane %v4981_v54, %v20242_v57 }
 0x351   : > { %v5911_v20 = vsel %vm5759_vm4, %v5910_v16, %v5909_v0  ;;  %v6175_v4 = vsel %vm5759_vm4, %v6174_v5, %v6173_v36  ;;  %v23043_v40 = vunpack.c.l.b16 %v8111_v9  ;;  %v23045_v59 = vunpack.c.l.b16 %v4974_v37 }
 0x352   : > { %v6633_v33 = vunpack.c.l.b16 %v6505_v49  ;;  %v6734_v52 = vsel %vm5756_vm3, %v6174_v5, %v6733_v61  ;;  %v2782_v63 = vcombine.high %v2774_v2, %v2774_v2  ;;  %v23048_v38 = vunpack.c.l.b16 %v4988_v25 }
 0x353   : > { %v9120_v46 = vrot.slane %v8917_v58, 7  ;;  %v23050_v30 = vunpack.c.l.b16 %v4960_v24  ;;  %v27096_v29 = vrot.slane %v23045_v59, 7  ;;  %v1242_v14 = vpack.c.bf16 %v23014_v17, %v1176_v31 }
 0x354   : > { %v23055_v16 = vsel %vm5762_vm5, %v5912_v50, %v5911_v20  ;;  %v23058_v9 = vsel %vm5762_vm5, %v6176_v28, %v6175_v4  ;;  %v9384_v0 = vrot.slane %v8916_v32, 1  ;;  %v2790_v36 = vrot.slane %v2774_v2, %v20242_v57 }
 0x355   : > { %27427 = vst [vmem:[#allocation84_spill] sm:$0xff] %v23055_v16  ;;  %27428 = vst [vmem:[#allocation85_spill] sm:$0xff] %v23058_v9  ;;  %v23062_v5 = vrot.slane %v18678_v13, %v20242_v57  ;;  %v6735_v49 = vsel %vm5759_vm4, %v6176_v28, %v6734_v52  ;;  %v27097_v54 = vrot.slane %v23043_v40, 7  ;;  %v6738_v31 = vsel %vm5750_vm1, %v27096_v29, %v23050_v30 }
 0x356   : > { %v6736_v61 = vrot.slane %v6633_v33, 3  ;;  %v9122_v24 = vrot.slane %v23043_v40, 6  ;;  %v23072_v37 = vrot.slane %v2782_v63, %v20242_v57  ;;  %v27095_v2 = vrot.slane %v23048_v38, 6 }
 0x357   : > { %27429 = vst [vmem:[#allocation86_spill] sm:$0xff] %v23062_v5  ;;  %v9121_v13 = vsel %vm5750_vm1, %v9120_v46, %v8916_v32  ;;  %v18616_v28 = vpack.c.bf16 %v23014_v17, %v23014_v17  ;;  %v2823_v25 = vrot.slane %v1242_v14, %v20242_v57  ;;  %v9385_v4 = vsel %vm5750_vm1, %v8917_v58, %v9384_v0 }
 0x358   : > { %v23082_v20 = vsel %vm5762_vm5, %v6736_v61, %v6735_v49  ;;  %v4939_v33 = vrot.slane %v23019_v45, %v20242_v57  ;;  %v8118_v52 = vrot.slane %v2790_v36, %v20242_v57  ;;  %v23091_v32 = vsel %vm5750_vm1, %v27097_v54, %v8917_v58  ;;  %v19594_v54 = vpop.f32.mrf.mxu0 }
 0x359   : > { %27430 = vst [vmem:[#allocation87_spill] sm:$0xff] %v23082_v20  ;;  %v2812_v63 = vcombine.high %v2790_v36, %v2790_v36  ;;  %v2830_v17 = vrot.slane %v18616_v28, %v20242_v57  ;;  %v2831_v46 = vcombine.high %v2823_v25, %v2823_v25  ;;  %v2814_v14 = vcombine.high %v23072_v37, %v23072_v37 }
 0x35a   : > { %v23097_v49 = vsel %vm5753_vm2, %v9122_v24, %v9121_v13  ;;  %v2839_v0 = vrot.slane %v2823_v25, %v20242_v57  ;;  %v6739_v45 = vsel %vm5753_vm2, %v27095_v2, %v6738_v31  ;;  %v8132_v58 = vrot.slane %v23072_v37, %v20242_v57 }
 0x35b   : > { %v2832_v61 = vcombine.high %v2830_v17, %v2830_v17  ;;  %v2846_v36 = vrot.slane %v2830_v17, %v20242_v57  ;;  %v2853_v28 = vrot.slane %v2831_v46, %v20242_v57  ;;  %v23108_v50 = vrot.slane %v4939_v33, %v20242_v57 }
 0x35c   : > { %v23111_v24 = vrot.slane %v8118_v52, %v20242_v57  ;;  %v2861_v13 = vcombine.high %v2839_v0, %v2839_v0  ;;  %v4995_v25 = vrot.slane %v2839_v0, %v20242_v57  ;;  %v23117_v31 = vrot.slane %v2812_v63, %v20242_v57 }
 0x35d   : > { %v2860_v37 = vrot.slane %v2832_v61, %v20242_v57  ;;  %v2862_v2 = vcombine.high %v2846_v36, %v2846_v36  ;;  %v2863_v17 = vcombine.high %v2853_v28, %v2853_v28  ;;  %v5009_v33 = vrot.slane %v2853_v28, %v20242_v57 }
 0x35e   : > { %v23121_v46 = vrot.slane %v4995_v25, %v20242_v57  ;;  %v6512_v52 = vrot.slane %v2861_v13, %v20242_v57  ;;  %v8174_v29 = vrot.slane %v2846_v36, %v20242_v57  ;;  %v23135_v13 = vpop.f32.mrf.mxu0  ;;  %v5914_v21 = vrot.slane %v23050_v30, 7 }
 0x35f   : > { %v2864_v0 = vcombine.high %v2860_v37, %v2860_v37  ;;  %v8160_v48 = vrot.slane %v2863_v17, %v20242_v57  ;;  %v8188_v63 = vrot.slane %v2860_v37, %v20242_v57  ;;  %v8202_v20 = vrot.slane %v2862_v2, %v20242_v57  ;;  %27432 = vst [vmem:[#allocation89_spill] sm:$0xff] %v23135_v13 }
 0x360   : > { %v23130_v61 = vrot.slane %v5009_v33, %v20242_v57  ;;  %v27102_v25 = vunpack.c.l.b16 %v23121_v46  ;;  %v6519_v5 = vrot.slane %v6512_v52, %v20242_v57  ;;  %v8181_v28 = vrot.slane %v8174_v29, %v20242_v57  ;;  %v19595_v16 = vpop.f32.mrf.mxu0 }
 0x361   : > { %v8167_v54 = vrot.slane %v8160_v48, %v20242_v57  ;;  %v8195_v36 = vrot.slane %v8188_v63, %v20242_v57  ;;  %v8209_v17 = vrot.slane %v8202_v20, %v20242_v57  ;;  %v8216_v37 = vrot.slane %v2864_v0, %v20242_v57 }
 0x362   : > { %v23142_v2 = vrot.slane %v8132_v58, %v20242_v57  ;;  %v27103_v33 = vunpack.c.l.b16 %v23130_v61  ;;  %v23147_v52 = vrot.slane %v27102_v25, 5  ;;  %v6634_v29 = vunpack.c.l.b16 %v6519_v5 }
 0x363   : > { %v27107_v13 = vunpack.c.l.b16 %v23108_v50  ;;  %v8223_v48 = vrot.slane %v8216_v37, %v20242_v57  ;;  %v23151_v63 = vunpack.c.l.b16 %v8181_v28  ;;  %v8924_v20 = vunpack.c.l.b16 %v8195_v36 }
 0x364   : > { %v27433_v58 = vrot.slane %v23043_v40, 7  ;;  %v23161_v25 = vrot.slane %v27103_v33, 4  ;;  %v8922_v5 = vunpack.c.l.b16 %v8167_v54  ;;  %v8153_v16 = vrot.slane %v23117_v31, %v20242_v57 }
 0x365   : > { %v6740_v28 = vsel %vm5756_vm3, %v23147_v52, %v6739_v45  ;;  %v6742_v37 = vrot.slane %v6634_v29, 3  ;;  %v23167_v36 = vunpack.c.l.b16 %v8209_v17  ;;  %v23171_v40 = vrot.slane %v2814_v14, %v20242_v57  ;;  %v23185_v29 = vpop.f32.mrf.mxu0 }
 0x366   : > { %v23157_v9 = vsel %vm5753_vm2, %v27433_v58, %v9385_v4  ;;  %v6741_v4 = vsel %vm5759_vm4, %v23161_v25, %v6740_v28  ;;  %v9130_v58 = vrot.slane %v23151_v63, 7  ;;  %v23178_v54 = vrot.slane %v27107_v13, 1  ;;  %27435 = vst [vmem:[#allocation91_spill] sm:$0xff] %v23185_v29 }
 0x367   : > { %v23181_v31 = vsel %vm5762_vm5, %v6742_v37, %v6741_v4  ;;  %v23183_v45 = vunpack.c.l.b16 %v8223_v48  ;;  %v9132_v17 = vrot.slane %v8924_v20, 6  ;;  %v27436_v14 = vunpack.c.l.b16 %v23111_v24  ;;  %v27437_v48 = vld [vmem:[#allocation58_spill] sm:$0xff]  ;;  %v19598_v29 = vpop.f32.mrf.mxu0 }
 0x368   : > { %27434 = vst [vmem:[#allocation90_spill] sm:$0xff] %v23181_v31  ;;  %v9131_v0 = vsel %vm5750_vm1, %v9130_v58, %v8922_v5  ;;  %v9134_v28 = vrot.slane %v23167_v36, 5  ;;  %v9394_v10 = vrot.slane %v8922_v5, 1  ;;  %v23193_v26 = vrot.slane %v8924_v20, 7 }
 0x369   : > { %v9124_v33 = vrot.slane %v27436_v14, 5  ;;  %v9133_v13 = vsel %vm5753_vm2, %v9132_v17, %v9131_v0  ;;  %v27438_v37 = vpack.c.b16 %v22111_v3, %v27437_v48  ;;  %v27110_v5 = vrot.slane %v23167_v36, 6  ;;  %v23213_v29 = vpop.f32.mrf.mxu0 }
 0x36a   : > { %v9135_v14 = vsel %vm5756_vm3, %v9134_v28, %v9133_v13  ;;  %v9395_v58 = vsel %vm5750_vm1, %v23151_v63, %v9394_v10  ;;  %v986_v19 = vadd.f32 %v22545_v60, %v20231_v43  ;;  %v9136_v20 = vrot.slane %v23183_v45, 4 }
 0x36b   : > { %v23199_v4 = vrot.slane %v27438_v37, %v20242_v57  ;;  %v9397_v0 = vsel %vm5753_vm2, %v23193_v26, %v9395_v58  ;;  %v27440_v60 = vpack.c.b16 %v22507_v51, %v22498_v41  ;;  %v27441_v28 = vpack.c.b16 %v22516_v55, %v22511_v23  ;;  %v19599_v23 = vpop.f32.mrf.mxu0 }
 0x36c   : > { %v9399_v10 = vsel %vm5756_vm3, %v27110_v5, %v9397_v0  ;;  %v18670_v37 = vpack.c.b16 %v22686_v62, %v22681_v12  ;;  %v27444_v0 = vpack.c.b16 %v22831_v35, %v22689_v15  ;;  %v11596_v51 = vcombine.low %v22877_v42, %v22868_v47 }
 0x36d   : > { %27439 = vst [vmem:[#allocation58_spill] sm:$0xff] %v23199_v4  ;;  %v11424_v17 = vcombine.low %v23199_v4, %v22504_v6  ;;  %v11489_v13 = vrot.slane %v27440_v60, %v20242_v57  ;;  %v23226_v48 = vrot.slane %v27441_v28, %v20242_v57  ;;  %v11676_v60 = vcombine.low %v22868_v47, %v22909_v18 }
 0x36e   : > { %v11579_v5 = vrot.slane %v27444_v0, %v20242_v57  ;;  %v11572_v62 = vrot.slane %v18670_v37, %v20242_v57  ;;  %v23249_v35 = vrot.slane %v11596_v51, %v20242_v57  ;;  %v989_v0 = vadd.f32 %v22732_v8, %v20231_v43 }
 0x36f   : > { %27442 = vst [vmem:[#allocation92_spill] sm:$0xff] %v23226_v48  ;;  %v23231_v58 = vrot.slane %v11424_v17, %v20242_v57  ;;  %v11504_v55 = vcombine.low %v22504_v6, %v11489_v13  ;;  %v11505_v28 = vcombine.high %v22504_v6, %v11489_v13  ;;  %v11506_v12 = vcombine.low %v22526_v44, %v23226_v48 }
 0x370   : > { %v1178_v17 = vmax.f32 %v986_v19, 0.0  ;;  %27445 = vst [vmem:[#allocation94_spill] sm:$0xff] %v23249_v35  ;;  %v11594_v3 = vcombine.low %v11572_v62, %v11579_v5  ;;  %v23260_v42 = vrot.slane %v11676_v60, %v20242_v57  ;;  %v11595_v19 = vcombine.high %v11572_v62, %v11579_v5 }
 0x371   : > { %27443 = vst [vmem:[#allocation93_spill] sm:$0xff] %v23231_v58  ;;  %v11455_v15 = vcombine.high %v22603_v39, %v23231_v58  ;;  %v23254_v23 = vrot.slane %v11504_v55, %v20242_v57  ;;  %v23257_v13 = vrot.slane %v11506_v12, %v20242_v57  ;;  %v1179_v37 = vmax.f32 %v989_v0, 0.0 }
 0x372   : > { %27448 = vst [vmem:[#allocation97_spill] sm:$0xff] %v23260_v42  ;;  %v23263_v39 = vsel %vm5759_vm4, %v9136_v20, %v9135_v14  ;;  %v27449_v51 = vrot.slane %v23183_v45, 5  ;;  %v23271_v8 = vrot.slane %v11505_v28, %v20242_v57  ;;  %v11604_v12 = vrot.slane %v11594_v3, %v20242_v57 }
 0x373   : > { %27446 = vst [vmem:[#allocation95_spill] sm:$0xff] %v23254_v23  ;;  %27447 = vst [vmem:[#allocation96_spill] sm:$0xff] %v23257_v13  ;;  %v11537_v55 = vcombine.high %v23254_v23, %v23257_v13  ;;  %v18740_v60 = vcombine.low %v11455_v15, %v23254_v23  ;;  %v23277_v5 = vunpack.c.l.b16 %v8153_v16  ;;  %v11611_v14 = vrot.slane %v11595_v19, %v20242_v57  ;;  %v23291_v19 = vpop.f32.mrf.mxu0 }
 0x374   : > { %v23268_v58 = vsel %vm5759_vm4, %v27449_v51, %v9399_v10  ;;  %27450 = vst [vmem:[#allocation98_spill] sm:$0xff] %v23271_v8  ;;  %v1243_v20 = vpack.c.bf16 %v1179_v37, %v1178_v17  ;;  %v18617_v62 = vpack.c.bf16 %v1179_v37, %v1179_v37  ;;  %v5916_v0 = vrot.slane %v23045_v59, 6 }
 0x375   : > { %v27451_v10 = vunpack.c.l.b16 %v23142_v2  ;;  %v11627_v28 = vcombine.high %v11604_v12, %v23249_v35  ;;  %v18742_v44 = vcombine.low %v23271_v8, %v11537_v55  ;;  %v27452_v13 = vunpack.c.l.b16 %v23108_v50 }
 0x376   : > { %v9125_v16 = vsel %vm5756_vm3, %v9124_v33, %v23097_v49  ;;  %v18744_v15 = vcombine.low %v11604_v12, %v11611_v14  ;;  %v2872_v17 = vrot.slane %v1243_v20, %v20242_v57  ;;  %v2879_v55 = vrot.slane %v18617_v62, %v20242_v57  ;;  %v19602_v12 = vpop.f32.mrf.mxu0 }
 0x377   : > { %v9126_v51 = vrot.slane %v27451_v10, 4  ;;  %v5915_v3 = vsel %vm5750_vm1, %v5914_v21, %v27452_v13  ;;  %v18746_v37 = vcombine.low %v11627_v28, %v23260_v42  ;;  %v13464_v10 = vrot.slane %v18740_v60, %v20242_v57 }
 0x378   : > { %v13478_v35 = vrot.slane %v18742_v44, %v20242_v57  ;;  %v6179_v21 = vsel %vm5750_vm1, %v23050_v30, %v23178_v54  ;;  %v27453_v50 = vunpack.c.l.b16 %v23111_v24  ;;  %v2880_v33 = vcombine.high %v2872_v17, %v2872_v17  ;;  %v23309_v24 = vpop.f32.mrf.mxu0 }
 0x379   : > { %v2888_v13 = vrot.slane %v2872_v17, %v20242_v57  ;;  %v13492_v14 = vrot.slane %v18744_v15, %v20242_v57  ;;  %v13506_v20 = vrot.slane %v18746_v37, %v20242_v57  ;;  %v5917_v44 = vsel %vm5753_vm2, %v5916_v0, %v5915_v3 }
 0x37a   : > { %v9388_v49 = vrot.slane %v27453_v50, 6  ;;  %v13515_v60 = vcombine.high %v13464_v10, %v13478_v35  ;;  %v13514_v28 = vcombine.low %v13464_v10, %v13478_v35  ;;  %v5918_v62 = vrot.slane %v23048_v38, 5  ;;  %v19603_v10 = vpop.f32.mrf.mxu0 }
 0x37b   : > { %v9127_v8 = vsel %vm5759_vm4, %v9126_v51, %v9125_v16  ;;  %v2902_v30 = vrot.slane %v2880_v33, %v20242_v57  ;;  %v13519_v54 = vcombine.high %v13492_v14, %v13506_v20  ;;  %v13518_v50 = vcombine.low %v13492_v14, %v13506_v20 }
 0x37c   : > { %v2881_v17 = vcombine.high %v2879_v55, %v2879_v55  ;;  %v2910_v12 = vcombine.high %v2888_v13, %v2888_v13  ;;  %v9128_v15 = vrot.slane %v23277_v5, 3  ;;  %v9389_v37 = vsel %vm5756_vm3, %v9388_v49, %v23157_v9 }
 0x37d   : > { %v27454_v35 = vunpack.c.l.b16 %v23142_v2  ;;  %v2912_v3 = vcombine.high %v2902_v30, %v2902_v30  ;;  %v23317_v51 = vrot.slane %v13515_v60, %v20242_v57  ;;  %v23320_v16 = vrot.slane %v13519_v54, %v20242_v57 }
 0x37e   : > { %v23323_v33 = vrot.slane %v13514_v28, %v20242_v57  ;;  %v23326_v14 = vrot.slane %v13518_v50, %v20242_v57  ;;  %v9949_v9 = vsel %vm5753_vm2, %v9388_v49, %v23091_v32  ;;  %v2895_v2 = vrot.slane %v2879_v55, %v20242_v57 }
 0x37f   : > { %v9390_v0 = vrot.slane %v27454_v35, 5  ;;  %27455 = vst [vmem:[#allocation99_spill] sm:$0xff] %v23317_v51  ;;  %27456 = vst [vmem:[#allocation100_spill] sm:$0xff] %v23320_v16  ;;  %v5037_v20 = vrot.slane %v2912_v3, %v20242_v57  ;;  %v8230_v35 = vrot.slane %v2888_v13, %v20242_v57  ;;  %v13582_v60 = vcombine.low %v23317_v51, %v23320_v16 }
 0x380   : > { %27457 = vst [vmem:[#allocation101_spill] sm:$0xff] %v23323_v33  ;;  %27458 = vst [vmem:[#allocation102_spill] sm:$0xff] %v23326_v14  ;;  %v13578_v54 = vcombine.low %v23323_v33, %v23326_v14  ;;  %v2909_v28 = vrot.slane %v2881_v17, %v20242_v57  ;;  %v5023_v50 = vrot.slane %v2910_v12, %v20242_v57  ;;  %v27459_v10 = vrot.slane %v23045_v59, 7 }
 0x381   : > { %v9392_v55 = vrot.slane %v23277_v5, 4  ;;  %v9721_v49 = vrot.slane %v23171_v40, %v20242_v57  ;;  %v5044_v13 = vrot.slane %v5037_v20, %v20242_v57  ;;  %v23347_v3 = vsel %vm5762_vm5, %v9128_v15, %v9127_v8  ;;  %14952 = vmatprep.mubr.bf16.mxu1 %v13582_v60 }
 0x382   : > { %v6181_v32 = vsel %vm5753_vm2, %v27459_v10, %v6179_v21  ;;  %v9391_v23 = vsel %vm5759_vm4, %v9390_v0, %v9389_v37  ;;  %v9950_v17 = vsel %vm5756_vm3, %v9390_v0, %v9949_v9  ;;  %v997_v59 = vadd.f32 %v22815_v53, %v20231_v43  ;;  %14953 = vmatmul.mubr.bf16.gmra.mxu1 %v13578_v54 }
 0x383   : > { %v9954_v5 = vsel %vm5750_vm1, %v23193_v26, %v23151_v63  ;;  %v2911_v21 = vcombine.high %v2895_v2, %v2895_v2  ;;  %v5051_v40 = vrot.slane %v2895_v2, %v20242_v57  ;;  %v8237_v12 = vrot.slane %v8230_v35, %v20242_v57 }
 0x384   : > { %v2913_v8 = vcombine.high %v2909_v28, %v2909_v28  ;;  %v5030_v15 = vrot.slane %v5023_v50, %v20242_v57  ;;  %v9728_v37 = vrot.slane %v2902_v30, %v20242_v57  ;;  %v994_v0 = vadd.f32 %v22794_v27, %v20231_v43 }
 0x385   : > { %v23362_v9 = vunpack.c.l.b16 %v9721_v49  ;;  %v5919_v53 = vsel %vm5756_vm3, %v5918_v62, %v5917_v44  ;;  %v5065_v26 = vrot.slane %v2909_v28, %v20242_v57  ;;  %v23366_v63 = vunpack.c.l.b16 %v5044_v13 }
 0x386   : > { %v23369_v2 = vsel %vm5762_vm5, %v9392_v55, %v9391_v23  ;;  %v23372_v20 = vsel %vm5759_vm4, %v9392_v55, %v9950_v17  ;;  %v27460_v35 = vunpack.c.l.b16 %v23121_v46  ;;  %v1181_v60 = vmax.f32 %v997_v59, 0.0 }
 0x387   : > { %v27461_v27 = vrot.slane %v23167_v36, 6  ;;  %v5058_v44 = vrot.slane %v5051_v40, %v20242_v57  ;;  %v5079_v62 = vrot.slane %v2911_v21, %v20242_v57  ;;  %v8927_v28 = vunpack.c.l.b16 %v8237_v12  ;;  %v23388_v12 = vpop.f32.mrf.mxu0 }
 0x388   : > { %v5920_v30 = vrot.slane %v27460_v35, 4  ;;  %v5093_v50 = vrot.slane %v2913_v8, %v20242_v57  ;;  %v5707_v23 = vunpack.c.l.b16 %v5030_v15  ;;  %v9735_v10 = vrot.slane %v9728_v37, %v20242_v57 }
 0x389   : > { %v9955_v54 = vsel %vm5753_vm2, %v27461_v27, %v9954_v5  ;;  %v1180_v55 = vmax.f32 %v994_v0, 0.0  ;;  %v5072_v49 = vrot.slane %v5065_v26, %v20242_v57  ;;  %v5924_v46 = vrot.slane %v23366_v63, 7 }
 0x38a   : > { %v9138_v13 = vrot.slane %v8927_v28, 3  ;;  %v9402_v17 = vrot.slane %v8927_v28, 4  ;;  %v9850_v36 = vunpack.c.l.b16 %v9735_v10  ;;  %v27462_v59 = vrot.slane %v23183_v45, 5 }
 0x38b   : > { %v1244_v40 = vpack.c.bf16 %v1181_v60, %v1180_v55  ;;  %v18618_v21 = vpack.c.bf16 %v1181_v60, %v1181_v60  ;;  %v5086_v8 = vrot.slane %v5079_v62, %v20242_v57  ;;  %v5709_v15 = vunpack.c.l.b16 %v5058_v44 }
 0x38c   : > { %v9956_v5 = vsel %vm5756_vm3, %v27462_v59, %v9955_v54  ;;  %v23393_v37 = vsel %vm5762_vm5, %v9138_v13, %v23263_v39  ;;  %v6188_v26 = vrot.slane %v5707_v23, 1  ;;  %v9958_v35 = vrot.slane %v9850_v36, 3  ;;  %v19606_v54 = vpop.f32.mrf.mxu0 }
 0x38d   : > { %v9957_v0 = vsel %vm5759_vm4, %v9402_v17, %v9956_v5  ;;  %v2921_v27 = vrot.slane %v1244_v40, %v20242_v57  ;;  %v5100_v60 = vrot.slane %v5093_v50, %v20242_v57  ;;  %v5710_v28 = vunpack.c.l.b16 %v5072_v49 }
 0x38e   : > { %v5925_v62 = vsel %vm5750_vm1, %v5924_v46, %v5707_v23  ;;  %v2928_v44 = vrot.slane %v18618_v21, %v20242_v57  ;;  %v23404_v39 = vsel %vm5762_vm5, %v9402_v17, %v23268_v58  ;;  %v23407_v10 = vsel %vm5762_vm5, %v9958_v35, %v9957_v0  ;;  %v23410_v36 = vpop.f32.mrf.mxu0 }
 0x38f   : > { %v2929_v55 = vcombine.high %v2921_v27, %v2921_v27  ;;  %v2937_v13 = vrot.slane %v2921_v27, %v20242_v57  ;;  %v27463_v59 = vrot.slane %v23048_v38, 6  ;;  %v5926_v49 = vrot.slane %v5709_v15, 6 }
 0x390   : > { %v18684_v23 = vpack.c.b16 %v23407_v10, %v23404_v39  ;;  %v2930_v46 = vcombine.high %v2928_v44, %v2928_v44  ;;  %v6189_v58 = vsel %vm5750_vm1, %v23366_v63, %v6188_v26  ;;  %v2944_v17 = vrot.slane %v2928_v44, %v20242_v57  ;;  %v19607_v21 = vpop.f32.mrf.mxu0 }
 0x391   : > { %v6183_v50 = vsel %vm5756_vm3, %v27463_v59, %v6181_v32  ;;  %v2951_v5 = vrot.slane %v2929_v55, %v20242_v57  ;;  %v2959_v40 = vcombine.high %v2937_v13, %v2937_v13  ;;  %v27464_v0 = vunpack.c.l.b16 %v23130_v61 }
 0x392   : > { %v5711_v38 = vunpack.c.l.b16 %v5086_v8  ;;  %v5927_v32 = vsel %vm5753_vm2, %v5926_v49, %v5925_v62  ;;  %v6190_v27 = vrot.slane %v5709_v15, 7  ;;  %v5921_v54 = vsel %vm5759_vm4, %v5920_v30, %v5919_v53  ;;  %v23429_v44 = vpop.f32.mrf.mxu0 }
 0x393   : > { %v5922_v35 = vrot.slane %v27464_v0, 3  ;;  %v6185_v59 = vsel %vm5759_vm4, %v23147_v52, %v6183_v50  ;;  %v23427_v45 = vunpack.c.l.b16 %v5100_v60  ;;  %v5928_v26 = vrot.slane %v5710_v28, 5 }
 0x394   : > { %v6191_v55 = vsel %vm5753_vm2, %v6190_v27, %v6189_v58  ;;  %v23433_v21 = vrot.slane %v2930_v46, %v20242_v57  ;;  %v2961_v61 = vcombine.high %v2951_v5, %v2951_v5  ;;  %v6526_v8 = vrot.slane %v2937_v13, %v20242_v57  ;;  %v19610_v52 = vpop.f32.mrf.mxu0 }
 0x395   : > { %v5929_v15 = vsel %vm5756_vm3, %v5928_v26, %v5927_v32  ;;  %v6192_v62 = vrot.slane %v5710_v28, 6  ;;  %v2960_v53 = vcombine.high %v2944_v17, %v2944_v17  ;;  %v8258_v30 = vrot.slane %v2959_v40, %v20242_v57 }
 0x396   : > { %v9952_v60 = vrot.slane %v23362_v9, 3  ;;  %v5923_v50 = vsel %vm5762_vm5, %v5922_v35, %v5921_v54  ;;  %v5930_v49 = vrot.slane %v5711_v38, 4  ;;  %v8244_v58 = vrot.slane %v2951_v5, %v20242_v57  ;;  %v23447_v32 = vpop.f32.mrf.mxu0 }
 0x397   : > { %v6187_v46 = vsel %vm5762_vm5, %v23161_v25, %v6185_v59  ;;  %v6193_v0 = vsel %vm5756_vm3, %v6192_v62, %v6191_v55  ;;  %v6744_v13 = vsel %vm5750_vm1, %v6190_v27, %v23366_v63  ;;  %v8286_v28 = vrot.slane %v2944_v17, %v20242_v57 }
 0x398   : > { %v5931_v40 = vsel %vm5759_vm4, %v5930_v49, %v5929_v15  ;;  %v6533_v9 = vrot.slane %v6526_v8, %v20242_v57  ;;  %v8272_v35 = vrot.slane %v2961_v61, %v20242_v57  ;;  %v8300_v5 = vrot.slane %v23433_v21, %v20242_v57  ;;  %v19611_v27 = vpop.f32.mrf.mxu0 }
 0x399   : > { %v5932_v25 = vrot.slane %v23427_v45, 3  ;;  %v6194_v54 = vrot.slane %v5711_v38, 5  ;;  %v8265_v59 = vrot.slane %v8258_v30, %v20242_v57  ;;  %v8314_v63 = vrot.slane %v2960_v53, %v20242_v57 }
 0x39a   : > { %v23459_v17 = vsel %vm5762_vm5, %v9952_v60, %v23372_v20  ;;  %v18682_v26 = vpack.c.b16 %v6187_v46, %v5923_v50  ;;  %v6196_v55 = vrot.slane %v23427_v45, 4  ;;  %v8251_v61 = vrot.slane %v8244_v58, %v20242_v57 }
 0x39b   : > { %v23464_v8 = vsel %vm5762_vm5, %v5932_v25, %v5931_v40  ;;  %v6195_v15 = vsel %vm5759_vm4, %v6194_v54, %v6193_v0  ;;  %v6745_v38 = vsel %vm5753_vm2, %v6192_v62, %v6744_v13  ;;  %v8293_v30 = vrot.slane %v8286_v28, %v20242_v57  ;;  %v23493_v25 = vpop.f32.mrf.mxu0 }
 0x39c   : > { %v6635_v53 = vunpack.c.l.b16 %v6533_v9  ;;  %v8279_v52 = vrot.slane %v8272_v35, %v20242_v57  ;;  %v8307_v20 = vrot.slane %v8300_v5, %v20242_v57  ;;  %v1002_v60 = vadd.f32 %v22873_v11, %v20231_v43 }
 0x39d   : > { %v8321_v45 = vrot.slane %v8314_v63, %v20242_v57  ;;  %v23474_v50 = vunpack.c.l.b16 %v8265_v59  ;;  %v1005_v49 = vadd.f32 %v22888_v7, %v20231_v43  ;;  %v1013_v62 = vadd.f32 %v22945_v1, %v20231_v43 }
 0x39e   : > { %v23483_v46 = vsel %vm5762_vm5, %v6196_v55, %v6195_v15  ;;  %v2962_v0 = vcombine.high %v23433_v21, %v23433_v21  ;;  %v8928_v11 = vunpack.c.l.b16 %v8251_v61  ;;  %v23488_v13 = vrot.slane %v18682_v26, %v20242_v57 }
 0x39f   : > { %v6746_v28 = vsel %vm5756_vm3, %v6194_v54, %v6745_v38  ;;  %v8931_v40 = vunpack.c.l.b16 %v8293_v30  ;;  %v6748_v1 = vrot.slane %v6635_v53, 3  ;;  %v8930_v9 = vunpack.c.l.b16 %v8279_v52  ;;  %v19614_v38 = vpop.f32.mrf.mxu0 }
 0x3a0   : > { %v8932_v35 = vunpack.c.l.b16 %v8307_v20  ;;  %v1182_v5 = vmax.f32 %v1002_v60, 0.0  ;;  %v23495_v59 = vunpack.c.l.b16 %v8321_v45  ;;  %v9140_v21 = vrot.slane %v23474_v50, 7 }
 0x3a1   : > { %v1183_v63 = vmax.f32 %v1005_v49, 0.0  ;;  %v1185_v27 = vmax.f32 %v1013_v62, 0.0  ;;  %v23502_v54 = vrot.slane %v18684_v23, %v20242_v57  ;;  %v6747_v26 = vsel %vm5759_vm4, %v6196_v55, %v6746_v28  ;;  %v23517_v10 = vpop.f32.mrf.mxu0 }
 0x3a2   : > { %v9404_v61 = vrot.slane %v8928_v11, 1  ;;  %v23506_v15 = vrot.slane %v2962_v0, %v20242_v57  ;;  %v23508_v30 = vrot.slane %v8931_v40, 5  ;;  %v23511_v60 = vsel %vm5762_vm5, %v6748_v1, %v6747_v26 }
 0x3a3   : > { %v1245_v53 = vpack.c.bf16 %v1183_v63, %v1182_v5  ;;  %v18619_v52 = vpack.c.bf16 %v1183_v63, %v1183_v63  ;;  %v18620_v20 = vpack.c.bf16 %v1185_v27, %v1185_v27  ;;  %27465 = vst [vmem:[#allocation103_spill] sm:$0xff] %v23511_v60  ;;  %v9142_v45 = vrot.slane %v8930_v9, 6  ;;  %v19615_v63 = vpop.f32.mrf.mxu0 }
 0x3a4   : > { %v23513_v49 = vrot.slane %v8932_v35, 4  ;;  %v23515_v39 = vrot.slane %v8931_v40, 6  ;;  %v9141_v23 = vsel %vm5750_vm1, %v9140_v21, %v8928_v11  ;;  %v9405_v28 = vsel %vm5750_vm1, %v23474_v50, %v9404_v61 }
 0x3a5   : > { %v2970_v62 = vrot.slane %v1245_v53, %v20242_v57  ;;  %v2977_v0 = vrot.slane %v18619_v52, %v20242_v57  ;;  %v23525_v1 = vrot.slane %v8932_v35, 5  ;;  %v3018_v5 = vrot.slane %v18620_v20, %v20242_v57 }
 0x3a6   : > { %v1021_v40 = vadd.f32 %v22973_v56, %v20231_v43  ;;  %v9143_v38 = vsel %vm5753_vm2, %v9142_v45, %v9141_v23  ;;  %v9406_v53 = vrot.slane %v8930_v9, 7  ;;  %v9749_v61 = vrot.slane %v23506_v15, %v20242_v57 }
 0x3a7   : > { %v2978_v27 = vcombine.high %v2970_v62, %v2970_v62  ;;  %v2979_v26 = vcombine.high %v2977_v0, %v2977_v0  ;;  %v2986_v11 = vrot.slane %v2970_v62, %v20242_v57  ;;  %v2993_v21 = vrot.slane %v2977_v0, %v20242_v57 }
 0x3a8   : > { %v1018_v35 = vadd.f32 %v22957_v34, %v20231_v43  ;;  %v3019_v0 = vcombine.high %v3018_v5, %v3018_v5  ;;  %v1187_v58 = vmax.f32 %v1021_v40, 0.0  ;;  %v3026_v55 = vrot.slane %v3018_v5, %v20242_v57 }
 0x3a9   : > { %v3000_v52 = vrot.slane %v2978_v27, %v20242_v57  ;;  %v3007_v56 = vrot.slane %v2979_v26, %v20242_v57  ;;  %v3008_v20 = vcombine.high %v2986_v11, %v2986_v11  ;;  %v3009_v63 = vcombine.high %v2993_v21, %v2993_v21 }
 0x3aa   : > { %v10200_v7 = vrot.slane %v2986_v11, %v20242_v57  ;;  %v10256_v62 = vrot.slane %v2993_v21, %v20242_v57  ;;  %v1186_v6 = vmax.f32 %v1018_v35, 0.0 }
 0x3ab   : > { %v3010_v45 = vcombine.high %v3000_v52, %v3000_v52  ;;  %v10214_v9 = vrot.slane %v3000_v52, %v20242_v57  ;;  %v10228_v15 = vrot.slane %v3008_v20, %v20242_v57  ;;  %v10270_v23 = vrot.slane %v3007_v56, %v20242_v57 }
 0x3ac   : > { %v10207_v34 = vrot.slane %v10200_v7, %v20242_v57  ;;  %v10263_v27 = vrot.slane %v10256_v62, %v20242_v57  ;;  %v10508_v26 = vrot.slane %v3009_v63, %v20242_v57  ;;  %v9407_v20 = vsel %vm5753_vm2, %v9406_v53, %v9405_v28 }
 0x3ad   : > { %v10221_v11 = vrot.slane %v10214_v9, %v20242_v57  ;;  %v10235_v21 = vrot.slane %v10228_v15, %v20242_v57  ;;  %v10242_v40 = vrot.slane %v3010_v45, %v20242_v57  ;;  %v23552_v52 = vrot.slane %v10270_v23, %v20242_v57 }
 0x3ae   : > { %v9960_v7 = vsel %vm5750_vm1, %v9406_v53, %v23474_v50  ;;  %v10374_v56 = vunpack.c.l.b16 %v10207_v34  ;;  %v10515_v62 = vrot.slane %v10508_v26, %v20242_v57  ;;  %v18621_v9 = vpack.c.bf16 %v1187_v58, %v1187_v58 }
 0x3af   : > { %v10249_v63 = vrot.slane %v10242_v40, %v20242_v57  ;;  %v10375_v5 = vunpack.c.l.b16 %v10221_v11  ;;  %v10376_v48 = vunpack.c.l.b16 %v10235_v21  ;;  %v10378_v4 = vunpack.c.l.b16 %v10263_v27 }
 0x3b0   : > { %v3033_v15 = vrot.slane %v3019_v0, %v20242_v57  ;;  %v3034_v45 = vcombine.high %v3026_v55, %v3026_v55  ;;  %v10379_v33 = vunpack.c.l.b16 %v23552_v52  ;;  %v10450_v14 = vrot.slane %v10374_v56, 1 }
 0x3b1   : > { %v10377_v23 = vunpack.c.l.b16 %v10249_v63  ;;  %v10406_v28 = vrot.slane %v10375_v5, 7  ;;  %v9145_v50 = vsel %vm5756_vm3, %v23508_v30, %v9143_v38  ;;  %v9409_v53 = vsel %vm5756_vm3, %v23515_v39, %v9407_v20 }
 0x3b2   : > { %v10452_v34 = vrot.slane %v10376_v48, 7  ;;  %v10532_v26 = vunpack.c.l.b16 %v10515_v62  ;;  %v10408_v11 = vrot.slane %v10376_v48, 6  ;;  %v1247_v27 = vpack.c.bf16 %v1187_v58, %v1186_v6 }
 0x3b3   : > { %v10454_v21 = vrot.slane %v10377_v23, 6  ;;  %v3050_v0 = vrot.slane %v18621_v9, %v20242_v57  ;;  %v10407_v55 = vsel %vm5750_vm1, %v10406_v28, %v10374_v56  ;;  %v10456_v35 = vrot.slane %v10378_v4, 5 }
 0x3b4   : > { %v10546_v40 = vsel %vm5750_vm1, %v10452_v34, %v10375_v5  ;;  %v5107_v52 = vrot.slane %v3034_v45, %v20242_v57  ;;  %v10451_v63 = vsel %vm5750_vm1, %v10375_v5, %v10450_v14  ;;  %v10458_v30 = vrot.slane %v10379_v33, 4 }
 0x3b5   : > { %v10547_v38 = vsel %vm5753_vm2, %v10454_v21, %v10546_v40  ;;  %v3035_v20 = vcombine.high %v3033_v15, %v3033_v15  ;;  %v9961_v48 = vsel %vm5753_vm2, %v23515_v39, %v9960_v7  ;;  %v10410_v62 = vrot.slane %v10377_v23, 5 }
 0x3b6   : > { %v10548_v6 = vsel %vm5756_vm3, %v10456_v35, %v10547_v38  ;;  %v10550_v58 = vrot.slane %v10532_v26, 3  ;;  %v9147_v56 = vsel %vm5759_vm4, %v23513_v49, %v9145_v50  ;;  %v9851_v9 = vunpack.c.l.b16 %v9749_v61 }
 0x3b7   : > { %v10409_v28 = vsel %vm5753_vm2, %v10408_v11, %v10407_v55  ;;  %v10549_v45 = vsel %vm5759_vm4, %v10458_v30, %v10548_v6  ;;  %v10453_v14 = vsel %vm5753_vm2, %v10452_v34, %v10451_v63  ;;  %v5114_v15 = vrot.slane %v5107_v52, %v20242_v57 }
 0x3b8   : > { %v23580_v5 = vsel %vm5762_vm5, %v10550_v58, %v10549_v45  ;;  %v3043_v39 = vrot.slane %v1247_v27, %v20242_v57  ;;  %v9962_v7 = vsel %vm5756_vm3, %v23525_v1, %v9961_v48  ;;  %v5121_v23 = vrot.slane %v3035_v20, %v20242_v57  ;;  %v27468_v58 = vld [vmem:[#allocation17_spill] sm:$0xff] }
 0x3b9   : > { %27466 = vst [vmem:[#allocation104_spill] sm:$0xff] %v23580_v5  ;;  %v3052_v49 = vcombine.high %v3050_v0, %v3050_v0  ;;  %v23588_v61 = vrot.slane %v3050_v0, %v20242_v57  ;;  %v27467_v50 = vrot.slane %v23495_v59, 3  ;;  %v9411_v26 = vsel %vm5759_vm4, %v23525_v1, %v9409_v53  ;;  %v27482_v5 = vld [vmem:[#allocation87_spill] sm:$0xff] }
 0x3ba   : > { %v9412_v11 = vrot.slane %v23495_v59, 4  ;;  %v10411_v27 = vsel %vm5756_vm3, %v10410_v62, %v10409_v28  ;;  %v10412_v55 = vrot.slane %v10378_v4, 4  ;;  %v10455_v40 = vsel %vm5756_vm3, %v10454_v21, %v10453_v14 }
 0x3bb   : > { %v23593_v34 = vsel %vm5762_vm5, %v27467_v50, %v9147_v56  ;;  %v3080_v52 = vrot.slane %v3052_v49, %v20242_v57  ;;  %v3082_v0 = vcombine.high %v23588_v61, %v23588_v61  ;;  %v9964_v38 = vrot.slane %v9851_v9, 3 }
 0x3bc   : > { %v9963_v63 = vsel %vm5759_vm4, %v9412_v11, %v9962_v7  ;;  %v5713_v20 = vunpack.c.l.b16 %v5114_v15  ;;  %v3051_v48 = vcombine.high %v3043_v39, %v3043_v39  ;;  %v10413_v6 = vsel %vm5759_vm4, %v10412_v55, %v10411_v27  ;;  %v27472_v55 = vld [vmem:[#allocation83_spill] sm:$0xff] }
 0x3bd   : > { %v5128_v1 = vrot.slane %v5121_v23, %v20242_v57  ;;  %v3084_v59 = vcombine.high %v3080_v52, %v3080_v52  ;;  %v8328_v53 = vrot.slane %v3080_v52, %v20242_v57  ;;  %v10414_v4 = vrot.slane %v10379_v33, 3 }
 0x3be   : > { %v10457_v21 = vsel %vm5759_vm4, %v10456_v35, %v10455_v40  ;;  %v3059_v62 = vrot.slane %v3043_v39, %v20242_v57  ;;  %v27469_v56 = vpack.c.b16 %v22804_v22, %v27468_v58  ;;  %v23616_v9 = vsel %vm5762_vm5, %v9412_v11, %v9411_v26  ;;  %v27471_v39 = vld [vmem:[#allocation82_spill] sm:$0xff]  ;;  %v27473_v40 = vld [vmem:[#allocation81_spill] sm:$0xff] }
 0x3bf   : > { %v8342_v45 = vrot.slane %v3082_v0, %v20242_v57  ;;  %v8356_v14 = vrot.slane %v3084_v59, %v20242_v57  ;;  %v11677_v33 = vcombine.high %v22868_v47, %v22909_v18  ;;  %v23623_v35 = vsel %vm5762_vm5, %v9964_v38, %v9963_v63 }
 0x3c0   : > { %v23613_v28 = vrot.slane %v27469_v56, %v20242_v57  ;;  %v23626_v15 = vsel %vm5762_vm5, %v10414_v4, %v10413_v6  ;;  %v3073_v22 = vrot.slane %v3051_v48, %v20242_v57  ;;  %v23632_v23 = vsel %vm5762_vm5, %v10458_v30, %v10457_v21  ;;  %v27478_v4 = vld [vmem:[#allocation84_spill] sm:$0xff] }
 0x3c1   : > { %v23634_v49 = vunpack.c.l.b16 %v5128_v1  ;;  %v6198_v50 = vrot.slane %v5713_v20, 1  ;;  %v23637_v26 = vrot.slane %v8328_v53, %v20242_v57  ;;  %v5135_v11 = vrot.slane %v3059_v62, %v20242_v57  ;;  %v27477_v53 = vld [vmem:[#allocation85_spill] sm:$0xff] }
 0x3c2   : > { %27470 = vst [vmem:[#allocation17_spill] sm:$0xff] %v23613_v28  ;;  %v11678_v7 = vcombine.low %v23613_v28, %v27471_v39  ;;  %v8363_v27 = vrot.slane %v8356_v14, %v20242_v57  ;;  %v27474_v52 = vpack.c.b16 %v27472_v55, %v27473_v40  ;;  %v3081_v63 = vcombine.high %v3059_v62, %v3059_v62 }
 0x3c3   : > { %v8349_v38 = vrot.slane %v8342_v45, %v20242_v57  ;;  %v23651_v48 = vrot.slane %v11677_v33, %v20242_v57  ;;  %v3083_v1 = vcombine.high %v3073_v22, %v3073_v22  ;;  %v27479_v21 = vpack.c.b16 %v27477_v53, %v27478_v4 }
 0x3c4   : > { %v11743_v0 = vrot.slane %v27474_v52, %v20242_v57  ;;  %v23656_v59 = vrot.slane %v11678_v7, %v20242_v57  ;;  %v5934_v62 = vrot.slane %v23634_v49, 7  ;;  %v23667_v56 = vsel %vm5750_vm1, %v23634_v49, %v6198_v50 }
 0x3c5   : > { %27475 = vst [vmem:[#allocation83_spill] sm:$0xff] %v23651_v48  ;;  %v23662_v58 = vrot.slane %v27479_v21, %v20242_v57  ;;  %v5149_v45 = vrot.slane %v3073_v22, %v20242_v57  ;;  %v27128_v14 = vunpack.c.l.b16 %v23637_v26  ;;  %v5142_v33 = vrot.slane %v5135_v11, %v20242_v57 }
 0x3c6   : > { %27476 = vst [vmem:[#allocation105_spill] sm:$0xff] %v23656_v59  ;;  %v6540_v7 = vrot.slane %v23588_v61, %v20242_v57  ;;  %v23674_v55 = vunpack.c.l.b16 %v8363_v27  ;;  %v11758_v52 = vcombine.low %v27471_v39, %v11743_v0  ;;  %v5163_v53 = vrot.slane %v3081_v63, %v20242_v57  ;;  %v27481_v27 = vld [vmem:[#allocation86_spill] sm:$0xff] }
 0x3c7   : > { %27480 = vst [vmem:[#allocation85_spill] sm:$0xff] %v23662_v58  ;;  %v23678_v4 = vunpack.c.l.b16 %v8349_v38  ;;  %v9414_v50 = vrot.slane %v27128_v14, 1  ;;  %v11759_v22 = vcombine.high %v27471_v39, %v11743_v0  ;;  %v5177_v21 = vrot.slane %v3083_v1, %v20242_v57 }
 0x3c8   : > { %v9416_v11 = vrot.slane %v23674_v55, 7  ;;  %v11709_v61 = vcombine.high %v23260_v42, %v23656_v59  ;;  %v11760_v6 = vcombine.low %v27481_v27, %v23662_v58  ;;  %v5156_v30 = vrot.slane %v5149_v45, %v20242_v57 }
 0x3c9   : > { %v9415_v63 = vsel %vm5750_vm1, %v23678_v4, %v9414_v50  ;;  %v11768_v38 = vrot.slane %v11758_v52, %v20242_v57  ;;  %v11775_v18 = vrot.slane %v11759_v22, %v20242_v57  ;;  %v5935_v0 = vsel %vm5750_vm1, %v5934_v62, %v5713_v20  ;;  %v27485_v20 = vld [vmem:[#allocation88_spill] sm:$0xff] }
 0x3ca   : > { %v6547_v1 = vrot.slane %v6540_v7, %v20242_v57  ;;  %v23698_v14 = vsel %vm5750_vm1, %v9416_v11, %v23678_v4  ;;  %v18680_v40 = vpack.c.b16 %v23347_v3, %v27482_v5  ;;  %v5170_v45 = vrot.slane %v5163_v53, %v20242_v57  ;;  %v27487_v3 = vld [vmem:[#allocation89_spill] sm:$0xff] }
 0x3cb   : > { %v5715_v27 = vunpack.c.l.b16 %v5142_v33  ;;  %v27483_v52 = vpack.c.b16 %v23459_v17, %v23369_v2  ;;  %v1026_v62 = vadd.f32 %v27485_v20, %v20231_v43  ;;  %v5184_v7 = vrot.slane %v5177_v21, %v20242_v57 }
 0x3cc   : > { %v23713_v22 = vrot.slane %v11760_v6, %v20242_v57  ;;  %v11825_v28 = vrot.slane %v18680_v40, %v20242_v57  ;;  %v1029_v53 = vadd.f32 %v27487_v3, %v20231_v43  ;;  %v5716_v33 = vunpack.c.l.b16 %v5156_v30 }
 0x3cd   : > { %v23707_v50 = vrot.slane %v27483_v52, %v20242_v57  ;;  %v18750_v2 = vcombine.low %v11768_v38, %v11775_v18  ;;  %v1188_v17 = vmax.f32 %v1026_v62, 0.0  ;;  %v23723_v21 = vsel %vm5753_vm2, %v9416_v11, %v9415_v63 }
 0x3ce   : > { %27486 = vst [vmem:[#allocation88_spill] sm:$0xff] %v23713_v22  ;;  %v11840_v52 = vcombine.low %v23662_v58, %v11825_v28  ;;  %v11841_v20 = vcombine.high %v23662_v58, %v11825_v28  ;;  %v1189_v39 = vmax.f32 %v1029_v53, 0.0  ;;  %v6200_v6 = vrot.slane %v5715_v27, 7 }
 0x3cf   : > { %27484 = vst [vmem:[#allocation84_spill] sm:$0xff] %v23707_v50  ;;  %v11842_v5 = vcombine.low %v23707_v50, %v23488_v13  ;;  %v6636_v42 = vunpack.c.l.b16 %v6547_v1  ;;  %v18748_v30 = vcombine.low %v23651_v48, %v11709_v61  ;;  %v11791_v3 = vcombine.high %v11768_v38, %v23713_v22 }
 0x3d0   : > { %v23731_v18 = vrot.slane %v11840_v52, %v20242_v57  ;;  %v1248_v62 = vpack.c.bf16 %v1189_v39, %v1188_v17  ;;  %v18622_v50 = vpack.c.bf16 %v1189_v39, %v1189_v39  ;;  %v23733_v59 = vunpack.c.l.b16 %v5170_v45 }
 0x3d1   : > { %v23726_v40 = vrot.slane %v11842_v5, %v20242_v57  ;;  %v5936_v28 = vrot.slane %v5715_v27, 6  ;;  %v23736_v11 = vrot.slane %v11841_v20, %v20242_v57  ;;  %v13663_v63 = vrot.slane %v18750_v2, %v20242_v57 }
 0x3d2   : > { %27489 = vst [vmem:[#allocation106_spill] sm:$0xff] %v23731_v18  ;;  %v18752_v61 = vcombine.low %v11791_v3, %v23731_v18  ;;  %v3092_v38 = vrot.slane %v1248_v62, %v20242_v57  ;;  %v3099_v1 = vrot.slane %v18622_v50, %v20242_v57  ;;  %v23744_v53 = vunpack.c.l.b16 %v5184_v7 }
 0x3d3   : > { %27488 = vst [vmem:[#allocation89_spill] sm:$0xff] %v23726_v40  ;;  %27490 = vst [vmem:[#allocation107_spill] sm:$0xff] %v23736_v11  ;;  %v11873_v5 = vcombine.high %v23731_v18, %v23726_v40  ;;  %v5938_v39 = vrot.slane %v5716_v33, 5  ;;  %v6202_v45 = vrot.slane %v5716_v33, 6  ;;  %v13649_v27 = vrot.slane %v18748_v30, %v20242_v57 }
 0x3d4   : > { %v6750_v17 = vsel %vm5750_vm1, %v6200_v6, %v23634_v49  ;;  %v23749_v52 = vrot.slane %v6636_v42, 3  ;;  %v3100_v20 = vcombine.high %v3092_v38, %v3092_v38  ;;  %v3101_v18 = vcombine.high %v3099_v1, %v3099_v1 }
 0x3d5   : > { %v18754_v2 = vcombine.low %v23736_v11, %v11873_v5  ;;  %v13700_v22 = vcombine.high %v13649_v27, %v13663_v63  ;;  %v13699_v3 = vcombine.low %v13649_v27, %v13663_v63  ;;  %v3108_v62 = vrot.slane %v3092_v38, %v20242_v57 }
 0x3d6   : > { %v5937_v50 = vsel %vm5753_vm2, %v5936_v28, %v5935_v0  ;;  %v13677_v7 = vrot.slane %v18752_v61, %v20242_v57  ;;  %v3122_v30 = vrot.slane %v3100_v20, %v20242_v57  ;;  %v1037_v5 = vadd.f32 %v23213_v29, %v20231_v43  ;;  %v27493_v20 = vld [vmem:[#allocation91_spill] sm:$0xff] }
 0x3d7   : > { %v13691_v33 = vrot.slane %v18754_v2, %v20242_v57  ;;  %v3130_v42 = vcombine.high %v3108_v62, %v3108_v62  ;;  %v8370_v40 = vrot.slane %v3108_v62, %v20242_v57  ;;  %v6751_v63 = vsel %vm5753_vm2, %v6202_v45, %v6750_v17 }
 0x3d8   : > { %v3115_v0 = vrot.slane %v3099_v1, %v20242_v57  ;;  %v23764_v28 = vrot.slane %v13700_v22, %v20242_v57  ;;  %v23767_v61 = vrot.slane %v13699_v3, %v20242_v57  ;;  %v3129_v2 = vrot.slane %v3101_v18, %v20242_v57  ;;  %v23782_v1 = vpop.f32.mrf.mxu0 }
 0x3d9   : > { %v13704_v27 = vcombine.high %v13677_v7, %v13691_v33  ;;  %v13703_v38 = vcombine.low %v13677_v7, %v13691_v33  ;;  %v1034_v62 = vadd.f32 %v27493_v20, %v20231_v43  ;;  %v23779_v17 = vrot.slane %v8370_v40, %v20242_v57 }
 0x3da   : > { %27491 = vst [vmem:[#allocation108_spill] sm:$0xff] %v23764_v28  ;;  %27492 = vst [vmem:[#allocation109_spill] sm:$0xff] %v23767_v61  ;;  %v8384_v22 = vrot.slane %v3122_v30, %v20242_v57  ;;  %v3132_v7 = vcombine.high %v3122_v30, %v3122_v30  ;;  %v8398_v18 = vrot.slane %v3130_v42, %v20242_v57  ;;  %v1191_v33 = vmax.f32 %v1037_v5, 0.0  ;;  %v19618_v11 = vpop.f32.mrf.mxu0 }
 0x3db   : > { %v23773_v49 = vrot.slane %v13704_v27, %v20242_v57  ;;  %v23776_v29 = vrot.slane %v13703_v38, %v20242_v57  ;;  %v3131_v20 = vcombine.high %v3115_v0, %v3115_v0  ;;  %v6201_v48 = vsel %vm5753_vm2, %v6200_v6, %v23667_v56 }
 0x3dc   : > { %v23791_v40 = vrot.slane %v8384_v22, %v20242_v57  ;;  %v27148_v3 = vrot.slane %v23744_v53, 4  ;;  %v27496_v30 = vrot.slane %v23733_v59, 5  ;;  %v8405_v5 = vrot.slane %v8398_v18, %v20242_v57 }
 0x3dd   : > { %27494 = vst [vmem:[#allocation91_spill] sm:$0xff] %v23773_v49  ;;  %27495 = vst [vmem:[#allocation110_spill] sm:$0xff] %v23776_v29  ;;  %v13767_v27 = vcombine.low %v23764_v28, %v23773_v49  ;;  %v13763_v38 = vcombine.low %v23767_v61, %v23776_v29  ;;  %v3133_v58 = vcombine.high %v3129_v2, %v3129_v2  ;;  %v1190_v22 = vmax.f32 %v1034_v62, 0.0  ;;  %v23802_v29 = vpop.f32.mrf.mxu0 }
 0x3de   : > { %v6752_v42 = vsel %vm5756_vm3, %v27496_v30, %v6751_v63  ;;  %v5191_v47 = vrot.slane %v3115_v0, %v20242_v57  ;;  %v5939_v11 = vsel %vm5756_vm3, %v5938_v39, %v5937_v50  ;;  %v5205_v56 = vrot.slane %v3129_v2, %v20242_v57 }
 0x3df   : > { %14960 = vmatprep.mubr.bf16.mxu1 %v13767_v27  ;;  %v27149_v6 = vunpack.c.l.b16 %v23791_v40  ;;  %v9756_v63 = vrot.slane %v3132_v7, %v20242_v57  ;;  %v5219_v27 = vrot.slane %v3131_v20, %v20242_v57  ;;  %v23810_v30 = vunpack.c.l.b16 %v8405_v5  ;;  %v19619_v61 = vpop.f32.mrf.mxu0 }
 0x3e0   : > { %14961 = vmatmul.mubr.bf16.gmra.mxu1 %v13763_v38  ;;  %v1249_v0 = vpack.c.bf16 %v1191_v33, %v1190_v22  ;;  %v6203_v62 = vsel %vm5756_vm3, %v6202_v45, %v6201_v48  ;;  %v6753_v39 = vsel %vm5759_vm4, %v27148_v3, %v6752_v42  ;;  %v9150_v50 = vrot.slane %v23678_v4, 7 }
 0x3e1   : > { %v18623_v2 = vpack.c.bf16 %v1191_v33, %v1191_v33  ;;  %v9152_v38 = vrot.slane %v23674_v55, 6  ;;  %v5198_v7 = vrot.slane %v5191_v47, %v20242_v57  ;;  %v5233_v18 = vrot.slane %v3133_v58, %v20242_v57  ;;  %v23833_v33 = vpop.f32.mrf.mxu0 }
 0x3e2   : > { %v27497_v20 = vunpack.c.l.b16 %v23779_v17  ;;  %v5212_v61 = vrot.slane %v5205_v56, %v20242_v57  ;;  %v9420_v48 = vrot.slane %v27149_v6, 5  ;;  %v9422_v45 = vrot.slane %v23810_v30, 4 }
 0x3e3   : > { %v9763_v42 = vrot.slane %v9756_v63, %v20242_v57  ;;  %v5226_v4 = vrot.slane %v5219_v27, %v20242_v57  ;;  %v3141_v58 = vrot.slane %v1249_v0, %v20242_v57  ;;  %v3148_v3 = vrot.slane %v18623_v2, %v20242_v57 }
 0x3e4   : > { %v9418_v5 = vrot.slane %v27497_v20, 6  ;;  %v27499_v0 = vunpack.c.l.b16 %v23637_v26  ;;  %v5719_v28 = vunpack.c.l.b16 %v5198_v7  ;;  %v27501_v7 = vrot.slane %v23733_v59, 4 }
 0x3e5   : > { %v9852_v56 = vunpack.c.l.b16 %v9763_v42  ;;  %v3157_v6 = vrot.slane %v3141_v58, %v20242_v57  ;;  %v3150_v42 = vcombine.high %v3148_v3, %v3148_v3 }
 0x3e6   : > { %v9419_v55 = vsel %vm5756_vm3, %v9418_v5, %v23723_v21  ;;  %v9967_v47 = vsel %vm5753_vm2, %v9418_v5, %v23698_v14  ;;  %v3149_v21 = vcombine.high %v3141_v58, %v3141_v58  ;;  %v19622_v14 = vpop.f32.mrf.mxu0  ;;  %v9151_v5 = vsel %vm5750_vm1, %v9150_v50, %v27499_v0 }
 0x3e7   : > { %v9421_v22 = vsel %vm5759_vm4, %v9420_v48, %v9419_v55  ;;  %v9968_v20 = vsel %vm5756_vm3, %v9420_v48, %v9967_v47  ;;  %v9970_v55 = vrot.slane %v9852_v56, 3  ;;  %v5240_v48 = vrot.slane %v5233_v18, %v20242_v57 }
 0x3e8   : > { %v23839_v63 = vsel %vm5762_vm5, %v9422_v45, %v9421_v22  ;;  %v9969_v27 = vsel %vm5759_vm4, %v9422_v45, %v9968_v20  ;;  %v5720_v47 = vunpack.c.l.b16 %v5212_v61  ;;  %v3171_v2 = vrot.slane %v3149_v21, %v20242_v57  ;;  %v23849_v49 = vpop.f32.mrf.mxu0 }
 0x3e9   : > { %27498 = vst [vmem:[#allocation111_spill] sm:$0xff] %v23839_v63  ;;  %v5247_v22 = vrot.slane %v3157_v6, %v20242_v57  ;;  %v23852_v45 = vsel %vm5762_vm5, %v9970_v55, %v9969_v27  ;;  %v3164_v58 = vrot.slane %v3148_v3, %v20242_v57  ;;  %v3178_v26 = vrot.slane %v3150_v42, %v20242_v57 }
 0x3ea   : > { %27500 = vst [vmem:[#allocation112_spill] sm:$0xff] %v23852_v45  ;;  %v3179_v50 = vcombine.high %v3157_v6, %v3157_v6  ;;  %v23859_v56 = vsel %vm5759_vm4, %v27501_v7, %v5939_v11  ;;  %v5721_v18 = vunpack.c.l.b16 %v5226_v4  ;;  %v5261_v20 = vrot.slane %v3171_v2, %v20242_v57  ;;  %v19623_v21 = vpop.f32.mrf.mxu0 }
 0x3eb   : > { %v27502_v27 = vrot.slane %v23733_v59, 5  ;;  %v23871_v3 = vsel %vm5762_vm5, %v23749_v52, %v6753_v39  ;;  %v3181_v6 = vcombine.high %v3171_v2, %v3171_v2  ;;  %v5254_v11 = vrot.slane %v5247_v22, %v20242_v57 }
 0x3ec   : > { %v5944_v0 = vrot.slane %v5720_v47, 7  ;;  %v6208_v4 = vrot.slane %v5719_v28, 1  ;;  %v9153_v55 = vsel %vm5753_vm2, %v9152_v38, %v9151_v5  ;;  %v1042_v42 = vadd.f32 %v23291_v19, %v20231_v43 }
 0x3ed   : > { %v23867_v14 = vsel %vm5759_vm4, %v27502_v27, %v6203_v62  ;;  %v5722_v7 = vunpack.c.l.b16 %v5240_v48  ;;  %v3180_v21 = vcombine.high %v3164_v58, %v3164_v58  ;;  %v3182_v59 = vcombine.high %v3178_v26, %v3178_v26 }
 0x3ee   : > { %v6554_v62 = vrot.slane %v3179_v50, %v20242_v57  ;;  %v6210_v27 = vrot.slane %v5721_v18, 7  ;;  %v5268_v61 = vrot.slane %v5261_v20, %v20242_v57  ;;  %v8426_v52 = vrot.slane %v3164_v58, %v20242_v57 }
 0x3ef   : > { %v1045_v39 = vadd.f32 %v23309_v24, %v20231_v43  ;;  %v5946_v2 = vrot.slane %v5721_v18, 6  ;;  %v5723_v22 = vunpack.c.l.b16 %v5254_v11  ;;  %v8412_v38 = vrot.slane %v3181_v6, %v20242_v57 }
 0x3f0   : > { %v8440_v5 = vrot.slane %v3178_v26, %v20242_v57  ;;  %v5945_v19 = vsel %vm5750_vm1, %v5944_v0, %v5719_v28  ;;  %v6209_v48 = vsel %vm5750_vm1, %v5720_v47, %v6208_v4  ;;  %v27503_v50 = vunpack.c.l.b16 %v23779_v17 }
 0x3f1   : > { %v1192_v16 = vmax.f32 %v1042_v42, 0.0  ;;  %v5948_v20 = vrot.slane %v5722_v7, 5  ;;  %v6561_v58 = vrot.slane %v6554_v62, %v20242_v57  ;;  %v8454_v41 = vrot.slane %v3180_v21, %v20242_v57 }
 0x3f2   : > { %v9154_v51 = vrot.slane %v27503_v50, 5  ;;  %v8468_v24 = vrot.slane %v3182_v59, %v20242_v57  ;;  %v6212_v18 = vrot.slane %v5722_v7, 6  ;;  %v6756_v6 = vsel %vm5750_vm1, %v6210_v27, %v5720_v47 }
 0x3f3   : > { %v5724_v11 = vunpack.c.l.b16 %v5268_v61  ;;  %v8433_v26 = vrot.slane %v8426_v52, %v20242_v57  ;;  %v5947_v28 = vsel %vm5753_vm2, %v5946_v2, %v5945_v19  ;;  %v6214_v0 = vrot.slane %v5723_v22, 5 }
 0x3f4   : > { %v8419_v17 = vrot.slane %v8412_v38, %v20242_v57  ;;  %v8447_v4 = vrot.slane %v8440_v5, %v20242_v57  ;;  %v6211_v42 = vsel %vm5753_vm2, %v6210_v27, %v6209_v48  ;;  %v9155_v62 = vsel %vm5756_vm3, %v9154_v51, %v9153_v55 }
 0x3f5   : > { %v27504_v21 = vunpack.c.l.b16 %v23791_v40  ;;  %v5950_v7 = vrot.slane %v5723_v22, 4  ;;  %v9158_v47 = vrot.slane %v23810_v30, 3  ;;  %v6637_v61 = vunpack.c.l.b16 %v6561_v58 }
 0x3f6   : > { %v8461_v52 = vrot.slane %v8454_v41, %v20242_v57  ;;  %v8475_v2 = vrot.slane %v8468_v24, %v20242_v57  ;;  %v5949_v19 = vsel %vm5756_vm3, %v5948_v20, %v5947_v28  ;;  %v6216_v38 = vrot.slane %v5724_v11, 4 }
 0x3f7   : > { %v9156_v59 = vrot.slane %v27504_v21, 4  ;;  %v6757_v5 = vsel %vm5753_vm2, %v6212_v18, %v6756_v6  ;;  %v8941_v50 = vunpack.c.l.b16 %v8433_v26  ;;  %v5952_v27 = vrot.slane %v5724_v11, 3 }
 0x3f8   : > { %v6758_v51 = vsel %vm5756_vm3, %v6214_v0, %v6757_v5  ;;  %v8940_v55 = vunpack.c.l.b16 %v8419_v17  ;;  %v8942_v40 = vunpack.c.l.b16 %v8447_v4  ;;  %v5951_v30 = vsel %vm5759_vm4, %v5950_v7, %v5949_v19  ;;  %v19823_v17 = vld [vmem:[%s26965_s2 + $0xf8] sm:$0xff]  }
 0x3f9   : > { %v9157_v22 = vsel %vm5759_vm4, %v9156_v59, %v9155_v62  ;;  %v6213_v48 = vsel %vm5756_vm3, %v6212_v18, %v6211_v42  ;;  %v1193_v41 = vmax.f32 %v1045_v39, 0.0  ;;  %v6760_v24 = vrot.slane %v6637_v61, 3  ;;  %v19824_v18 = vld [vmem:[%s26965_s2 + $0xb8] sm:$0xff]   ;;  %v23919_v39 = vpop.f32.mrf.mxu0  ;;  %19100 = vmatprep.subr.bf16.mxu1 %v19823_v17 }
 0x3fa   : > { %v6215_v58 = vsel %vm5759_vm4, %v6214_v0, %v6213_v48  ;;  %v8943_v20 = vunpack.c.l.b16 %v8461_v52  ;;  %v23910_v28 = vunpack.c.l.b16 %v8475_v2  ;;  %v6759_v6 = vsel %vm5759_vm4, %v6216_v38, %v6758_v51  ;;  %19101 = vmatpush3.bf16.msra.mxu1 %v19824_v18 }
 0x3fb   : > { %v9160_v11 = vrot.slane %v8941_v50, 7  ;;  %v1250_v26 = vpack.c.bf16 %v1193_v41, %v1192_v16  ;;  %v18624_v21 = vpack.c.bf16 %v1193_v41, %v1193_v41  ;;  %v23922_v0 = vsel %vm5762_vm5, %v9158_v47, %v9157_v22  ;;  %v19626_v52 = vpop.f32.mrf.mxu0 }
 0x3fc   : > { %v5953_v4 = vsel %vm5762_vm5, %v5952_v27, %v5951_v30  ;;  %v9162_v42 = vrot.slane %v8942_v40, 6  ;;  %v9424_v62 = vrot.slane %v8940_v55, 1  ;;  %v9426_v59 = vrot.slane %v8942_v40, 7 }
 0x3fd   : > { %v9161_v16 = vsel %vm5750_vm1, %v9160_v11, %v8940_v55  ;;  %v3190_v7 = vrot.slane %v1250_v26, %v20242_v57  ;;  %v3197_v61 = vrot.slane %v18624_v21, %v20242_v57  ;;  %v6217_v2 = vsel %vm5762_vm5, %v6216_v38, %v6215_v58  ;;  %v23935_v22 = vpop.f32.mrf.mxu0 }
 0x3fe   : > { %v23930_v19 = vsel %vm5762_vm5, %v6760_v24, %v6759_v6  ;;  %v9164_v47 = vrot.slane %v8943_v20, 5  ;;  %v9166_v5 = vrot.slane %v23910_v28, 4  ;;  %v9163_v30 = vsel %vm5753_vm2, %v9162_v42, %v9161_v16 }
 0x3ff   : > { %27505 = vst [vmem:[#allocation113_spill] sm:$0xff] %v23930_v19  ;;  %v3198_v27 = vcombine.high %v3190_v7, %v3190_v7  ;;  %v3199_v51 = vcombine.high %v3197_v61, %v3197_v61  ;;  %v3206_v55 = vrot.slane %v3190_v7, %v20242_v57  ;;  %v3213_v40 = vrot.slane %v3197_v61, %v20242_v57  ;;  %v19627_v26 = vpop.f32.mrf.mxu0 }
 0x400   : > { %v9425_v48 = vsel %vm5750_vm1, %v8941_v50, %v9424_v62  ;;  %v9428_v38 = vrot.slane %v8943_v20, 6  ;;  %v1053_v41 = vadd.f32 %v23410_v36, %v20231_v43  ;;  %v9972_v58 = vsel %vm5750_vm1, %v9426_v59, %v8941_v50 }
 0x401   : > { %v3220_v24 = vrot.slane %v3198_v27, %v20242_v57  ;;  %v3227_v6 = vrot.slane %v3199_v51, %v20242_v57  ;;  %v3228_v11 = vcombine.high %v3206_v55, %v3206_v55  ;;  %v9430_v21 = vrot.slane %v23910_v28, 5 }
 0x402   : > { %v18692_v17 = vpack.c.b16 %v6217_v2, %v5953_v4  ;;  %v3229_v18 = vcombine.high %v3213_v40, %v3213_v40  ;;  %v1050_v42 = vadd.f32 %v23388_v12, %v20231_v43  ;;  %v9427_v20 = vsel %vm5753_vm2, %v9426_v59, %v9425_v48 }
 0x403   : > { %v3230_v62 = vcombine.high %v3220_v24, %v3220_v24  ;;  %v5275_v36 = vrot.slane %v3228_v11, %v20242_v57  ;;  %v5303_v50 = vrot.slane %v3213_v40, %v20242_v57  ;;  %v9165_v16 = vsel %vm5756_vm3, %v9164_v47, %v9163_v30 }
 0x404   : > { %v9973_v7 = vsel %vm5753_vm2, %v9428_v38, %v9972_v58  ;;  %v8482_v61 = vrot.slane %v3206_v55, %v20242_v57  ;;  %v1195_v52 = vmax.f32 %v1053_v41, 0.0  ;;  %v3231_v28 = vcombine.high %v3227_v6, %v3227_v6 }
 0x405   : > { %v5282_v4 = vrot.slane %v5275_v36, %v20242_v57  ;;  %v5289_v2 = vrot.slane %v3230_v62, %v20242_v57  ;;  %v5317_v12 = vrot.slane %v3227_v6, %v20242_v57  ;;  %v9429_v59 = vsel %vm5756_vm3, %v9428_v38, %v9427_v20 }
 0x406   : > { %v5331_v27 = vrot.slane %v3229_v18, %v20242_v57  ;;  %v1194_v51 = vmax.f32 %v1050_v42, 0.0  ;;  %v1061_v47 = vadd.f32 %v23447_v32, %v20231_v43  ;;  %v23961_v40 = vrot.slane %v18692_v17, %v20242_v57 }
 0x407   : > { %v5296_v55 = vrot.slane %v5289_v2, %v20242_v57  ;;  %v5310_v30 = vrot.slane %v5303_v50, %v20242_v57  ;;  %v1058_v48 = vadd.f32 %v23429_v44, %v20231_v43  ;;  %v8489_v41 = vrot.slane %v8482_v61, %v20242_v57 }
 0x408   : > { %27506 = vst [vmem:[#allocation114_spill] sm:$0xff] %v23961_v40  ;;  %v1251_v58 = vpack.c.bf16 %v1195_v52, %v1194_v51  ;;  %v18625_v38 = vpack.c.bf16 %v1195_v52, %v1195_v52  ;;  %v23970_v6 = vadd.f32 %v23493_v25, %v20231_v43  ;;  %v5324_v32 = vrot.slane %v5317_v12, %v20242_v57 }
 0x409   : > { %v5345_v11 = vrot.slane %v3231_v28, %v20242_v57  ;;  %v5725_v26 = vunpack.c.l.b16 %v5282_v4  ;;  %v5726_v17 = vunpack.c.l.b16 %v5296_v55  ;;  %v5338_v18 = vrot.slane %v5331_v27, %v20242_v57 }
 0x40a   : > { %v9167_v42 = vsel %vm5759_vm4, %v9166_v5, %v9165_v16  ;;  %v23977_v44 = vsel %vm5759_vm4, %v9430_v21, %v9429_v59  ;;  %v23979_v20 = vmax.f32 %v1061_v47, 0.0  ;;  %v5727_v62 = vunpack.c.l.b16 %v5310_v30 }
 0x40b   : > { %v9770_v36 = vrot.slane %v3220_v24, %v20242_v57  ;;  %v23983_v25 = vsel %vm5756_vm3, %v9430_v21, %v9973_v7  ;;  %v1196_v50 = vmax.f32 %v1058_v48, 0.0  ;;  %v5954_v61 = vrot.slane %v5726_v17, 7  ;;  %v19825_v24 = vld [vmem:[%s26965_s2 + $0xf0] sm:$0xff]   ;;  %v23995_v7 = vpop.f32.mrf.mxu0 }
 0x40c   : > { %v8945_v52 = vunpack.c.l.b16 %v8489_v41  ;;  %v3239_v28 = vrot.slane %v1251_v58, %v20242_v57  ;;  %v5352_v5 = vrot.slane %v5345_v11, %v20242_v57  ;;  %v5728_v16 = vunpack.c.l.b16 %v5324_v32  ;;  %v19826_v21 = vld [vmem:[%s26965_s2 + $0xb0] sm:$0xff]   ;;  %27507 = vst [vmem:[#allocation115_spill] sm:$0xff] %v23995_v7  ;;  %19102 = vmatprep.subr.bf16.mxu1 %v19825_v24 }
 0x40d   : > { %v6218_v2 = vrot.slane %v5725_v26, 1  ;;  %v3246_v12 = vrot.slane %v18625_v38, %v20242_v57  ;;  %v23997_v59 = vunpack.c.l.b16 %v5338_v18  ;;  %v24000_v27 = vpack.c.bf16 %v23979_v20, %v1196_v50  ;;  %v19630_v38 = vpop.f32.mrf.mxu0  ;;  %19103 = vmatpush3.bf16.msra.mxu1 %v19826_v21 }
 0x40e   : > { %v24004_v51 = vadd.f32 %v23517_v10, %v20231_v43  ;;  %v27508_v47 = vrot.slane %v23744_v53, 3  ;;  %v5956_v30 = vrot.slane %v5727_v62, 6  ;;  %v6220_v48 = vrot.slane %v5727_v62, 7 }
 0x40f   : > { %v9777_v41 = vrot.slane %v9770_v36, %v20242_v57  ;;  %v5955_v32 = vsel %vm5750_vm1, %v5954_v61, %v5725_v26  ;;  %v9168_v11 = vrot.slane %v8945_v52, 3  ;;  %v3247_v10 = vcombine.high %v3239_v28, %v3239_v28  ;;  %v24018_v62 = vpop.f32.mrf.mxu0 }
 0x410   : > { %v24010_v55 = vsel %vm5762_vm5, %v27508_v47, %v23859_v56  ;;  %v3255_v18 = vrot.slane %v3239_v28, %v20242_v57  ;;  %v5730_v50 = vunpack.c.l.b16 %v5352_v5  ;;  %v5958_v4 = vrot.slane %v5728_v16, 5 }
 0x411   : > { %v6219_v56 = vsel %vm5750_vm1, %v5726_v17, %v6218_v2  ;;  %v3248_v47 = vcombine.high %v3246_v12, %v3246_v12  ;;  %v5960_v36 = vrot.slane %v23997_v59, 4  ;;  %v6222_v40 = vrot.slane %v5728_v16, 6  ;;  %v19631_v21 = vpop.f32.mrf.mxu0 }
 0x412   : > { %v3262_v24 = vrot.slane %v3246_v12, %v20242_v57  ;;  %v3269_v38 = vrot.slane %v3247_v10, %v20242_v57  ;;  %v5957_v26 = vsel %vm5753_vm2, %v5956_v30, %v5955_v32  ;;  %v6224_v61 = vrot.slane %v23997_v59, 5 }
 0x413   : > { %v3277_v28 = vcombine.high %v3255_v18, %v3255_v18  ;;  %v6568_v5 = vrot.slane %v3255_v18, %v20242_v57  ;;  %v6221_v2 = vsel %vm5753_vm2, %v6220_v48, %v6219_v56  ;;  %v9853_v58 = vunpack.c.l.b16 %v9777_v41 }
 0x414   : > { %v3279_v63 = vcombine.high %v3269_v38, %v3269_v38  ;;  %v8496_v45 = vrot.slane %v3269_v38, %v20242_v57  ;;  %v6762_v16 = vsel %vm5750_vm1, %v6220_v48, %v5726_v17  ;;  %v9432_v7 = vrot.slane %v8945_v52, 4 }
 0x415   : > { %v3276_v12 = vrot.slane %v3248_v47, %v20242_v57  ;;  %v8510_v10 = vrot.slane %v3277_v28, %v20242_v57  ;;  %v5959_v30 = vsel %vm5756_vm3, %v5958_v4, %v5957_v26  ;;  %v3278_v59 = vcombine.high %v3262_v24, %v3262_v24 }
 0x416   : > { %v8524_v32 = vrot.slane %v3279_v63, %v20242_v57  ;;  %v8538_v18 = vrot.slane %v3262_v24, %v20242_v57  ;;  %v5962_v21 = vrot.slane %v5730_v50, 3  ;;  %v24035_v41 = vsel %vm5762_vm5, %v9168_v11, %v9167_v42 }
 0x417   : > { %v6575_v56 = vrot.slane %v6568_v5, %v20242_v57  ;;  %v8517_v17 = vrot.slane %v8510_v10, %v20242_v57  ;;  %v6223_v52 = vsel %vm5756_vm3, %v6222_v40, %v6221_v2  ;;  %v6763_v48 = vsel %vm5753_vm2, %v6222_v40, %v6762_v16 }
 0x418   : > { %v9976_v47 = vrot.slane %v9853_v58, 3  ;;  %v8503_v4 = vrot.slane %v8496_v45, %v20242_v57  ;;  %v5961_v38 = vsel %vm5759_vm4, %v5960_v36, %v5959_v30  ;;  %v3280_v63 = vcombine.high %v3276_v12, %v3276_v12 }
 0x419   : > { %v8531_v24 = vrot.slane %v8524_v32, %v20242_v57  ;;  %v8552_v26 = vrot.slane %v3276_v12, %v20242_v57  ;;  %v6226_v42 = vrot.slane %v5730_v50, 4  ;;  %v9975_v11 = vsel %vm5759_vm4, %v9432_v7, %v23983_v25 }
 0x41a   : > { %v8545_v28 = vrot.slane %v8538_v18, %v20242_v57  ;;  %v8566_v5 = vrot.slane %v3278_v59, %v20242_v57  ;;  %v6225_v40 = vsel %vm5759_vm4, %v6224_v61, %v6223_v52  ;;  %v6638_v58 = vunpack.c.l.b16 %v6575_v56 }
 0x41b   : > { %v8947_v36 = vunpack.c.l.b16 %v8517_v17  ;;  %v24053_v2 = vsel %vm5762_vm5, %v5962_v21, %v5961_v38  ;;  %v6764_v16 = vsel %vm5756_vm3, %v6224_v61, %v6763_v48  ;;  %v24058_v50 = vsel %vm5762_vm5, %v9432_v7, %v23977_v44  ;;  %v19827_v48 = vld [vmem:[%s26965_s2 + $0xe8] sm:$0xff]  }
 0x41c   : > { %27509 = vst [vmem:[#allocation116_spill] sm:$0xff] %v24053_v2  ;;  %v8946_v25 = vunpack.c.l.b16 %v8503_v4  ;;  %v24061_v12 = vsel %vm5762_vm5, %v9976_v47, %v9975_v11  ;;  %v8559_v10 = vrot.slane %v8552_v26, %v20242_v57  ;;  %v8948_v30 = vunpack.c.l.b16 %v8531_v24  ;;  %v24082_v47 = vpop.f32.mrf.mxu0  ;;  %19104 = vmatprep.subr.bf16.mxu1 %v19827_v48 }
 0x41d   : > { %v9784_v59 = vrot.slane %v3280_v63, %v20242_v57  ;;  %v8573_v32 = vrot.slane %v8566_v5, %v20242_v57  ;;  %v8949_v18 = vunpack.c.l.b16 %v8545_v28  ;;  %v3288_v21 = vrot.slane %v24000_v27, %v20242_v57  ;;  %v19828_v27 = vld [vmem:[%s26965_s2 + $0xa8] sm:$0xff]   ;;  %27511 = vst [vmem:[#allocation117_spill] sm:$0xff] %v24082_v47 }
 0x41e   : > { %v27510_v44 = vpack.c.bf16 %v23979_v20, %v23979_v20  ;;  %v24073_v61 = vsel %vm5762_vm5, %v6226_v42, %v6225_v40  ;;  %v6765_v56 = vsel %vm5759_vm4, %v6226_v42, %v6764_v16  ;;  %v6766_v17 = vrot.slane %v6638_v58, 3  ;;  %v19634_v28 = vpop.f32.mrf.mxu0  ;;  %19105 = vmatpush3.bf16.msra.mxu1 %v19828_v27 }
 0x41f   : > { %v9170_v52 = vrot.slane %v8947_v36, 7  ;;  %v9434_v38 = vrot.slane %v8946_v25, 1  ;;  %v3296_v63 = vcombine.high %v3288_v21, %v3288_v21  ;;  %v8950_v24 = vunpack.c.l.b16 %v8559_v10 }
 0x420   : > { %v3295_v7 = vrot.slane %v27510_v44, %v20242_v57  ;;  %v9436_v26 = vrot.slane %v8948_v30, 7  ;;  %v9791_v42 = vrot.slane %v9784_v59, %v20242_v57  ;;  %v24089_v5 = vunpack.c.l.b16 %v8573_v32  ;;  %v24097_v20 = vpop.f32.mrf.mxu0 }
 0x421   : > { %v9172_v40 = vrot.slane %v8948_v30, 6  ;;  %v9174_v58 = vrot.slane %v8949_v18, 5  ;;  %v3304_v16 = vrot.slane %v3288_v21, %v20242_v57  ;;  %v24093_v44 = vsel %vm5762_vm5, %v6766_v17, %v6765_v56  ;;  %27513 = vst [vmem:[#allocation119_spill] sm:$0xff] %v24097_v20 }
 0x422   : > { %v3297_v11 = vcombine.high %v3295_v7, %v3295_v7  ;;  %27512 = vst [vmem:[#allocation118_spill] sm:$0xff] %v24093_v44  ;;  %v9171_v4 = vsel %vm5750_vm1, %v9170_v52, %v8946_v25  ;;  %v9438_v45 = vrot.slane %v8949_v18, 6  ;;  %v3318_v10 = vrot.slane %v3296_v63, %v20242_v57  ;;  %v19635_v25 = vpop.f32.mrf.mxu0 }
 0x423   : > { %v9435_v59 = vsel %vm5750_vm1, %v8947_v36, %v9434_v38  ;;  %v3311_v32 = vrot.slane %v3295_v7, %v20242_v57  ;;  %v3326_v48 = vcombine.high %v3304_v16, %v3304_v16  ;;  %v5359_v30 = vrot.slane %v3304_v16, %v20242_v57 }
 0x424   : > { %v9978_v21 = vsel %vm5750_vm1, %v9436_v26, %v8947_v36  ;;  %v3325_v27 = vrot.slane %v3297_v11, %v20242_v57  ;;  %v3328_v56 = vcombine.high %v3318_v10, %v3318_v10  ;;  %v5373_v17 = vrot.slane %v3318_v10, %v20242_v57 }
 0x425   : > { %v9173_v18 = vsel %vm5753_vm2, %v9172_v40, %v9171_v4  ;;  %v9440_v52 = vrot.slane %v8950_v24, 5  ;;  %v5366_v63 = vrot.slane %v5359_v30, %v20242_v57  ;;  %v5387_v38 = vrot.slane %v3326_v48, %v20242_v57 }
 0x426   : > { %v9437_v7 = vsel %vm5753_vm2, %v9436_v26, %v9435_v59  ;;  %v9854_v28 = vunpack.c.l.b16 %v9791_v42  ;;  %v5380_v16 = vrot.slane %v5373_v17, %v20242_v57  ;;  %v5401_v36 = vrot.slane %v3328_v56, %v20242_v57 }
 0x427   : > { %v9979_v11 = vsel %vm5753_vm2, %v9438_v45, %v9978_v21  ;;  %v3327_v20 = vcombine.high %v3311_v32, %v3311_v32  ;;  %v5394_v10 = vrot.slane %v5387_v38, %v20242_v57  ;;  %v5731_v25 = vunpack.c.l.b16 %v5366_v63 }
 0x428   : > { %v9175_v4 = vsel %vm5756_vm3, %v9174_v58, %v9173_v18  ;;  %v3329_v40 = vcombine.high %v3325_v27, %v3325_v27  ;;  %v5732_v47 = vunpack.c.l.b16 %v5380_v16  ;;  %v1199_v30 = vmax.f32 %v24004_v51, 0.0 }
 0x429   : > { %v9176_v48 = vrot.slane %v8950_v24, 4  ;;  %v9442_v26 = vrot.slane %v24089_v5, 4  ;;  %v5408_v42 = vrot.slane %v5401_v36, %v20242_v57  ;;  %v5415_v59 = vrot.slane %v3311_v32, %v20242_v57 }
 0x42a   : > { %v9439_v56 = vsel %vm5756_vm3, %v9438_v45, %v9437_v7  ;;  %v9980_v21 = vsel %vm5756_vm3, %v9440_v52, %v9979_v11  ;;  %v5429_v17 = vrot.slane %v3325_v27, %v20242_v57  ;;  %v5733_v63 = vunpack.c.l.b16 %v5394_v10 }
 0x42b   : > { %v9177_v58 = vsel %vm5759_vm4, %v9176_v48, %v9175_v4  ;;  %v5964_v18 = vrot.slane %v5732_v47, 7  ;;  %v6228_v38 = vrot.slane %v5731_v25, 1  ;;  %v6582_v51 = vrot.slane %v3327_v20, %v20242_v57 }
 0x42c   : > { %v9178_v24 = vrot.slane %v24089_v5, 3  ;;  %v9982_v16 = vrot.slane %v9854_v28, 3  ;;  %v24125_v36 = vrot.slane %v3329_v40, %v20242_v57  ;;  %v27514_v32 = vmax.f32 %v23970_v6, 0.0 }
 0x42d   : > { %v9441_v7 = vsel %vm5759_vm4, %v9440_v52, %v9439_v56  ;;  %v9981_v27 = vsel %vm5759_vm4, %v9442_v26, %v9980_v21  ;;  %v5422_v11 = vrot.slane %v5415_v59, %v20242_v57  ;;  %v5734_v10 = vunpack.c.l.b16 %v5408_v42 }
 0x42e   : > { %v1253_v45 = vpack.c.bf16 %v1199_v30, %v27514_v32  ;;  %v24133_v4 = vsel %vm5762_vm5, %v9178_v24, %v9177_v58  ;;  %v5436_v20 = vrot.slane %v5429_v17, %v20242_v57  ;;  %v5966_v5 = vrot.slane %v5733_v63, 6 }
 0x42f   : > { %v6230_v28 = vrot.slane %v5733_v63, 7  ;;  %v5965_v40 = vsel %vm5750_vm1, %v5964_v18, %v5731_v25  ;;  %v6229_v48 = vsel %vm5750_vm1, %v5732_v47, %v6228_v38  ;;  %v6589_v6 = vrot.slane %v6582_v51, %v20242_v57  ;;  %v19829_v38 = vld [vmem:[%s26965_s2 + $0xe0] sm:$0xff]  }
 0x430   : > { %v18627_v32 = vpack.c.bf16 %v1199_v30, %v1199_v30  ;;  %v24140_v52 = vsel %vm5762_vm5, %v9442_v26, %v9441_v7  ;;  %v24143_v59 = vsel %vm5762_vm5, %v9982_v16, %v9981_v27  ;;  %v8587_v42 = vrot.slane %v24125_v36, %v20242_v57  ;;  %v19831_v7 = vld [vmem:[%s26965_s2 + $0xd8] sm:$0xff]   ;;  %19106 = vmatprep.subr.bf16.mxu1 %v19829_v38 }
 0x431   : > { %v3337_v56 = vrot.slane %v1253_v45, %v20242_v57  ;;  %v5735_v21 = vunpack.c.l.b16 %v5422_v11  ;;  %v5968_v17 = vrot.slane %v5734_v10, 5  ;;  %v6232_v63 = vrot.slane %v5734_v10, 6  ;;  %v19830_v45 = vld [vmem:[%s26965_s2 + $0xa0] sm:$0xff]  }
 0x432   : > { %v3344_v25 = vrot.slane %v18627_v32, %v20242_v57  ;;  %v5967_v58 = vsel %vm5753_vm2, %v5966_v5, %v5965_v40  ;;  %v6231_v30 = vsel %vm5753_vm2, %v6230_v28, %v6229_v48  ;;  %v5736_v51 = vunpack.c.l.b16 %v5436_v20  ;;  %19107 = vmatpush3.bf16.msra.mxu1 %v19830_v45  ;;  %v19832_v32 = vld [vmem:[%s26965_s2 + $0x98] sm:$0xff]  }
 0x433   : > { %v3345_v18 = vcombine.high %v3337_v56, %v3337_v56  ;;  %v3353_v26 = vrot.slane %v3337_v56, %v20242_v57  ;;  %v24155_v24 = vunpack.c.l.b16 %v6589_v6  ;;  %v6768_v27 = vsel %vm5750_vm1, %v6230_v28, %v5732_v47  ;;  %19108 = vmatprep.subr.bf16.mxu1 %v19831_v7 }
 0x434   : > { %v3346_v16 = vcombine.high %v3344_v25, %v3344_v25  ;;  %v3360_v36 = vrot.slane %v3344_v25, %v20242_v57  ;;  %v5969_v5 = vsel %vm5756_vm3, %v5968_v17, %v5967_v58  ;;  %v6233_v40 = vsel %vm5756_vm3, %v6232_v63, %v6231_v30  ;;  %v19833_v17 = vld [vmem:[%s26965_s2 + $0xd0] sm:$0xff]  }
 0x435   : > { %v3367_v11 = vrot.slane %v3345_v18, %v20242_v57  ;;  %v3375_v10 = vcombine.high %v3353_v26, %v3353_v26  ;;  %v8594_v20 = vrot.slane %v3353_v26, %v20242_v57  ;;  %v5970_v58 = vrot.slane %v5735_v21, 4 }
 0x436   : > { %v3374_v48 = vrot.slane %v3346_v16, %v20242_v57  ;;  %v3376_v6 = vcombine.high %v3360_v36, %v3360_v36  ;;  %v6234_v30 = vrot.slane %v5735_v21, 5  ;;  %v6769_v18 = vsel %vm5753_vm2, %v6232_v63, %v6768_v27  ;;  %19109 = vmatpush3.bf16.msra.mxu1 %v19832_v32  ;;  %v19834_v21 = vld [vmem:[%s26965_s2 + $0x90] sm:$0xff]  }
 0x437   : > { %v3377_v56 = vcombine.high %v3367_v11, %v3367_v11  ;;  %v8601_v47 = vrot.slane %v8594_v20, %v20242_v57  ;;  %v8608_v28 = vrot.slane %v3367_v11, %v20242_v57  ;;  %v8622_v25 = vrot.slane %v3375_v10, %v20242_v57  ;;  %19110 = vmatprep.subr.bf16.mxu1 %v19833_v17 }
 0x438   : > { %v3378_v26 = vcombine.high %v3374_v48, %v3374_v48  ;;  %v5972_v38 = vrot.slane %v5736_v51, 3  ;;  %v6236_v16 = vrot.slane %v5736_v51, 4  ;;  %v8650_v20 = vrot.slane %v3360_v36, %v20242_v57 }
 0x439   : > { %v8615_v45 = vrot.slane %v8608_v28, %v20242_v57  ;;  %v5971_v11 = vsel %vm5759_vm4, %v5970_v58, %v5969_v5  ;;  %v6235_v10 = vsel %vm5759_vm4, %v6234_v30, %v6233_v40  ;;  %v5443_v7 = vrot.slane %v3376_v6, %v20242_v57  ;;  %v19835_v5 = vld [vmem:[%s26965_s2 + $0xc8] sm:$0xff]  }
 0x43a   : > { %v8953_v2 = vunpack.c.l.b16 %v8601_v47  ;;  %v6770_v63 = vsel %vm5756_vm3, %v6234_v30, %v6769_v18  ;;  %v5457_v51 = vrot.slane %v3378_v26, %v20242_v57  ;;  %v8629_v27 = vrot.slane %v8622_v25, %v20242_v57  ;;  %19111 = vmatpush3.bf16.msra.mxu1 %v19834_v21 }
 0x43b   : > { %v8636_v36 = vrot.slane %v3377_v56, %v20242_v57  ;;  %v27515_v40 = vpack.c.b16 %v24061_v12, %v24058_v50  ;;  %v8952_v28 = vunpack.c.l.b16 %v8587_v42  ;;  %v24206_v56 = vsel %vm5762_vm5, %v5972_v38, %v5971_v11  ;;  %v19836_v42 = vld [vmem:[%s26965_s2 + $0x88] sm:$0xff]   ;;  %19112 = vmatprep.subr.bf16.mxu1 %v19835_v5 }
 0x43c   : > { %v24209_v25 = vsel %vm5762_vm5, %v6236_v16, %v6235_v10  ;;  %v24212_v17 = vrot.slane %v8650_v20, %v20242_v57  ;;  %v8954_v58 = vunpack.c.l.b16 %v8615_v45  ;;  %v6771_v50 = vsel %vm5759_vm4, %v6236_v16, %v6770_v63  ;;  %v19837_v16 = vld [vmem:[%s26965_s2 + $0xc0] sm:$0xff]  }
 0x43d   : > { %v24199_v6 = vrot.slane %v27515_v40, %v20242_v57  ;;  %v5450_v12 = vrot.slane %v5443_v7, %v20242_v57  ;;  %v9180_v30 = vrot.slane %v8953_v2, 7  ;;  %v9798_v18 = vrot.slane %v3374_v48, %v20242_v57 }
 0x43e   : > { %v6772_v26 = vrot.slane %v24155_v24, 3  ;;  %v5464_v38 = vrot.slane %v5457_v51, %v20242_v57  ;;  %v8643_v20 = vrot.slane %v8636_v36, %v20242_v57  ;;  %v24223_v11 = vunpack.c.l.b16 %v8629_v27  ;;  %19113 = vmatpush3.bf16.msra.mxu1 %v19836_v42 }
 0x43f   : > { %v9444_v45 = vrot.slane %v8952_v28, 1  ;;  %v27516_v48 = vrot.slane %v23744_v53, 4  ;;  %v27517_v24 = vpack.c.b16 %v23393_v37, %v23181_v31  ;;  %v27518_v21 = vpack.c.b16 %v23483_v46, %v23464_v8  ;;  %v19838_v8 = vld [vmem:[%s26965_s2 + $0x80] sm:$0xff]   ;;  %19114 = vmatprep.subr.bf16.mxu1 %v19837_v16 }
 0x440   : > { %v24243_v51 = vsel %vm5762_vm5, %v6772_v26, %v6771_v50  ;;  %v18698_v27 = vpack.c.b16 %v24209_v25, %v24206_v56  ;;  %v8957_v53 = vunpack.c.l.b16 %v24212_v17  ;;  %v24248_v36 = vunpack.c.l.b16 %v5450_v12 }
 0x441   : > { %v6207_v10 = vsel %vm5762_vm5, %v27516_v48, %v23867_v14  ;;  %v11907_v7 = vrot.slane %v27517_v24, %v20242_v57  ;;  %v24240_v63 = vrot.slane %v27518_v21, %v20242_v57  ;;  %27519 = vst [vmem:[#allocation120_spill] sm:$0xff] %v24243_v51  ;;  %v9182_v14 = vrot.slane %v8954_v58, 6 }
 0x442   : > { %v9181_v37 = vsel %vm5750_vm1, %v9180_v30, %v8952_v28  ;;  %v9446_v5 = vrot.slane %v8954_v58, 7  ;;  %v24252_v40 = vrot.slane %v9798_v18, %v20242_v57  ;;  %v24257_v46 = vunpack.c.l.b16 %v5464_v38  ;;  %v19839_v28 = vld [vmem:[%s26965_s2 + $0x178] sm:$0xff]   ;;  %19115 = vmatpush3.bf16.msra.mxu1 %v19838_v8 }
 0x443   : > { %v24259_v50 = vunpack.c.l.b16 %v8643_v20  ;;  %v9184_v26 = vrot.slane %v24223_v11, 5  ;;  %v9445_v12 = vsel %vm5750_vm1, %v8953_v2, %v9444_v45  ;;  %v9448_v58 = vrot.slane %v24223_v11, 6  ;;  %19170 = vmatprep.subr.bf16.mxu1 %v19839_v28 }
 0x444   : > { %v11922_v30 = vcombine.low %v23488_v13, %v11907_v7  ;;  %v11923_v18 = vcombine.high %v23488_v13, %v11907_v7  ;;  %v11924_v42 = vcombine.low %v23502_v54, %v24240_v63  ;;  %v9183_v38 = vsel %vm5753_vm2, %v9182_v14, %v9181_v37 }
 0x445   : > { %v27520_v20 = vpack.c.b16 %v23593_v34, %v23511_v60  ;;  %v27521_v45 = vpack.c.b16 %v23623_v35, %v23616_v9  ;;  %v27522_v11 = vpack.c.b16 %v23632_v23, %v23626_v15  ;;  %v9984_v7 = vsel %vm5750_vm1, %v9446_v5, %v8953_v2 }
 0x446   : > { %v11932_v21 = vrot.slane %v11922_v30, %v20242_v57  ;;  %v11939_v14 = vrot.slane %v11923_v18, %v20242_v57  ;;  %v24292_v34 = vrot.slane %v11924_v42, %v20242_v57  ;;  %v18689_v15 = vpack.c.b16 %v6207_v10, %v24010_v55 }
 0x447   : > { %v11989_v16 = vrot.slane %v27520_v20, %v20242_v57  ;;  %v24280_v48 = vrot.slane %v27521_v45, %v20242_v57  ;;  %v24286_v24 = vrot.slane %v27522_v11, %v20242_v57  ;;  %v9186_v23 = vrot.slane %v24259_v50, 4 }
 0x448   : > { %27523 = vst [vmem:[#allocation121_spill] sm:$0xff] %v24292_v34  ;;  %v9447_v2 = vsel %vm5753_vm2, %v9446_v5, %v9445_v12  ;;  %v9450_v30 = vrot.slane %v24259_v50, 5  ;;  %v18690_v18 = vpack.c.b16 %v23922_v0, %v23871_v3  ;;  %v9985_v8 = vsel %vm5753_vm2, %v9448_v58, %v9984_v7 }
 0x449   : > { %v12004_v9 = vcombine.low %v24240_v63, %v11989_v16  ;;  %v12005_v35 = vcombine.high %v24240_v63, %v11989_v16  ;;  %v12006_v37 = vcombine.low %v24280_v48, %v24286_v24  ;;  %v11955_v42 = vcombine.high %v11932_v21, %v24292_v34 }
 0x44a   : > { %v12072_v55 = vrot.slane %v18689_v15, %v20242_v57  ;;  %v12079_v10 = vrot.slane %v18690_v18, %v20242_v57  ;;  %v1074_v5 = vadd.f32 %v23782_v1, %v20231_v43  ;;  %v1077_v3 = vadd.f32 %v23802_v29, %v20231_v43 }
 0x44b   : > { %v24307_v20 = vrot.slane %v12004_v9, %v20242_v57  ;;  %v24310_v16 = vrot.slane %v12006_v37, %v20242_v57  ;;  %v24319_v0 = vrot.slane %v12005_v35, %v20242_v57  ;;  %v18756_v28 = vcombine.low %v11932_v21, %v11939_v14 }
 0x44c   : > { %v12094_v11 = vcombine.low %v12072_v55, %v12079_v10  ;;  %v12095_v7 = vcombine.high %v12072_v55, %v12079_v10  ;;  %v1200_v9 = vmax.f32 %v1074_v5, 0.0  ;;  %v1201_v37 = vmax.f32 %v1077_v3, 0.0 }
 0x44d   : > { %27524 = vst [vmem:[#allocation122_spill] sm:$0xff] %v24307_v20  ;;  %27525 = vst [vmem:[#allocation123_spill] sm:$0xff] %v24319_v0  ;;  %v12037_v12 = vcombine.high %v24307_v20, %v24310_v16  ;;  %v18758_v45 = vcombine.low %v11955_v42, %v24307_v20  ;;  %v9449_v15 = vsel %vm5756_vm3, %v9448_v58, %v9447_v2  ;;  %v9452_v1 = vrot.slane %v8957_v53, 4 }
 0x44e   : > { %v24330_v18 = vrot.slane %v12094_v11, %v20242_v57  ;;  %v12111_v21 = vrot.slane %v12095_v7, %v20242_v57  ;;  %v1254_v14 = vpack.c.bf16 %v1201_v37, %v1200_v9  ;;  %v18628_v42 = vpack.c.bf16 %v1201_v37, %v1201_v37 }
 0x44f   : > { %v18760_v29 = vcombine.low %v24319_v0, %v12037_v12  ;;  %v13848_v35 = vrot.slane %v18758_v45, %v20242_v57  ;;  %v9855_v55 = vunpack.c.l.b16 %v24252_v40  ;;  %v9986_v10 = vsel %vm5756_vm3, %v9450_v30, %v9985_v8 }
 0x450   : > { %v13834_v58 = vrot.slane %v18756_v28, %v20242_v57  ;;  %v1082_v2 = vadd.f32 %v23833_v33, %v20231_v43  ;;  %v18762_v5 = vcombine.low %v24330_v18, %v12111_v21  ;;  %v3386_v3 = vrot.slane %v1254_v14, %v20242_v57 }
 0x451   : > { %v3393_v12 = vrot.slane %v18628_v42, %v20242_v57  ;;  %v1085_v45 = vadd.f32 %v23849_v49, %v20231_v43  ;;  %v9185_v11 = vsel %vm5756_vm3, %v9184_v26, %v9183_v38  ;;  %v9451_v40 = vsel %vm5759_vm4, %v9450_v30, %v9449_v15 }
 0x452   : > { %v13862_v8 = vrot.slane %v18760_v29, %v20242_v57  ;;  %v13885_v7 = vcombine.high %v13834_v58, %v13848_v35  ;;  %v13876_v28 = vrot.slane %v18762_v5, %v20242_v57  ;;  %v13884_v9 = vcombine.low %v13834_v58, %v13848_v35 }
 0x453   : > { %v3394_v33 = vcombine.high %v3386_v3, %v3386_v3  ;;  %v3402_v37 = vrot.slane %v3386_v3, %v20242_v57  ;;  %v9987_v21 = vsel %vm5759_vm4, %v9452_v1, %v9986_v10  ;;  %v9988_v14 = vrot.slane %v9855_v55, 3 }
 0x454   : > { %v3395_v42 = vcombine.high %v3393_v12, %v3393_v12  ;;  %v1202_v47 = vmax.f32 %v1082_v2, 0.0  ;;  %v13889_v32 = vcombine.high %v13862_v8, %v13876_v28  ;;  %v13888_v49 = vcombine.low %v13862_v8, %v13876_v28 }
 0x455   : > { %v3416_v26 = vrot.slane %v3394_v33, %v20242_v57  ;;  %v1203_v38 = vmax.f32 %v1085_v45, 0.0  ;;  %v24351_v30 = vrot.slane %v13885_v7, %v20242_v57  ;;  %v3409_v15 = vrot.slane %v3393_v12, %v20242_v57 }
 0x456   : > { %v3424_v29 = vcombine.high %v3402_v37, %v3402_v37  ;;  %v5471_v35 = vrot.slane %v3402_v37, %v20242_v57  ;;  %v24356_v58 = vrot.slane %v13889_v32, %v20242_v57  ;;  %v24359_v55 = vrot.slane %v13884_v9, %v20242_v57 }
 0x457   : > { %v24362_v10 = vrot.slane %v13888_v49, %v20242_v57  ;;  %v3426_v2 = vcombine.high %v3416_v26, %v3416_v26  ;;  %v3423_v5 = vrot.slane %v3395_v42, %v20242_v57  ;;  %v5485_v45 = vrot.slane %v3416_v26, %v20242_v57 }
 0x458   : > { %27526 = vst [vmem:[#allocation124_spill] sm:$0xff] %v24359_v55  ;;  %v5478_v3 = vrot.slane %v5471_v35, %v20242_v57  ;;  %v5499_v12 = vrot.slane %v3424_v29, %v20242_v57  ;;  %v6238_v8 = vrot.slane %v24248_v36, 1  ;;  %v9453_v32 = vsel %vm5762_vm5, %v9452_v1, %v9451_v40 }
 0x459   : > { %27527 = vst [vmem:[#allocation125_spill] sm:$0xff] %v24362_v10  ;;  %v13952_v7 = vcombine.low %v24351_v30, %v24356_v58  ;;  %v13948_v28 = vcombine.low %v24359_v55, %v24362_v10  ;;  %v9989_v9 = vsel %vm5762_vm5, %v9988_v14, %v9987_v21  ;;  %v5492_v33 = vrot.slane %v5485_v45, %v20242_v57 }
 0x45a   : > { %v6596_v37 = vrot.slane %v3409_v15, %v20242_v57  ;;  %v1255_v42 = vpack.c.bf16 %v1203_v38, %v1202_v47  ;;  %v9187_v49 = vsel %vm5759_vm4, %v9186_v23, %v9185_v11  ;;  %v3425_v26 = vcombine.high %v3409_v15, %v3409_v15 }
 0x45b   : > { %14968 = vmatprep.mubr.bf16.mxu1 %v13952_v7  ;;  %v5513_v1 = vrot.slane %v3426_v2, %v20242_v57  ;;  %v5739_v40 = vunpack.c.l.b16 %v5478_v3  ;;  %v5974_v29 = vrot.slane %v24257_v46, 7  ;;  %v9188_v35 = vrot.slane %v8957_v53, 3 }
 0x45c   : > { %14969 = vmatmul.mubr.bf16.gmra.mxu1 %v13948_v28  ;;  %v3427_v21 = vcombine.high %v3423_v5, %v3423_v5  ;;  %v5506_v14 = vrot.slane %v5499_v12, %v20242_v57  ;;  %v24389_v47 = vrot.slane %v18698_v27, %v20242_v57  ;;  %v6239_v50 = vsel %vm5750_vm1, %v24257_v46, %v6238_v8 }
 0x45d   : > { %v18700_v23 = vpack.c.b16 %v9989_v9, %v9453_v32  ;;  %v18629_v11 = vpack.c.bf16 %v1203_v38, %v1203_v38  ;;  %v24394_v15 = vsel %vm5762_vm5, %v9188_v35, %v9187_v49  ;;  %v5740_v17 = vunpack.c.l.b16 %v5492_v33 }
 0x45e   : > { %27528 = vst [vmem:[#allocation126_spill] sm:$0xff] %v24389_v47  ;;  %v24397_v53 = vrot.slane %v6596_v37, %v20242_v57  ;;  %v3435_v2 = vrot.slane %v1255_v42, %v20242_v57  ;;  %v5520_v3 = vrot.slane %v5513_v1, %v20242_v57  ;;  %v5976_v45 = vrot.slane %v5739_v40, 6 }
 0x45f   : > { %v8664_v56 = vrot.slane %v3423_v5, %v20242_v57  ;;  %v8678_v25 = vrot.slane %v3425_v26, %v20242_v57  ;;  %v5975_v27 = vsel %vm5750_vm1, %v5974_v29, %v24248_v36  ;;  %v5741_v38 = vunpack.c.l.b16 %v5506_v14 }
 0x460   : > { %v6240_v12 = vrot.slane %v5739_v40, 7  ;;  %v8692_v8 = vrot.slane %v3427_v21, %v20242_v57  ;;  %v24409_v7 = vrot.slane %v18700_v23, %v20242_v57  ;;  %v3442_v28 = vrot.slane %v18629_v11, %v20242_v57 }
 0x461   : > { %v24414_v5 = vadd.f32 %v23919_v39, %v20231_v43  ;;  %v5978_v9 = vrot.slane %v5740_v17, 5  ;;  %v6640_v33 = vunpack.c.l.b16 %v24397_v53  ;;  %v3443_v36 = vcombine.high %v3435_v2, %v3435_v2 }
 0x462   : > { %27529 = vst [vmem:[#allocation127_spill] sm:$0xff] %v24409_v7  ;;  %v3451_v37 = vrot.slane %v3435_v2, %v20242_v57  ;;  %v5742_v42 = vunpack.c.l.b16 %v5520_v3  ;;  %v5977_v49 = vsel %vm5753_vm2, %v5976_v45, %v5975_v27  ;;  %v8671_v26 = vrot.slane %v8664_v56, %v20242_v57 }
 0x463   : > { %v8685_v1 = vrot.slane %v8678_v25, %v20242_v57  ;;  %v5980_v40 = vrot.slane %v5741_v38, 4  ;;  %v6241_v29 = vsel %vm5753_vm2, %v6240_v12, %v6239_v50  ;;  %v6242_v35 = vrot.slane %v5740_v17, 6 }
 0x464   : > { %v8699_v39 = vrot.slane %v8692_v8, %v20242_v57  ;;  %v6244_v21 = vrot.slane %v5741_v38, 5  ;;  %v6774_v14 = vsel %vm5750_vm1, %v6240_v12, %v24257_v46  ;;  %v3444_v23 = vcombine.high %v3442_v28, %v3442_v28 }
 0x465   : > { %v3458_v11 = vrot.slane %v3442_v28, %v20242_v57  ;;  %v5979_v53 = vsel %vm5756_vm3, %v5978_v9, %v5977_v49  ;;  %v24428_v2 = vrot.slane %v3443_v36, %v20242_v57  ;;  %v3473_v3 = vcombine.high %v3451_v37, %v3451_v37 }
 0x466   : > { %v8706_v45 = vrot.slane %v3451_v37, %v20242_v57  ;;  %v8959_v56 = vunpack.c.l.b16 %v8685_v1  ;;  %v3472_v50 = vrot.slane %v3444_v23, %v20242_v57  ;;  %v6775_v27 = vsel %vm5753_vm2, %v6242_v35, %v6774_v14 }
 0x467   : > { %v3474_v17 = vcombine.high %v3458_v11, %v3458_v11  ;;  %v5527_v25 = vrot.slane %v3458_v11, %v20242_v57  ;;  %v8958_v46 = vunpack.c.l.b16 %v8671_v26  ;;  %v8720_v12 = vrot.slane %v24428_v2, %v20242_v57 }
 0x468   : > { %v8713_v38 = vrot.slane %v8706_v45, %v20242_v57  ;;  %v3476_v8 = vcombine.high %v3472_v50, %v3472_v50  ;;  %v5541_v28 = vrot.slane %v3472_v50, %v20242_v57  ;;  %v8734_v36 = vrot.slane %v3473_v3, %v20242_v57 }
 0x469   : > { %v5555_v9 = vrot.slane %v3474_v17, %v20242_v57  ;;  %v6243_v37 = vsel %vm5756_vm3, %v6242_v35, %v6241_v29  ;;  %v8960_v49 = vunpack.c.l.b16 %v8699_v39  ;;  %v5534_v1 = vrot.slane %v5527_v25, %v20242_v57  ;;  %v24450_v25 = vpop.f32.mrf.mxu1 }
 0x46a   : > { %v8727_v14 = vrot.slane %v8720_v12, %v20242_v57  ;;  %v6246_v26 = vrot.slane %v5742_v42, 4  ;;  %v9190_v23 = vrot.slane %v8959_v56, 7  ;;  %v5548_v11 = vrot.slane %v5541_v28, %v20242_v57  ;;  %27530 = vst [vmem:[#allocation128_spill] sm:$0xff] %v24450_v25 }
 0x46b   : > { %v8961_v45 = vunpack.c.l.b16 %v8713_v38  ;;  %v5981_v32 = vsel %vm5759_vm4, %v5980_v40, %v5979_v53  ;;  %v5982_v60 = vrot.slane %v5742_v42, 3  ;;  %v6776_v50 = vsel %vm5756_vm3, %v6244_v21, %v6775_v27 }
 0x46c   : > { %v5569_v17 = vrot.slane %v3476_v8, %v20242_v57  ;;  %v6245_v3 = vsel %vm5759_vm4, %v6244_v21, %v6243_v37  ;;  %v9454_v29 = vrot.slane %v8958_v46, 1  ;;  %v5562_v35 = vrot.slane %v5555_v9, %v20242_v57 }
 0x46d   : > { %v8741_v39 = vrot.slane %v8734_v36, %v20242_v57  ;;  %v6778_v12 = vrot.slane %v6640_v33, 3  ;;  %v9192_v31 = vrot.slane %v8960_v49, 6  ;;  %v5743_v28 = vunpack.c.l.b16 %v5534_v1 }
 0x46e   : > { %v8962_v38 = vunpack.c.l.b16 %v8727_v14  ;;  %v6777_v40 = vsel %vm5759_vm4, %v6246_v26, %v6776_v50  ;;  %v9191_v42 = vsel %vm5750_vm1, %v9190_v23, %v8958_v46  ;;  %v5744_v53 = vunpack.c.l.b16 %v5548_v11  ;;  %v24464_v50 = vpop.f32.mrf.mxu1 }
 0x46f   : > { %v9194_v27 = vrot.slane %v8961_v45, 5  ;;  %v24455_v8 = vsel %vm5762_vm5, %v5982_v60, %v5981_v32  ;;  %v24458_v21 = vsel %vm5762_vm5, %v6246_v26, %v6245_v3  ;;  %v9456_v9 = vrot.slane %v8960_v49, 7  ;;  %27531 = vst [vmem:[#allocation129_spill] sm:$0xff] %v24464_v50 }
 0x470   : > { %v5576_v36 = vrot.slane %v5569_v17, %v20242_v57  ;;  %v9455_v33 = vsel %vm5750_vm1, %v8959_v56, %v9454_v29  ;;  %v5745_v37 = vunpack.c.l.b16 %v5562_v35  ;;  %v24462_v1 = vunpack.c.l.b16 %v8741_v39 }
 0x471   : > { %v9458_v14 = vrot.slane %v8961_v45, 6  ;;  %v24467_v46 = vsel %vm5762_vm5, %v6778_v12, %v6777_v40  ;;  %v6248_v23 = vrot.slane %v5743_v28, 1  ;;  %v9193_v60 = vsel %vm5753_vm2, %v9192_v31, %v9191_v42  ;;  %v24483_v42 = vpop.f32.mrf.mxu1 }
 0x472   : > { %27532 = vst [vmem:[#allocation130_spill] sm:$0xff] %v24467_v46  ;;  %v9196_v32 = vrot.slane %v8962_v38, 4  ;;  %v3475_v26 = vcombine.high %v24428_v2, %v24428_v2  ;;  %v5984_v11 = vrot.slane %v5744_v53, 7  ;;  %v9195_v17 = vsel %vm5756_vm3, %v9194_v27, %v9193_v60  ;;  %27533 = vst [vmem:[#allocation131_spill] sm:$0xff] %v24483_v42 }
 0x473   : > { %v9990_v45 = vsel %vm5750_vm1, %v9456_v9, %v8959_v56  ;;  %v24476_v3 = vunpack.c.l.b16 %v5576_v36  ;;  %v9457_v29 = vsel %vm5753_vm2, %v9456_v9, %v9455_v33  ;;  %v1093_v35 = vadd.f32 %v23935_v22, %v20231_v43 }
 0x474   : > { %v5986_v31 = vrot.slane %v5745_v37, 6  ;;  %v9198_v39 = vrot.slane %v24462_v1, 3  ;;  %v9459_v12 = vsel %vm5756_vm3, %v9458_v14, %v9457_v29  ;;  %v9460_v40 = vrot.slane %v8962_v38, 5 }
 0x475   : > { %v6249_v2 = vsel %vm5750_vm1, %v5744_v53, %v6248_v23  ;;  %v9197_v27 = vsel %vm5759_vm4, %v9196_v32, %v9195_v17  ;;  %v1204_v56 = vmax.f32 %v24414_v5, 0.0  ;;  %v1205_v36 = vmax.f32 %v1093_v35, 0.0 }
 0x476   : > { %v5985_v9 = vsel %vm5750_vm1, %v5984_v11, %v5743_v28  ;;  %v6250_v33 = vrot.slane %v5745_v37, 7  ;;  %v9812_v22 = vrot.slane %v3475_v26, %v20242_v57  ;;  %v1101_v60 = vadd.f32 %v24018_v62, %v20231_v43  ;;  %v27534_v28 = vld [vmem:[#allocation115_spill] sm:$0xff]  ;;  %v24501_v26 = vpop.f32.mrf.mxu1 }
 0x477   : > { %v5988_v29 = vrot.slane %v24476_v3, 5  ;;  %v9462_v38 = vrot.slane %v24462_v1, 4  ;;  %v1256_v49 = vpack.c.bf16 %v1205_v36, %v1204_v56  ;;  %v18630_v42 = vpack.c.bf16 %v1205_v36, %v1205_v36  ;;  %27535 = vst [vmem:[#allocation115_spill] sm:$0xff] %v24501_v26 }
 0x478   : > { %v6252_v23 = vrot.slane %v24476_v3, 6  ;;  %v24496_v32 = vsel %vm5762_vm5, %v9198_v39, %v9197_v27  ;;  %v9461_v5 = vsel %vm5759_vm4, %v9460_v40, %v9459_v12  ;;  %v1098_v37 = vadd.f32 %v27534_v28, %v20231_v43  ;;  %v24510_v27 = vpop.f32.mrf.mxu1 }
 0x479   : > { %v5987_v62 = vsel %vm5753_vm2, %v5986_v31, %v5985_v9  ;;  %v9991_v11 = vsel %vm5753_vm2, %v9458_v14, %v9990_v45  ;;  %v3484_v1 = vrot.slane %v1256_v49, %v20242_v57  ;;  %v3491_v17 = vrot.slane %v18630_v42, %v20242_v57  ;;  %27536 = vst [vmem:[#allocation132_spill] sm:$0xff] %v24510_v27 }
 0x47a   : > { %v6251_v3 = vsel %vm5753_vm2, %v6250_v33, %v6249_v2  ;;  %v6780_v35 = vsel %vm5750_vm1, %v6250_v33, %v5744_v53  ;;  %v9819_v39 = vrot.slane %v9812_v22, %v20242_v57  ;;  %v1207_v12 = vmax.f32 %v1101_v60, 0.0 }
 0x47b   : > { %v24513_v56 = vsel %vm5762_vm5, %v9462_v38, %v9461_v5  ;;  %v3492_v36 = vcombine.high %v3484_v1, %v3484_v1  ;;  %v3493_v31 = vcombine.high %v3491_v17, %v3491_v17  ;;  %v3500_v14 = vrot.slane %v3484_v1, %v20242_v57  ;;  %v24523_v1 = vpop.f32.mrf.mxu1 }
 0x47c   : > { %v9992_v49 = vsel %vm5756_vm3, %v9460_v40, %v9991_v11  ;;  %v3507_v45 = vrot.slane %v3491_v17, %v20242_v57  ;;  %v5989_v42 = vsel %vm5756_vm3, %v5988_v29, %v5987_v62  ;;  %v1206_v2 = vmax.f32 %v1098_v37, 0.0  ;;  %27537 = vst [vmem:[#allocation133_spill] sm:$0xff] %v24523_v1 }
 0x47d   : > { %v3514_v53 = vrot.slane %v3492_v36, %v20242_v57  ;;  %v3521_v9 = vrot.slane %v3493_v31, %v20242_v57  ;;  %v3522_v33 = vcombine.high %v3500_v14, %v3500_v14  ;;  %v5583_v22 = vrot.slane %v3500_v14, %v20242_v57  ;;  %v24537_v26 = vpop.f32.mrf.mxu1 }
 0x47e   : > { %v9856_v60 = vunpack.c.l.b16 %v9819_v39  ;;  %v3523_v5 = vcombine.high %v3507_v45, %v3507_v45  ;;  %v8762_v28 = vrot.slane %v3507_v45, %v20242_v57  ;;  %v1257_v27 = vpack.c.bf16 %v1207_v12, %v1206_v2  ;;  %27538 = vst [vmem:[#allocation134_spill] sm:$0xff] %v24537_v26  ;;  %v27540_v26 = vld [vmem:[#allocation111_spill] sm:$0xff] }
 0x47f   : > { %v3524_v40 = vcombine.high %v3514_v53, %v3514_v53  ;;  %v3525_v11 = vcombine.high %v3521_v9, %v3521_v9  ;;  %v5590_v17 = vrot.slane %v5583_v22, %v20242_v57  ;;  %v5597_v29 = vrot.slane %v3514_v53, %v20242_v57 }
 0x480   : > { %v6610_v37 = vrot.slane %v3522_v33, %v20242_v57  ;;  %v8769_v62 = vrot.slane %v8762_v28, %v20242_v57  ;;  %v8776_v36 = vrot.slane %v3521_v9, %v20242_v57  ;;  %v8790_v39 = vrot.slane %v3523_v5, %v20242_v57 }
 0x481   : > { %v5604_v31 = vrot.slane %v5597_v29, %v20242_v57  ;;  %v5747_v14 = vunpack.c.l.b16 %v5590_v17  ;;  %v8748_v45 = vrot.slane %v3524_v40, %v20242_v57  ;;  %v18631_v2 = vpack.c.bf16 %v1207_v12, %v1207_v12 }
 0x482   : > { %v9993_v1 = vsel %vm5759_vm4, %v9462_v38, %v9992_v49  ;;  %v6253_v22 = vsel %vm5756_vm3, %v6252_v23, %v6251_v3  ;;  %v8783_v53 = vrot.slane %v8776_v36, %v20242_v57  ;;  %v8804_v33 = vrot.slane %v3525_v11, %v20242_v57 }
 0x483   : > { %v5748_v28 = vunpack.c.l.b16 %v5604_v31  ;;  %v6617_v9 = vrot.slane %v6610_v37, %v20242_v57  ;;  %v8755_v5 = vrot.slane %v8748_v45, %v20242_v57  ;;  %v8965_v29 = vunpack.c.l.b16 %v8769_v62  ;;  %v27539_v37 = vld [vmem:[#allocation112_spill] sm:$0xff] }
 0x484   : > { %v5990_v17 = vrot.slane %v5747_v14, 4  ;;  %v6254_v50 = vrot.slane %v5747_v14, 5  ;;  %v8797_v12 = vrot.slane %v8790_v39, %v20242_v57  ;;  %v8966_v40 = vunpack.c.l.b16 %v8783_v53 }
 0x485   : > { %v9994_v38 = vrot.slane %v9856_v60, 3  ;;  %v6781_v3 = vsel %vm5753_vm2, %v6252_v23, %v6780_v35  ;;  %v3533_v49 = vrot.slane %v1257_v27, %v20242_v57  ;;  %v3540_v11 = vrot.slane %v18631_v2, %v20242_v57  ;;  %v24558_v23 = vpop.f32.mrf.mxu1 }
 0x486   : > { %v8811_v36 = vrot.slane %v8804_v33, %v20242_v57  ;;  %v8964_v31 = vunpack.c.l.b16 %v8755_v5  ;;  %v27541_v45 = vpack.c.b16 %v27539_v37, %v27540_v26  ;;  %v27542_v39 = vpack.c.b16 %v24035_v41, %v23930_v19  ;;  %27543 = vst [vmem:[#allocation112_spill] sm:$0xff] %v24558_v23 }
 0x487   : > { %v5992_v35 = vrot.slane %v5748_v28, 3  ;;  %v6256_v27 = vrot.slane %v5748_v28, 4  ;;  %v24560_v14 = vunpack.c.l.b16 %v6617_v9  ;;  %v9200_v2 = vrot.slane %v8965_v29, 7  ;;  %v24564_v37 = vpop.f32.mrf.mxu1 }
 0x488   : > { %v24550_v62 = vrot.slane %v27541_v45, %v20242_v57  ;;  %v24556_v60 = vrot.slane %v27542_v39, %v20242_v57  ;;  %v5991_v53 = vsel %vm5759_vm4, %v5990_v17, %v5989_v42  ;;  %v6255_v33 = vsel %vm5759_vm4, %v6254_v50, %v6253_v22  ;;  %27544 = vst [vmem:[#allocation111_spill] sm:$0xff] %v24564_v37 }
 0x489   : > { %v8967_v26 = vunpack.c.l.b16 %v8797_v12  ;;  %v9202_v5 = vrot.slane %v8966_v40, 6  ;;  %v9201_v45 = vsel %vm5750_vm1, %v9200_v2, %v8964_v31  ;;  %v9464_v41 = vrot.slane %v8964_v31, 1 }
 0x48a   : > { %v3541_v39 = vcombine.high %v3533_v49, %v3533_v49  ;;  %v3542_v25 = vcombine.high %v3540_v11, %v3540_v11  ;;  %v24568_v23 = vsel %vm5762_vm5, %v9994_v38, %v9993_v1  ;;  %v6782_v28 = vsel %vm5756_vm3, %v6254_v50, %v6781_v3  ;;  %v24584_v38 = vpop.f32.mrf.mxu1 }
 0x48b   : > { %v24571_v9 = vunpack.c.l.b16 %v8811_v36  ;;  %v9466_v19 = vrot.slane %v8966_v40, 7  ;;  %v24574_v42 = vsel %vm5762_vm5, %v5992_v35, %v5991_v53  ;;  %v24577_v22 = vsel %vm5762_vm5, %v6256_v27, %v6255_v33  ;;  %27545 = vst [vmem:[#allocation135_spill] sm:$0xff] %v24584_v38 }
 0x48c   : > { %v3549_v12 = vrot.slane %v3533_v49, %v20242_v57  ;;  %v9203_v31 = vsel %vm5753_vm2, %v9202_v5, %v9201_v45  ;;  %v9204_v2 = vrot.slane %v8967_v26, 5  ;;  %v9465_v1 = vsel %vm5750_vm1, %v8965_v29, %v9464_v41  ;;  %v24597_v37 = vpop.f32.mrf.mxu1 }
 0x48d   : > { %v3556_v50 = vrot.slane %v3540_v11, %v20242_v57  ;;  %v9468_v40 = vrot.slane %v8967_v26, 6  ;;  %v3563_v3 = vrot.slane %v3541_v39, %v20242_v57  ;;  %v3570_v36 = vrot.slane %v3542_v25, %v20242_v57  ;;  %27546 = vst [vmem:[#allocation136_spill] sm:$0xff] %v24597_v37 }
 0x48e   : > { %v3571_v35 = vcombine.high %v3549_v12, %v3549_v12  ;;  %v9470_v53 = vrot.slane %v24571_v9, 5  ;;  %v9996_v33 = vsel %vm5750_vm1, %v9466_v19, %v8965_v29  ;;  %v8818_v5 = vrot.slane %v3549_v12, %v20242_v57  ;;  %v24613_v0 = vpop.f32.mrf.mxu1 }
 0x48f   : > { %v3572_v49 = vcombine.high %v3556_v50, %v3556_v50  ;;  %v9467_v45 = vsel %vm5753_vm2, %v9466_v19, %v9465_v1  ;;  %v3573_v41 = vcombine.high %v3563_v3, %v3563_v3  ;;  %v3574_v17 = vcombine.high %v3570_v36, %v3570_v36  ;;  %27547 = vst [vmem:[#allocation137_spill] sm:$0xff] %v24613_v0 }
 0x490   : > { %v9826_v11 = vrot.slane %v3563_v3, %v20242_v57  ;;  %v8825_v26 = vrot.slane %v8818_v5, %v20242_v57  ;;  %v10284_v39 = vrot.slane %v3571_v35, %v20242_v57  ;;  %v10312_v25 = vrot.slane %v3556_v50, %v20242_v57 }
 0x491   : > { %v10326_v38 = vrot.slane %v3570_v36, %v20242_v57  ;;  %v10298_v12 = vrot.slane %v3573_v41, %v20242_v57  ;;  %v10340_v19 = vrot.slane %v3572_v49, %v20242_v57  ;;  %v10354_v1 = vrot.slane %v3574_v17, %v20242_v57 }
 0x492   : > { %v9833_v29 = vrot.slane %v9826_v11, %v20242_v57  ;;  %v9469_v3 = vsel %vm5756_vm3, %v9468_v40, %v9467_v45  ;;  %v10291_v5 = vrot.slane %v10284_v39, %v20242_v57  ;;  %v10319_v35 = vrot.slane %v10312_v25, %v20242_v57 }
 0x493   : > { %v10333_v50 = vrot.slane %v10326_v38, %v20242_v57  ;;  %v8969_v43 = vunpack.c.l.b16 %v8825_v26  ;;  %v10305_v36 = vrot.slane %v10298_v12, %v20242_v57  ;;  %v10347_v37 = vrot.slane %v10340_v19, %v20242_v57 }
 0x494   : > { %v10361_v11 = vrot.slane %v10354_v1, %v20242_v57  ;;  %v9997_v41 = vsel %vm5753_vm2, %v9468_v40, %v9996_v33  ;;  %v9857_v49 = vunpack.c.l.b16 %v9833_v29  ;;  %v10380_v34 = vunpack.c.l.b16 %v10291_v5  ;;  %v24620_v5 = vpop.f32.mrf.mxu1 }
 0x495   : > { %v10382_v17 = vunpack.c.l.b16 %v10319_v35  ;;  %v6783_v45 = vsel %vm5759_vm4, %v6256_v27, %v6782_v28  ;;  %v9206_v39 = vrot.slane %v24571_v9, 4  ;;  %v10381_v25 = vunpack.c.l.b16 %v10305_v36  ;;  %27548 = vst [vmem:[#allocation138_spill] sm:$0xff] %v24620_v5 }
 0x496   : > { %v10383_v38 = vunpack.c.l.b16 %v10333_v50  ;;  %v9205_v26 = vsel %vm5756_vm3, %v9204_v2, %v9203_v31  ;;  %v9471_v12 = vsel %vm5759_vm4, %v9470_v53, %v9469_v3  ;;  %v10384_v19 = vunpack.c.l.b16 %v10347_v37 }
 0x497   : > { %v24617_v20 = vunpack.c.l.b16 %v10361_v11  ;;  %v9208_v1 = vrot.slane %v8969_v43, 3  ;;  %v9472_v40 = vrot.slane %v8969_v43, 4  ;;  %v9998_v33 = vsel %vm5756_vm3, %v9470_v53, %v9997_v41 }
 0x498   : > { %v10416_v29 = vrot.slane %v10381_v25, 7  ;;  %v10000_v27 = vrot.slane %v9857_v49, 3  ;;  %v10418_v28 = vrot.slane %v10382_v17, 6  ;;  %v10460_v9 = vrot.slane %v10380_v34, 1 }
 0x499   : > { %v10462_v35 = vrot.slane %v10382_v17, 7  ;;  %v10420_v36 = vrot.slane %v10383_v38, 5  ;;  %v10464_v31 = vrot.slane %v10383_v38, 6  ;;  %v10468_v2 = vrot.slane %v24617_v20, 4  ;;  %v24636_v38 = vpop.f32.mrf.mxu1 }
 0x49a   : > { %v10417_v50 = vsel %vm5750_vm1, %v10416_v29, %v10380_v34  ;;  %v10461_v3 = vsel %vm5750_vm1, %v10381_v25, %v10460_v9  ;;  %v10466_v43 = vrot.slane %v10384_v19, 5  ;;  %v27549_v11 = vrot.slane %v24560_v14, 3  ;;  %27551 = vst [vmem:[#allocation140_spill] sm:$0xff] %v24636_v38 }
 0x49b   : > { %v10419_v37 = vsel %vm5753_vm2, %v10418_v28, %v10417_v50  ;;  %v10552_v53 = vsel %vm5750_vm1, %v10462_v35, %v10381_v25  ;;  %v18704_v49 = vpack.c.b16 %v24577_v22, %v24574_v42  ;;  %v9999_v34 = vsel %vm5759_vm4, %v9472_v40, %v9998_v33 }
 0x49c   : > { %v24630_v41 = vsel %vm5762_vm5, %v27549_v11, %v6783_v45  ;;  %v10553_v17 = vsel %vm5753_vm2, %v10464_v31, %v10552_v53  ;;  %v9207_v29 = vsel %vm5759_vm4, %v9206_v39, %v9205_v26  ;;  %v10421_v28 = vsel %vm5756_vm3, %v10420_v36, %v10419_v37  ;;  %v27553_v53 = vld [vmem:[#allocation114_spill] sm:$0xff]  ;;  %v27554_v26 = vld [vmem:[#allocation116_spill] sm:$0xff] }
 0x49d   : > { %27550 = vst [vmem:[#allocation139_spill] sm:$0xff] %v24630_v41  ;;  %v10463_v25 = vsel %vm5753_vm2, %v10462_v35, %v10461_v3  ;;  %v10554_v14 = vsel %vm5756_vm3, %v10466_v43, %v10553_v17  ;;  %v9209_v45 = vsel %vm5762_vm5, %v9208_v1, %v9207_v29  ;;  %v9473_v9 = vsel %vm5762_vm5, %v9472_v40, %v9471_v12 }
 0x49e   : > { %v10422_v50 = vrot.slane %v10384_v19, 4  ;;  %v24645_v42 = vsel %vm5759_vm4, %v10468_v2, %v10554_v14  ;;  %v10001_v22 = vsel %vm5762_vm5, %v10000_v27, %v9999_v34  ;;  %v10424_v33 = vrot.slane %v24617_v20, 3  ;;  %v24665_v27 = vpop.f32.mrf.mxu1 }
 0x49f   : > { %27552 = vst [vmem:[#allocation141_spill] sm:$0xff] %v24645_v42  ;;  %v12096_v39 = vcombine.low %v24550_v62, %v27553_v53  ;;  %v27555_v35 = vpack.c.b16 %v24073_v61, %v27554_v26  ;;  %v10465_v12 = vsel %vm5756_vm3, %v10464_v31, %v10463_v25  ;;  %v12176_v19 = vcombine.low %v27553_v53, %v24556_v60  ;;  %v27608_v42 = vld [vmem:[#allocation28_spill] sm:$0xff] }
 0x4a0   : > { %v10423_v1 = vsel %vm5759_vm4, %v10422_v50, %v10421_v28  ;;  %v27556_v20 = vpack.c.b16 %v24133_v4, %v24093_v44  ;;  %27557 = vst [vmem:[#allocation114_spill] sm:$0xff] %v24665_v27  ;;  %v12177_v61 = vcombine.high %v27553_v53, %v24556_v60  ;;  %v27558_v31 = vpack.c.b16 %v24143_v59, %v24140_v52  ;;  %v27607_v44 = vld [vmem:[#allocation30_spill] sm:$0xff] }
 0x4a1   : > { %v24655_v36 = vrot.slane %v27555_v35, %v20242_v57  ;;  %v24668_v37 = vrot.slane %v12096_v39, %v20242_v57  ;;  %v18706_v34 = vpack.c.b16 %v10001_v22, %v9473_v9  ;;  %v24681_v4 = vrot.slane %v12176_v19, %v20242_v57 }
 0x4a2   : > { %v12243_v40 = vrot.slane %v27556_v20, %v20242_v57  ;;  %v24678_v11 = vrot.slane %v27558_v31, %v20242_v57  ;;  %v10425_v28 = vsel %vm5762_vm5, %v10424_v33, %v10423_v1  ;;  %v10467_v59 = vsel %vm5759_vm4, %v10466_v43, %v10465_v12  ;;  %v24700_v33 = vpop.f32.mrf.mxu1 }
 0x4a3   : > { %v12178_v3 = vcombine.low %v24199_v6, %v24655_v36  ;;  %v12127_v60 = vcombine.high %v24330_v18, %v24668_v37  ;;  %v27560_v50 = vpack.c.b16 %v24394_v15, %v24243_v51  ;;  %27561 = vst [vmem:[#allocation142_spill] sm:$0xff] %v24700_v33  ;;  %v24703_v18 = vrot.slane %v12177_v61, %v20242_v57 }
 0x4a4   : > { %27559 = vst [vmem:[#allocation116_spill] sm:$0xff] %v24678_v11  ;;  %v12258_v17 = vcombine.low %v24655_v36, %v12243_v40  ;;  %v12259_v29 = vcombine.high %v24655_v36, %v12243_v40  ;;  %v12260_v52 = vcombine.low %v24678_v11, %v24389_v47  ;;  %v18703_v35 = vpack.c.b16 %v24568_v23, %v24513_v56  ;;  %v24715_v19 = vpop.f32.mrf.mxu1  ;;  %v27658_v11 = vld [vmem:[#allocation33_spill] sm:$0xff] }
 0x4a5   : > { %v24689_v25 = vrot.slane %v12178_v3, %v20242_v57  ;;  %v12325_v22 = vrot.slane %v27560_v50, %v20242_v57  ;;  %27562 = vst [vmem:[#allocation143_spill] sm:$0xff] %v24703_v18  ;;  %v18764_v43 = vcombine.low %v12127_v60, %v24681_v4  ;;  %v18705_v1 = vpack.c.b16 %v9209_v45, %v24630_v41 }
 0x4a6   : > { %v12268_v14 = vrot.slane %v12258_v17, %v20242_v57  ;;  %v12275_v9 = vrot.slane %v12259_v29, %v20242_v57  ;;  %v24708_v26 = vrot.slane %v12260_v52, %v20242_v57  ;;  %27564 = vst [vmem:[#allocation145_spill] sm:$0xff] %v24715_v19  ;;  %v24718_v20 = vrot.slane %v18704_v49, %v20242_v57 }
 0x4a7   : > { %v12209_v39 = vcombine.high %v24681_v4, %v24689_v25  ;;  %v12340_v15 = vcombine.low %v24389_v47, %v12325_v22  ;;  %v10469_v40 = vsel %vm5762_vm5, %v10468_v2, %v10467_v59  ;;  %v24722_v61 = vrot.slane %v18706_v34, %v20242_v57 }
 0x4a8   : > { %27563 = vst [vmem:[#allocation144_spill] sm:$0xff] %v24708_v26  ;;  %v18768_v12 = vcombine.low %v12268_v14, %v12275_v9  ;;  %27565 = vst [vmem:[#allocation146_spill] sm:$0xff] %v24718_v20  ;;  %v18707_v31 = vpack.c.b16 %v10469_v40, %v10425_v28  ;;  %v12291_v56 = vcombine.high %v12268_v14, %v24708_v26  ;;  %v24746_v14 = vpop.f32.mrf.mxu1 }
 0x4a9   : > { %27566 = vst [vmem:[#allocation147_spill] sm:$0xff] %v24722_v61  ;;  %v18766_v3 = vcombine.low %v24703_v18, %v12209_v39  ;;  %v24727_v23 = vrot.slane %v12340_v15, %v20242_v57  ;;  %v14019_v45 = vrot.slane %v18764_v43, %v20242_v57  ;;  %v27568_v49 = vpack.c.b16 %v24458_v21, %v24455_v8 }
 0x4aa   : > { %v12341_v34 = vcombine.high %v24389_v47, %v12325_v22  ;;  %v18702_v29 = vpack.c.b16 %v24496_v32, %v24467_v46  ;;  %v14047_v60 = vrot.slane %v18768_v12, %v20242_v57  ;;  %v24743_v52 = vrot.slane %v18703_v35, %v20242_v57  ;;  %27571 = vst [vmem:[#allocation151_spill] sm:$0xff] %v24746_v14  ;;  %v27605_v46 = vld [vmem:[#allocation26_spill] sm:$0xff]  ;;  %v27659_v47 = vld [vmem:[#allocation35_spill] sm:$0xff] }
 0x4ab   : > { %27567 = vst [vmem:[#allocation148_spill] sm:$0xff] %v24727_v23  ;;  %v14033_v17 = vrot.slane %v18766_v3, %v20242_v57  ;;  %v24735_v2 = vrot.slane %v27568_v49, %v20242_v57  ;;  %v18770_v28 = vcombine.low %v12291_v56, %v24727_v23  ;;  %v12489_v59 = vrot.slane %v18705_v1, %v20242_v57 }
 0x4ac   : > { %27570 = vst [vmem:[#allocation150_spill] sm:$0xff] %v24743_v52  ;;  %v24751_v50 = vrot.slane %v12341_v34, %v20242_v57  ;;  %v12407_v22 = vrot.slane %v18702_v29, %v20242_v57  ;;  %v12424_v39 = vcombine.low %v24743_v52, %v24718_v20  ;;  %v24758_v43 = vrot.slane %v18707_v31, %v20242_v57  ;;  %v27652_v52 = vld [vmem:[#allocation7_spill] sm:$0xff] }
 0x4ad   : > { %27569 = vst [vmem:[#allocation149_spill] sm:$0xff] %v24735_v2  ;;  %v14070_v9 = vcombine.high %v14019_v45, %v14033_v17  ;;  %v14069_v8 = vcombine.low %v14019_v45, %v14033_v17  ;;  %v12342_v21 = vcombine.low %v24409_v7, %v24735_v2  ;;  %v14061_v32 = vrot.slane %v18770_v28, %v20242_v57  ;;  %v24772_v17 = vpop.f32.mrf.mxu1 }
 0x4ae   : > { %27572 = vst [vmem:[#allocation152_spill] sm:$0xff] %v24751_v50  ;;  %27573 = vst [vmem:[#allocation153_spill] sm:$0xff] %v24758_v43  ;;  %v12504_v12 = vcombine.low %v24718_v20, %v12489_v59  ;;  %v12422_v56 = vcombine.low %v24735_v2, %v12407_v22  ;;  %v12423_v45 = vcombine.high %v24735_v2, %v12407_v22 }
 0x4af   : > { %v24761_v35 = vrot.slane %v14070_v9, %v20242_v57  ;;  %v24764_v1 = vrot.slane %v14069_v8, %v20242_v57  ;;  %v24767_v15 = vrot.slane %v12342_v21, %v20242_v57  ;;  %v14074_v40 = vcombine.high %v14047_v60, %v14061_v32  ;;  %27577 = vst [vmem:[#allocation157_spill] sm:$0xff] %v24772_v17  ;;  %v27581_v21 = vld [vmem:[#allocation20_spill] sm:$0xff]  ;;  %v24806_v14 = vpop.f32.mrf.mxu1 }
 0x4b0   : > { %v14073_v3 = vcombine.low %v14047_v60, %v14061_v32  ;;  %v24777_v49 = vrot.slane %v12424_v39, %v20242_v57  ;;  %v12505_v34 = vcombine.high %v24718_v20, %v12489_v59  ;;  %v12506_v29 = vcombine.low %v24722_v61, %v24758_v43  ;;  %27585 = vst [vmem:[#allocation162_spill] sm:$0xff] %v24806_v14  ;;  %v27650_v61 = vld [vmem:[#allocation101_spill] sm:$0xff] }
 0x4b1   : > { %27574 = vst [vmem:[#allocation154_spill] sm:$0xff] %v24761_v35  ;;  %27575 = vst [vmem:[#allocation155_spill] sm:$0xff] %v24764_v1  ;;  %v12373_v31 = vcombine.high %v24727_v23, %v24767_v15  ;;  %v24783_v28 = vrot.slane %v14074_v40, %v20242_v57  ;;  %v12432_v9 = vrot.slane %v12422_v56, %v20242_v57 }
 0x4b2   : > { %27576 = vst [vmem:[#allocation156_spill] sm:$0xff] %v24767_v15  ;;  %27578 = vst [vmem:[#allocation158_spill] sm:$0xff] %v24777_v49  ;;  %v24786_v60 = vrot.slane %v14073_v3, %v20242_v57  ;;  %v12439_v8 = vrot.slane %v12423_v45, %v20242_v57  ;;  %v27582_v32 = vpack.c.b16 %v27581_v21, %v27581_v21  ;;  %v27586_v21 = vld [vmem:[#allocation21_spill] sm:$0xff]  ;;  %v27656_v15 = vld [vmem:[#allocation51_spill] sm:$0xff] }
 0x4b3   : > { %27579 = vst [vmem:[#allocation159_spill] sm:$0xff] %v24783_v28  ;;  %v24795_v59 = vrot.slane %v12504_v12, %v20242_v57  ;;  %v24798_v39 = vrot.slane %v12506_v29, %v20242_v57  ;;  %v18772_v40 = vcombine.low %v24751_v50, %v12373_v31  ;;  %v14137_v3 = vcombine.low %v24761_v35, %v24783_v28  ;;  %v27637_v35 = vld [vmem:[#allocation66_spill] sm:$0xff] }
 0x4b4   : > { %27580 = vst [vmem:[#allocation160_spill] sm:$0xff] %v24786_v60  ;;  %v10717_v22 = vrot.slane %v27582_v32, %v20242_v57  ;;  %v14133_v56 = vcombine.low %v24764_v1, %v24786_v60  ;;  %v12455_v45 = vcombine.high %v12432_v9, %v24777_v49  ;;  %v18774_v17 = vcombine.low %v12432_v9, %v12439_v8  ;;  %v27591_v9 = vld [vmem:[#allocation22_spill] sm:$0xff]  ;;  %v27609_v60 = vld [vmem:[#allocation23_spill] sm:$0xff] }
 0x4b5   : > { %27583 = vst [vmem:[#allocation20_spill] sm:$0xff] %v24795_v59  ;;  %27584 = vst [vmem:[#allocation161_spill] sm:$0xff] %v24798_v39  ;;  %v24810_v12 = vrot.slane %v27586_v21, %v20242_v57  ;;  %v27588_v29 = vcombine.high %v27586_v21, %v27586_v21  ;;  %v24819_v32 = vrot.slane %v12505_v34, %v20242_v57  ;;  %14976 = vmatprep.mubr.bf16.mxu1 %v14137_v3  ;;  %v27661_v50 = vld [vmem:[#allocation110_spill] sm:$0xff] }
 0x4b6   : > { %v12537_v19 = vcombine.high %v24795_v59, %v24798_v39  ;;  %v27592_v8 = vcombine.high %v27591_v9, %v27591_v9  ;;  %v18776_v33 = vcombine.low %v12455_v45, %v24795_v59  ;;  %v14204_v27 = vrot.slane %v18772_v40, %v20242_v57  ;;  %14977 = vmatmul.mubr.bf16.gmra.mxu1 %v14133_v56  ;;  %v27642_v59 = vld [vmem:[#allocation75_spill] sm:$0xff] }
 0x4b7   : > { %27587 = vst [vmem:[#allocation21_spill] sm:$0xff] %v24810_v12  ;;  %v24816_v31 = vrot.slane %v27588_v29, %v20242_v57  ;;  %27590 = vst [vmem:[#allocation164_spill] sm:$0xff] %v24819_v32  ;;  %v14218_v21 = vrot.slane %v18774_v17, %v20242_v57  ;;  %v19076_v29 = vpop.f32.mrf.mxu1  ;;  %v10718_v38 = vcombine.high %v10717_v22, %v10717_v22  ;;  %v27648_v39 = vld [vmem:[#allocation99_spill] sm:$0xff] }
 0x4b8   : > { %v24827_v14 = vrot.slane %v27592_v8, %v20242_v57  ;;  %v18778_v34 = vcombine.low %v24819_v32, %v12537_v19  ;;  %v24835_v5 = vrot.slane %v27591_v9, %v20242_v57  ;;  %v24838_v0 = vrot.slane %v10717_v22, %v20242_v57  ;;  %v27615_v9 = vld [vmem:[#allocation32_spill] sm:$0xff]  ;;  %v27641_v32 = vld [vmem:[#allocation43_spill] sm:$0xff] }
 0x4b9   : > { %27589 = vst [vmem:[#allocation163_spill] sm:$0xff] %v24816_v31  ;;  %v14255_v8 = vcombine.high %v14204_v27, %v14218_v21  ;;  %v14232_v3 = vrot.slane %v18776_v33, %v20242_v57  ;;  %v14254_v40 = vcombine.low %v14204_v27, %v14218_v21  ;;  %v10651_v17 = vcombine.high %v24810_v12, %v24810_v12  ;;  %v19077_v22 = vpop.f32.mrf.mxu1  ;;  %v27634_v31 = vld [vmem:[#allocation38_spill] sm:$0xff]  ;;  %v27636_v12 = vld [vmem:[#allocation67_spill] sm:$0xff] }
 0x4ba   : > { %27593 = vst [vmem:[#allocation22_spill] sm:$0xff] %v24827_v14  ;;  %27594 = vst [vmem:[#allocation165_spill] sm:$0xff] %v24835_v5  ;;  %v14246_v45 = vrot.slane %v18778_v34, %v20242_v57  ;;  %v24853_v33 = vrot.slane %v10718_v38, %v20242_v57  ;;  %v27606_v34 = vld [vmem:[#allocation25_spill] sm:$0xff]  ;;  %v10708_v41 = vcombine.low %v27608_v42, %v27607_v44  ;;  %v27616_v5 = vld [vmem:[#allocation27_spill] sm:$0xff] }
 0x4bb   : > { %27595 = vst [vmem:[#allocation166_spill] sm:$0xff] %v24838_v0  ;;  %v24858_v56 = vrot.slane %v14255_v8, %v20242_v57  ;;  %v24868_v38 = vrot.slane %v14254_v40, %v20242_v57  ;;  %v24876_v8 = vcombine.low %v10651_v17, %v24838_v0  ;;  %v10597_v19 = vcombine.high %v27606_v34, %v27605_v46  ;;  %v27617_v17 = vld [vmem:[#allocation24_spill] sm:$0xff]  ;;  %v27629_v42 = vld [vmem:[#allocation29_spill] sm:$0xff] }
 0x4bc   : > { %27598 = vst [vmem:[#allocation167_spill] sm:$0xff] %v24853_v33  ;;  %v14259_v27 = vcombine.high %v14232_v3, %v14246_v45  ;;  %v14258_v21 = vcombine.low %v14232_v3, %v14246_v45  ;;  %v24873_v45 = vadd.f32 %v19077_v22, %v19076_v29  ;;  %v18711_v28 = vcombine.high %v27616_v5, %v10708_v41  ;;  %v27622_v40 = vld [vmem:[#allocation12_spill] sm:$0xff]  ;;  %v27625_v41 = vld [vmem:[#allocation47_spill] sm:$0xff]  ;;  %v27627_v22 = vld [vmem:[#allocation65_spill] sm:$0xff] }
 0x4bd   : > { %27599 = vst [vmem:[#allocation168_spill] sm:$0xff] %v24858_v56  ;;  %27601 = vst [vmem:[#allocation170_spill] sm:$0xff] %v24868_v38  ;;  %v27628_v46 = vld [vmem:[#allocation64_spill] sm:$0xff]  ;;  %v27660_v18 = vcombine.high %v27658_v11, %v27659_v47  ;;  %v19843_v11 = vld [vmem:[%s26965_s2 + $0x168] sm:$0xff]  }
 0x4be   : > { %v24865_v51 = vrot.slane %v14259_v27, %v20242_v57  ;;  %v24871_v3 = vrot.slane %v14258_v21, %v20242_v57  ;;  %27603 = vst [vmem:[#allocation172_spill] sm:$0xff] %v24873_v45  ;;  %27604 = vst [vmem:[#allocation173_spill] sm:$0xff] %v24876_v8  ;;  %v27610_v27 = vld [vmem:[#allocation13_spill] sm:$0xff]  ;;  %v27614_v45 = vld [vmem:[#allocation34_spill] sm:$0xff] }
 0x4bf   : > { %v10761_v1 = vcombine.high %v27610_v27, %v27609_v60  ;;  %v10625_v60 = vrot.slane %v10597_v19, %v20242_v57  ;;  %v12843_v14 = vcombine.high %v27615_v9, %v27614_v45  ;;  %v27624_v9 = vld [vmem:[#allocation44_spill] sm:$0xff]  ;;  %v27626_v27 = vld [vmem:[#allocation46_spill] sm:$0xff] }
 0x4c0   : > { %27600 = vst [vmem:[#allocation169_spill] sm:$0xff] %v24865_v51  ;;  %27602 = vst [vmem:[#allocation171_spill] sm:$0xff] %v24871_v3  ;;  %v14322_v21 = vcombine.low %v24858_v56, %v24865_v51  ;;  %v14318_v29 = vcombine.low %v24868_v38, %v24871_v3  ;;  %v27618_v51 = vld [vmem:[#allocation14_spill] sm:$0xff]  ;;  %v27623_v38 = vld [vmem:[#allocation45_spill] sm:$0xff]  ;;  %v27676_v10 = vcombine.high %v27626_v27, %v27625_v41 }
 0x4c1   : > { %v10789_v34 = vrot.slane %v10761_v1, %v20242_v57  ;;  %v10843_v56 = vcombine.high %v27618_v51, %v27617_v17  ;;  %v13028_v45 = vcombine.high %v27624_v9, %v27623_v38  ;;  %v18709_v51 = vcombine.low %v27616_v5, %v10625_v60  ;;  %v27630_v1 = vld [vmem:[#allocation31_spill] sm:$0xff]  ;;  %v27635_v38 = vld [vmem:[#allocation18_spill] sm:$0xff]  ;;  %v27640_v19 = vld [vmem:[#allocation8_spill] sm:$0xff] }
 0x4c2   : > { %14984 = vmatprep.mubr.bf16.mxu1 %v14322_v21  ;;  %v11007_v9 = vcombine.high %v27635_v38, %v27634_v31  ;;  %v12745_v5 = vrot.slane %v18711_v28, %v20242_v57  ;;  %v27639_v60 = vld [vmem:[#allocation15_spill] sm:$0xff]  ;;  %v11036_v49 = vcombine.low %v27641_v32, %v27640_v19  ;;  %v27646_v31 = vld [vmem:[#allocation41_spill] sm:$0xff]  ;;  %v27647_v33 = vld [vmem:[#allocation100_spill] sm:$0xff] }
 0x4c3   : > { %14985 = vmatmul.mubr.bf16.gmra.mxu1 %v14318_v29  ;;  %v18715_v21 = vcombine.low %v27622_v40, %v10789_v34  ;;  %v10871_v17 = vrot.slane %v10843_v56, %v20242_v57  ;;  %v27631_v29 = vcombine.low %v27629_v42, %v27630_v1  ;;  %v27632_v34 = vld [vmem:[#allocation36_spill] sm:$0xff]  ;;  %v27643_v42 = vld [vmem:[#allocation74_spill] sm:$0xff]  ;;  %v27644_v1 = vld [vmem:[#allocation77_spill] sm:$0xff]  ;;  %v12731_v43 = vrot.slane %v18709_v51, %v20242_v57 }
 0x4c4   : > { %15025 = vmatprep.mubr.bf16.mxu1 %v12843_v14  ;;  %v27633_v14 = vld [vmem:[#allocation10_spill] sm:$0xff]  ;;  %v27638_v56 = vld [vmem:[#allocation16_spill] sm:$0xff]  ;;  %v19840_v28 = vld [vmem:[%s26965_s2 + $0x138] sm:$0xff]  }
 0x4c5   : > { %v18713_v3 = vcombine.high %v27631_v29, %v27607_v44  ;;  %v10925_v8 = vcombine.high %v27633_v14, %v27632_v34  ;;  %v10872_v0 = vcombine.low %v27639_v60, %v27638_v56  ;;  %v27645_v29 = vld [vmem:[#allocation76_spill] sm:$0xff]  ;;  %v12773_v14 = vrot.slane %v18715_v21, %v20242_v57  ;;  %v27651_v44 = vld [vmem:[#allocation49_spill] sm:$0xff]  ;;  %v19841_v21 = vld [vmem:[%s26965_s2 + $0x170] sm:$0xff]  }
 0x4c6   : > { %v10874_v38 = vcombine.low %v27646_v31, %v10871_v17  ;;  %v11097_v20 = vcombine.high %v27652_v52, %v27651_v44  ;;  %v11035_v60 = vrot.slane %v11007_v9, %v20242_v57  ;;  %v12777_v26 = vcombine.high %v12731_v43, %v12745_v5  ;;  %v27655_v51 = vld [vmem:[#allocation42_spill] sm:$0xff]  ;;  %v27662_v34 = vld [vmem:[#allocation109_spill] sm:$0xff]  ;;  %v27664_v9 = vld [vmem:[#allocation60_spill] sm:$0xff] }
 0x4c7   : > { %v12759_v7 = vrot.slane %v18713_v3, %v20242_v57  ;;  %v10953_v2 = vrot.slane %v10925_v8, %v20242_v57  ;;  %v18717_v32 = vcombine.high %v27622_v40, %v10872_v0  ;;  %v18723_v23 = vcombine.high %v27655_v51, %v11036_v49  ;;  %v27657_v52 = vld [vmem:[#allocation50_spill] sm:$0xff]  ;;  %v19847_v41 = vld [vmem:[%s26965_s2 + $0x158] sm:$0xff]  }
 0x4c8   : > { %v11179_v44 = vcombine.high %v27657_v52, %v27656_v15  ;;  %v12776_v3 = vcombine.low %v12731_v43, %v12745_v5  ;;  %v18719_v8 = vcombine.high %v10874_v38, %v27638_v56  ;;  %v19842_v0 = vld [vmem:[%s26965_s2 + $0x130] sm:$0xff]   ;;  %v11125_v47 = vrot.slane %v11097_v20, %v20242_v57  ;;  %v27663_v43 = vld [vmem:[#allocation59_spill] sm:$0xff]  ;;  %v27673_v15 = vld [vmem:[#allocation72_spill] sm:$0xff] }
 0x4c9   : > { %v12781_v31 = vcombine.high %v12759_v7, %v12773_v14  ;;  %v12780_v49 = vcombine.low %v12759_v7, %v12773_v14  ;;  %v11038_v40 = vcombine.low %v27663_v43, %v11035_v60  ;;  %v27665_v5 = vld [vmem:[#allocation62_spill] sm:$0xff]  ;;  %v24986_v7 = vrot.slane %v12777_v26, %v20242_v57  ;;  %v19844_v26 = vld [vmem:[%s26965_s2 + $0x128] sm:$0xff]  }
 0x4ca   : > { %v11208_v56 = vcombine.low %v27665_v5, %v27664_v9  ;;  %v12916_v20 = vrot.slane %v18717_v32, %v20242_v57  ;;  %v12958_v14 = vrot.slane %v18723_v23, %v20242_v57  ;;  %v12930_v60 = vrot.slane %v18719_v8, %v20242_v57  ;;  %v27667_v32 = vld [vmem:[#allocation61_spill] sm:$0xff]  ;;  %v19845_v8 = vld [vmem:[%s26965_s2 + $0x160] sm:$0xff]  }
 0x4cb   : > { %15026 = vmatmul.mubr.bf16.vlgmr.msra.gmra.mxu1 %v27660_v18  ;;  %v18721_v18 = vcombine.low %v27655_v51, %v10953_v2  ;;  %v24994_v2 = vrot.slane %v12776_v3, %v20242_v57  ;;  %v25002_v52 = vrot.slane %v12780_v49, %v20242_v57  ;;  %v18727_v23 = vcombine.low %v27667_v32, %v11125_v47  ;;  %v27670_v5 = vld [vmem:[#allocation53_spill] sm:$0xff] }
 0x4cc   : > { %19171 = vmatpush3.bf16.msra.mxu1 %v19840_v28  ;;  %15033 = vmatprep.mubr.bf16.mxu1 %v13028_v45  ;;  %v11207_v45 = vrot.slane %v11179_v44, %v20242_v57  ;;  %v24991_v28 = vrot.slane %v12781_v31, %v20242_v57  ;;  %v27668_v44 = vld [vmem:[#allocation57_spill] sm:$0xff]  ;;  %v27669_v31 = vld [vmem:[#allocation54_spill] sm:$0xff]  ;;  %v18729_v49 = vcombine.high %v27667_v32, %v11208_v56  ;;  %v27677_v56 = vld [vmem:[#allocation92_spill] sm:$0xff] }
 0x4cd   : > { %19172 = vmatprep.subr.bf16.mxu1 %v19841_v21  ;;  %v27666_v21 = vld [vmem:[#allocation63_spill] sm:$0xff]  ;;  %v11261_v43 = vcombine.high %v27669_v31, %v27668_v44  ;;  %v27671_v3 = vld [vmem:[#allocation37_spill] sm:$0xff]  ;;  %v27678_v32 = vld [vmem:[#allocation52_spill] sm:$0xff] }
 0x4ce   : > { %v11210_v51 = vcombine.low %v27666_v21, %v11207_v45  ;;  %v11343_v38 = vcombine.high %v27671_v3, %v27670_v5  ;;  %v18725_v45 = vcombine.high %v11038_v40, %v27640_v19  ;;  %v27672_v21 = vld [vmem:[#allocation39_spill] sm:$0xff]  ;;  %v27675_v5 = vld [vmem:[#allocation58_spill] sm:$0xff]  ;;  %v12961_v40 = vcombine.low %v12916_v20, %v12930_v60 }
 0x4cf   : > { %v11372_v47 = vcombine.low %v27673_v15, %v27672_v21  ;;  %v11289_v44 = vrot.slane %v11261_v43, %v20242_v57  ;;  %v11507_v55 = vcombine.high %v27678_v32, %v27677_v56  ;;  %v27679_v15 = vcombine.high %v27628_v46, %v27627_v22  ;;  %v27681_v46 = vld [vmem:[#allocation71_spill] sm:$0xff] }
 0x4d0   : > { %19173 = vmatpush3.bf16.msra.mxu1 %v19842_v0  ;;  %v12944_v0 = vrot.slane %v18721_v18, %v20242_v57  ;;  %v18731_v17 = vcombine.high %v11210_v51, %v27664_v9  ;;  %v11371_v31 = vrot.slane %v11343_v38, %v20242_v57  ;;  %v12962_v18 = vcombine.high %v12916_v20, %v12930_v60  ;;  %v19846_v9 = vld [vmem:[%s26965_s2 + $0x120] sm:$0xff]   ;;  %v27680_v51 = vld [vmem:[#allocation73_spill] sm:$0xff]  ;;  %v27684_v56 = vld [vmem:[#allocation95_spill] sm:$0xff] }
 0x4d1   : > { %19174 = vmatprep.subr.bf16.mxu1 %v19843_v11  ;;  %v27674_v11 = vld [vmem:[#allocation70_spill] sm:$0xff]  ;;  %v13115_v38 = vrot.slane %v18727_v23, %v20242_v57  ;;  %v13101_v22 = vrot.slane %v18725_v45, %v20242_v57  ;;  %v18735_v60 = vcombine.high %v27681_v46, %v11372_v47  ;;  %v13129_v43 = vrot.slane %v18729_v49, %v20242_v57 }
 0x4d2   : > { %v11425_v3 = vcombine.high %v27675_v5, %v27674_v11  ;;  %v12966_v19 = vcombine.high %v12944_v0, %v12958_v14  ;;  %v11374_v27 = vcombine.low %v27680_v51, %v11371_v31  ;;  %v12965_v20 = vcombine.low %v12944_v0, %v12958_v14  ;;  %v27682_v11 = vld [vmem:[#allocation93_spill] sm:$0xff]  ;;  %v27685_v14 = vld [vmem:[#allocation98_spill] sm:$0xff] }
 0x4d3   : > { %15034 = vmatmul.mubr.bf16.gmra.mxu1 %v27676_v10  ;;  %v13143_v23 = vrot.slane %v18731_v17, %v20242_v57  ;;  %v18733_v31 = vcombine.low %v27681_v46, %v11289_v44  ;;  %v27686_v45 = vld [vmem:[#allocation78_spill] sm:$0xff]  ;;  %v25058_v49 = vrot.slane %v12962_v18, %v20242_v57  ;;  %v13146_v44 = vcombine.low %v13101_v22, %v13115_v38 }
 0x4d4   : > { %15041 = vmatprep.mubr.bf16.mxu1 %v27679_v15  ;;  %19175 = vmatpush3.bf16.msra.mxu1 %v19844_v26  ;;  %v11453_v10 = vrot.slane %v11425_v3, %v20242_v57  ;;  %v11535_v26 = vrot.slane %v11507_v55, %v20242_v57  ;;  %v27683_v3 = vld [vmem:[#allocation96_spill] sm:$0xff]  ;;  %v27687_v15 = vld [vmem:[#allocation79_spill] sm:$0xff]  ;;  %v19849_v51 = vld [vmem:[%s26965_s2 + $0x150] sm:$0xff]   ;;  %v25072_v18 = vrot.slane %v12965_v20, %v20242_v57 }
 0x4d5   : > { %19176 = vmatprep.subr.bf16.mxu1 %v19845_v8  ;;  %v18737_v8 = vcombine.high %v11374_v27, %v27672_v21  ;;  %v11536_v32 = vcombine.low %v27684_v56, %v27683_v3  ;;  %v11597_v47 = vcombine.high %v27687_v15, %v27686_v45  ;;  %v19848_v55 = vld [vmem:[%s26965_s2 + $0x118] sm:$0xff]   ;;  %v13147_v21 = vcombine.high %v13101_v22, %v13115_v38  ;;  %v27689_v22 = vld [vmem:[#allocation97_spill] sm:$0xff] }
 0x4d6   : > { %v18739_v5 = vcombine.low %v27682_v11, %v11453_v10  ;;  %v11538_v0 = vcombine.low %v27685_v14, %v11535_v26  ;;  %v25064_v27 = vrot.slane %v12966_v19, %v20242_v57  ;;  %v13300_v10 = vrot.slane %v18735_v60, %v20242_v57  ;;  %v27693_v45 = vld [vmem:[#allocation17_spill] sm:$0xff] }
 0x4d7   : > { %v13151_v26 = vcombine.high %v13129_v43, %v13143_v23  ;;  %v13286_v38 = vrot.slane %v18733_v31, %v20242_v57  ;;  %v27690_v19 = vcombine.high %v27637_v35, %v27636_v12  ;;  %v11625_v14 = vrot.slane %v11597_v47, %v20242_v57  ;;  %v19850_v31 = vld [vmem:[%s26965_s2 + $0x110] sm:$0xff]  }
 0x4d8   : > { %19177 = vmatpush3.bf16.msra.mxu1 %v19846_v9  ;;  %v25067_v9 = vrot.slane %v12961_v40, %v20242_v57  ;;  %v13328_v46 = vrot.slane %v18739_v5, %v20242_v57  ;;  %v13314_v40 = vrot.slane %v18737_v8, %v20242_v57  ;;  %v18741_v60 = vcombine.high %v27682_v11, %v11536_v32  ;;  %v27692_v8 = vld [vmem:[#allocation82_spill] sm:$0xff] }
 0x4d9   : > { %19178 = vmatprep.subr.bf16.mxu1 %v19847_v41  ;;  %v27688_v41 = vld [vmem:[#allocation105_spill] sm:$0xff]  ;;  %v18743_v5 = vcombine.high %v11538_v0, %v27683_v3  ;;  %v27691_v20 = vcombine.high %v27643_v42, %v27642_v59  ;;  %v25091_v35 = vrot.slane %v13147_v21, %v20242_v57  ;;  %v25094_v12 = vrot.slane %v13146_v44, %v20242_v57  ;;  %v27694_v47 = vld [vmem:[#allocation94_spill] sm:$0xff] }
 0x4da   : > { %v11708_v56 = vcombine.low %v27689_v22, %v27688_v41  ;;  %v11679_v11 = vcombine.high %v27693_v45, %v27692_v8  ;;  %v19851_v59 = vld [vmem:[%s26965_s2 + $0x148] sm:$0xff]   ;;  %v13150_v42 = vcombine.low %v13129_v43, %v13143_v23  ;;  %v13332_v3 = vcombine.high %v13286_v38, %v13300_v10  ;;  %v27696_v44 = vld [vmem:[#allocation86_spill] sm:$0xff] }
 0x4db   : > { %15042 = vmatmul.mubr.bf16.gmra.mxu1 %v27690_v19  ;;  %v13336_v32 = vcombine.high %v13314_v40, %v13328_v46  ;;  %v13331_v0 = vcombine.low %v13286_v38, %v13300_v10  ;;  %v13335_v15 = vcombine.low %v13314_v40, %v13328_v46  ;;  %v27695_v22 = vld [vmem:[#allocation85_spill] sm:$0xff]  ;;  %v13471_v8 = vrot.slane %v18741_v60, %v20242_v57  ;;  %v27697_v10 = vld [vmem:[#allocation83_spill] sm:$0xff]  ;;  %v27700_v45 = vld [vmem:[#allocation106_spill] sm:$0xff] }
 0x4dc   : > { %15049 = vmatprep.mubr.bf16.mxu1 %v27691_v20  ;;  %19179 = vmatpush3.bf16.msra.mxu1 %v19848_v55  ;;  %v18747_v55 = vcombine.high %v27694_v47, %v11708_v56  ;;  %v11707_v21 = vrot.slane %v11679_v11, %v20242_v57  ;;  %v11761_v19 = vcombine.high %v27696_v44, %v27695_v22  ;;  %v19852_v23 = vld [vmem:[%s26965_s2 + $0x108] sm:$0xff]   ;;  %v27698_v56 = vld [vmem:[#allocation84_spill] sm:$0xff] }
 0x4dd   : > { %19180 = vmatprep.subr.bf16.mxu1 %v19849_v51  ;;  %v25106_v20 = vrot.slane %v13151_v26, %v20242_v57  ;;  %v18745_v51 = vcombine.low %v27694_v47, %v11625_v14  ;;  %v13485_v43 = vrot.slane %v18743_v5, %v20242_v57  ;;  %v11843_v40 = vcombine.high %v27698_v56, %v23488_v13  ;;  %v27699_v26 = vld [vmem:[#allocation89_spill] sm:$0xff]  ;;  %v19853_v14 = vld [vmem:[%s26965_s2 + $0x140] sm:$0xff]  }
 0x4de   : > { %v11710_v46 = vcombine.low %v27697_v10, %v11707_v21  ;;  %v11789_v38 = vrot.slane %v11761_v19, %v20242_v57  ;;  %v11872_v11 = vcombine.low %v27700_v45, %v27699_v26  ;;  %v25124_v60 = vrot.slane %v13150_v42, %v20242_v57  ;;  %v27701_v22 = vld [vmem:[#allocation88_spill] sm:$0xff]  ;;  %v27704_v19 = vld [vmem:[#allocation107_spill] sm:$0xff] }
 0x4df   : > { %v25127_v5 = vrot.slane %v13332_v3, %v20242_v57  ;;  %v25133_v47 = vrot.slane %v13331_v0, %v20242_v57  ;;  %v25136_v13 = vrot.slane %v13335_v15, %v20242_v57  ;;  %v11871_v21 = vrot.slane %v11843_v40, %v20242_v57  ;;  %v27706_v40 = vld [vmem:[#allocation123_spill] sm:$0xff] }
 0x4e0   : > { %19181 = vmatpush3.bf16.msra.mxu1 %v19850_v31  ;;  %v25130_v31 = vrot.slane %v13336_v32, %v20242_v57  ;;  %v18751_v44 = vcombine.low %v27701_v22, %v11789_v38  ;;  %v27702_v42 = vcombine.high %v27645_v29, %v27644_v1  ;;  %v13499_v3 = vrot.slane %v18745_v51, %v20242_v57  ;;  %v19854_v1 = vld [vmem:[%s26965_s2 + $0x100] sm:$0xff]  }
 0x4e1   : > { %19182 = vmatprep.subr.bf16.mxu1 %v19851_v59  ;;  %v13513_v59 = vrot.slane %v18747_v55, %v20242_v57  ;;  %v18749_v32 = vcombine.high %v11710_v46, %v27688_v41  ;;  %v11925_v0 = vcombine.high %v23502_v54, %v24240_v63  ;;  %v12007_v15 = vcombine.high %v24280_v48, %v24286_v24  ;;  %v19855_v54 = vld [vmem:[%s26965_s2 + $0x1f8] sm:$0xff]  }
 0x4e2   : > { %v27703_v55 = vcombine.high %v27648_v39, %v27647_v33  ;;  %v13517_v29 = vcombine.high %v13471_v8, %v13485_v43  ;;  %v11874_v51 = vcombine.low %v27704_v19, %v11871_v21  ;;  %v18753_v41 = vcombine.high %v27701_v22, %v11872_v11  ;;  %v27705_v39 = vld [vmem:[#allocation122_spill] sm:$0xff]  ;;  %v27707_v11 = vld [vmem:[#allocation121_spill] sm:$0xff] }
 0x4e3   : > { %15050 = vmatmul.mubr.bf16.gmra.mxu1 %v27702_v42  ;;  %v13670_v63 = vrot.slane %v18751_v44, %v20242_v57  ;;  %v11953_v48 = vrot.slane %v11925_v0, %v20242_v57  ;;  %v12035_v24 = vrot.slane %v12007_v15, %v20242_v57  ;;  %v12036_v33 = vcombine.low %v27705_v39, %v24310_v16 }
 0x4e4   : > { %15057 = vmatprep.mubr.bf16.mxu1 %v27703_v55  ;;  %19183 = vmatpush3.bf16.msra.mxu1 %v19852_v23  ;;  %v13521_v23 = vcombine.high %v13499_v3, %v13513_v59  ;;  %v13516_v10 = vcombine.low %v13471_v8, %v13485_v43  ;;  %v18755_v46 = vcombine.high %v11874_v51, %v27699_v26  ;;  %v27711_v51 = vld [vmem:[#allocation108_spill] sm:$0xff] }
 0x4e5   : > { %19184 = vmatprep.subr.bf16.mxu1 %v19853_v14  ;;  %v12097_v38 = vcombine.high %v24550_v62, %v27553_v53  ;;  %v13656_v56 = vrot.slane %v18749_v32, %v20242_v57  ;;  %v12038_v45 = vcombine.low %v27706_v40, %v12035_v24  ;;  %v18759_v14 = vcombine.high %v27707_v11, %v12036_v33 }
 0x4e6   : > { %v12179_v21 = vcombine.high %v24199_v6, %v24655_v36  ;;  %v13520_v22 = vcombine.low %v13499_v3, %v13513_v59  ;;  %v13684_v44 = vrot.slane %v18753_v41, %v20242_v57  ;;  %v18757_v43 = vcombine.low %v27707_v11, %v11953_v48  ;;  %v27708_v59 = vld [vmem:[#allocation102_spill] sm:$0xff]  ;;  %v27712_v41 = vld [vmem:[#allocation91_spill] sm:$0xff]  ;;  %v27715_v48 = vld [vmem:[#allocation116_spill] sm:$0xff] }
 0x4e7   : > { %v12125_v8 = vrot.slane %v12097_v38, %v20242_v57  ;;  %v13698_v62 = vrot.slane %v18755_v46, %v20242_v57  ;;  %v13702_v53 = vcombine.high %v13656_v56, %v13670_v63  ;;  %v13701_v26 = vcombine.low %v13656_v56, %v13670_v63  ;;  %v27714_v63 = vld [vmem:[#allocation126_spill] sm:$0xff] }
 0x4e8   : > { %19185 = vmatpush3.bf16.msra.mxu1 %v19854_v1  ;;  %v12207_v42 = vrot.slane %v12179_v21, %v20242_v57  ;;  %v18761_v32 = vcombine.high %v12038_v45, %v24310_v16  ;;  %v13855_v6 = vrot.slane %v18759_v14, %v20242_v57  ;;  %v12208_v36 = vcombine.low %v24681_v4, %v24689_v25  ;;  %v27710_v16 = vld [vmem:[#allocation143_spill] sm:$0xff] }
 0x4e9   : > { %19240 = vmatprep.subr.bf16.mxu1 %v19855_v54  ;;  %v18763_v0 = vcombine.low %v24668_v37, %v12125_v8  ;;  %v27709_v3 = vcombine.high %v27650_v61, %v27708_v59  ;;  %v25188_v15 = vrot.slane %v13517_v29, %v20242_v57  ;;  %v25191_v55 = vrot.slane %v13521_v23, %v20242_v57  ;;  %v27716_v23 = vld [vmem:[#allocation156_spill] sm:$0xff] }
 0x4ea   : > { %v25194_v1 = vrot.slane %v13516_v10, %v20242_v57  ;;  %v12210_v19 = vcombine.low %v27710_v16, %v12207_v42  ;;  %v27713_v54 = vcombine.high %v27711_v51, %v27712_v41  ;;  %v25201_v4 = vrot.slane %v13520_v22, %v20242_v57  ;;  %v27717_v10 = vld [vmem:[#allocation148_spill] sm:$0xff]  ;;  %v27719_v42 = vld [vmem:[#allocation149_spill] sm:$0xff]  ;;  %v27724_v16 = vld [vmem:[#allocation147_spill] sm:$0xff] }
 0x4eb   : > { %15058 = vmatmul.mubr.bf16.gmra.mxu1 %v27709_v3  ;;  %v13841_v61 = vrot.slane %v18757_v43, %v20242_v57  ;;  %v13883_v29 = vrot.slane %v18763_v0, %v20242_v57  ;;  %v12261_v24 = vcombine.high %v27715_v48, %v27714_v63  ;;  %v25208_v39 = vrot.slane %v13702_v53, %v20242_v57  ;;  %v27718_v22 = vld [vmem:[#allocation144_spill] sm:$0xff]  ;;  %v27720_v0 = vld [vmem:[#allocation127_spill] sm:$0xff]  ;;  %v27723_v3 = vld [vmem:[#allocation153_spill] sm:$0xff] }
 0x4ec   : > { %15065 = vmatprep.mubr.bf16.mxu1 %v27713_v54  ;;  %v25211_v33 = vrot.slane %v13701_v26, %v20242_v57  ;;  %v12372_v46 = vcombine.low %v27717_v10, %v27716_v23  ;;  %v18765_v38 = vcombine.high %v24668_v37, %v12208_v36  ;;  %v13706_v56 = vcombine.high %v13684_v44, %v13698_v62  ;;  %v27721_v37 = vld [vmem:[#allocation146_spill] sm:$0xff] }
 0x4ed   : > { %v13705_v40 = vcombine.low %v13684_v44, %v13698_v62  ;;  %v13869_v45 = vrot.slane %v18761_v32, %v20242_v57  ;;  %v13887_v11 = vcombine.high %v13841_v61, %v13855_v6  ;;  %v12289_v14 = vrot.slane %v12261_v24, %v20242_v57  ;;  %v27722_v36 = vld [vmem:[#allocation150_spill] sm:$0xff] }
 0x4ee   : > { %v18767_v21 = vcombine.high %v12210_v19, %v24689_v25  ;;  %v18771_v8 = vcombine.high %v27718_v22, %v12372_v46  ;;  %v25221_v43 = vrot.slane %v18765_v38, %v20242_v57  ;;  %v13886_v26 = vcombine.low %v13841_v61, %v13855_v6  ;;  %v27727_v38 = vld [vmem:[#allocation152_spill] sm:$0xff] }
 0x4ef   : > { %v13891_v53 = vcombine.high %v13869_v45, %v13883_v29  ;;  %v12343_v59 = vcombine.high %v27720_v0, %v27719_v42  ;;  %v12425_v44 = vcombine.high %v27722_v36, %v27721_v37  ;;  %v18769_v62 = vcombine.low %v27718_v22, %v12289_v14  ;;  %v27729_v14 = vld [vmem:[#allocation20_spill] sm:$0xff] }
 0x4f0   : > { %v25229_v32 = vrot.slane %v18767_v21, %v20242_v57  ;;  %v25232_v25 = vrot.slane %v18771_v8, %v20242_v57  ;;  %v12507_v19 = vcombine.high %v27724_v16, %v27723_v3  ;;  %v25237_v51 = vrot.slane %v13706_v56, %v20242_v57  ;;  %v19872_v3 = vld [vmem:[%s26966_s3 + $0xf8] sm:$0xff]   ;;  %v27757_v36 = vld [vmem:[#allocation160_spill] sm:$0xff] }
 0x4f1   : > { %v25240_v6 = vrot.slane %v13705_v40, %v20242_v57  ;;  %v12371_v41 = vrot.slane %v12343_v59, %v20242_v57  ;;  %v12453_v54 = vrot.slane %v12425_v44, %v20242_v57  ;;  %v27725_v61 = vcombine.high %v27662_v34, %v27661_v50  ;;  %v27728_v40 = vld [vmem:[#allocation161_spill] sm:$0xff]  ;;  %v27730_v50 = vld [vmem:[#allocation158_spill] sm:$0xff]  ;;  %19349 = vmatprep.subr.bf16.mxu0 %v19872_v3  ;;  %v27743_v3 = vld [vmem:[#allocation159_spill] sm:$0xff] }
 0x4f2   : > { %v13890_v63 = vcombine.low %v13869_v45, %v13883_v29  ;;  %v25248_v48 = vrot.slane %v18769_v62, %v20242_v57  ;;  %v14072_v24 = vcombine.high %v25221_v43, %v25229_v32  ;;  %v12535_v10 = vrot.slane %v12507_v19, %v20242_v57  ;;  %v27756_v16 = vld [vmem:[#allocation155_spill] sm:$0xff] }
 0x4f3   : > { %15066 = vmatmul.mubr.bf16.gmra.mxu1 %v27725_v61  ;;  %v27726_v46 = vcombine.high %v24351_v30, %v24356_v58  ;;  %v12374_v56 = vcombine.low %v27727_v38, %v12371_v41  ;;  %v12536_v21 = vcombine.low %v27729_v14, %v27728_v40  ;;  %v18775_v34 = vcombine.low %v27730_v50, %v12453_v54  ;;  %v27731_v58 = vld [vmem:[#allocation164_spill] sm:$0xff] }
 0x4f4   : > { %v25263_v45 = vrot.slane %v13887_v11, %v20242_v57  ;;  %v25266_v22 = vrot.slane %v13891_v53, %v20242_v57  ;;  %v25269_v8 = vrot.slane %v13886_v26, %v20242_v57  ;;  %v14076_v30 = vcombine.high %v25248_v48, %v25232_v25  ;;  %v27732_v38 = vld [vmem:[#allocation124_spill] sm:$0xff] }
 0x4f5   : > { %15073 = vmatprep.mubr.bf16.mxu1 %v27726_v46  ;;  %v12538_v42 = vcombine.low %v27731_v58, %v12535_v10  ;;  %v18773_v0 = vcombine.high %v12374_v56, %v27716_v23  ;;  %v18777_v59 = vcombine.high %v27730_v50, %v12536_v21  ;;  %v14225_v37 = vrot.slane %v18775_v34, %v20242_v57  ;;  %v27733_v56 = vld [vmem:[#allocation125_spill] sm:$0xff]  ;;  %v27735_v21 = vld [vmem:[#allocation166_spill] sm:$0xff]  ;;  %v27737_v34 = vld [vmem:[#allocation167_spill] sm:$0xff] }
 0x4f6   : > { %v25278_v11 = vrot.slane %v13890_v63, %v20242_v57  ;;  %v25281_v53 = vrot.slane %v14072_v24, %v20242_v57  ;;  %v25296_v19 = vrot.slane %v14076_v30, %v20242_v57  ;;  %v27736_v50 = vcombine.high %v27735_v21, %v27735_v21  ;;  %v27738_v58 = vld [vmem:[#allocation21_spill] sm:$0xff]  ;;  %v27754_v46 = vld [vmem:[#allocation40_spill] sm:$0xff] }
 0x4f7   : > { %v18779_v44 = vcombine.high %v12538_v42, %v27728_v40  ;;  %v14211_v23 = vrot.slane %v18773_v0, %v20242_v57  ;;  %v14239_v62 = vrot.slane %v18777_v59, %v20242_v57  ;;  %v27734_v40 = vcombine.high %v27732_v38, %v27733_v56  ;;  %v27739_v42 = vld [vmem:[#allocation163_spill] sm:$0xff] }
 0x4f8   : > { %v12848_v30 = vcombine.low %v27737_v34, %v27736_v50  ;;  %v27740_v0 = vcombine.low %v27738_v58, %v27739_v42  ;;  %v19873_v50 = vld [vmem:[%s26966_s3 + $0xb8] sm:$0xff]   ;;  %v27745_v58 = vld [vmem:[#allocation165_spill] sm:$0xff]  ;;  %v27746_v42 = vld [vmem:[#allocation22_spill] sm:$0xff]  ;;  %v27755_v61 = vpack.c.b16 %v27754_v46, %v27754_v46 }
 0x4f9   : > { %v14253_v63 = vrot.slane %v18779_v44, %v20242_v57  ;;  %v14257_v24 = vcombine.high %v14211_v23, %v14225_v37  ;;  %v14256_v10 = vcombine.low %v14211_v23, %v14225_v37  ;;  %v27741_v37 = vld [vmem:[#allocation173_spill] sm:$0xff]  ;;  %v27742_v23 = vld [vmem:[#allocation154_spill] sm:$0xff]  ;;  %19350 = vmatpush3.bf16.msra.mxu0 %v19873_v50 }
 0x4fa   : > { %v12856_v59 = vrot.slane %v27740_v0, %v20242_v57  ;;  %v12863_v44 = vrot.slane %v27741_v37, %v20242_v57  ;;  %v27744_v38 = vcombine.high %v27742_v23, %v27743_v3  ;;  %v12870_v34 = vrot.slane %v12848_v30, %v20242_v57 }
 0x4fb   : > { %15074 = vmatmul.mubr.bf16.gmra.mxu1 %v27734_v40  ;;  %v14261_v56 = vcombine.high %v14239_v62, %v14253_v63  ;;  %v25326_v40 = vrot.slane %v14257_v24, %v20242_v57  ;;  %v14260_v14 = vcombine.low %v14239_v62, %v14253_v63  ;;  %v25329_v21 = vrot.slane %v14256_v10, %v20242_v57  ;;  %v27748_v10 = vld [vmem:[#allocation19_spill] sm:$0xff] }
 0x4fc   : > { %15081 = vmatprep.mubr.bf16.mxu1 %v27744_v38  ;;  %v27747_v0 = vcombine.low %v27745_v58, %v27746_v42  ;;  %v12878_v23 = vcombine.low %v12856_v59, %v12863_v44  ;;  %v10815_v24 = vcombine.high %v27745_v58, %v27745_v58  ;;  %v27749_v3 = vpack.c.b16 %v27748_v10, %v27748_v10  ;;  %v27750_v38 = vld [vmem:[#allocation9_spill] sm:$0xff] }
 0x4fd   : > { %v25342_v62 = vrot.slane %v14261_v56, %v20242_v57  ;;  %v25345_v63 = vrot.slane %v14260_v14, %v20242_v57  ;;  %v27751_v42 = vpack.c.b16 %v27750_v38, %v27750_v38  ;;  %v27752_v56 = vld [vmem:[#allocation11_spill] sm:$0xff]  ;;  %v11135_v10 = vrot.slane %v27755_v61, %v20242_v57 }
 0x4fe   : > { %v12877_v37 = vrot.slane %v27747_v0, %v20242_v57  ;;  %v10881_v30 = vrot.slane %v27749_v3, %v20242_v57  ;;  %v12886_v44 = vrot.slane %v12878_v23, %v20242_v57  ;;  %v27753_v58 = vpack.c.b16 %v27752_v56, %v27752_v56 }
 0x4ff   : > { %v10963_v0 = vrot.slane %v27751_v42, %v20242_v57  ;;  %v27760_v42 = vld [vmem:[#allocation168_spill] sm:$0xff]  ;;  %v11136_v41 = vcombine.high %v11135_v10, %v11135_v10 }
 0x500   : > { %v12879_v59 = vcombine.low %v12870_v34, %v12877_v37  ;;  %v11045_v14 = vrot.slane %v27753_v58, %v20242_v57  ;;  %v10882_v50 = vcombine.high %v10881_v30, %v10881_v30  ;;  %v10889_v34 = vrot.slane %v10881_v30, %v20242_v57 }
 0x501   : > { %v10964_v58 = vcombine.high %v10963_v0, %v10963_v0  ;;  %v10971_v54 = vrot.slane %v10963_v0, %v20242_v57  ;;  %v27758_v30 = vcombine.high %v27756_v16, %v27757_v36  ;;  %v11143_v37 = vrot.slane %v11135_v10, %v20242_v57 }
 0x502   : > { %v12893_v61 = vrot.slane %v12879_v59, %v20242_v57  ;;  %v10896_v46 = vrot.slane %v10882_v50, %v20242_v57  ;;  %v10897_v56 = vcombine.high %v10889_v34, %v10889_v34  ;;  %v11053_v59 = vrot.slane %v11045_v14, %v20242_v57  ;;  %v27761_v50 = vld [vmem:[#allocation169_spill] sm:$0xff] }
 0x503   : > { %15082 = vmatmul.mubr.bf16.gmra.mxu1 %v27758_v30  ;;  %v27762_v29 = vcombine.high %v27760_v42, %v27761_v50  ;;  %v10978_v0 = vrot.slane %v10964_v58, %v20242_v57  ;;  %v10979_v38 = vcombine.high %v10971_v54, %v10971_v54  ;;  %v13031_v3 = vcombine.low %v10815_v24, %v10889_v34  ;;  %v27763_v58 = vld [vmem:[#allocation48_spill] sm:$0xff] }
 0x504   : > { %v25385_v26 = vcombine.low %v12886_v44, %v12893_v61  ;;  %v13032_v36 = vcombine.low %v10896_v46, %v10897_v56  ;;  %v11046_v16 = vcombine.high %v11045_v14, %v11045_v14  ;;  %v11061_v30 = vcombine.high %v11053_v59, %v11053_v59 }
 0x505   : > { %15089 = vmatprep.mubr.bf16.mxu1 %v27762_v29  ;;  %v13033_v17 = vcombine.low %v10971_v54, %v10978_v0  ;;  %v13034_v23 = vcombine.low %v10979_v38, %v11053_v59  ;;  %v13041_v44 = vrot.slane %v13031_v3, %v20242_v57  ;;  %v11150_v29 = vrot.slane %v11136_v41, %v20242_v57  ;;  %v27765_v38 = vld [vmem:[#allocation56_spill] sm:$0xff] }
 0x506   : > { %27759 = vst [vmem:[#allocation26_spill] sm:$0xff] %v25385_v26  ;;  %v13048_v61 = vrot.slane %v13032_v36, %v20242_v57  ;;  %v11060_v26 = vrot.slane %v11046_v16, %v20242_v57  ;;  %v11151_v42 = vcombine.high %v11143_v37, %v11143_v37  ;;  %v27764_v24 = vpack.c.b16 %v27763_v58, %v27763_v58 }
 0x507   : > { %v13055_v34 = vrot.slane %v13033_v17, %v20242_v57  ;;  %v13062_v10 = vrot.slane %v13034_v23, %v20242_v57  ;;  %v27766_v3 = vpack.c.b16 %v27765_v38, %v27765_v38  ;;  %v13217_v50 = vcombine.low %v11143_v37, %v11150_v29  ;;  %v27767_v17 = vld [vmem:[#allocation170_spill] sm:$0xff] }
 0x508   : > { %v11217_v14 = vrot.slane %v27764_v24, %v20242_v57  ;;  %v13063_v54 = vcombine.low %v13041_v44, %v13048_v61  ;;  %v13216_v41 = vcombine.low %v11060_v26, %v11061_v30  ;;  %v27768_v24 = vld [vmem:[#allocation171_spill] sm:$0xff]  ;;  %v27770_v26 = vcombine.low %v24986_v7, %v24991_v28 }
 0x509   : > { %v11299_v46 = vrot.slane %v27766_v3, %v20242_v57  ;;  %v13064_v0 = vcombine.low %v13055_v34, %v13062_v10  ;;  %v27769_v23 = vcombine.high %v27767_v17, %v27768_v24  ;;  %v14071_v34 = vcombine.low %v25221_v43, %v25229_v32  ;;  %v27773_v17 = vld [vmem:[#allocation55_spill] sm:$0xff] }
 0x50a   : > { %v11218_v56 = vcombine.high %v11217_v14, %v11217_v14  ;;  %v11225_v59 = vrot.slane %v11217_v14, %v20242_v57  ;;  %v13071_v36 = vrot.slane %v13063_v54, %v20242_v57  ;;  %v13226_v3 = vrot.slane %v13216_v41, %v20242_v57 }
 0x50b   : > { %v11300_v16 = vcombine.high %v11299_v46, %v11299_v46  ;;  %v11307_v58 = vrot.slane %v11299_v46, %v20242_v57  ;;  %15090 = vmatmul.mubr.bf16.gmra.mxu1 %v27769_v23  ;;  %v13078_v29 = vrot.slane %v13064_v0, %v20242_v57  ;;  %v13233_v14 = vrot.slane %v13217_v50, %v20242_v57  ;;  %v19856_v23 = vld [vmem:[%s26965_s2 + $0x1b8] sm:$0xff]  }
 0x50c   : > { %v11232_v44 = vrot.slane %v11218_v56, %v20242_v57  ;;  %v11233_v61 = vcombine.high %v11225_v59, %v11225_v59  ;;  %v13218_v38 = vcombine.low %v11151_v42, %v11225_v59  ;;  %15130 = vmatprep.mubr.bf16.mxu1 %v27770_v26  ;;  %v27771_v56 = vld [vmem:[#allocation68_spill] sm:$0xff]  ;;  %v27774_v0 = vpack.c.b16 %v27773_v17, %v27773_v17 }
 0x50d   : > { %v11314_v10 = vrot.slane %v11300_v16, %v20242_v57  ;;  %v25427_v54 = vcombine.low %v13071_v36, %v13078_v29  ;;  %v13248_v46 = vcombine.low %v13226_v3, %v13233_v14  ;;  %v27772_v59 = vpack.c.b16 %v27771_v56, %v27771_v56 }
 0x50e   : > { %v13219_v42 = vcombine.low %v11232_v44, %v11233_v61  ;;  %v11463_v24 = vrot.slane %v27774_v0, %v20242_v57  ;;  %v12840_v50 = vcombine.low %v24994_v2, %v25002_v52  ;;  %v27775_v43 = vcombine.low %v25248_v48, %v25232_v25  ;;  %v19879_v44 = vld [vmem:[%s26966_s3 + $0xf0] sm:$0xff]   ;;  %v27776_v0 = vld [vmem:[#allocation69_spill] sm:$0xff] }
 0x50f   : > { %v11381_v41 = vrot.slane %v27772_v59, %v20242_v57  ;;  %v13240_v36 = vrot.slane %v13218_v38, %v20242_v57  ;;  %v11315_v61 = vcombine.high %v11307_v58, %v11307_v58  ;;  %v13029_v25 = vcombine.low %v25058_v49, %v25064_v27  ;;  %v19857_v48 = vld [vmem:[%s26965_s2 + $0x1f0] sm:$0xff]   ;;  %19351 = vmatprep.subr.bf16.mxu0 %v19879_v44 }
 0x510   : > { %v25443_v32 = vrot.slane %v27775_v43, %v20242_v57  ;;  %v13247_v16 = vrot.slane %v13219_v42, %v20242_v57  ;;  %v11464_v29 = vcombine.high %v11463_v24, %v11463_v24  ;;  %v25460_v38 = vrot.slane %v14071_v34, %v20242_v57 }
 0x511   : > { %v11382_v3 = vcombine.high %v11381_v41, %v11381_v41  ;;  %v11389_v26 = vrot.slane %v11381_v41, %v20242_v57  ;;  %v13401_v42 = vcombine.low %v11307_v58, %v11314_v10  ;;  %v10559_v43 = vpack.c.b16 %v27776_v0, %v27776_v0  ;;  %v19858_v58 = vld [vmem:[%s26965_s2 + $0x1b0] sm:$0xff]  }
 0x512   : > { %v13249_v14 = vcombine.low %v13240_v36, %v13247_v16  ;;  %v11478_v17 = vrot.slane %v11464_v29, %v20242_v57  ;;  %v13256_v30 = vrot.slane %v13248_v46, %v20242_v57  ;;  %v11471_v34 = vrot.slane %v11463_v24, %v20242_v57  ;;  %v19881_v10 = vld [vmem:[%s26966_s3 + $0xb0] sm:$0xff]   ;;  %v19859_v24 = vld [vmem:[%s26965_s2 + $0x1e8] sm:$0xff]   ;;  %v27792_v36 = vld [vmem:[#allocation104_spill] sm:$0xff] }
 0x513   : > { %v11396_v56 = vrot.slane %v11382_v3, %v20242_v57  ;;  %v11397_v59 = vcombine.high %v11389_v26, %v11389_v26  ;;  %v13402_v41 = vcombine.low %v11315_v61, %v11389_v26  ;;  %15131 = vmatmul.mubr.bf16.vlgmr.msra.gmra.mxu1 %v12840_v50  ;;  %v13411_v44 = vrot.slane %v13401_v42, %v20242_v57 }
 0x514   : > { %v13263_v37 = vrot.slane %v13249_v14, %v20242_v57  ;;  %19241 = vmatpush3.bf16.msra.mxu1 %v19856_v23  ;;  %15138 = vmatprep.mubr.bf16.mxu1 %v13029_v25  ;;  %v13404_v23 = vcombine.low %v11471_v34, %v11478_v17  ;;  %v19860_v25 = vld [vmem:[%s26965_s2 + $0x1a8] sm:$0xff]   ;;  %v19861_v14 = vld [vmem:[%s26965_s2 + $0x1e0] sm:$0xff]   ;;  %v14135_v46 = vcombine.low %v25460_v38, %v25443_v32 }
 0x515   : > { %v13403_v50 = vcombine.low %v11396_v56, %v11397_v59  ;;  %19242 = vmatprep.subr.bf16.mxu1 %v19857_v48  ;;  %v13418_v61 = vrot.slane %v13402_v41, %v20242_v57  ;;  %19352 = vmatpush3.bf16.msra.mxu0 %v19881_v10  ;;  %v11545_v48 = vrot.slane %v10559_v43, %v20242_v57  ;;  %v19862_v41 = vld [vmem:[%s26965_s2 + $0x1a0] sm:$0xff]  }
 0x516   : > { %v25482_v16 = vcombine.low %v13256_v30, %v13263_v37  ;;  %v13432_v26 = vrot.slane %v13404_v23, %v20242_v57  ;;  %v25492_v37 = vpop.f32.mrf.mxu1  ;;  %v13025_v30 = vcombine.low %v25067_v9, %v25072_v18  ;;  %v13214_v56 = vcombine.low %v25091_v35, %v25106_v20 }
 0x517   : > { %v13425_v3 = vrot.slane %v13403_v50, %v20242_v57  ;;  %v13433_v29 = vcombine.low %v13411_v44, %v13418_v61  ;;  %27778 = vst [vmem:[#allocation30_spill] sm:$0xff] %v25492_v37  ;;  %v11479_v50 = vcombine.high %v11471_v34, %v11471_v34  ;;  %v11553_v23 = vrot.slane %v11545_v48, %v20242_v57  ;;  %v19865_v34 = vld [vmem:[%s26965_s2 + $0x1d0] sm:$0xff]  }
 0x518   : > { %27777 = vst [vmem:[#allocation25_spill] sm:$0xff] %v25482_v16  ;;  %19243 = vmatpush3.bf16.msra.mxu1 %v19858_v58  ;;  %v25508_v43 = vpop.f32.mrf.mxu1  ;;  %v19863_v58 = vld [vmem:[%s26965_s2 + $0x1d8] sm:$0xff]   ;;  %v27794_v16 = vld [vmem:[#allocation118_spill] sm:$0xff] }
 0x519   : > { %19244 = vmatprep.subr.bf16.mxu1 %v19859_v24  ;;  %v13434_v42 = vcombine.low %v13425_v3, %v13432_v26  ;;  %v13441_v59 = vrot.slane %v13433_v29, %v20242_v57  ;;  %27779 = vst [vmem:[#allocation28_spill] sm:$0xff] %v25508_v43  ;;  %v11546_v24 = vcombine.high %v11545_v48, %v11545_v48  ;;  %v19864_v29 = vld [vmem:[%s26965_s2 + $0x198] sm:$0xff]  }
 0x51a   : > { %v11561_v3 = vcombine.high %v11553_v23, %v11553_v23  ;;  %v13586_v26 = vcombine.low %v11479_v50, %v11553_v23  ;;  %v19868_v50 = vld [vmem:[%s26965_s2 + $0x188] sm:$0xff]   ;;  %v19869_v23 = vld [vmem:[%s26965_s2 + $0x1c0] sm:$0xff]  }
 0x51b   : > { %15139 = vmatmul.mubr.bf16.gmra.mxu1 %v13025_v30  ;;  %v13448_v17 = vrot.slane %v13434_v42, %v20242_v57  ;;  %v11560_v61 = vrot.slane %v11546_v24, %v20242_v57  ;;  %v13395_v24 = vcombine.low %v25133_v47, %v25136_v13 }
 0x51c   : > { %15146 = vmatprep.mubr.bf16.mxu1 %v13214_v56  ;;  %19245 = vmatpush3.bf16.msra.mxu1 %v19860_v25  ;;  %v19082_v44 = vpop.f32.mrf.mxu1  ;;  %v13210_v25 = vcombine.low %v25094_v12, %v25124_v60  ;;  %v13596_v56 = vrot.slane %v13586_v26, %v20242_v57  ;;  %v27782_v26 = vmov 0.0  }
 0x51d   : > { %19246 = vmatprep.subr.bf16.mxu1 %v19861_v14  ;;  %v25513_v10 = vcombine.low %v13441_v59, %v13448_v17  ;;  %v13587_v48 = vcombine.low %v11560_v61, %v11561_v3  ;;  %v13399_v14 = vcombine.low %v25127_v5, %v25130_v31  ;;  %v19866_v17 = vld [vmem:[%s26965_s2 + $0x190] sm:$0xff]   ;;  %v19870_v61 = vld [vmem:[%s26965_s2 + $0x180] sm:$0xff]   ;;  %v13580_v3 = vcombine.low %v25194_v1, %v25201_v4 }
 0x51e   : > { %v19083_v30 = vpop.f32.mrf.mxu1 }
 0x51f   : > { %27780 = vst [vmem:[#allocation23_spill] sm:$0xff] %v25513_v10  ;;  %v25527_v42 = vadd.f32 %v19083_v30, %v19082_v44  ;;  %v13603_v59 = vrot.slane %v13587_v48, %v20242_v57  ;;  %v13584_v44 = vcombine.low %v25188_v15, %v25191_v55  ;;  %v27785_v48 = vld [vmem:[#allocation117_spill] sm:$0xff] }
 0x520   : > { %19247 = vmatpush3.bf16.msra.mxu1 %v19862_v41  ;;  %v19867_v41 = vld [vmem:[%s26965_s2 + $0x1c8] sm:$0xff]  }
 0x521   : > { %19248 = vmatprep.subr.bf16.mxu1 %v19863_v58  ;;  %27781 = vst [vmem:[#allocation13_spill] sm:$0xff] %v25527_v42  ;;  %v25537_v58 = vcombine.low %v13596_v56, %v13603_v59  ;;  %v27786_v56 = vld [vmem:[#allocation119_spill] sm:$0xff] }
 0x523   : > { %15147 = vmatmul.mubr.bf16.gmra.mxu1 %v13210_v25  ;;  %v27783_v25 = vld [vmem:[#allocation80_spill] sm:$0xff] }
 0x524   : > { %15154 = vmatprep.mubr.bf16.mxu1 %v13399_v14  ;;  %19249 = vmatpush3.bf16.msra.mxu1 %v19864_v29  ;;  %v13769_v29 = vcombine.low %v25208_v39, %v25237_v51  ;;  %v6799_v30 = vpack.c.b16 %v27783_v25, %v27783_v25  ;;  %v13950_v25 = vcombine.low %v25269_v8, %v25278_v11 }
 0x525   : > { %19250 = vmatprep.subr.bf16.mxu1 %v19865_v34  ;;  %v27784_v34 = vld [vmem:[#allocation6_spill] sm:$0xff] }
 0x526   : > { %v1106_v14 = vadd.f32 %v27785_v48, %v27784_v34  ;;  %v1109_v59 = vadd.f32 %v27786_v56, %v27784_v34  ;;  %v14139_v34 = vcombine.low %v25281_v53, %v25296_v19 }
 0x528   : > { %19251 = vmatpush3.bf16.msra.mxu1 %v19866_v17  ;;  %v13765_v17 = vcombine.low %v25211_v33, %v25240_v6 }
 0x529   : > { %19252 = vmatprep.subr.bf16.mxu1 %v19867_v41  ;;  %v13954_v41 = vcombine.low %v25263_v45, %v25266_v22 }
 0x52b   : > { %15155 = vmatmul.mubr.bf16.gmra.mxu1 %v13395_v24  ;;  %v1208_v24 = vmax.f32 %v1106_v14, 0.0  ;;  %v19883_v14 = vld [vmem:[%s26966_s3 + $0xe8] sm:$0xff]  }
 0x52c   : > { %15162 = vmatprep.mubr.bf16.mxu1 %v13584_v44  ;;  %19253 = vmatpush3.bf16.msra.mxu1 %v19868_v50  ;;  %v11635_v50 = vrot.slane %v6799_v30, %v20242_v57 }
 0x52d   : > { %19254 = vmatprep.subr.bf16.mxu1 %v19869_v23  ;;  %v1209_v23 = vmax.f32 %v1109_v59, 0.0  ;;  %v19884_v59 = vld [vmem:[%s26966_s3 + $0xa8] sm:$0xff]   ;;  %19353 = vmatprep.subr.bf16.mxu0 %v19883_v14 }
 0x52e   : > { %v11636_v44 = vcombine.high %v11635_v50, %v11635_v50  ;;  %v11643_v48 = vrot.slane %v11635_v50, %v20242_v57  ;;  %19354 = vmatpush3.bf16.msra.mxu0 %v19884_v59  ;;  %v27790_v59 = vcombine.low %v25326_v40, %v25342_v62 }
 0x530   : > { %19255 = vmatpush3.bf16.msra.mxu1 %v19870_v61  ;;  %v1258_v61 = vpack.c.bf16 %v1209_v23, %v1208_v24  ;;  %v11650_v56 = vrot.slane %v11636_v44, %v20242_v57 }
 0x531   : > { %19636 = vmatprep.subr.bf16.mxu1 %v27782_v26 }
 0x532   : > { %v3581_v30 = vrot.slane %v1258_v61, %v20242_v57  ;;  %v13588_v24 = vcombine.low %v11643_v48, %v11650_v56  ;;  %v27788_v61 = vld [vmem:[#allocation87_spill] sm:$0xff] }
 0x533   : > { %15163 = vmatmul.mubr.bf16.gmra.mxu1 %v13580_v3  ;;  %v27787_v3 = vld [vmem:[#allocation81_spill] sm:$0xff] }
 0x534   : > { %15170 = vmatprep.mubr.bf16.mxu1 %v13769_v29  ;;  %v6800_v29 = vpack.c.b16 %v27787_v3, %v27787_v3  ;;  %v3588_v23 = vrot.slane %v3581_v30, %v20242_v57  ;;  %v6801_v3 = vpack.c.b16 %v27788_v61, %v27788_v61 }
 0x53b   : > { %15171 = vmatmul.mubr.bf16.gmra.mxu1 %v13765_v17  ;;  %v11717_v17 = vrot.slane %v6800_v29, %v20242_v57  ;;  %v13610_v29 = vrot.slane %v13588_v24, %v20242_v57 }
 0x53c   : > { %15178 = vmatprep.mubr.bf16.mxu1 %v13954_v41  ;;  %v11651_v41 = vcombine.high %v11643_v48, %v11643_v48  ;;  %v10522_v48 = vrot.slane %v3588_v23, %v20242_v57 }
 0x53d   : > { %v11725_v50 = vrot.slane %v11717_v17, %v20242_v57  ;;  %v11718_v44 = vcombine.high %v11717_v17, %v11717_v17 }
 0x53f   : > { %v13589_v0 = vcombine.low %v11651_v41, %v11725_v50  ;;  %v11732_v56 = vrot.slane %v11718_v44, %v20242_v57  ;;  %v11733_v30 = vcombine.high %v11725_v50, %v11725_v50  ;;  %v11799_v41 = vrot.slane %v6801_v3, %v20242_v57 }
 0x541   : > { %v13617_v14 = vrot.slane %v13589_v0, %v20242_v57  ;;  %v13626_v0 = vrot.slane %v25537_v58, %v20242_v57  ;;  %v11800_v23 = vcombine.high %v11799_v41, %v11799_v41  ;;  %v11807_v50 = vrot.slane %v11799_v41, %v20242_v57 }
 0x543   : > { %15179 = vmatmul.mubr.bf16.gmra.mxu1 %v13950_v25  ;;  %v27789_v25 = vld [vmem:[#allocation90_spill] sm:$0xff]  ;;  %v13619_v17 = vcombine.low %v13610_v29, %v13617_v14  ;;  %v10529_v29 = vrot.slane %v10522_v48, %v20242_v57  ;;  %v11815_v42 = vcombine.high %v11807_v50, %v11807_v50 }
 0x544   : > { %15186 = vmatprep.mubr.bf16.mxu1 %v14139_v34  ;;  %v6802_v34 = vpack.c.b16 %v27789_v25, %v27789_v25  ;;  %v27791_v25 = vld [vmem:[#allocation103_spill] sm:$0xff] }
 0x545   : > { %v6803_v24 = vpack.c.b16 %v27791_v25, %v27791_v25  ;;  %v11814_v25 = vrot.slane %v11800_v23, %v20242_v57  ;;  %v10533_v48 = vunpack.c.l.b16 %v10529_v29 }
 0x546   : > { %v11881_v61 = vrot.slane %v6802_v34, %v20242_v57  ;;  %v13771_v34 = vcombine.low %v11732_v56, %v11733_v30  ;;  %v27795_v56 = vcombine.low %v25329_v21, %v25345_v63 }
 0x547   : > { %v13772_v43 = vcombine.low %v11807_v50, %v11814_v25  ;;  %v11963_v23 = vrot.slane %v6803_v24, %v20242_v57  ;;  %v27797_v50 = vld [vmem:[#allocation120_spill] sm:$0xff] }
 0x548   : > { %v11882_v44 = vcombine.high %v11881_v61, %v11881_v61  ;;  %v11889_v3 = vrot.slane %v11881_v61, %v20242_v57  ;;  %v27796_v61 = vcombine.high %v24986_v7, %v24991_v28 }
 0x549   : > { %v11964_v7 = vcombine.high %v11963_v23, %v11963_v23  ;;  %v11971_v28 = vrot.slane %v11963_v23, %v20242_v57 }
 0x54a   : > { %v11896_v58 = vrot.slane %v11882_v44, %v20242_v57  ;;  %v11897_v41 = vcombine.high %v11889_v3, %v11889_v3  ;;  %v13773_v37 = vcombine.low %v11815_v42, %v11889_v3 }
 0x54b   : > { %15187 = vmatmul.mubr.bf16.gmra.mxu1 %v14135_v46  ;;  %v13633_v46 = vrot.slane %v13619_v17, %v20242_v57  ;;  %v27793_v17 = vld [vmem:[#allocation113_spill] sm:$0xff] }
 0x54c   : > { %15194 = vmatprep.mubr.bf16.mxu1 %v27790_v59  ;;  %v10560_v59 = vpack.c.b16 %v27792_v36, %v27792_v36  ;;  %v6805_v10 = vpack.c.b16 %v27793_v17, %v27793_v17  ;;  %v6806_v36 = vpack.c.b16 %v27794_v16, %v27794_v16  ;;  %v13774_v30 = vcombine.low %v11896_v58, %v11897_v41 }
 0x54d   : > { %v25611_v14 = vcombine.low %v13626_v0, %v13633_v46  ;;  %v13781_v0 = vrot.slane %v13771_v34, %v20242_v57  ;;  %v13788_v46 = vrot.slane %v13772_v43, %v20242_v57  ;;  %v6807_v16 = vpack.c.b16 %v27797_v50, %v27797_v50 }
 0x54e   : > { %v12045_v42 = vrot.slane %v10560_v59, %v20242_v57  ;;  %v13795_v44 = vrot.slane %v13773_v37, %v20242_v57  ;;  %v13802_v29 = vrot.slane %v13774_v30, %v20242_v57  ;;  %v12135_v3 = vrot.slane %v6805_v10, %v20242_v57  ;;  %v19871_v59 = vld [vmem:[%s26965_s2 + $0x238] sm:$0xff]  }
 0x54f   : > { %v13803_v25 = vcombine.low %v13781_v0, %v13788_v46  ;;  %v10556_v58 = vrot.slane %v10533_v48, 3  ;;  %v11978_v37 = vrot.slane %v11964_v7, %v20242_v57  ;;  %v11979_v41 = vcombine.high %v11971_v28, %v11971_v28  ;;  %v27798_v46 = vld [vmem:[#allocation130_spill] sm:$0xff] }
 0x550   : > { %v12046_v34 = vcombine.high %v12045_v42, %v12045_v42  ;;  %v13804_v43 = vcombine.low %v13795_v44, %v13802_v29  ;;  %v12053_v24 = vrot.slane %v12045_v42, %v20242_v57  ;;  %v12136_v17 = vcombine.high %v12135_v3, %v12135_v3  ;;  %v27799_v44 = vld [vmem:[#allocation141_spill] sm:$0xff] }
 0x551   : > { %v12143_v10 = vrot.slane %v12135_v3, %v20242_v57  ;;  %v13811_v30 = vrot.slane %v13803_v25, %v20242_v57  ;;  %v6808_v23 = vpack.c.b16 %v27798_v46, %v27798_v46  ;;  %v13956_v42 = vcombine.low %v11971_v28, %v11978_v37  ;;  %v19874_v28 = vld [vmem:[%s26965_s2 + $0x230] sm:$0xff]   ;;  %v19875_v46 = vld [vmem:[%s26965_s2 + $0x228] sm:$0xff]  }
 0x552   : > { %v12061_v48 = vcombine.high %v12053_v24, %v12053_v24  ;;  %v12150_v0 = vrot.slane %v12136_v17, %v20242_v57  ;;  %v13957_v50 = vcombine.low %v11979_v41, %v12053_v24  ;;  %v10557_v29 = vsel %vm5762_vm5, %v10556_v58, %v27799_v44 }
 0x553   : > { %15195 = vmatmul.mubr.bf16.gmra.mxu1 %v27795_v56  ;;  %v12060_v56 = vrot.slane %v12046_v34, %v20242_v57  ;;  %v27800_v7 = vcombine.high %v24994_v2, %v25002_v52  ;;  %v13966_v24 = vrot.slane %v13956_v42, %v20242_v57  ;;  %v12217_v17 = vrot.slane %v6806_v36, %v20242_v57 }
 0x554   : > { %15235 = vmatprep.mubr.bf16.mxu1 %v27796_v61  ;;  %v13818_v61 = vrot.slane %v13804_v43, %v20242_v57  ;;  %v13959_v34 = vcombine.low %v12143_v10, %v12150_v0  ;;  %v27801_v43 = vcombine.high %v25058_v49, %v25064_v27  ;;  %v13973_v58 = vrot.slane %v13957_v50, %v20242_v57  ;;  %v27802_v49 = vld [vmem:[#allocation139_spill] sm:$0xff] }
 0x555   : > { %v13958_v25 = vcombine.low %v12060_v56, %v12061_v48  ;;  %v6809_v27 = vpack.c.b16 %v27802_v49, %v27802_v49  ;;  %v10561_v37 = vpack.c.b16 %v10557_v29, %v10557_v29  ;;  %v12381_v56 = vrot.slane %v6808_v23, %v20242_v57 }
 0x556   : > { %v25652_v3 = vcombine.low %v13811_v30, %v13818_v61  ;;  %v13987_v52 = vrot.slane %v13959_v34, %v20242_v57  ;;  %v13988_v41 = vcombine.low %v13966_v24, %v13973_v58  ;;  %v12218_v61 = vcombine.high %v12217_v17, %v12217_v17 }
 0x557   : > { %v13980_v2 = vrot.slane %v13958_v25, %v20242_v57  ;;  %v12225_v48 = vrot.slane %v12217_v17, %v20242_v57  ;;  %v12389_v50 = vrot.slane %v12381_v56, %v20242_v57  ;;  %v12545_v25 = vrot.slane %v10561_v37, %v20242_v57 }
 0x558   : > { %v13996_v36 = vrot.slane %v13988_v41, %v20242_v57  ;;  %v12232_v44 = vrot.slane %v12218_v61, %v20242_v57  ;;  %v12382_v49 = vcombine.high %v12381_v56, %v12381_v56  ;;  %v12463_v41 = vrot.slane %v6809_v27, %v20242_v57 }
 0x559   : > { %v13989_v30 = vcombine.low %v13980_v2, %v13987_v52  ;;  %v12233_v29 = vcombine.high %v12225_v48, %v12225_v48  ;;  %v27804_v2 = vcombine.high %v25091_v35, %v25106_v20  ;;  %v19876_v52 = vld [vmem:[%s26965_s2 + $0x220] sm:$0xff]   ;;  %v12397_v37 = vcombine.high %v12389_v50, %v12389_v50 }
 0x55a   : > { %v12396_v20 = vrot.slane %v12382_v49, %v20242_v57  ;;  %v12553_v61 = vrot.slane %v12545_v25, %v20242_v57  ;;  %v12471_v56 = vrot.slane %v12463_v41, %v20242_v57 }
 0x55b   : > { %15236 = vmatmul.mubr.bf16.vlgmr.msra.gmra.mxu1 %v27800_v7  ;;  %v14003_v23 = vrot.slane %v13989_v30, %v20242_v57  ;;  %v14142_v24 = vcombine.low %v12232_v44, %v12233_v29  ;;  %v12546_v30 = vcombine.high %v12545_v25, %v12545_v25  ;;  %v27805_v25 = vcombine.high %v25094_v12, %v25124_v60 }
 0x55c   : > { %19637 = vmatpush3.bf16.msra.mxu1 %v19871_v59  ;;  %15243 = vmatprep.mubr.bf16.mxu1 %v27801_v43  ;;  %v12299_v59 = vrot.slane %v6807_v16, %v20242_v57  ;;  %v12151_v16 = vcombine.high %v12143_v10, %v12143_v10  ;;  %v27803_v10 = vcombine.high %v25067_v9, %v25072_v18 }
 0x55d   : > { %19638 = vmatprep.subr.bf16.mxu1 %v27782_v26  ;;  %v14158_v9 = vrot.slane %v14142_v24, %v20242_v57  ;;  %v12561_v27 = vcombine.high %v12553_v61, %v12553_v61  ;;  %v19878_v24 = vld [vmem:[%s26965_s2 + $0x210] sm:$0xff]  }
 0x55e   : > { %v12300_v0 = vcombine.high %v12299_v59, %v12299_v59  ;;  %v12307_v42 = vrot.slane %v12299_v59, %v20242_v57  ;;  %v14141_v43 = vcombine.low %v12151_v16, %v12225_v48  ;;  %v12560_v16 = vrot.slane %v12546_v30, %v20242_v57 }
 0x560   : > { %19639 = vmatpush3.bf16.msra.mxu1 %v19874_v28  ;;  %v12314_v7 = vrot.slane %v12300_v0, %v20242_v57  ;;  %v12315_v34 = vcombine.high %v12307_v42, %v12307_v42  ;;  %v25685_v28 = vcombine.low %v13996_v36, %v14003_v23  ;;  %v14151_v59 = vrot.slane %v14141_v43, %v20242_v57 }
 0x561   : > { %19640 = vmatprep.subr.bf16.mxu1 %v27782_v26  ;;  %v12464_v0 = vcombine.high %v12463_v41, %v12463_v41  ;;  %v14326_v23 = vcombine.low %v12396_v20, %v12397_v37  ;;  %v27808_v41 = vcombine.high %v25188_v15, %v25191_v55  ;;  %v19885_v20 = vld [vmem:[%s26966_s3 + $0xe0] sm:$0xff]  }
 0x562   : > { %v14143_v58 = vcombine.low %v12307_v42, %v12314_v7  ;;  %v14144_v17 = vcombine.low %v12315_v34, %v12389_v50  ;;  %v14173_v48 = vcombine.low %v14151_v59, %v14158_v9  ;;  %v12479_v50 = vcombine.high %v12471_v56, %v12471_v56  ;;  %v25732_v9 = vpop.f32.mrf.mxu1  ;;  %19355 = vmatprep.subr.bf16.mxu0 %v19885_v20  ;;  %v27819_v20 = vld [vmem:[#allocation5_spill] sm:$0xff] }
 0x563   : > { %15244 = vmatmul.mubr.bf16.gmra.mxu1 %v27803_v10  ;;  %v12478_v42 = vrot.slane %v12464_v0, %v20242_v57  ;;  %v14329_v7 = vcombine.low %v12560_v16, %v12561_v27  ;;  %v27806_v10 = vcombine.high %v25127_v5, %v25130_v31  ;;  %v14336_v12 = vrot.slane %v14326_v23, %v20242_v57  ;;  %v19880_v31 = vld [vmem:[%s26965_s2 + $0x208] sm:$0xff]  }
 0x564   : > { %15251 = vmatprep.mubr.bf16.mxu1 %v27804_v2  ;;  %19641 = vmatpush3.bf16.msra.mxu1 %v19875_v46  ;;  %v14165_v18 = vrot.slane %v14143_v58, %v20242_v57  ;;  %v14172_v35 = vrot.slane %v14144_v17, %v20242_v57  ;;  %v19877_v46 = vld [vmem:[%s26965_s2 + $0x218] sm:$0xff]   ;;  %v14181_v44 = vrot.slane %v14173_v48, %v20242_v57 }
 0x565   : > { %19642 = vmatprep.subr.bf16.mxu1 %v27782_v26  ;;  %v14327_v34 = vcombine.low %v12471_v56, %v12478_v42  ;;  %v14328_v43 = vcombine.low %v12479_v50, %v12553_v61  ;;  %v14357_v2 = vrot.slane %v14329_v7, %v20242_v57  ;;  %v27809_v61 = vcombine.high %v25194_v1, %v25201_v4 }
 0x566   : > { %v14174_v36 = vcombine.low %v14165_v18, %v14172_v35  ;;  %v27807_v18 = vcombine.high %v25133_v47, %v25136_v13  ;;  %v19882_v35 = vld [vmem:[%s26965_s2 + $0x200] sm:$0xff]   ;;  %v25752_v13 = vpop.f32.mrf.mxu1  ;;  %v27810_v0 = vcombine.high %v25208_v39, %v25237_v51  ;;  %v27811_v16 = vcombine.high %v25211_v33, %v25240_v6 }
 0x567   : > { %v14343_v60 = vrot.slane %v14327_v34, %v20242_v57  ;;  %v19886_v47 = vld [vmem:[%s26966_s3 + $0xa0] sm:$0xff]   ;;  %v27812_v27 = vcombine.high %v25263_v45, %v25266_v22  ;;  %v27813_v51 = vcombine.high %v25269_v8, %v25278_v11  ;;  %v27814_v33 = vcombine.high %v25281_v53, %v25296_v19 }
 0x568   : > { %19643 = vmatpush3.bf16.msra.mxu1 %v19876_v52  ;;  %v14188_v29 = vrot.slane %v14174_v36, %v20242_v57  ;;  %v14350_v52 = vrot.slane %v14328_v43, %v20242_v57  ;;  %19356 = vmatpush3.bf16.msra.mxu0 %v19886_v47  ;;  %v27816_v8 = vcombine.high %v25326_v40, %v25342_v62  ;;  %v12708_v47 = vsub.s32 1, %v27819_v20 }
 0x569   : > { %19644 = vmatprep.subr.bf16.mxu1 %v27782_v26  ;;  %v14358_v17 = vcombine.low %v14336_v12, %v14343_v60  ;;  %v27818_v60 = vld [vmem:[#allocation26_spill] sm:$0xff] }
 0x56a   : > { %v25719_v58 = vcombine.low %v14181_v44, %v14188_v29  ;;  %v14359_v5 = vcombine.low %v14350_v52, %v14357_v2  ;;  %v19887_v52 = vld [vmem:[%s26966_s3 + $0xd8] sm:$0xff]  }
 0x56b   : > { %15252 = vmatmul.mubr.bf16.gmra.mxu1 %v27805_v25  ;;  %v14366_v59 = vrot.slane %v14358_v17, %v20242_v57  ;;  %v27815_v25 = vcombine.high %v25460_v38, %v25443_v32  ;;  %19357 = vmatprep.subr.bf16.mxu0 %v19887_v52 }
 0x56c   : > { %15259 = vmatprep.mubr.bf16.mxu1 %v27806_v10  ;;  %19645 = vmatpush3.bf16.msra.mxu1 %v19877_v46  ;;  %v14373_v49 = vrot.slane %v14359_v5, %v20242_v57 }
 0x56d   : > { %19646 = vmatprep.subr.bf16.mxu1 %v27782_v26 }
 0x56e   : > { %v25737_v37 = vcombine.low %v14366_v59, %v14373_v49 }
 0x570   : > { %19647 = vmatpush3.bf16.msra.mxu1 %v19878_v24  ;;  %v27817_v24 = vcombine.high %v25329_v21, %v25345_v63  ;;  %v19888_v21 = vld [vmem:[%s26966_s3 + $0x98] sm:$0xff]  }
 0x571   : > { %19648 = vmatprep.subr.bf16.mxu1 %v27782_v26  ;;  %19358 = vmatpush3.bf16.msra.mxu0 %v19888_v21 }
 0x573   : > { %15260 = vmatmul.mubr.bf16.gmra.mxu1 %v27807_v18 }
 0x574   : > { %15267 = vmatprep.mubr.bf16.mxu1 %v27808_v41  ;;  %19649 = vmatpush3.bf16.msra.mxu1 %v19880_v31 }
 0x575   : > { %19650 = vmatprep.subr.bf16.mxu1 %v27782_v26 }
 0x576   : > { %v19088_v15 = vpop.f32.mrf.mxu1 }
 0x578   : > { %19651 = vmatpush3.bf16.msra.mxu1 %v19882_v35  ;;  %v19089_v55 = vpop.f32.mrf.mxu1 }
 0x579   : > { %v25754_v30 = vadd.f32 %v19089_v55, %v19088_v15 }
 0x57a   : > { %v19091_v48 = vpop.f32.mrf.mxu1 }
 0x57b   : > { %15268 = vmatmul.mubr.bf16.gmra.mxu1 %v27809_v61 }
 0x57c   : > { %15275 = vmatprep.mubr.bf16.mxu1 %v27810_v0  ;;  %v19092_v56 = vpop.f32.mrf.mxu1  ;;  %v19951_v0 = vld [vmem:[%s26967_s4] sm:$0x7] }
 0x57d   : > { %v25762_v46 = vadd.f32 %v19092_v56, %v19091_v48  ;;  %v27820_v48 = vld [vmem:[#allocation25_spill] sm:$0xff] }
 0x583   : > { %v19094_v36 = vpop.f32.mrf.mxu1  ;;  %15276 = vmatmul.mubr.bf16.gmra.mxu1 %v27811_v16 }
 0x584   : > { %15283 = vmatprep.mubr.bf16.mxu1 %v27812_v27  ;;  %v27822_v27 = vld [vmem:[#allocation30_spill] sm:$0xff] }
 0x585   : > { %v19095_v42 = vpop.f32.mrf.mxu1 }
 0x586   : > { %v25770_v1 = vadd.f32 %v19095_v42, %v19094_v36  ;;  %v27821_v36 = vld [vmem:[#allocation172_spill] sm:$0xff] }
 0x587   : > { %v19097_v4 = vpop.f32.mrf.mxu1  ;;  %v27823_v42 = vld [vmem:[#allocation28_spill] sm:$0xff] }
 0x589   : > { %v19098_v50 = vpop.f32.mrf.mxu1 }
 0x58a   : > { %v25772_v23 = vadd.f32 %v19098_v50, %v19097_v4  ;;  %v19081_v4 = vadd.f32 %v27823_v42, %v27822_v27  ;;  %v19889_v42 = vld [vmem:[%s26966_s3 + $0xd0] sm:$0xff]  }
 0x58b   : > { %v19116_v39 = vpop.f32.mrf.mxu1  ;;  %15284 = vmatmul.mubr.bf16.gmra.mxu1 %v27813_v51  ;;  %19359 = vmatprep.subr.bf16.mxu0 %v19889_v42 }
 0x58c   : > { %15291 = vmatprep.mubr.bf16.mxu1 %v27814_v33 }
 0x58d   : > { %v19117_v6 = vpop.f32.mrf.mxu1 }
 0x58e   : > { %v25780_v44 = vadd.f32 %v19117_v6, %v19116_v39 }
 0x58f   : > { %v19119_v45 = vpop.f32.mrf.mxu1 }
 0x591   : > { %v19120_v22 = vpop.f32.mrf.mxu1 }
 0x592   : > { %v25782_v29 = vadd.f32 %v19120_v22, %v19119_v45 }
 0x593   : > { %v19122_v7 = vpop.f32.mrf.mxu1  ;;  %15292 = vmatmul.mubr.bf16.gmra.mxu1 %v27815_v25 }
 0x594   : > { %15299 = vmatprep.mubr.bf16.mxu1 %v27816_v8 }
 0x595   : > { %v19123_v11 = vpop.f32.mrf.mxu1 }
 0x596   : > { %v25790_v34 = vadd.f32 %v19123_v11, %v19122_v7  ;;  %v27824_v7 = vld [vmem:[#allocation23_spill] sm:$0xff]  ;;  %v27825_v11 = vld [vmem:[#allocation13_spill] sm:$0xff] }
 0x597   : > { %v19125_v53 = vpop.f32.mrf.mxu1 }
 0x599   : > { %v19126_v19 = vpop.f32.mrf.mxu1 }
 0x59a   : > { %v25792_v43 = vadd.f32 %v19126_v19, %v19125_v53  ;;  %v19087_v19 = vadd.f32 %v25752_v13, %v25732_v9 }
 0x59b   : > { %v19128_v10 = vpop.f32.mrf.mxu1  ;;  %15300 = vmatmul.mubr.bf16.gmra.mxu1 %v27817_v24 }
 0x59c   : > { %19652 = vmatprep.mubr.msk.bf16.mxu1 %vm20016_vm0, %v27782_v26 }
 0x59d   : > { %v19129_v32 = vpop.f32.mrf.mxu1 }
 0x59e   : > { %v25799_v38 = vadd.f32 %v19129_v32, %v19128_v10 }
 0x59f   : > { %v19131_v40 = vpop.f32.mrf.mxu1 }
 0x5a1   : > { %v19132_v62 = vpop.f32.mrf.mxu1 }
 0x5a2   : > { %v25801_v2 = vadd.f32 %v19132_v62, %v19131_v40 }
 0x5a3   : > { %v19134_v12 = vpop.f32.mrf.mxu1  ;;  %19653 = vmatmul.mubr.bf16.vlgmr.msra.gmra.mxu1 %v27818_v60 }
 0x5a4   : > { %19656 = vmatprep.mubr.msk.bf16.mxu1 %vm20016_vm0, %v27782_v26 }
 0x5a5   : > { %v19135_v63 = vpop.f32.mrf.mxu1 }
 0x5a6   : > { %v25812_v17 = vadd.f32 %v19135_v63, %v19134_v12 }
 0x5a7   : > { %v19137_v5 = vpop.f32.mrf.mxu1 }
 0x5a9   : > { %v19138_v31 = vpop.f32.mrf.mxu1 }
 0x5aa   : > { %v25814_v59 = vadd.f32 %v19138_v31, %v19137_v5 }
 0x5ab   : > { %v19140_v49 = vpop.f32.mrf.mxu1  ;;  %19657 = vmatmul.mubr.bf16.gmra.mxu1 %v25427_v54  ;;  %v25828_v54 = vrot.slane %v19951_v0, %v12708_v47  ;;  %v27827_v0 = vld [vmem:[#allocation129_spill] sm:$0xff] }
 0x5ac   : > { %19660 = vmatprep.mubr.msk.bf16.mxu1 %vm20016_vm0, %v27782_v26 }
 0x5ad   : > { %v19141_v18 = vpop.f32.mrf.mxu1  ;;  %v14963_v16 = vadd.f32 %v27821_v36, %v25828_v54  ;;  %v14966_v6 = vadd.f32 %v19081_v4, %v25828_v54  ;;  %v14971_v53 = vadd.f32 %v27825_v11, %v25828_v54  ;;  %v14974_v62 = vadd.f32 %v19087_v19, %v25828_v54  ;;  %v27828_v4 = vld [vmem:[#allocation131_spill] sm:$0xff]  ;;  %v27831_v11 = vld [vmem:[#allocation133_spill] sm:$0xff] }
 0x5ae   : > { %v25819_v41 = vadd.f32 %v19141_v18, %v19140_v49  ;;  %v14979_v9 = vadd.f32 %v25754_v30, %v25828_v54  ;;  %v14982_v49 = vadd.f32 %v25762_v46, %v25828_v54  ;;  %v14987_v30 = vadd.f32 %v25770_v1, %v25828_v54 }
 0x5af   : > { %v19143_v35 = vpop.f32.mrf.mxu1 }
 0x5b1   : > { %v19144_v15 = vpop.f32.mrf.mxu1 }
 0x5b2   : > { %v25822_v55 = vadd.f32 %v19144_v15, %v19143_v35 }
 0x5b3   : > { %v19146_v61 = vpop.f32.mrf.mxu1  ;;  %19661 = vmatmul.mubr.bf16.gmra.mxu1 %v27820_v48  ;;  %v27826_v48 = vld [vmem:[#allocation128_spill] sm:$0xff] }
 0x5b4   : > { %19664 = vmatprep.mubr.msk.bf16.mxu1 %vm20016_vm0, %v27782_v26 }
 0x5b5   : > { %v19147_v56 = vpop.f32.mrf.mxu1 }
 0x5b6   : > { %v19148_v50 = vadd.f32 %v19147_v56, %v19146_v61  ;;  %v19048_v56 = vadd.f32 %v27827_v0, %v27826_v48 }
 0x5b7   : > { %v19149_v39 = vpop.f32.mrf.mxu1 }
 0x5b8   : > { %v25836_v51 = vadd.f32 %v19148_v50, %v14963_v16  ;;  %v14923_v1 = vadd.f32 %v19048_v56, %v25828_v54  ;;  %v27829_v50 = vld [vmem:[#allocation115_spill] sm:$0xff]  ;;  %v27836_v56 = vld [vmem:[#allocation136_spill] sm:$0xff] }
 0x5b9   : > { %v19150_v33 = vpop.f32.mrf.mxu1 }
 0x5ba   : > { %v19151_v45 = vadd.f32 %v19150_v33, %v19149_v39  ;;  %v19051_v39 = vadd.f32 %v27829_v50, %v27828_v4  ;;  %v27838_v50 = vld [vmem:[#allocation138_spill] sm:$0xff] }
 0x5bb   : > { %v19152_v22 = vpop.f32.mrf.mxu1  ;;  %19665 = vmatmul.mubr.bf16.gmra.mxu1 %v27824_v7 }
 0x5bc   : > { %v25840_v25 = vadd.f32 %v19151_v45, %v14966_v6  ;;  %19668 = vmatprep.mubr.msk.bf16.mxu1 %vm20016_vm0, %v27782_v26  ;;  %v14926_v7 = vadd.f32 %v19051_v39, %v25828_v54 }
 0x5bd   : > { %v19153_v8 = vpop.f32.mrf.mxu1 }
 0x5be   : > { %v19154_v10 = vadd.f32 %v19153_v8, %v19152_v22  ;;  %v27830_v8 = vld [vmem:[#allocation132_spill] sm:$0xff] }
 0x5bf   : > { %v19155_v24 = vpop.f32.mrf.mxu1 }
 0x5c0   : > { %v25848_v32 = vadd.f32 %v19154_v10, %v14971_v53  ;;  %v19054_v53 = vadd.f32 %v27831_v11, %v27830_v8  ;;  %v27841_v8 = vld [vmem:[#allocation142_spill] sm:$0xff] }
 0x5c1   : > { %v19156_v40 = vpop.f32.mrf.mxu1 }
 0x5c2   : > { %v19157_v12 = vadd.f32 %v19156_v40, %v19155_v24  ;;  %v15031_v24 = vadd.f32 %v25782_v29, %v14926_v7  ;;  %v27840_v7 = vld [vmem:[#allocation114_spill] sm:$0xff] }
 0x5c3   : > { %v19158_v60 = vpop.f32.mrf.mxu1  ;;  %19669 = vmatmul.mubr.bf16.gmra.mxu1 %v25611_v14  ;;  %v19069_v11 = vadd.f32 %v27841_v8, %v27840_v7 }
 0x5c4   : > { %v25852_v52 = vadd.f32 %v19157_v12, %v14974_v62  ;;  %19672 = vmatprep.mubr.msk.bf16.mxu1 %vm20016_vm0, %v27782_v26  ;;  %v27832_v12 = vld [vmem:[#allocation134_spill] sm:$0xff] }
 0x5c5   : > { %v19159_v21 = vpop.f32.mrf.mxu1 }
 0x5c6   : > { %v19160_v13 = vadd.f32 %v19159_v21, %v19158_v60  ;;  %v27833_v60 = vld [vmem:[#allocation112_spill] sm:$0xff] }
 0x5c7   : > { %v19161_v63 = vpop.f32.mrf.mxu1  ;;  %v19057_v21 = vadd.f32 %v27833_v60, %v27832_v12  ;;  %v27843_v12 = vld [vmem:[#allocation151_spill] sm:$0xff] }
 0x5c8   : > { %v25858_v5 = vadd.f32 %v19160_v13, %v14979_v9 }
 0x5c9   : > { %v19162_v31 = vpop.f32.mrf.mxu1  ;;  %v14934_v29 = vadd.f32 %v19057_v21, %v25828_v54 }
 0x5ca   : > { %v19163_v18 = vadd.f32 %v19162_v31, %v19161_v63 }
 0x5cb   : > { %v19164_v35 = vpop.f32.mrf.mxu1  ;;  %19673 = vmatmul.mubr.bf16.gmra.mxu1 %v25652_v3  ;;  %v14990_v3 = vadd.f32 %v25772_v23, %v25828_v54  ;;  %v15028_v23 = vadd.f32 %v25780_v44, %v14923_v1  ;;  %v14931_v44 = vadd.f32 %v19054_v53, %v25828_v54 }
 0x5cc   : > { %v25863_v14 = vadd.f32 %v19163_v18, %v14982_v49  ;;  %19676 = vmatprep.mubr.msk.bf16.mxu1 %vm20016_vm0, %v27782_v26  ;;  %v27834_v18 = vld [vmem:[#allocation111_spill] sm:$0xff] }
 0x5cd   : > { %v19165_v47 = vpop.f32.mrf.mxu1  ;;  %v15036_v63 = vadd.f32 %v25790_v34, %v14931_v44  ;;  %v27837_v34 = vld [vmem:[#allocation137_spill] sm:$0xff] }
 0x5ce   : > { %v19166_v15 = vadd.f32 %v19165_v47, %v19164_v35  ;;  %v27835_v35 = vld [vmem:[#allocation135_spill] sm:$0xff]  ;;  %v27842_v44 = vld [vmem:[#allocation145_spill] sm:$0xff] }
 0x5cf   : > { %v19167_v61 = vpop.f32.mrf.mxu1  ;;  %v19072_v60 = vadd.f32 %v27843_v12, %v27842_v44 }
 0x5d0   : > { %v25871_v36 = vadd.f32 %v19166_v15, %v14987_v30  ;;  %v15039_v15 = vadd.f32 %v25792_v43, %v14934_v29  ;;  %v27839_v43 = vld [vmem:[#allocation140_spill] sm:$0xff]  ;;  %v27844_v29 = vld [vmem:[#allocation157_spill] sm:$0xff] }
 0x5d1   : > { %v19168_v46 = vpop.f32.mrf.mxu1  ;;  %v19066_v39 = vadd.f32 %v27839_v43, %v27838_v50 }
 0x5d2   : > { %v19169_v16 = vadd.f32 %v19168_v46, %v19167_v61  ;;  %v19063_v46 = vadd.f32 %v27837_v34, %v27836_v56 }
 0x5d3   : > { %v19186_v27 = vpop.f32.mrf.mxu1  ;;  %19677 = vmatmul.mubr.bf16.gmra.mxu1 %v25685_v28  ;;  %v19890_v28 = vld [vmem:[%s26966_s3 + $0x90] sm:$0xff]  }
 0x5d4   : > { %v25882_v33 = vadd.f32 %v19169_v16, %v14990_v3  ;;  %19680 = vmatprep.mubr.msk.bf16.mxu1 %vm20016_vm0, %v27782_v26  ;;  %19360 = vmatpush3.bf16.msra.mxu0 %v19890_v28  ;;  %v14942_v4 = vadd.f32 %v19063_v46, %v25828_v54 }
 0x5d5   : > { %v19187_v6 = vpop.f32.mrf.mxu1 }
 0x5d6   : > { %v19188_v45 = vadd.f32 %v19187_v6, %v19186_v27 }
 0x5d7   : > { %v19189_v22 = vpop.f32.mrf.mxu1 }
 0x5d8   : > { %v25893_v19 = vadd.f32 %v19188_v45, %v15028_v23  ;;  %v15047_v23 = vadd.f32 %v25801_v2, %v14942_v4 }
 0x5d9   : > { %v19190_v10 = vpop.f32.mrf.mxu1 }
 0x5da   : > { %v19191_v40 = vadd.f32 %v19190_v10, %v19189_v22  ;;  %v14947_v22 = vadd.f32 %v19066_v39, %v25828_v54 }
 0x5db   : > { %v19192_v62 = vpop.f32.mrf.mxu1  ;;  %19681 = vmatmul.mubr.bf16.gmra.mxu1 %v25719_v58  ;;  %v19060_v58 = vadd.f32 %v27835_v35, %v27834_v18  ;;  %v27845_v18 = vld [vmem:[#allocation162_spill] sm:$0xff] }
 0x5dc   : > { %v25900_v9 = vadd.f32 %v19191_v40, %v15031_v24  ;;  %19684 = vmatprep.mubr.msk.bf16.mxu1 %vm20016_vm0, %v27782_v26  ;;  %v15052_v10 = vadd.f32 %v25812_v17, %v14947_v22  ;;  %v19075_v35 = vadd.f32 %v27845_v18, %v27844_v29 }
 0x5dd   : > { %v19193_v13 = vpop.f32.mrf.mxu1  ;;  %v14939_v0 = vadd.f32 %v19060_v58, %v25828_v54 }
 0x5de   : > { %v19194_v31 = vadd.f32 %v19193_v13, %v19192_v62  ;;  %v14950_v62 = vadd.f32 %v19069_v11, %v25828_v54 }
 0x5df   : > { %v19195_v49 = vpop.f32.mrf.mxu1  ;;  %v15044_v27 = vadd.f32 %v25799_v38, %v14939_v0 }
 0x5e0   : > { %v25908_v47 = vadd.f32 %v19194_v31, %v15036_v63  ;;  %v15055_v13 = vadd.f32 %v25814_v59, %v14950_v62 }
 0x5e1   : > { %v19196_v30 = vpop.f32.mrf.mxu1 }
 0x5e2   : > { %v19197_v61 = vadd.f32 %v19196_v30, %v19195_v49  ;;  %v14955_v49 = vadd.f32 %v19072_v60, %v25828_v54 }
 0x5e3   : > { %v19198_v48 = vpop.f32.mrf.mxu1  ;;  %19685 = vmatmul.mubr.bf16.gmra.mxu1 %v25737_v37 }
 0x5e4   : > { %v25915_v3 = vadd.f32 %v19197_v61, %v15039_v15  ;;  %v15060_v30 = vadd.f32 %v25819_v41, %v14955_v49 }
 0x5e5   : > { %v19199_v16 = vpop.f32.mrf.mxu1 }
 0x5e6   : > { %v19200_v42 = vadd.f32 %v19199_v16, %v19198_v48  ;;  %v14958_v48 = vadd.f32 %v19075_v35, %v25828_v54 }
 0x5e7   : > { %v19201_v1 = vpop.f32.mrf.mxu1 }
 0x5e8   : > { %v25921_v6 = vadd.f32 %v19200_v42, %v15044_v27  ;;  %v15063_v59 = vadd.f32 %v25822_v55, %v14958_v48 }
 0x5e9   : > { %v19202_v37 = vpop.f32.mrf.mxu1 }
 0x5ea   : > { %v19203_v45 = vadd.f32 %v19202_v37, %v19201_v1 }
 0x5eb   : > { %v19204_v28 = vpop.f32.mrf.mxu1 }
 0x5ec   : > { %v25927_v38 = vadd.f32 %v19203_v45, %v15047_v23 }
 0x5ed   : > { %v19205_v53 = vpop.f32.mrf.mxu1 }
 0x5ee   : > { %v19206_v24 = vadd.f32 %v19205_v53, %v19204_v28 }
 0x5ef   : > { %v19207_v40 = vpop.f32.mrf.mxu1 }
 0x5f0   : > { %v25933_v2 = vadd.f32 %v19206_v24, %v15052_v10 }
 0x5f1   : > { %v19208_v21 = vpop.f32.mrf.mxu1 }
 0x5f2   : > { %v19209_v63 = vadd.f32 %v19208_v21, %v19207_v40 }
 0x5f3   : > { %v19210_v31 = vpop.f32.mrf.mxu1 }
 0x5f4   : > { %v25939_v17 = vadd.f32 %v19209_v63, %v15055_v13 }
 0x5f5   : > { %v19211_v58 = vpop.f32.mrf.mxu1 }
 0x5f6   : > { %v19212_v15 = vadd.f32 %v19211_v58, %v19210_v31 }
 0x5f7   : > { %v19213_v61 = vpop.f32.mrf.mxu1 }
 0x5f8   : > { %v25943_v0 = vadd.f32 %v19212_v15, %v15060_v30 }
 0x5f9   : > { %v19214_v56 = vpop.f32.mrf.mxu1 }
 0x5fa   : > { %v19215_v34 = vadd.f32 %v19214_v56, %v19213_v61  ;;  %v19892_v56 = vld [vmem:[%s26966_s3 + $0xc8] sm:$0xff]  }
 0x5fb   : > { %v19216_v46 = vpop.f32.mrf.mxu1  ;;  %19361 = vmatprep.subr.bf16.mxu0 %v19892_v56 }
 0x5fc   : > { %v25946_v16 = vadd.f32 %v19215_v34, %v15063_v59 }
 0x5fd   : > { %v19217_v27 = vpop.f32.mrf.mxu1 }
 0x5fe   : > { %v19218_v42 = vadd.f32 %v19217_v27, %v19216_v46 }
 0x5ff   : > { %v19219_v1 = vpop.f32.mrf.mxu1 }
 0x600   : > { %v25949_v4 = vadd.f32 %v19218_v42, %v25836_v51 }
 0x601   : > { %v19220_v41 = vpop.f32.mrf.mxu1 }
 0x602   : > { %v19221_v50 = vadd.f32 %v19220_v41, %v19219_v1 }
 0x603   : > { %v19222_v43 = vpop.f32.mrf.mxu1 }
 0x604   : > { %v25952_v54 = vadd.f32 %v19221_v50, %v25840_v25 }
 0x605   : > { %v19223_v39 = vpop.f32.mrf.mxu1 }
 0x606   : > { %v19224_v37 = vadd.f32 %v19223_v39, %v19222_v43 }
 0x607   : > { %v19225_v23 = vpop.f32.mrf.mxu1 }
 0x608   : > { %v25955_v55 = vadd.f32 %v19224_v37, %v25848_v32 }
 0x609   : > { %v19226_v45 = vpop.f32.mrf.mxu1 }
 0x60a   : > { %v19227_v28 = vadd.f32 %v19226_v45, %v19225_v23 }
 0x60b   : > { %v19228_v22 = vpop.f32.mrf.mxu1 }
 0x60c   : > { %v25958_v7 = vadd.f32 %v19227_v28, %v25852_v52 }
 0x60d   : > { %v19229_v51 = vpop.f32.mrf.mxu1 }
 0x60e   : > { %v19230_v8 = vadd.f32 %v19229_v51, %v19228_v22 }
 0x60f   : > { %v19231_v11 = vpop.f32.mrf.mxu1 }
 0x610   : > { %v25961_v53 = vadd.f32 %v19230_v8, %v25858_v5 }
 0x611   : > { %v19232_v25 = vpop.f32.mrf.mxu1 }
 0x612   : > { %v19233_v10 = vadd.f32 %v19232_v25, %v19231_v11 }
 0x613   : > { %v19234_v24 = vpop.f32.mrf.mxu1 }
 0x614   : > { %v25964_v40 = vadd.f32 %v19233_v10, %v25863_v14 }
 0x615   : > { %v19235_v32 = vpop.f32.mrf.mxu1 }
 0x616   : > { %v19236_v62 = vadd.f32 %v19235_v32, %v19234_v24  ;;  %v19895_v24 = vld [vmem:[%s26966_s3 + $0x70] sm:$0xff]  }
 0x617   : > { %v19237_v44 = vpop.f32.mrf.mxu1 }
 0x618   : > { %v25967_v12 = vadd.f32 %v19236_v62, %v25871_v36 }
 0x619   : > { %v19238_v52 = vpop.f32.mrf.mxu1 }
 0x61a   : > { %v19239_v60 = vadd.f32 %v19238_v52, %v19237_v44 }
 0x61b   : > { %v19256_v21 = vpop.f32.mrf.mxu1 }
 0x61c   : > { %v25970_v13 = vadd.f32 %v19239_v60, %v25882_v33 }
 0x61d   : > { %v19257_v5 = vpop.f32.mrf.mxu1 }
 0x61e   : > { %v19258_v63 = vadd.f32 %v19257_v5, %v19256_v21  ;;  %v19896_v21 = vld [vmem:[%s26966_s3 + $0x30] sm:$0xff]  }
 0x61f   : > { %v19259_v31 = vpop.f32.mrf.mxu1 }
 0x620   : > { %v25973_v49 = vadd.f32 %v19258_v63, %v25893_v19  ;;  %v19891_v19 = vld [vmem:[%s26966_s3 + $0x78] sm:$0xff]  }
 0x621   : > { %v19260_v14 = vpop.f32.mrf.mxu1  ;;  %19327 = vmatprep.subr.bf16.mxu1 %v19891_v19 }
 0x622   : > { %v19261_v29 = vadd.f32 %v19260_v14, %v19259_v31 }
 0x623   : > { %v19262_v18 = vpop.f32.mrf.mxu1 }
 0x624   : > { %v25976_v35 = vadd.f32 %v19261_v29, %v25900_v9  ;;  %v19893_v9 = vld [vmem:[%s26966_s3 + $0x38] sm:$0xff]  }
 0x625   : > { %v19263_v36 = vpop.f32.mrf.mxu1  ;;  %19328 = vmatpush3.bf16.msra.mxu1 %v19893_v9 }
 0x626   : > { %v19264_v58 = vadd.f32 %v19263_v36, %v19262_v18  ;;  %19329 = vmatprep.subr.bf16.mxu1 %v19895_v24 }
 0x627   : > { %v19265_v30 = vpop.f32.mrf.mxu1 }
 0x628   : > { %v25979_v15 = vadd.f32 %v19264_v58, %v25908_v47  ;;  %v19894_v47 = vld [vmem:[%s26966_s3 + $0x88] sm:$0xff]  }
 0x629   : > { %v19266_v33 = vpop.f32.mrf.mxu1  ;;  %19362 = vmatpush3.bf16.msra.mxu0 %v19894_v47  ;;  %19330 = vmatpush3.bf16.msra.mxu1 %v19896_v21 }
 0x62a   : > { %v19267_v61 = vadd.f32 %v19266_v33, %v19265_v30 }
 0x62b   : > { %v19268_v48 = vpop.f32.mrf.mxu1 }
 0x62c   : > { %v25991_v59 = vadd.f32 %v19267_v61, %v25915_v3  ;;  %v19898_v61 = vld [vmem:[%s26966_s3 + $0x28] sm:$0xff]  }
 0x62d   : > { %v19269_v34 = vpop.f32.mrf.mxu1 }
 0x62e   : > { %v19270_v46 = vadd.f32 %v19269_v34, %v19268_v48 }
 0x62f   : > { %v19271_v27 = vpop.f32.mrf.mxu1 }
 0x630   : > { %v25997_v42 = vadd.f32 %v19270_v46, %v25921_v6 }
 0x631   : > { %v19272_v1 = vpop.f32.mrf.mxu1 }
 0x632   : > { %v19273_v41 = vadd.f32 %v19272_v1, %v19271_v27  ;;  %v19899_v1 = vld [vmem:[%s26966_s3 + $0x60] sm:$0xff]  }
 0x633   : > { %v19274_v50 = vpop.f32.mrf.mxu1 }
 0x634   : > { %v26000_v3 = vadd.f32 %v19273_v41, %v25927_v38 }
 0x635   : > { %v19275_v43 = vpop.f32.mrf.mxu1 }
 0x636   : > { %v19276_v39 = vadd.f32 %v19275_v43, %v19274_v50 }
 0x637   : > { %v19277_v37 = vpop.f32.mrf.mxu1 }
 0x638   : > { %v26003_v23 = vadd.f32 %v19276_v39, %v25933_v2 }
 0x639   : > { %v19278_v45 = vpop.f32.mrf.mxu1 }
 0x63a   : > { %v19279_v28 = vadd.f32 %v19278_v45, %v19277_v37 }
 0x63b   : > { %v19280_v22 = vpop.f32.mrf.mxu1 }
 0x63c   : > { %v26006_v51 = vadd.f32 %v19279_v28, %v25939_v17 }
 0x63d   : > { %v19281_v6 = vpop.f32.mrf.mxu1 }
 0x63e   : > { %v19282_v8 = vadd.f32 %v19281_v6, %v19280_v22 }
 0x63f   : > { %v19283_v11 = vpop.f32.mrf.mxu1 }
 0x640   : > { %v26009_v25 = vadd.f32 %v19282_v8, %v25943_v0 }
 0x641   : > { %v19284_v38 = vpop.f32.mrf.mxu1 }
 0x642   : > { %v19285_v10 = vadd.f32 %v19284_v38, %v19283_v11 }
 0x643   : > { %v19286_v2 = vpop.f32.mrf.mxu1 }
 0x644   : > { %v26015_v32 = vadd.f32 %v19285_v10, %v25946_v16 }
 0x645   : > { %v19287_v62 = vpop.f32.mrf.mxu1 }
 0x646   : > { %v19288_v17 = vadd.f32 %v19287_v62, %v19286_v2 }
 0x647   : > { %v19289_v44 = vpop.f32.mrf.mxu1 }
 0x648   : > { %v26018_v52 = vadd.f32 %v19288_v17, %v25949_v4 }
 0x649   : > { %v19290_v60 = vpop.f32.mrf.mxu1 }
 0x64a   : > { %v19291_v0 = vadd.f32 %v19290_v60, %v19289_v44 }
 0x64b   : > { %v19292_v5 = vpop.f32.mrf.mxu1 }
 0x64c   : > { %v26024_v63 = vadd.f32 %v19291_v0, %v25952_v54  ;;  %v19897_v54 = vld [vmem:[%s26966_s3 + $0x68] sm:$0xff]  }
 0x64d   : > { %v19293_v16 = vpop.f32.mrf.mxu1  ;;  %19331 = vmatprep.subr.bf16.mxu1 %v19897_v54 }
 0x64e   : > { %v19294_v31 = vadd.f32 %v19293_v16, %v19292_v5  ;;  %19332 = vmatpush3.bf16.msra.mxu1 %v19898_v61 }
 0x64f   : > { %v19295_v14 = vpop.f32.mrf.mxu1  ;;  %19333 = vmatprep.subr.bf16.mxu1 %v19899_v1 }
 0x650   : > { %v26027_v29 = vadd.f32 %v19294_v31, %v25955_v55 }
 0x651   : > { %v19296_v18 = vpop.f32.mrf.mxu1 }
 0x652   : > { %v19297_v4 = vadd.f32 %v19296_v18, %v19295_v14 }
 0x653   : > { %v19298_v36 = vpop.f32.mrf.mxu1 }
 0x654   : > { %v26030_v58 = vadd.f32 %v19297_v4, %v25958_v7 }
 0x655   : > { %v19299_v30 = vpop.f32.mrf.mxu1 }
 0x656   : > { %v19300_v33 = vadd.f32 %v19299_v30, %v19298_v36 }
 0x657   : > { %v19301_v48 = vpop.f32.mrf.mxu1 }
 0x658   : > { %v26039_v55 = vadd.f32 %v19300_v33, %v25961_v53  ;;  %v19900_v53 = vld [vmem:[%s26966_s3 + $0x20] sm:$0xff]  }
 0x659   : > { %v19302_v19 = vpop.f32.mrf.mxu1  ;;  %19334 = vmatpush3.bf16.msra.mxu1 %v19900_v53 }
 0x65a   : > { %v19303_v56 = vadd.f32 %v19302_v19, %v19301_v48 }
 0x65b   : > { %v19304_v7 = vpop.f32.mrf.mxu1 }
 0x65c   : > { %v26042_v9 = vadd.f32 %v19303_v56, %v25964_v40 }
 0x65d   : > { %v19305_v47 = vpop.f32.mrf.mxu1 }
 0x65e   : > { %v19306_v34 = vadd.f32 %v19305_v47, %v19304_v7 }
 0x65f   : > { %v19307_v46 = vpop.f32.mrf.mxu1 }
 0x660   : > { %v26051_v41 = vadd.f32 %v19306_v34, %v25967_v12 }
 0x661   : > { %v19308_v27 = vpop.f32.mrf.mxu1 }
 0x662   : > { %v19309_v50 = vadd.f32 %v19308_v27, %v19307_v46 }
 0x663   : > { %v15342_v43 = vpop.f32.mrf.mxu1 }
 0x664   : > { %v15343_v40 = vadd.f32 %v15342_v43, %v25973_v49  ;;  %v26055_v39 = vadd.f32 %v19309_v50, %v25970_v13 }
 0x665   : > { %v19654_v37 = vpop.f32.mrf.mxu1 }
 0x666   : > { %v15413_v6 = vmax.f32 %v15343_v40, 0.0 }
 0x667   : > { %v15345_v45 = vpop.f32.mrf.mxu1 }
 0x668   : > { %v15346_v28 = vadd.f32 %v15345_v45, %v25976_v35 }
 0x669   : > { %v19655_v22 = vpop.f32.mrf.mxu1 }
 0x66a   : > { %v15414_v8 = vmax.f32 %v15346_v28, 0.0 }
 0x66b   : > { %v15350_v11 = vpop.f32.mrf.mxu1 }
 0x66c   : > { %v15431_v38 = vpack.c.bf16 %v15414_v8, %v15413_v6  ;;  %v18852_v12 = vpack.c.bf16 %v15414_v8, %v15414_v8  ;;  %v15351_v10 = vadd.f32 %v15350_v11, %v25979_v15  ;;  %v19901_v6 = vld [vmem:[%s26966_s3 + $0x58] sm:$0xff]   ;;  %v19903_v11 = vld [vmem:[%s26966_s3 + $0x50] sm:$0xff]  }
 0x66d   : > { %v19658_v24 = vpop.f32.mrf.mxu1  ;;  %v19902_v8 = vld [vmem:[%s26966_s3 + $0x18] sm:$0xff]   ;;  %19335 = vmatprep.subr.bf16.mxu1 %v19901_v6 }
 0x66e   : > { %v15456_v2 = vrot.slane %v15431_v38, %v20242_v57  ;;  %v15463_v49 = vrot.slane %v18852_v12, %v20242_v57  ;;  %v15415_v18 = vmax.f32 %v15351_v10, 0.0  ;;  %19336 = vmatpush3.bf16.msra.mxu1 %v19902_v8 }
 0x66f   : > { %v15353_v62 = vpop.f32.mrf.mxu1  ;;  %19337 = vmatprep.subr.bf16.mxu1 %v19903_v11 }
 0x670   : > { %v15464_v13 = vcombine.high %v15456_v2, %v15456_v2  ;;  %v15465_v17 = vcombine.high %v15463_v49, %v15463_v49  ;;  %v15472_v44 = vrot.slane %v15456_v2, %v20242_v57  ;;  %v15479_v35 = vrot.slane %v15463_v49, %v20242_v57  ;;  %v19905_v49 = vld [vmem:[%s26966_s3 + $0xc0] sm:$0xff]  }
 0x671   : > { %v15354_v60 = vadd.f32 %v15353_v62, %v25991_v59  ;;  %v19659_v0 = vpop.f32.mrf.mxu1  ;;  %v19906_v62 = vld [vmem:[%s26966_s3 + $0x80] sm:$0xff]   ;;  %19363 = vmatprep.subr.bf16.mxu0 %v19905_v49 }
 0x672   : > { %v15486_v21 = vrot.slane %v15464_v13, %v20242_v57  ;;  %v15493_v5 = vrot.slane %v15465_v17, %v20242_v57  ;;  %v15494_v15 = vcombine.high %v15472_v44, %v15472_v44  ;;  %v15495_v16 = vcombine.high %v15479_v35, %v15479_v35  ;;  %19364 = vmatpush3.bf16.msra.mxu0 %v19906_v62 }
 0x673   : > { %v15874_v31 = vrot.slane %v15472_v44, %v20242_v57  ;;  %v16320_v14 = vrot.slane %v15479_v35, %v20242_v57  ;;  %v26068_v4 = vmax.f32 %v15354_v60, 0.0  ;;  %v26070_v36 = vpop.f32.mrf.mxu1 }
 0x674   : > { %v15496_v30 = vcombine.high %v15486_v21, %v15486_v21  ;;  %v15497_v33 = vcombine.high %v15493_v5, %v15493_v5  ;;  %v15888_v59 = vrot.slane %v15486_v21, %v20242_v57  ;;  %v15902_v54 = vrot.slane %v15495_v16, %v20242_v57 }
 0x675   : > { %v15881_v61 = vrot.slane %v15874_v31, %v20242_v57  ;;  %v16162_v48 = vrot.slane %v15494_v15, %v20242_v57  ;;  %v16327_v19 = vrot.slane %v16320_v14, %v20242_v57  ;;  %v16594_v56 = vrot.slane %v15493_v5, %v20242_v57  ;;  %v19662_v7 = vpop.f32.mrf.mxu1  ;;  %v19904_v15 = vld [vmem:[%s26966_s3 + $0x10] sm:$0xff]  }
 0x676   : > { %v15895_v47 = vrot.slane %v15888_v59, %v20242_v57  ;;  %v15909_v34 = vrot.slane %v15902_v54, %v20242_v57  ;;  %v15916_v46 = vrot.slane %v15497_v33, %v20242_v57  ;;  %v16306_v27 = vrot.slane %v15496_v30, %v20242_v57  ;;  %19338 = vmatpush3.bf16.msra.mxu1 %v19904_v15 }
 0x677   : > { %v16092_v1 = vunpack.c.l.b16 %v15881_v61  ;;  %v16169_v53 = vrot.slane %v16162_v48, %v20242_v57  ;;  %v16525_v50 = vunpack.c.l.b16 %v16327_v19  ;;  %v16601_v43 = vrot.slane %v16594_v56, %v20242_v57  ;;  %v15361_v40 = vpop.f32.mrf.mxu1 }
 0x678   : > { %v15923_v37 = vrot.slane %v15916_v46, %v20242_v57  ;;  %v16093_v45 = vunpack.c.l.b16 %v15895_v47  ;;  %v16094_v28 = vunpack.c.l.b16 %v15909_v34  ;;  %v16313_v22 = vrot.slane %v16306_v27, %v20242_v57 }
 0x679   : > { %v16132_v38 = vrot.slane %v16092_v1, 1  ;;  %v16268_v12 = vunpack.c.l.b16 %v16169_v53  ;;  %v16540_v10 = vrot.slane %v16525_v50, 7  ;;  %v16700_v24 = vunpack.c.l.b16 %v16601_v43  ;;  %v19663_v2 = vpop.f32.mrf.mxu1  ;;  %v19908_v43 = vld [vmem:[%s26966_s3 + $0x8] sm:$0xff]  }
 0x67a   : > { %v26101_v13 = vunpack.c.l.b16 %v15923_v37  ;;  %v16108_v17 = vrot.slane %v16093_v45, 7  ;;  %v16134_v44 = vrot.slane %v16094_v28, 1  ;;  %v16524_v35 = vunpack.c.l.b16 %v16313_v22 }
 0x67b   : > { %v16276_v60 = vrot.slane %v16268_v12, 7  ;;  %v16708_v0 = vrot.slane %v16700_v24, 7  ;;  %v15432_v21 = vpack.c.bf16 %v26068_v4, %v15415_v18  ;;  %v15366_v5 = vpop.f32.mrf.mxu1  ;;  %v26112_v14 = vsel %vm5750_vm1, %v16093_v45, %v16132_v38  ;;  %v19907_v18 = vld [vmem:[%s26966_s3 + $0x48] sm:$0xff]  }
 0x67c   : > { %v26108_v16 = vsel %vm5750_vm1, %v16108_v17, %v16092_v1  ;;  %v16110_v31 = vrot.slane %v26101_v13, 7  ;;  %v26115_v30 = vsel %vm5750_vm1, %v16540_v10, %v16524_v35  ;;  %v26122_v33 = vsel %vm5750_vm1, %v26101_v13, %v16134_v44  ;;  %19339 = vmatprep.subr.bf16.mxu1 %v19907_v18 }
 0x67d   : > { %v26125_v59 = vsel %vm5750_vm1, %v16276_v60, %v16093_v45  ;;  %v16564_v54 = vrot.slane %v16524_v35, 1  ;;  %v26128_v61 = vsel %vm5750_vm1, %v16708_v0, %v16525_v50  ;;  %v19666_v48 = vpop.f32.mrf.mxu1  ;;  %v18853_v7 = vpack.c.bf16 %v26068_v4, %v26068_v4  ;;  %19340 = vmatpush3.bf16.msra.mxu1 %v19908_v43  ;;  %v19911_v35 = vld [vmem:[%s26966_s3 + $0x178] sm:$0xff]  }
 0x67e   : > { %v15505_v47 = vrot.slane %v15432_v21, %v20242_v57  ;;  %v26138_v34 = vsel %vm5750_vm1, %v16110_v31, %v16094_v28  ;;  %v15359_v27 = vadd.f32 %v26070_v36, %v25997_v42  ;;  %v15362_v1 = vadd.f32 %v15361_v40, %v26000_v3  ;;  %v19909_v42 = vld [vmem:[%s26966_s3 + $0x40] sm:$0xff]   ;;  %v19912_v60 = vld [vmem:[%s26966_s3 + $0x1f8] sm:$0xff]  }
 0x67f   : > { %v26141_v46 = vsel %vm5750_vm1, %v16525_v50, %v16564_v54  ;;  %v15369_v53 = vpop.f32.mrf.mxu1  ;;  %v15512_v37 = vrot.slane %v18853_v7, %v20242_v57  ;;  %v26157_v40 = vadd.f32 %v15366_v5, %v26003_v23  ;;  %v19910_v23 = vld [vmem:[%s26966_s3] sm:$0xff]   ;;  %19341 = vmatprep.subr.bf16.mxu1 %v19909_v42  ;;  %19393 = vmatprep.subr.bf16.mxu0 %v19912_v60 }
 0x680   : > { %v15513_v45 = vcombine.high %v15505_v47, %v15505_v47  ;;  %v15521_v50 = vrot.slane %v15505_v47, %v20242_v57  ;;  %v15417_v3 = vmax.f32 %v15359_v27, 0.0  ;;  %v15418_v36 = vmax.f32 %v15362_v1, 0.0 }
 0x681   : > { %v26160_v28 = vadd.f32 %v15369_v53, %v26006_v51  ;;  %v19667_v22 = vpop.f32.mrf.mxu1  ;;  %v15514_v6 = vcombine.high %v15512_v37, %v15512_v37  ;;  %v15528_v8 = vrot.slane %v15512_v37, %v20242_v57  ;;  %19342 = vmatpush3.bf16.msra.mxu1 %v19910_v23 }
 0x682   : > { %v15535_v11 = vrot.slane %v15513_v45, %v20242_v57  ;;  %v15543_v38 = vcombine.high %v15521_v50, %v15521_v50  ;;  %v16176_v10 = vrot.slane %v15521_v50, %v20242_v57  ;;  %v15433_v24 = vpack.c.bf16 %v15418_v36, %v15417_v3  ;;  %19371 = vmatprep.subr.bf16.mxu1 %v19911_v35 }
 0x683   : > { %v18854_v2 = vpack.c.bf16 %v15418_v36, %v15418_v36  ;;  %v26167_v49 = vpop.f32.mrf.mxu1  ;;  %v15542_v51 = vrot.slane %v15514_v6, %v20242_v57  ;;  %v15544_v62 = vcombine.high %v15528_v8, %v15528_v8  ;;  %v16738_v5 = vrot.slane %v15528_v8, %v20242_v57 }
 0x684   : > { %v15545_v17 = vcombine.high %v15535_v11, %v15535_v11  ;;  %v16334_v44 = vrot.slane %v15535_v11, %v20242_v57  ;;  %v16183_v0 = vrot.slane %v16176_v10, %v20242_v57  ;;  %v16348_v21 = vrot.slane %v15543_v38, %v20242_v57 }
 0x685   : > { %v15553_v15 = vrot.slane %v15433_v24, %v20242_v57  ;;  %v19670_v31 = vpop.f32.mrf.mxu1  ;;  %v16752_v48 = vrot.slane %v15542_v51, %v20242_v57  ;;  %v16882_v7 = vrot.slane %v15544_v62, %v20242_v57  ;;  %v16745_v1 = vrot.slane %v16738_v5, %v20242_v57 }
 0x686   : > { %v16341_v18 = vrot.slane %v16334_v44, %v20242_v57  ;;  %v16608_v54 = vrot.slane %v15545_v17, %v20242_v57  ;;  %v16269_v47 = vunpack.c.l.b16 %v16183_v0  ;;  %v16355_v27 = vrot.slane %v16348_v21, %v20242_v57 }
 0x687   : > { %v15560_v53 = vrot.slane %v18854_v2, %v20242_v57  ;;  %v26191_v43 = vpop.f32.mrf.mxu1  ;;  %v16759_v50 = vrot.slane %v16752_v48, %v20242_v57  ;;  %v16889_v42 = vrot.slane %v16882_v7, %v20242_v57  ;;  %v16844_v22 = vunpack.c.l.b16 %v16745_v1 }
 0x688   : > { %v16526_v37 = vunpack.c.l.b16 %v16341_v18  ;;  %v16615_v45 = vrot.slane %v16608_v54, %v20242_v57  ;;  %v16278_v3 = vrot.slane %v16269_v47, 7  ;;  %v16527_v36 = vunpack.c.l.b16 %v16355_v27 }
 0x689   : > { %v15419_v6 = vmax.f32 %v26157_v40, 0.0  ;;  %v19671_v8 = vpop.f32.mrf.mxu1  ;;  %v16845_v10 = vunpack.c.l.b16 %v16759_v50  ;;  %v16932_v24 = vunpack.c.l.b16 %v16889_v42  ;;  %v16864_v51 = vrot.slane %v16844_v22, 1 }
 0x68a   : > { %v16566_v11 = vrot.slane %v16526_v37, 1  ;;  %v16701_v38 = vunpack.c.l.b16 %v16615_v45  ;;  %v26199_v2 = vsel %vm5750_vm1, %v16278_v3, %v26101_v13  ;;  %v16542_v23 = vrot.slane %v16527_v36, 7 }
 0x68b   : > { %v15561_v62 = vcombine.high %v15553_v15, %v15553_v15  ;;  %v26201_v17 = vpop.f32.mrf.mxu1  ;;  %v16293_v44 = vpack.c.b16 %v26199_v2, %v26199_v2  ;;  %v16852_v60 = vrot.slane %v16845_v10, 7  ;;  %v15562_v40 = vcombine.high %v15560_v53, %v15560_v53 }
 0x68c   : > { %v16710_v35 = vrot.slane %v16701_v38, 7  ;;  %v26206_v0 = vsel %vm5750_vm1, %v16542_v23, %v16526_v37  ;;  %v26209_v21 = vsel %vm5750_vm1, %v16527_v36, %v16566_v11  ;;  %v16936_v5 = vrot.slane %v16932_v24, 7 }
 0x68d   : > { %v15569_v13 = vrot.slane %v15553_v15, %v20242_v57  ;;  %v19674_v31 = vpop.f32.mrf.mxu1  ;;  %v26216_v54 = vsel %vm5750_vm1, %v16852_v60, %v16844_v22  ;;  %v26219_v48 = vrot.slane %v16293_v44, %v20242_v57  ;;  %v26224_v47 = vsel %vm5750_vm1, %v16845_v10, %v16864_v51 }
 0x68e   : > { %v26213_v18 = vsel %vm5750_vm1, %v16710_v35, %v16527_v36  ;;  %27846 = vst [vmem:[#allocation34_spill] sm:$0xff] %v26216_v54  ;;  %v16937_v27 = vsel %vm5750_vm1, %v16936_v5, %v16845_v10  ;;  %v15576_v1 = vrot.slane %v15560_v53, %v20242_v57  ;;  %v15583_v42 = vrot.slane %v15561_v62, %v20242_v57 }
 0x68f   : > { %27847 = vst [vmem:[#allocation32_spill] sm:$0xff] %v26219_v48  ;;  %v26230_v37 = vpop.f32.mrf.mxu1  ;;  %v16944_v45 = vpack.c.b16 %v16937_v27, %v16937_v27  ;;  %v15590_v3 = vrot.slane %v15562_v40, %v20242_v57  ;;  %v15591_v36 = vcombine.high %v15569_v13, %v15569_v13  ;;  %v15420_v11 = vmax.f32 %v26160_v28, 0.0 }
 0x690   : > { %v15592_v22 = vcombine.high %v15576_v1, %v15576_v1  ;;  %v16190_v8 = vrot.slane %v15576_v1, %v20242_v57  ;;  %v15593_v10 = vcombine.high %v15583_v42, %v15583_v42 }
 0x691   : > { %v19675_v38 = vpop.f32.mrf.mxu1  ;;  %v15594_v24 = vcombine.high %v15590_v3, %v15590_v3  ;;  %v16362_v23 = vrot.slane %v15590_v3, %v20242_v57  ;;  %v15930_v51 = vrot.slane %v15591_v36, %v20242_v57  ;;  %v15434_v35 = vpack.c.bf16 %v15420_v11, %v15419_v6 }
 0x692   : > { %v16197_v62 = vrot.slane %v16190_v8, %v20242_v57  ;;  %v16376_v44 = vrot.slane %v15592_v22, %v20242_v57  ;;  %v15944_v40 = vrot.slane %v15593_v10, %v20242_v57  ;;  %v18855_v13 = vpack.c.bf16 %v15420_v11, %v15420_v11 }
 0x693   : > { %v26244_v60 = vpop.f32.mrf.mxu1  ;;  %v16369_v28 = vrot.slane %v16362_v23, %v20242_v57  ;;  %v16622_v5 = vrot.slane %v15594_v24, %v20242_v57  ;;  %v15937_v31 = vrot.slane %v15930_v51, %v20242_v57  ;;  %v15602_v42 = vrot.slane %v15434_v35, %v20242_v57 }
 0x694   : > { %v16270_v27 = vunpack.c.l.b16 %v16197_v62  ;;  %v16383_v1 = vrot.slane %v16376_v44, %v20242_v57  ;;  %v15951_v36 = vrot.slane %v15944_v40, %v20242_v57  ;;  %v15609_v8 = vrot.slane %v18855_v13, %v20242_v57 }
 0x695   : > { %v19678_v3 = vpop.f32.mrf.mxu1  ;;  %v16528_v6 = vunpack.c.l.b16 %v16369_v28  ;;  %v16629_v22 = vrot.slane %v16622_v5, %v20242_v57  ;;  %v16096_v38 = vunpack.c.l.b16 %v15937_v31  ;;  %v15610_v24 = vcombine.high %v15602_v42, %v15602_v42 }
 0x696   : > { %v16280_v10 = vrot.slane %v16270_v27, 7  ;;  %v16529_v23 = vunpack.c.l.b16 %v16383_v1  ;;  %v16097_v51 = vunpack.c.l.b16 %v15951_v36  ;;  %v15611_v44 = vcombine.high %v15609_v8, %v15609_v8 }
 0x697   : > { %v26255_v11 = vpop.f32.mrf.mxu1  ;;  %v16568_v62 = vrot.slane %v16528_v6, 1  ;;  %v16702_v53 = vunpack.c.l.b16 %v16629_v22  ;;  %v16136_v50 = vrot.slane %v16096_v38, 1  ;;  %v15618_v3 = vrot.slane %v15602_v42, %v20242_v57 }
 0x698   : > { %v16544_v35 = vrot.slane %v16529_v23, 7  ;;  %v15625_v40 = vrot.slane %v15609_v8, %v20242_v57  ;;  %v26260_v5 = vrot.slane %v16944_v45, %v20242_v57  ;;  %v16112_v13 = vrot.slane %v16097_v51, 7 }
 0x699   : > { %v19679_v28 = vpop.f32.mrf.mxu1  ;;  %v26263_v31 = vsel %vm5750_vm1, %v16280_v10, %v16097_v51  ;;  %v16712_v27 = vrot.slane %v16702_v53, 7  ;;  %v26269_v36 = vsel %vm5750_vm1, %v16529_v23, %v16568_v62  ;;  %v15632_v22 = vrot.slane %v15610_v24, %v20242_v57 }
 0x69a   : > { %27848 = vst [vmem:[#allocation27_spill] sm:$0xff] %v26260_v5  ;;  %v26266_v1 = vsel %vm5750_vm1, %v16544_v35, %v16528_v6  ;;  %v15639_v42 = vrot.slane %v15611_v44, %v20242_v57  ;;  %v26276_v45 = vsel %vm5750_vm1, %v16112_v13, %v16096_v38  ;;  %v26279_v28 = vsel %vm5750_vm1, %v16097_v51, %v16136_v50 }
 0x69b   : > { %v26273_v8 = vpop.f32.mrf.mxu1  ;;  %v15640_v6 = vcombine.high %v15618_v3, %v15618_v3  ;;  %v26284_v10 = vsel %vm5750_vm1, %v16712_v27, %v16529_v23  ;;  %v15641_v62 = vcombine.high %v15625_v40, %v15625_v40  ;;  %v15642_v44 = vcombine.high %v15632_v22, %v15632_v22 }
 0x69c   : > { %v15643_v15 = vcombine.high %v15639_v42, %v15639_v42  ;;  %v15958_v38 = vrot.slane %v15618_v3, %v20242_v57  ;;  %v15972_v13 = vrot.slane %v15632_v22, %v20242_v57  ;;  %v16404_v4 = vrot.slane %v15625_v40, %v20242_v57 }
 0x69d   : > { %v19682_v35 = vpop.f32.mrf.mxu1  ;;  %v16204_v50 = vrot.slane %v15640_v6, %v20242_v57  ;;  %v16390_v51 = vrot.slane %v15642_v44, %v20242_v57  ;;  %v16636_v23 = vrot.slane %v15639_v42, %v20242_v57  ;;  %v16766_v27 = vrot.slane %v15641_v62, %v20242_v57 }
 0x69e   : > { %v15965_v24 = vrot.slane %v15958_v38, %v20242_v57  ;;  %v15979_v35 = vrot.slane %v15972_v13, %v20242_v57  ;;  %v16780_v3 = vrot.slane %v15643_v15, %v20242_v57  ;;  %v16411_v6 = vrot.slane %v16404_v4, %v20242_v57 }
 0x69f   : > { %v15401_v53 = vpop.f32.mrf.mxu1  ;;  %v16211_v7 = vrot.slane %v16204_v50, %v20242_v57  ;;  %v16397_v22 = vrot.slane %v16390_v51, %v20242_v57  ;;  %v16643_v44 = vrot.slane %v16636_v23, %v20242_v57  ;;  %v16773_v40 = vrot.slane %v16766_v27, %v20242_v57 }
 0x6a0   : > { %v16098_v12 = vunpack.c.l.b16 %v15965_v24  ;;  %v16099_v62 = vunpack.c.l.b16 %v15979_v35  ;;  %v16787_v38 = vrot.slane %v16780_v3, %v20242_v57  ;;  %v16531_v13 = vunpack.c.l.b16 %v16411_v6 }
 0x6a1   : > { %v19683_v42 = vpop.f32.mrf.mxu1  ;;  %v16271_v56 = vunpack.c.l.b16 %v16211_v7  ;;  %v16530_v19 = vunpack.c.l.b16 %v16397_v22  ;;  %v16703_v20 = vunpack.c.l.b16 %v16643_v44  ;;  %v16846_v50 = vunpack.c.l.b16 %v16773_v40 }
 0x6a2   : > { %v16114_v15 = vrot.slane %v16099_v62, 7  ;;  %v16138_v48 = vrot.slane %v16098_v12, 1  ;;  %v26304_v5 = vunpack.c.l.b16 %v16787_v38  ;;  %v16546_v4 = vrot.slane %v16531_v13, 7 }
 0x6a3   : > { %v15406_v26 = vpop.f32.mrf.mxu1  ;;  %v16282_v51 = vrot.slane %v16271_v56, 7  ;;  %v16570_v23 = vrot.slane %v16530_v19, 1  ;;  %v16714_v54 = vrot.slane %v16703_v20, 7  ;;  %v16866_v27 = vrot.slane %v16846_v50, 1 }
 0x6a4   : > { %v26309_v24 = vsel %vm5750_vm1, %v16114_v15, %v16098_v12  ;;  %v16854_v3 = vrot.slane %v26304_v5, 7  ;;  %v26316_v56 = vsel %vm5750_vm1, %v16099_v62, %v16138_v48  ;;  %v26321_v20 = vsel %vm5750_vm1, %v16546_v4, %v16530_v19 }
 0x6a5   : > { %v19686_v42 = vpop.f32.mrf.mxu1  ;;  %v26312_v35 = vsel %vm5750_vm1, %v16282_v51, %v16099_v62  ;;  %v26324_v6 = vsel %vm5750_vm1, %v16531_v13, %v16570_v23  ;;  %v26329_v12 = vsel %vm5750_vm1, %v16714_v54, %v16531_v13  ;;  %v26336_v48 = vsel %vm5750_vm1, %v26304_v5, %v16866_v27 }
 0x6a6   : > { %v16295_v22 = vpack.c.b16 %v26312_v35, %v26312_v35  ;;  %v26332_v40 = vsel %vm5750_vm1, %v16854_v3, %v16846_v50  ;;  %27850 = vst [vmem:[#allocation14_spill] sm:$0xff] %v26336_v48  ;;  %v15375_v13 = vadd.f32 %v26167_v49, %v26009_v25  ;;  %v15378_v15 = vadd.f32 %v26191_v43, %v26015_v32 }
 0x6a7   : > { %v26326_v44 = vpop.f32.mrf.mxu1  ;;  %27849 = vst [vmem:[#allocation24_spill] sm:$0xff] %v26332_v40  ;;  %v15383_v51 = vadd.f32 %v26201_v17, %v26018_v52  ;;  %v15386_v4 = vadd.f32 %v26230_v37, %v26024_v63  ;;  %v15391_v23 = vadd.f32 %v26244_v60, %v26027_v29  ;;  %v15394_v42 = vadd.f32 %v26255_v11, %v26030_v58 }
 0x6a8   : > { %v26343_v38 = vrot.slane %v16295_v22, %v20242_v57  ;;  %v15399_v25 = vadd.f32 %v26273_v8, %v26039_v55  ;;  %v15402_v32 = vadd.f32 %v15401_v53, %v26042_v9  ;;  %v15421_v49 = vmax.f32 %v15375_v13, 0.0 }
 0x6a9   : > { %v19687_v50 = vpop.f32.mrf.mxu1  ;;  %v15422_v43 = vmax.f32 %v15378_v15, 0.0  ;;  %v15423_v52 = vmax.f32 %v15383_v51, 0.0  ;;  %v15424_v17 = vmax.f32 %v15386_v4, 0.0  ;;  %v15425_v3 = vmax.f32 %v15391_v23, 0.0 }
 0x6aa   : > { %27851 = vst [vmem:[#allocation12_spill] sm:$0xff] %v26343_v38  ;;  %v15426_v63 = vmax.f32 %v15394_v42, 0.0  ;;  %v15427_v37 = vmax.f32 %v15399_v25, 0.0  ;;  %v15428_v22 = vmax.f32 %v15402_v32, 0.0  ;;  %v26378_v4 = vadd.f32 %v15406_v26, %v26051_v41 }
 0x6ab   : > { %v15435_v29 = vpack.c.bf16 %v15422_v43, %v15421_v49  ;;  %v18856_v60 = vpack.c.bf16 %v15422_v43, %v15422_v43  ;;  %v15436_v50 = vpack.c.bf16 %v15424_v17, %v15423_v52  ;;  %v18857_v27 = vpack.c.bf16 %v15424_v17, %v15424_v17 }
 0x6ac   : > { %v15437_v54 = vpack.c.bf16 %v15426_v63, %v15425_v3  ;;  %v18858_v7 = vpack.c.bf16 %v15426_v63, %v15426_v63  ;;  %v15438_v58 = vpack.c.bf16 %v15428_v22, %v15427_v37  ;;  %v18859_v11 = vpack.c.bf16 %v15428_v22, %v15428_v22 }
 0x6ad   : > { %v15651_v55 = vrot.slane %v15435_v29, %v20242_v57  ;;  %v15658_v9 = vrot.slane %v18856_v60, %v20242_v57  ;;  %v15690_v8 = vrot.slane %v15436_v50, %v20242_v57  ;;  %v15697_v53 = vrot.slane %v18857_v27, %v20242_v57 }
 0x6ae   : > { %v26369_v13 = vrot.slane %v15437_v54, %v20242_v57  ;;  %v26372_v15 = vrot.slane %v18858_v7, %v20242_v57  ;;  %v26375_v51 = vrot.slane %v15438_v58, %v20242_v57  ;;  %v26385_v7 = vrot.slane %v18859_v11, %v20242_v57 }
 0x6af   : > { %v15659_v23 = vcombine.high %v15658_v9, %v15658_v9  ;;  %v15666_v42 = vrot.slane %v15651_v55, %v20242_v57  ;;  %v15673_v25 = vrot.slane %v15658_v9, %v20242_v57  ;;  %v15698_v32 = vcombine.high %v15690_v8, %v15690_v8 }
 0x6b0   : > { %v15699_v49 = vcombine.high %v15697_v53, %v15697_v53  ;;  %v15706_v27 = vrot.slane %v15690_v8, %v20242_v57  ;;  %v15713_v54 = vrot.slane %v15697_v53, %v20242_v57 }
 0x6b1   : > { %v15680_v43 = vrot.slane %v15659_v23, %v20242_v57  ;;  %v15681_v52 = vcombine.high %v15673_v25, %v15673_v25  ;;  %v15986_v26 = vrot.slane %v15673_v25, %v20242_v57  ;;  %v16896_v41 = vrot.slane %v15666_v42, %v20242_v57 }
 0x6b2   : > { %v15720_v17 = vrot.slane %v15698_v32, %v20242_v57  ;;  %v15727_v3 = vrot.slane %v15699_v49, %v20242_v57  ;;  %v15728_v63 = vcombine.high %v15706_v27, %v15706_v27  ;;  %v15729_v11 = vcombine.high %v15713_v54, %v15713_v54 }
 0x6b3   : > { %v15682_v22 = vcombine.high %v15680_v43, %v15680_v43  ;;  %v15993_v29 = vrot.slane %v15986_v26, %v20242_v57  ;;  %v16000_v60 = vrot.slane %v15680_v43, %v20242_v57  ;;  %v16218_v50 = vrot.slane %v15681_v52, %v20242_v57 }
 0x6b4   : > { %v16903_v58 = vrot.slane %v16896_v41, %v20242_v57  ;;  %v15730_v55 = vcombine.high %v15720_v17, %v15720_v17  ;;  %v16014_v9 = vrot.slane %v15728_v63, %v20242_v57  ;;  %v16232_v43 = vrot.slane %v15713_v54, %v20242_v57 }
 0x6b5   : > { %v16007_v8 = vrot.slane %v16000_v60, %v20242_v57  ;;  %v16100_v53 = vunpack.c.l.b16 %v15993_v29  ;;  %v16225_v23 = vrot.slane %v16218_v50, %v20242_v57  ;;  %v16418_v42 = vrot.slane %v15682_v22, %v20242_v57 }
 0x6b6   : > { %v16933_v25 = vunpack.c.l.b16 %v16903_v58  ;;  %v16021_v32 = vrot.slane %v16014_v9, %v20242_v57  ;;  %v16028_v49 = vrot.slane %v15730_v55, %v20242_v57  ;;  %v16239_v50 = vrot.slane %v16232_v43, %v20242_v57 }
 0x6b7   : > { %v16101_v52 = vunpack.c.l.b16 %v16007_v8  ;;  %v16140_v26 = vrot.slane %v16100_v53, 1  ;;  %v16272_v41 = vunpack.c.l.b16 %v16225_v23  ;;  %v16425_v62 = vrot.slane %v16418_v42, %v20242_v57 }
 0x6b8   : > { %v16938_v63 = vrot.slane %v16933_v25, 7  ;;  %v16035_v60 = vrot.slane %v16028_v49, %v20242_v57  ;;  %v16102_v29 = vunpack.c.l.b16 %v16021_v32  ;;  %v15731_v37 = vcombine.high %v15727_v3, %v15727_v3 }
 0x6b9   : > { %v16116_v19 = vrot.slane %v16101_v52, 7  ;;  %v16284_v22 = vrot.slane %v16272_v41, 7  ;;  %v16532_v58 = vunpack.c.l.b16 %v16425_v62  ;;  %v16273_v8 = vunpack.c.l.b16 %v16239_v50 }
 0x6ba   : > { %v16939_v55 = vsel %vm5750_vm1, %v16938_v63, %v26304_v5  ;;  %v16103_v9 = vunpack.c.l.b16 %v16035_v60  ;;  %v16142_v54 = vrot.slane %v16102_v29, 1  ;;  %v26414_v42 = vsel %vm5750_vm1, %v16101_v52, %v16140_v26 }
 0x6bb   : > { %v26411_v23 = vsel %vm5750_vm1, %v16116_v19, %v16100_v53  ;;  %v26417_v25 = vsel %vm5750_vm1, %v16284_v22, %v16101_v52  ;;  %v16945_v32 = vpack.c.b16 %v16939_v55, %v16939_v55  ;;  %v16572_v49 = vrot.slane %v16532_v58, 1 }
 0x6bc   : > { %v16118_v43 = vrot.slane %v16103_v9, 7  ;;  %v16286_v41 = vrot.slane %v16273_v8, 7  ;;  %v16432_v63 = vrot.slane %v15706_v27, %v20242_v57  ;;  %v16446_v19 = vrot.slane %v15727_v3, %v20242_v57 }
 0x6bd   : > { %v26422_v5 = vrot.slane %v16945_v32, %v20242_v57  ;;  %v16460_v53 = vrot.slane %v15729_v11, %v20242_v57  ;;  %v26428_v26 = vsel %vm5750_vm1, %v16103_v9, %v16142_v54  ;;  %v16650_v60 = vrot.slane %v15720_v17, %v20242_v57 }
 0x6be   : > { %v26431_v52 = vsel %vm5750_vm1, %v16286_v41, %v16103_v9  ;;  %v16664_v50 = vrot.slane %v15731_v37, %v20242_v57  ;;  %v26436_v22 = vsel %vm5750_vm1, %v16118_v43, %v16102_v29  ;;  %v16439_v3 = vrot.slane %v16432_v63, %v20242_v57 }
 0x6bf   : > { %27852 = vst [vmem:[#allocation45_spill] sm:$0xff] %v26422_v5  ;;  %v16297_v27 = vpack.c.b16 %v26431_v52, %v26431_v52  ;;  %v16453_v11 = vrot.slane %v16446_v19, %v20242_v57  ;;  %v16467_v9 = vrot.slane %v16460_v53, %v20242_v57  ;;  %v16657_v54 = vrot.slane %v16650_v60, %v20242_v57 }
 0x6c0   : > { %v16671_v17 = vrot.slane %v16664_v50, %v20242_v57  ;;  %v16533_v37 = vunpack.c.l.b16 %v16439_v3  ;;  %v15748_v32 = vcombine.high %v26372_v15, %v26372_v15  ;;  %v15755_v19 = vrot.slane %v26369_v13, %v20242_v57 }
 0x6c1   : > { %v16534_v8 = vunpack.c.l.b16 %v16453_v11  ;;  %v26448_v29 = vrot.slane %v16297_v27, %v20242_v57  ;;  %v16535_v43 = vunpack.c.l.b16 %v16467_v9  ;;  %v16704_v41 = vunpack.c.l.b16 %v16657_v54 }
 0x6c2   : > { %v16705_v63 = vunpack.c.l.b16 %v16671_v17  ;;  %v16548_v55 = vrot.slane %v16533_v37, 7  ;;  %v26455_v53 = vsel %vm5750_vm1, %v16533_v37, %v16572_v49  ;;  %v15762_v62 = vrot.slane %v26372_v15, %v20242_v57 }
 0x6c3   : > { %27853 = vst [vmem:[#allocation44_spill] sm:$0xff] %v26448_v29  ;;  %27854 = vst [vmem:[#allocation47_spill] sm:$0xff] %v26455_v53  ;;  %v16574_v60 = vrot.slane %v16534_v8, 1  ;;  %v16550_v3 = vrot.slane %v16535_v43, 7  ;;  %v16716_v27 = vrot.slane %v16704_v41, 7  ;;  %v27855_v49 = vcombine.high %v26369_v13, %v26369_v13 }
 0x6c4   : > { %v16718_v11 = vrot.slane %v16705_v63, 7  ;;  %v26462_v9 = vsel %vm5750_vm1, %v16548_v55, %v16532_v58  ;;  %v15776_v5 = vrot.slane %v15748_v32, %v20242_v57  ;;  %v15777_v58 = vcombine.high %v15755_v19, %v15755_v19 }
 0x6c5   : > { %v15769_v17 = vrot.slane %v27855_v49, %v20242_v57  ;;  %v26472_v50 = vsel %vm5750_vm1, %v16550_v3, %v16534_v8  ;;  %v26475_v41 = vsel %vm5750_vm1, %v16535_v43, %v16574_v60  ;;  %v26478_v15 = vsel %vm5750_vm1, %v16716_v27, %v16533_v37 }
 0x6c6   : > { %27856 = vst [vmem:[#allocation46_spill] sm:$0xff] %v26475_v41  ;;  %27857 = vst [vmem:[#allocation65_spill] sm:$0xff] %v26478_v15  ;;  %v26481_v55 = vsel %vm5750_vm1, %v16718_v11, %v16535_v43  ;;  %v15778_v32 = vcombine.high %v15762_v62, %v15762_v62  ;;  %v15779_v49 = vcombine.high %v15776_v5, %v15776_v5 }
 0x6c7   : > { %v16794_v8 = vrot.slane %v15755_v19, %v20242_v57  ;;  %v16808_v60 = vrot.slane %v15769_v17, %v20242_v57  ;;  %v16910_v3 = vrot.slane %v15777_v58, %v20242_v57  ;;  %v15795_v43 = vcombine.high %v26375_v51, %v26375_v51 }
 0x6c8   : > { %v16042_v37 = vrot.slane %v15778_v32, %v20242_v57  ;;  %v15796_v27 = vcombine.high %v26385_v7, %v26385_v7  ;;  %v15803_v11 = vrot.slane %v26375_v51, %v20242_v57  ;;  %v16056_v62 = vrot.slane %v15779_v49, %v20242_v57 }
 0x6c9   : > { %v16801_v5 = vrot.slane %v16794_v8, %v20242_v57  ;;  %v16815_v19 = vrot.slane %v16808_v60, %v20242_v57  ;;  %v16917_v17 = vrot.slane %v16910_v3, %v20242_v57  ;;  %v15810_v32 = vrot.slane %v26385_v7, %v20242_v57 }
 0x6ca   : > { %v16049_v58 = vrot.slane %v16042_v37, %v20242_v57  ;;  %v15817_v54 = vrot.slane %v15795_v43, %v20242_v57  ;;  %v15824_v63 = vrot.slane %v15796_v27, %v20242_v57  ;;  %v16063_v13 = vrot.slane %v16056_v62, %v20242_v57 }
 0x6cb   : > { %v16848_v51 = vunpack.c.l.b16 %v16801_v5  ;;  %v16849_v29 = vunpack.c.l.b16 %v16815_v19  ;;  %v16934_v49 = vunpack.c.l.b16 %v16917_v17  ;;  %v15825_v38 = vcombine.high %v15803_v11, %v15803_v11 }
 0x6cc   : > { %v16104_v60 = vunpack.c.l.b16 %v16049_v58  ;;  %v15826_v3 = vcombine.high %v15810_v32, %v15810_v32  ;;  %v16105_v53 = vunpack.c.l.b16 %v16063_v13  ;;  %v15827_v48 = vcombine.high %v15817_v54, %v15817_v54 }
 0x6cd   : > { %v16856_v37 = vrot.slane %v16849_v29, 7  ;;  %v16868_v15 = vrot.slane %v16848_v51, 1  ;;  %v16940_v40 = vrot.slane %v16934_v49, 7  ;;  %v16070_v43 = vrot.slane %v15810_v32, %v20242_v57 }
 0x6ce   : > { %v16144_v7 = vrot.slane %v16104_v60, 1  ;;  %v16084_v27 = vrot.slane %v15824_v63, %v20242_v57  ;;  %v16120_v62 = vrot.slane %v16105_v53, 7  ;;  %v15828_v17 = vcombine.high %v15824_v63, %v15824_v63 }
 0x6cf   : > { %v26512_v5 = vsel %vm5750_vm1, %v16856_v37, %v16848_v51  ;;  %v16941_v19 = vsel %vm5750_vm1, %v16940_v40, %v16849_v29  ;;  %v26519_v13 = vsel %vm5750_vm1, %v16849_v29, %v16868_v15  ;;  %v16077_v8 = vrot.slane %v16070_v43, %v20242_v57 }
 0x6d0   : > { %27858 = vst [vmem:[#allocation64_spill] sm:$0xff] %v26512_v5  ;;  %v26516_v58 = vsel %vm5750_vm1, %v16105_v53, %v16144_v7  ;;  %v16946_v49 = vpack.c.b16 %v16941_v19, %v16941_v19  ;;  %v16091_v41 = vrot.slane %v16084_v27, %v20242_v57  ;;  %v16246_v51 = vrot.slane %v15803_v11, %v20242_v57 }
 0x6d1   : > { %v16260_v37 = vrot.slane %v15826_v3, %v20242_v57  ;;  %v26528_v40 = vsel %vm5750_vm1, %v16120_v62, %v16104_v60  ;;  %v16106_v29 = vunpack.c.l.b16 %v16077_v8  ;;  %v16474_v15 = vrot.slane %v15817_v54, %v20242_v57 }
 0x6d2   : > { %v26531_v63 = vrot.slane %v16946_v49, %v20242_v57  ;;  %v16107_v7 = vunpack.c.l.b16 %v16091_v41  ;;  %v16253_v43 = vrot.slane %v16246_v51, %v20242_v57  ;;  %v16488_v27 = vrot.slane %v15825_v38, %v20242_v57 }
 0x6d3   : > { %v16267_v19 = vrot.slane %v16260_v37, %v20242_v57  ;;  %v16146_v32 = vrot.slane %v16106_v29, 1  ;;  %v16481_v11 = vrot.slane %v16474_v15, %v20242_v57  ;;  %v16502_v3 = vrot.slane %v15828_v17, %v20242_v57 }
 0x6d4   : > { %27859 = vst [vmem:[#allocation29_spill] sm:$0xff] %v26531_v63  ;;  %v16678_v60 = vrot.slane %v15827_v48, %v20242_v57  ;;  %v16122_v62 = vrot.slane %v16107_v7, 7  ;;  %v16274_v49 = vunpack.c.l.b16 %v16253_v43  ;;  %v16495_v8 = vrot.slane %v16488_v27, %v20242_v57 }
 0x6d5   : > { %v16275_v63 = vunpack.c.l.b16 %v16267_v19  ;;  %v18882_v54 = vpack.c.b16 %v26516_v58, %v26528_v40  ;;  %v16509_v41 = vrot.slane %v16502_v3, %v20242_v57  ;;  %v16536_v51 = vunpack.c.l.b16 %v16481_v11 }
 0x6d6   : > { %v16685_v38 = vrot.slane %v16678_v60, %v20242_v57  ;;  %v26546_v37 = vsel %vm5750_vm1, %v16122_v62, %v16106_v29  ;;  %v16288_v15 = vrot.slane %v16274_v49, 7  ;;  %v16537_v5 = vunpack.c.l.b16 %v16495_v8 }
 0x6d7   : > { %v16290_v17 = vrot.slane %v16275_v63, 7  ;;  %v26549_v48 = vsel %vm5750_vm1, %v16107_v7, %v16146_v32  ;;  %v26551_v43 = vunpack.c.l.b16 %v16509_v41  ;;  %v16576_v19 = vrot.slane %v16536_v51, 1 }
 0x6d8   : > { %v16706_v27 = vunpack.c.l.b16 %v16685_v38  ;;  %v16289_v58 = vsel %vm5750_vm1, %v16288_v15, %v16105_v53  ;;  %v16552_v11 = vrot.slane %v16537_v5, 7  ;;  %v18885_v29 = vpack.c.b16 %v26549_v48, %v26546_v37 }
 0x6d9   : > { %v26555_v40 = vsel %vm5750_vm1, %v16290_v17, %v16107_v7  ;;  %v26562_v3 = vsel %vm5750_vm1, %v16537_v5, %v16576_v19  ;;  %v15429_v60 = vmax.f32 %v26378_v4, 0.0  ;;  %v15410_v53 = vadd.f32 %v26326_v44, %v26055_v39 }
 0x6da   : > { %v16299_v63 = vpack.c.b16 %v26555_v40, %v26555_v40  ;;  %v16720_v32 = vrot.slane %v16706_v27, 7  ;;  %v16553_v62 = vsel %vm5750_vm1, %v16552_v11, %v16536_v51  ;;  %v27860_v7 = vpack.c.b16 %v26112_v14, %v26108_v16 }
 0x6db   : > { %v27861_v8 = vpack.c.b16 %v26115_v30, %v26125_v59  ;;  %v16578_v38 = vrot.slane %v26551_v43, 1  ;;  %v18883_v4 = vpack.c.b16 %v16553_v62, %v16289_v58  ;;  %v15430_v39 = vmax.f32 %v15410_v53, 0.0 }
 0x6dc   : > { %v16958_v49 = vrot.slane %v27860_v7, %v20242_v57  ;;  %v26578_v37 = vsel %vm5750_vm1, %v16720_v32, %v16537_v5  ;;  %v26581_v51 = vrot.slane %v16299_v63, %v20242_v57  ;;  %v27862_v16 = vpack.c.b16 %v26122_v33, %v26138_v34 }
 0x6dd   : > { %v16965_v41 = vrot.slane %v27861_v8, %v20242_v57  ;;  %v27863_v30 = vpack.c.b16 %v26206_v0, %v26199_v2  ;;  %v27864_v5 = vpack.c.b16 %v26279_v28, %v26276_v45  ;;  %v27865_v17 = vpack.c.b16 %v26266_v1, %v26263_v31 }
 0x6de   : > { %v26587_v14 = vrot.slane %v27862_v16, %v20242_v57  ;;  %v27866_v33 = vpack.c.b16 %v26316_v56, %v26309_v24  ;;  %v27867_v2 = vpack.c.b16 %v26321_v20, %v26312_v35  ;;  %v18884_v45 = vpack.c.b16 %v26578_v37, %v26562_v3 }
 0x6df   : > { %v16980_v44 = vcombine.low %v16958_v49, %v16965_v41  ;;  %v17020_v59 = vrot.slane %v27863_v30, %v20242_v57  ;;  %v17076_v15 = vrot.slane %v27864_v5, %v20242_v57  ;;  %v17083_v48 = vrot.slane %v27865_v17, %v20242_v57 }
 0x6e0   : > { %v26605_v34 = vrot.slane %v27866_v33, %v20242_v57  ;;  %v17138_v0 = vrot.slane %v27867_v2, %v20242_v57  ;;  %v15439_v28 = vpack.c.bf16 %v15430_v39, %v15429_v60  ;;  %v18860_v19 = vpack.c.bf16 %v15430_v39, %v15430_v39 }
 0x6e1   : > { %v17035_v27 = vcombine.low %v26587_v14, %v17020_v59  ;;  %v16988_v31 = vrot.slane %v16980_v44, %v20242_v57  ;;  %v17098_v1 = vcombine.low %v17076_v15, %v17083_v48  ;;  %v18876_v24 = vpack.c.b16 %v26462_v9, %v26417_v25 }
 0x6e2   : > { %v17153_v58 = vcombine.low %v26605_v34, %v17138_v0  ;;  %v15836_v56 = vrot.slane %v15439_v28, %v20242_v57  ;;  %v15843_v35 = vrot.slane %v18860_v19, %v20242_v57  ;;  %v27868_v20 = vpack.c.b16 %v26414_v42, %v26411_v23 }
 0x6e3   : > { %v27869_v63 = vpack.c.b16 %v26428_v26, %v26436_v22  ;;  %v17043_v60 = vrot.slane %v17035_v27, %v20242_v57  ;;  %v17106_v62 = vrot.slane %v17098_v1, %v20242_v57  ;;  %v17201_v25 = vrot.slane %v18876_v24, %v20242_v57 }
 0x6e4   : > { %v17194_v11 = vrot.slane %v27868_v20, %v20242_v57  ;;  %v27870_v9 = vpack.c.b16 %v26472_v50, %v26431_v52  ;;  %v15844_v7 = vcombine.high %v15836_v56, %v15836_v56  ;;  %v15851_v23 = vrot.slane %v15836_v56, %v20242_v57 }
 0x6e5   : > { %v26628_v32 = vrot.slane %v27869_v63, %v20242_v57  ;;  %v15858_v42 = vrot.slane %v15843_v35, %v20242_v57  ;;  %v17161_v26 = vrot.slane %v17153_v58, %v20242_v57  ;;  %v17312_v8 = vrot.slane %v18882_v54, %v20242_v57 }
 0x6e6   : > { %v17256_v53 = vrot.slane %v27870_v9, %v20242_v57  ;;  %v17216_v22 = vcombine.low %v17194_v11, %v17201_v25  ;;  %v17319_v41 = vrot.slane %v18883_v4, %v20242_v57  ;;  %v15865_v39 = vrot.slane %v15844_v7, %v20242_v57 }
 0x6e7   : > { %v15866_v16 = vcombine.high %v15851_v23, %v15851_v23  ;;  %v16516_v52 = vrot.slane %v15851_v23, %v20242_v57  ;;  %v16924_v50 = vrot.slane %v15858_v42, %v20242_v57  ;;  %v18889_v5 = vcombine.low %v16988_v31, %v17043_v60 }
 0x6e8   : > { %v17271_v49 = vcombine.low %v26628_v32, %v17256_v53  ;;  %v17224_v44 = vrot.slane %v17216_v22, %v20242_v57  ;;  %v17334_v59 = vcombine.low %v17312_v8, %v17319_v41  ;;  %v15867_v15 = vcombine.high %v15865_v39, %v15865_v39 }
 0x6e9   : > { %v16523_v17 = vrot.slane %v16516_v52, %v20242_v57  ;;  %v16692_v54 = vrot.slane %v15865_v39, %v20242_v57  ;;  %v16822_v4 = vrot.slane %v15866_v16, %v20242_v57  ;;  %v16931_v48 = vrot.slane %v16924_v50, %v20242_v57 }
 0x6ea   : > { %v17279_v30 = vrot.slane %v17271_v49, %v20242_v57  ;;  %v26653_v33 = vrot.slane %v18885_v29, %v20242_v57  ;;  %v18891_v2 = vcombine.low %v17106_v62, %v17161_v26  ;;  %v16836_v31 = vrot.slane %v15867_v15, %v20242_v57 }
 0x6eb   : > { %v16539_v28 = vunpack.c.l.b16 %v16523_v17  ;;  %v16699_v19 = vrot.slane %v16692_v54, %v20242_v57  ;;  %v16829_v27 = vrot.slane %v16822_v4, %v20242_v57  ;;  %v16935_v1 = vunpack.c.l.b16 %v16931_v48 }
 0x6ec   : > { %v18893_v0 = vcombine.low %v17224_v44, %v17279_v30  ;;  %v17342_v58 = vrot.slane %v17334_v59, %v20242_v57  ;;  %v17582_v24 = vrot.slane %v18889_v5, %v20242_v57  ;;  %v17596_v56 = vrot.slane %v18891_v2, %v20242_v57  ;;  %v27873_v59 = vld [vmem:[#allocation34_spill] sm:$0xff] }
 0x6ed   : > { %v16554_v35 = vrot.slane %v16539_v28, 7  ;;  %v16579_v29 = vsel %vm5750_vm1, %v16539_v28, %v16578_v38  ;;  %v16707_v20 = vunpack.c.l.b16 %v16699_v19  ;;  %v16843_v11 = vrot.slane %v16836_v31, %v20242_v57  ;;  %v27881_v31 = vld [vmem:[#allocation47_spill] sm:$0xff] }
 0x6ee   : > { %v16850_v63 = vunpack.c.l.b16 %v16829_v27  ;;  %v16942_v60 = vrot.slane %v16935_v1, 7  ;;  %v17632_v62 = vcombine.low %v17582_v24, %v17596_v56  ;;  %v17633_v25 = vcombine.high %v17582_v24, %v17596_v56  ;;  %v27880_v27 = vld [vmem:[#allocation65_spill] sm:$0xff] }
 0x6ef   : > { %v16555_v9 = vsel %vm5750_vm1, %v16554_v35, %v26551_v43  ;;  %v16722_v53 = vrot.slane %v16707_v20, 7  ;;  %v16851_v7 = vunpack.c.l.b16 %v16843_v11  ;;  %v27871_v23 = vpack.c.b16 %v26128_v61, %v26141_v46 }
 0x6f0   : > { %v16870_v26 = vrot.slane %v16850_v63, 1  ;;  %v18886_v38 = vpack.c.b16 %v16555_v9, %v26555_v40  ;;  %v17610_v22 = vrot.slane %v18893_v0, %v20242_v57  ;;  %v26672_v49 = vrot.slane %v17632_v62, %v20242_v57  ;;  %v27878_v0 = vld [vmem:[#allocation24_spill] sm:$0xff] }
 0x6f1   : > { %v16972_v42 = vrot.slane %v27871_v23, %v20242_v57  ;;  %v16723_v8 = vsel %vm5750_vm1, %v16722_v53, %v16539_v28  ;;  %v16858_v41 = vrot.slane %v16851_v7, 7  ;;  %v16943_v43 = vsel %vm5750_vm1, %v16942_v60, %v16851_v7 }
 0x6f2   : > { %v16947_v16 = vpack.c.b16 %v16943_v43, %v16943_v43  ;;  %v18887_v52 = vpack.c.b16 %v16723_v8, %v16579_v29  ;;  %v17374_v61 = vrot.slane %v18886_v38, %v20242_v57  ;;  %v26679_v46 = vrot.slane %v17633_v25, %v20242_v57 }
 0x6f3   : > { %v16981_v39 = vcombine.low %v16972_v42, %v26587_v14  ;;  %v16859_v40 = vsel %vm5750_vm1, %v16858_v41, %v16850_v63  ;;  %v16871_v50 = vsel %vm5750_vm1, %v16851_v7, %v16870_v26  ;;  %v27872_v44 = vpack.c.b16 %v26213_v18, %v26209_v21  ;;  %v27885_v63 = vld [vmem:[#allocation64_spill] sm:$0xff] }
 0x6f4   : > { %v27874_v14 = vpack.c.b16 %v26224_v47, %v27873_v59  ;;  %v18888_v15 = vpack.c.b16 %v16871_v50, %v16859_v40  ;;  %v26692_v17 = vrot.slane %v16947_v16, %v20242_v57  ;;  %v17389_v54 = vcombine.low %v26653_v33, %v17374_v61  ;;  %v27877_v47 = vld [vmem:[#allocation14_spill] sm:$0xff]  ;;  %v27888_v16 = vld [vmem:[#allocation12_spill] sm:$0xff]  ;;  %v27889_v59 = vld [vmem:[#allocation29_spill] sm:$0xff] }
 0x6f5   : > { %v17027_v30 = vrot.slane %v27872_v44, %v20242_v57  ;;  %v27875_v4 = vpack.c.b16 %v26284_v10, %v26269_v36  ;;  %v27876_v21 = vpack.c.b16 %v26329_v12, %v26324_v6  ;;  %v27879_v28 = vpack.c.b16 %v27877_v47, %v27878_v0  ;;  %v27883_v6 = vld [vmem:[#allocation46_spill] sm:$0xff]  ;;  %v19913_v0 = vld [vmem:[%s26966_s3 + $0x138] sm:$0xff]  }
 0x6f6   : > { %v17034_v5 = vrot.slane %v27874_v14, %v20242_v57  ;;  %v27882_v1 = vpack.c.b16 %v27880_v27, %v27881_v31  ;;  %v17397_v56 = vrot.slane %v17389_v54, %v20242_v57  ;;  %v16995_v36 = vrot.slane %v16981_v39, %v20242_v57  ;;  %v27892_v31 = vld [vmem:[#allocation45_spill] sm:$0xff] }
 0x6f7   : > { %v17090_v48 = vrot.slane %v27875_v4, %v20242_v57  ;;  %v17145_v18 = vrot.slane %v27876_v21, %v20242_v57  ;;  %v17152_v19 = vrot.slane %v27879_v28, %v20242_v57  ;;  %v27884_v12 = vpack.c.b16 %v26481_v55, %v27883_v6  ;;  %v19914_v28 = vld [vmem:[%s26966_s3 + $0x1b8] sm:$0xff]  }
 0x6f8   : > { %v17036_v2 = vcombine.low %v17027_v30, %v17034_v5  ;;  %v17208_v24 = vrot.slane %v27882_v1, %v20242_v57  ;;  %v27886_v60 = vpack.c.b16 %v26519_v13, %v27885_v63  ;;  %v17419_v25 = vrot.slane %v26692_v17, %v20242_v57  ;;  %v19918_v63 = vld [vmem:[%s26966_s3 + $0x1b0] sm:$0xff]  }
 0x6f9   : > { %v17099_v10 = vcombine.low %v17090_v48, %v26605_v34  ;;  %v17263_v35 = vrot.slane %v27884_v12, %v20242_v57  ;;  %v17154_v20 = vcombine.low %v17145_v18, %v17152_v19  ;;  %v18895_v9 = vcombine.low %v17342_v58, %v17397_v56  ;;  %v27887_v58 = vld [vmem:[#allocation27_spill] sm:$0xff]  ;;  %v27894_v56 = vld [vmem:[#allocation44_spill] sm:$0xff] }
 0x6fa   : > { %v17050_v29 = vrot.slane %v17036_v2, %v20242_v57  ;;  %v17217_v11 = vcombine.low %v17208_v24, %v26628_v32  ;;  %v17270_v62 = vrot.slane %v27886_v60, %v20242_v57  ;;  %v17326_v55 = vrot.slane %v18884_v45, %v20242_v57 }
 0x6fb   : > { %v17113_v34 = vrot.slane %v17099_v10, %v20242_v57  ;;  %v17168_v53 = vrot.slane %v17154_v20, %v20242_v57  ;;  %v17381_v32 = vrot.slane %v18887_v52, %v20242_v57  ;;  %v17388_v23 = vrot.slane %v18888_v15, %v20242_v57 }
 0x6fc   : > { %v17272_v7 = vcombine.low %v17263_v35, %v17270_v62  ;;  %v17624_v13 = vrot.slane %v18895_v9, %v20242_v57  ;;  %v17335_v42 = vcombine.low %v17326_v55, %v26653_v33  ;;  %v18890_v26 = vcombine.low %v16995_v36, %v17050_v29 }
 0x6fd   : > { %v17065_v38 = vrot.slane %v27887_v58, %v20242_v57  ;;  %v17231_v8 = vrot.slane %v17217_v11, %v20242_v57  ;;  %v17390_v37 = vcombine.low %v17381_v32, %v17388_v23  ;;  %v18892_v45 = vcombine.low %v17113_v34, %v17168_v53  ;;  %v19917_v11 = vld [vmem:[%s26966_s3 + $0x130] sm:$0xff]   ;;  %v19919_v53 = vld [vmem:[%s26966_s3 + $0x168] sm:$0xff]  }
 0x6fe   : > { %v17286_v3 = vrot.slane %v17272_v7, %v20242_v57  ;;  %v17636_v41 = vcombine.low %v17610_v22, %v17624_v13  ;;  %v17637_v43 = vcombine.high %v17610_v22, %v17624_v13  ;;  %v17349_v39 = vrot.slane %v17335_v42, %v20242_v57  ;;  %v27890_v22 = vld [vmem:[#allocation32_spill] sm:$0xff]  ;;  %v19920_v7 = vld [vmem:[%s26966_s3 + $0x1e8] sm:$0xff]  }
 0x6ff   : > { %v17128_v52 = vrot.slane %v27888_v16, %v20242_v57  ;;  %v17404_v61 = vrot.slane %v17390_v37, %v20242_v57  ;;  %v17589_v40 = vrot.slane %v18890_v26, %v20242_v57  ;;  %v17603_v50 = vrot.slane %v18892_v45, %v20242_v57  ;;  %v19921_v58 = vld [vmem:[%s26966_s3 + $0x128] sm:$0xff]   ;;  %v19923_v37 = vld [vmem:[%s26966_s3 + $0x160] sm:$0xff]   ;;  %v19928_v16 = vld [vmem:[%s26966_s3 + $0x1d8] sm:$0xff]  }
 0x700   : > { %v18894_v33 = vcombine.low %v17231_v8, %v17286_v3  ;;  %v17674_v44 = vrot.slane %v17636_v41, %v20242_v57  ;;  %v17688_v30 = vrot.slane %v17637_v43, %v20242_v57  ;;  %v17301_v14 = vrot.slane %v27889_v59, %v20242_v57  ;;  %v19924_v45 = vld [vmem:[%s26966_s3 + $0x1e0] sm:$0xff]   ;;  %v19936_v59 = vld [vmem:[%s26966_s3 + $0x1c8] sm:$0xff]  }
 0x701   : > { %v27891_v5 = vrot.slane %v27890_v22, %v20242_v57  ;;  %v18896_v17 = vcombine.low %v17349_v39, %v17404_v61  ;;  %v17634_v54 = vcombine.low %v17589_v40, %v17603_v50  ;;  %v17635_v4 = vcombine.high %v17589_v40, %v17603_v50  ;;  %v19926_v43 = vld [vmem:[%s26966_s3 + $0x1a0] sm:$0xff]   ;;  %v19927_v39 = vld [vmem:[%s26966_s3 + $0x158] sm:$0xff]   ;;  %v19932_v40 = vld [vmem:[%s26966_s3 + $0x1d0] sm:$0xff]  }
 0x702   : > { %v17364_v48 = vrot.slane %v26581_v51, %v20242_v57  ;;  %v17696_v2 = vcombine.low %v26672_v49, %v17674_v44  ;;  %v17697_v21 = vcombine.high %v26672_v49, %v17674_v44  ;;  %v17700_v18 = vcombine.low %v26679_v46, %v17688_v30  ;;  %v19915_v51 = vld [vmem:[%s26966_s3 + $0x170] sm:$0xff]   ;;  %v19930_v61 = vld [vmem:[%s26966_s3 + $0x198] sm:$0xff]   ;;  %v19938_v22 = vld [vmem:[%s26966_s3 + $0x188] sm:$0xff]  }
 0x703   : > { %v17704_v15 = vcombine.low %v27891_v5, %v17065_v38  ;;  %v17701_v47 = vcombine.high %v26679_v46, %v17688_v30  ;;  %v17617_v19 = vrot.slane %v18894_v33, %v20242_v57  ;;  %v17631_v49 = vrot.slane %v18896_v17, %v20242_v57  ;;  %v19916_v46 = vld [vmem:[%s26966_s3 + $0x1f0] sm:$0xff]   ;;  %v19922_v38 = vld [vmem:[%s26966_s3 + $0x1a8] sm:$0xff]   ;;  %v19939_v5 = vld [vmem:[%s26966_s3 + $0x140] sm:$0xff]  }
 0x704   : > { %v17667_v27 = vrot.slane %v17635_v4, %v20242_v57  ;;  %v27893_v1 = vrot.slane %v27892_v31, %v20242_v57  ;;  %18226 = vmatprep.mubr.bf16.mxu1 %v17700_v18  ;;  %v27895_v36 = vrot.slane %v27894_v56, %v20242_v57  ;;  %v17707_v6 = vcombine.low %v17364_v48, %v17419_v25  ;;  %v19931_v33 = vld [vmem:[%s26966_s3 + $0x150] sm:$0xff]   ;;  %v19935_v30 = vld [vmem:[%s26966_s3 + $0x148] sm:$0xff]   ;;  %v19941_v17 = vld [vmem:[%s26966_s3 + $0x100] sm:$0xff]  }
 0x705   : > { %18267 = vmatprep.mubr.bf16.mxu0 %v17701_v47  ;;  %v17714_v12 = vrot.slane %v17704_v15, %v20242_v57  ;;  %18227 = vmatmul.mubr.bf16.vlgmr.msra.gmra.mxu1 %v17696_v2  ;;  %v17638_v35 = vcombine.low %v17617_v19, %v17631_v49  ;;  %v17639_v29 = vcombine.high %v17617_v19, %v17631_v49  ;;  %v19933_v50 = vld [vmem:[%s26966_s3 + $0x110] sm:$0xff]   ;;  %v19940_v15 = vld [vmem:[%s26966_s3 + $0x1c0] sm:$0xff]   ;;  %v19943_v4 = vld [vmem:[%s26966_s3 + $0x238] sm:$0xff]   ;;  %v27896_v48 = vmov 0.0  }
 0x706   : > { %v17705_v24 = vcombine.low %v17128_v52, %v27893_v1  ;;  %v17706_v10 = vcombine.low %v27895_v36, %v17301_v14  ;;  %18268 = vmatmul.mubr.bf16.vlgmr.msra.gmra.mxu0 %v17697_v21  ;;  %19372 = vmatpush3.bf16.msra.mxu1 %v19913_v0  ;;  %v26789_v60 = vrot.slane %v17634_v54, %v20242_v57  ;;  %v19929_v52 = vld [vmem:[%s26966_s3 + $0x118] sm:$0xff]   ;;  %v19934_v44 = vld [vmem:[%s26966_s3 + $0x190] sm:$0xff]   ;;  %v19937_v14 = vld [vmem:[%s26966_s3 + $0x108] sm:$0xff]  }
 0x707   : > { %19394 = vmatpush3.bf16.msra.mxu0 %v19914_v28  ;;  %v17735_v25 = vrot.slane %v17707_v6, %v20242_v57  ;;  %19373 = vmatprep.subr.bf16.mxu1 %v19915_v51  ;;  %v17695_v9 = vrot.slane %v17639_v29, %v20242_v57  ;;  %v26795_v34 = vrot.slane %v17638_v35, %v20242_v57  ;;  %v19942_v54 = vld [vmem:[%s26966_s3 + $0x180] sm:$0xff]   ;;  %v19944_v2 = vld [vmem:[%s26966_s3 + $0x230] sm:$0xff]   ;;  %v19945_v21 = vld [vmem:[%s26966_s3 + $0x228] sm:$0xff]  }
 0x708   : > { %v17721_v20 = vrot.slane %v17705_v24, %v20242_v57  ;;  %v17728_v62 = vrot.slane %v17706_v10, %v20242_v57  ;;  %19395 = vmatprep.subr.bf16.mxu0 %v19916_v46  ;;  %v19946_v18 = vld [vmem:[%s26966_s3 + $0x220] sm:$0xff]   ;;  %v19947_v47 = vld [vmem:[%s26966_s3 + $0x218] sm:$0xff]   ;;  %v19948_v0 = vld [vmem:[%s26966_s3 + $0x210] sm:$0xff]  }
 0x709   : > { %v17702_v23 = vcombine.low %v17667_v27, %v17695_v9  ;;  %v17703_v13 = vcombine.high %v17667_v27, %v17695_v9  ;;  %v17698_v42 = vcombine.low %v26789_v60, %v26795_v34  ;;  %v17699_v26 = vcombine.high %v26789_v60, %v26795_v34  ;;  %v19949_v28 = vld [vmem:[%s26966_s3 + $0x208] sm:$0xff]   ;;  %v19950_v51 = vld [vmem:[%s26966_s3 + $0x200] sm:$0xff]  }
 0x70a   : > { %v17736_v55 = vcombine.low %v17714_v12, %v17721_v20  ;;  %v17737_v32 = vcombine.low %v17728_v62, %v17735_v25  ;;  %19374 = vmatpush3.bf16.msra.mxu1 %v19917_v11  ;;  %v27897_v36 = vld [vmem:[#allocation5_spill] sm:$0xff]  ;;  %v19952_v35 = vld [vmem:[%s26967_s4] sm:$0x7] }
 0x70b   : > { %19396 = vmatpush3.bf16.msra.mxu0 %v19918_v63  ;;  %18308 = vmatprep.mubr.bf16.mxu1 %v17702_v23  ;;  %v17566_v10 = vsub.s32 2, %v27897_v36 }
 0x70c   : > { %v17744_v8 = vrot.slane %v17736_v55, %v20242_v57  ;;  %v17751_v3 = vrot.slane %v17737_v32, %v20242_v57  ;;  %18349 = vmatprep.mubr.bf16.mxu0 %v17703_v13  ;;  %19375 = vmatprep.subr.bf16.mxu1 %v19919_v53  ;;  %v19925_v57 = vld [vmem:[%s26966_s3 + $0x120] sm:$0xff]  }
 0x70d   : > { %19397 = vmatprep.subr.bf16.mxu0 %v19920_v7  ;;  %v17567_v29 = vrot.slane %v19952_v35, %v17566_v10 }
 0x70e   : > { %v26821_v41 = vcombine.low %v17744_v8, %v17751_v3  ;;  %19376 = vmatpush3.bf16.msra.mxu1 %v19921_v58 }
 0x70f   : > { %19398 = vmatpush3.bf16.msra.mxu0 %v19922_v38  ;;  %19377 = vmatprep.subr.bf16.mxu1 %v19923_v37 }
 0x710   : > { %19399 = vmatprep.subr.bf16.mxu0 %v19924_v45 }
 0x712   : > { %19378 = vmatpush3.bf16.msra.mxu1 %v19925_v57 }
 0x713   : > { %19400 = vmatpush3.bf16.msra.mxu0 %v19926_v43  ;;  %19379 = vmatprep.subr.bf16.mxu1 %v19927_v39 }
 0x714   : > { %19401 = vmatprep.subr.bf16.mxu0 %v19928_v16 }
 0x716   : > { %19380 = vmatpush3.bf16.msra.mxu1 %v19929_v52 }
 0x717   : > { %19402 = vmatpush3.bf16.msra.mxu0 %v19930_v61  ;;  %19381 = vmatprep.subr.bf16.mxu1 %v19931_v33 }
 0x718   : > { %19403 = vmatprep.subr.bf16.mxu0 %v19932_v40 }
 0x71a   : > { %19382 = vmatpush3.bf16.msra.mxu1 %v19933_v50 }
 0x71b   : > { %19404 = vmatpush3.bf16.msra.mxu0 %v19934_v44  ;;  %19383 = vmatprep.subr.bf16.mxu1 %v19935_v30 }
 0x71c   : > { %19405 = vmatprep.subr.bf16.mxu0 %v19936_v59 }
 0x71e   : > { %19384 = vmatpush3.bf16.msra.mxu1 %v19937_v14 }
 0x71f   : > { %19406 = vmatpush3.bf16.msra.mxu0 %v19938_v22  ;;  %19385 = vmatprep.subr.bf16.mxu1 %v19939_v5 }
 0x720   : > { %19407 = vmatprep.subr.bf16.mxu0 %v19940_v15 }
 0x722   : > { %19386 = vmatpush3.bf16.msra.mxu1 %v19941_v17 }
 0x723   : > { %19408 = vmatpush3.bf16.msra.mxu0 %v19942_v54  ;;  %19688 = vmatprep.subr.bf16.mxu1 %v27896_v48 }
 0x725   : > { %18309 = vmatmul.mubr.bf16.vlgmr.msra.gmra.mxu1 %v17698_v42 }
 0x726   : > { %18350 = vmatmul.mubr.bf16.vlgmr.msra.gmra.mxu0 %v17699_v26  ;;  %19689 = vmatpush3.bf16.msra.mxu1 %v19943_v4 }
 0x727   : > { %19704 = vmatprep.mubr.msk.bf16.mxu1 %vm20016_vm0, %v27896_v48  ;;  %19690 = vmatprep.subr.bf16.mxu1 %v27896_v48 }
 0x72a   : > { %19691 = vmatpush3.bf16.msra.mxu1 %v19944_v2 }
 0x72b   : > { %19692 = vmatprep.subr.bf16.mxu1 %v27896_v48 }
 0x72e   : > { %19693 = vmatpush3.bf16.msra.mxu1 %v19945_v21 }
 0x72f   : > { %19694 = vmatprep.subr.bf16.mxu1 %v27896_v48 }
 0x732   : > { %19695 = vmatpush3.bf16.msra.mxu1 %v19946_v18 }
 0x733   : > { %19696 = vmatprep.subr.bf16.mxu1 %v27896_v48 }
 0x736   : > { %19697 = vmatpush3.bf16.msra.mxu1 %v19947_v47 }
 0x737   : > { %19698 = vmatprep.subr.bf16.mxu1 %v27896_v48 }
 0x73a   : > { %19699 = vmatpush3.bf16.msra.mxu1 %v19948_v0 }
 0x73b   : > { %19700 = vmatprep.subr.bf16.mxu1 %v27896_v48 }
 0x73e   : > { %19701 = vmatpush3.bf16.msra.mxu1 %v19949_v28 }
 0x73f   : > { %19702 = vmatprep.subr.bf16.mxu1 %v27896_v48 }
 0x742   : > { %19703 = vmatpush3.bf16.msra.mxu1 %v19950_v51 }
 0x745   : > { %19705 = vmatmul.mubr.bf16.vlgmr.msra.gmra.mxu1 %v26821_v41 }
 0x7c5   : > { %v19343_v19 = vpop.f32.mrf.mxu1 }
 0x7c6   : > { %v19365_v27 = vpop.f32.mrf.mxu0 }
 0x7c7   : > { %v19344_v49 = vpop.f32.mrf.mxu1 }
 0x7c8   : > { %v19366_v31 = vpop.f32.mrf.mxu0  ;;  %v19345_v20 = vadd.f32 %v19344_v49, %v19343_v19 }
 0x7c9   : > { %v19346_v46 = vpop.f32.mrf.mxu1  ;;  %v19367_v9 = vadd.f32 %v19366_v31, %v19365_v27 }
 0x7ca   : > { %v19368_v24 = vpop.f32.mrf.mxu0  ;;  %v18229_v60 = vadd.f32 %v19345_v20, %v17567_v29 }
 0x7cb   : > { %v19347_v1 = vpop.f32.mrf.mxu1 }
 0x7cc   : > { %v19369_v6 = vpop.f32.mrf.mxu0  ;;  %v19348_v62 = vadd.f32 %v19347_v1, %v19346_v46  ;;  %v18270_v53 = vadd.f32 %v19367_v9, %v18229_v60 }
 0x7cd   : > { %v19370_v23 = vadd.f32 %v19369_v6, %v19368_v24 }
 0x7ce   : > { %v18232_v7 = vadd.f32 %v19348_v62, %v17567_v29 }
 0x7d0   : > { %v18273_v26 = vadd.f32 %v19370_v23, %v18232_v7 }
 0x7e5   : > { %v19387_v56 = vpop.f32.mrf.mxu1 }
 0x7e6   : > { %v19409_v11 = vpop.f32.mrf.mxu0 }
 0x7e7   : > { %v19388_v12 = vpop.f32.mrf.mxu1 }
 0x7e8   : > { %v19410_v25 = vpop.f32.mrf.mxu0  ;;  %v19389_v34 = vadd.f32 %v19388_v12, %v19387_v56 }
 0x7e9   : > { %v19390_v63 = vpop.f32.mrf.mxu1  ;;  %v19411_v58 = vadd.f32 %v19410_v25, %v19409_v11 }
 0x7ea   : > { %v19412_v32 = vpop.f32.mrf.mxu0  ;;  %v18311_v13 = vadd.f32 %v19389_v34, %v18270_v53 }
 0x7eb   : > { %v19391_v55 = vpop.f32.mrf.mxu1 }
 0x7ec   : > { %v19392_v42 = vadd.f32 %v19391_v55, %v19390_v63  ;;  %v19413_v38 = vpop.f32.mrf.mxu0  ;;  %v18352_v3 = vadd.f32 %v19411_v58, %v18311_v13 }
 0x7ed   : > { %v19414_v45 = vadd.f32 %v19413_v38, %v19412_v32 }
 0x7ee   : > { %v18314_v8 = vadd.f32 %v19392_v42, %v18273_v26 }
 0x7f0   : > { %v18355_v39 = vadd.f32 %v19414_v45, %v18314_v8 }
 0x805   : > { %v18392_v37 = vpop.f32.mrf.mxu1 }
 0x806   : > { %v18393_v41 = vadd.f32 %v18392_v37, %v18352_v3 }
 0x807   : > { %v19706_v57 = vpop.f32.mrf.mxu1 }
 0x808   : > { %v18399_v43 = vmax.f32 %v18393_v41, 0.0 }
 0x809   : > { %v18395_v16 = vpop.f32.mrf.mxu1 }
 0x80a   : > { %v18403_v52 = vcombine.high %v18399_v43, %v18399_v43  ;;  %v18408_v61 = vsel %vm18407_vm6, %v18399_v43, 0.0  ;;  %v18396_v33 = vadd.f32 %v18395_v16, %v18355_v39 }
 0x80b   : > { %v18409_v40 = vrot.slane %v18408_v61, 4  ;;  %v19707_v50 = vpop.f32.mrf.mxu1 }
 0x80c   : > { %v18415_v44 = vsel %vm18407_vm6, %v18403_v52, 0.0  ;;  %v18400_v30 = vmax.f32 %v18396_v33, 0.0 }
 0x80d   : > { %v18410_v59 = vadd.f32 %v18409_v40, %v18408_v61  ;;  %v18416_v14 = vrot.slane %v18415_v44, 4 }
 0x80e   : > { %v18404_v22 = vcombine.high %v18400_v30, %v18400_v30  ;;  %v18422_v5 = vsel %vm18407_vm6, %v18400_v30, 0.0 }
 0x80f   : > { %v18411_v15 = vrot.slane %v18410_v59, 2  ;;  %v18417_v17 = vadd.f32 %v18416_v14, %v18415_v44  ;;  %v18423_v54 = vrot.slane %v18422_v5, 4 }
 0x810   : > { %v18429_v4 = vsel %vm18407_vm6, %v18404_v22, 0.0 }
 0x811   : > { %v18412_v48 = vadd.f32 %v18411_v15, %v18410_v59  ;;  %v18418_v2 = vrot.slane %v18417_v17, 2  ;;  %v18424_v21 = vadd.f32 %v18423_v54, %v18422_v5  ;;  %v18430_v18 = vrot.slane %v18429_v4, 4 }
 0x813   : > { %v18413_v47 = vrot.slane %v18412_v48, 1  ;;  %v18419_v0 = vadd.f32 %v18418_v2, %v18417_v17  ;;  %v18425_v28 = vrot.slane %v18424_v21, 2  ;;  %v18431_v51 = vadd.f32 %v18430_v18, %v18429_v4 }
 0x815   : > { %v18414_v19 = vadd.f32 %v18413_v47, %v18412_v48  ;;  %v18420_v49 = vrot.slane %v18419_v0, 1  ;;  %v18426_v27 = vadd.f32 %v18425_v28, %v18424_v21  ;;  %v18432_v46 = vrot.slane %v18431_v51, 2 }
 0x817   : > { %v18421_v31 = vadd.f32 %v18420_v49, %v18419_v0  ;;  %v18427_v1 = vrot.slane %v18426_v27, 1  ;;  %v18433_v24 = vadd.f32 %v18432_v46, %v18431_v51  ;;  %v18436_v56 = vmul.f32 0.25, %v18414_v19 }
 0x819   : > { %v18437_v36 = vmul.f32 0.25, %v18421_v31  ;;  %v18428_v10 = vadd.f32 %v18427_v1, %v18426_v27  ;;  %v18434_v6 = vrot.slane %v18433_v24, 1 }
 0x81b   : > { %v18438_v12 = vmul.f32 0.25, %v18428_v10  ;;  %v18435_v35 = vadd.f32 %v18434_v6, %v18433_v24  ;;  %v18444_v29 = vsel %vm5750_vm1, %v18437_v36, %v18436_v56 }
 0x81d   : > { %v18439_v20 = vmul.f32 0.25, %v18435_v35  ;;  %v18445_v11 = vsel %vm5753_vm2, %v18438_v12, %v18444_v29 }
 0x81f   : > { %v18446_v63 = vsel %vm5756_vm3, %v18439_v20, %v18445_v11 }
 0x820   : > { %18448 = vst [vmem:[%s218_s30] sm:$0xf] %v18446_v63 }
 0x821   : > { %19966 = shalt.err (!%p19963_p3)
}
 0x822   : > { %s19967_s15 = scalar_lea.hbm %s26927_s9, 64  ;;  %s19971_s17 = scalar_lea.hbm %s26968_s5, 128 }
 0x823   : > { %p19968_p4 = scmp.ne.s32.totalorder %s26927_s9, %s19967_s15  ;;  %p19972_p9 = scmp.lt.s32.totalorder %s26927_s9, %s26968_s5 }
 0x824   : > { %p19973_p10 = scmp.lt.s32.totalorder %s19971_s17, %s19967_s15 }
 0x825   : > { %p19969_p7 = pnand %p19968_p4, %p20087_p5 }
 0x826   : > { %p19974_p11 = por %p19973_p10, %p19972_p9 }
 0x827   : > { %p19970_p8 = pneg %p19969_p7 }
 0x829   : > { %p19975_p12 = pnand %p19974_p11, %p19970_p8 }
 0x82b   : > { %19978 = shalt.err (!%p19975_p12)
}
 0x82c   : > { %19708 = dma.vmem_to_hbm [thread:$0]  (%p20087_p5), %s18464_s6, 64, %s26927_s9, %s18450_s10  }
 0x82d PF: > { %p19714_p13 = scmp.ge.s32.totalorder %s20013_s21, 2  ;;  %s18475_s26 = sand.u32 1, %s20001_s18  }
 0x82e   : > { %s18476_s30 = scalar_lea.sflag [#allocation3], %s18475_s26 }
 0x82f   : > { %p19711_p0 = pnand %p19714_p13, %p20091_p6 }
 0x831   : > { %p19712_p1 = pneg %p19711_p0 }
 0x833   : > { %19996 = dma.done.wait (%p19712_p1), %s18476_s30, 64  }
 0x834   : > { %19998 = vsyncadd (%p19712_p1), %s18476_s30, 4294967232  ;;  %p15_p2 = scmp.ge.s32.totalorder %s20074_s24, 4   ;;  %s27898_s18 = smov %s20005_s19 }
 0x835   : > { %s27899_s19 = smov %s20009_s20  ;;  %s27900_s20 = smov %s20085_s27 }
 0x836   : > { %s27901_s21 = smov %s20074_s24  ;;  %17 = sbr.rel (!%p15_p2) target bundleno = 3 (0x3), region = 75 }
 0x83b   :  { %18481 = vsyncpa [#allocation3], 1 }
 0x83c   :  { %18483 = vsyncpa [#allocation3 + $0x1], 1 }

</bundles_post_ra>
